<compile_context>
chip_gen: v6e
topology: v6e:2x2x1
jax: 0.10.0
libtpu: 0.0.40
codegen_flags: <defaults>
</compile_context>

<pallas_src>
import functools

import jax
import jax.numpy as jnp
from jax.experimental import pallas as pl
from jax.experimental.pallas import tpu as pltpu

_LANE = 128
_ACC_ROWS = 512                 # (512, 128) f32 accumulator = 256 KiB
_MAX_BLOCK_ROWS = 8192          # (8192, 128) f32 tile = 4 MiB per step
_SMALL_NUMEL = 128 * 1024       # below this, fused XLA reduce beats launch cost


def _tensorcores_per_chip():
    """2 on multi-TC chips (v7x, v4 megacore), 1 on v5e/v6e."""
    try:
        kind = jax.devices()[0].device_kind.lower()
    except Exception:
        return 1
    if "v7" in kind or "7x" in kind or "v4" in kind:
        return 2
    return 1


_NUM_TC = _tensorcores_per_chip()


def _sum_kernel(x_ref, out_ref, acc_ref, *, rows, block_rows, steps,
                last_block, ragged_rows, has_dup, acc_chunks):
    part = pl.program_id(0)
    step = pl.program_id(1)

    @pl.when(step == 0)
    def _():
        acc_ref[...] = jnp.zeros_like(acc_ref)

    gb = part * steps + step          # global block index (may exceed last_block)
    sub = block_rows // acc_chunks    # == _ACC_ROWS

    def _accum(blk):
        # fold the (block_rows, 128) tile into the small (sub, 128) accumulator
        # with chunked adds: ~1 vld + 1 vadd per input vreg instead of
        # 2 vld + 1 vst, keeping ld/st slots free for the HBM stream.
        tot = blk[0:sub, :]
        for c in range(1, acc_chunks):
            tot = tot + blk[c * sub:(c + 1) * sub, :]
        acc_ref[...] += tot

    blk = x_ref[...].astype(jnp.float32)

    if not ragged_rows and not has_dup:
        _accum(blk)                               # pure VPU hot path, no masks
    else:
        full_cond = (gb < last_block) if ragged_rows else (gb <= last_block)

        @pl.when(full_cond)
        def _():
            _accum(blk)

        if ragged_rows:
            # only the statically-last block is partial; mask it here.
            @pl.when(gb == last_block)
            def _():
                row_ids = jax.lax.broadcasted_iota(jnp.int32, blk.shape, 0)
                valid = (last_block * block_rows + row_ids) < rows
                _accum(jnp.where(valid, blk, 0.0))
        # gb > last_block (clamped duplicate from uneven core split): skipped.

    @pl.when(step == pl.num_programs(1) - 1)
    def _():
        # single cross-lane/sublane reduce at the end; scalar lands at [0, 0]
        ri = jax.lax.broadcasted_iota(jnp.int32, (8, _LANE), 0)
        ci = jax.lax.broadcasted_iota(jnp.int32, (8, _LANE), 1)
        out_ref[...] = jnp.where((ri == 0) & (ci == 0),
                                 jnp.sum(acc_ref[...]), 0.0)


def _pallas_sum_2d(x2d):
    """f32 total sum of a (rows, 128) array, rows >= _ACC_ROWS."""
    rows = x2d.shape[0]
    # biggest tile that is a multiple of the accumulator height, capped at 4 MiB
    block_rows = min(_MAX_BLOCK_ROWS,
                     max(_ACC_ROWS, (rows // _ACC_ROWS) * _ACC_ROWS))
    total_blocks = pl.cdiv(rows, block_rows)
    last_block = total_blocks - 1
    n_partials = 2 if (_NUM_TC >= 2 and total_blocks >= 2) else 1
    steps = pl.cdiv(total_blocks, n_partials)
    ragged_rows = (rows % block_rows) != 0
    has_dup = (n_partials * steps) > total_blocks
    acc_chunks = block_rows // _ACC_ROWS

    kernel = functools.partial(
        _sum_kernel, rows=rows, block_rows=block_rows, steps=steps,
        last_block=last_block, ragged_rows=ragged_rows, has_dup=has_dup,
        acc_chunks=acc_chunks)

    def in_index(i, k):
        # clamp so the DMA source block always exists; clamped duplicates are
        # not accumulated inside the kernel.
        return (jnp.minimum(i * steps + k, last_block), 0)

    partials = pl.pallas_call(
        kernel,
        out_shape=jax.ShapeDtypeStruct((n_partials * 8, _LANE), jnp.float32),
        grid_spec=pltpu.PrefetchScalarGridSpec(
            num_scalar_prefetch=0,
            grid=(n_partials, steps),
            in_specs=[pl.BlockSpec((block_rows, _LANE), in_index)],
            out_specs=pl.BlockSpec((8, _LANE), lambda i, k: (i, 0)),
            scratch_shapes=[pltpu.VMEM((_ACC_ROWS, _LANE), jnp.float32)],
        ),
        compiler_params=pltpu.CompilerParams(
            dimension_semantics=("parallel", "arbitrary"),
            vmem_limit_bytes=32 * 1024 * 1024),
    )(x2d)
    # tiny (<=16, 128) reduce of the per-core partials, fused by XLA
    return jnp.sum(partials)


def _sum_one(x):
    """Total sum (f32) of one tensor; shape decisions are trace-time static."""
    n = int(x.size)
    if n >= _SMALL_NUMEL and n % _LANE == 0:
        return _pallas_sum_2d(x.reshape(n // _LANE, _LANE))
    # small or ragged tensors: a single fused XLA reduction is already at the
    # HBM roofline and avoids any padded/sliced copy or launch overhead.
    return jnp.sum(x, dtype=jnp.float32)


@jax.jit
def _sum_all(*tensors):
    # one dispatch for all per-tensor reductions
    return tuple(_sum_one(t) for t in tensors)


def ptmodule_forward(inputs):
    """Mirror of PtModule.forward: list of tensors -> list of (sum, mean)."""
    sums = jax.block_until_ready(_sum_all(*inputs))
    results = []
    for t, s in zip(inputs, sums):
        s_val = float(s)
        results.append((s_val, s_val / t.size))   # mean = sum / numel
    return results


if __name__ == "__main__":
    key = jax.random.PRNGKey(0)
    k0, k1, k2, k3, k4 = jax.random.split(key, 5)
    inputs = [
        jax.random.normal(k0, (2, 4, 16, 16), dtype=jnp.float32),   # small
        jax.random.normal(k1, (8, 32), dtype=jnp.float32),          # tiny
        jax.random.normal(k2, (3, 5, 7), dtype=jnp.float32),        # ragged -> XLA path
        jax.random.normal(k3, (64, 4097), dtype=jnp.float32),       # large ragged -> XLA path
        jax.random.normal(k4, (1024, 1280), dtype=jnp.float32),     # Pallas path, multi-block
    ]

    results = ptmodule_forward(inputs)

    # sanity check vs plain JAX reductions
    ok = True
    for x, (s, m) in zip(inputs, results):
        ref_s = float(jnp.sum(x, dtype=jnp.float32))
        ref_m = ref_s / x.size
        if abs(s - ref_s) > 1e-2 * max(1.0, abs(ref_s)) or \
           abs(m - ref_m) > 1e-4 * max(1.0, abs(ref_m)):
            ok = False

    if ok:
        print("KERNEL_OK")
    else:
        print("MISMATCH", results)
</pallas_src>

<mosaic_0001>
module attributes {stable_mosaic.version = 11 : i64} {
  func.func @_sum_kernel(%arg0: i32, %arg1: i32, %arg2: memref<8192x128xf32, #tpu.memory_space<vmem>>, %arg3: memref<8x128xf32, #tpu.memory_space<vmem>>, %arg4: memref<512x128xf32, #tpu.memory_space<vmem>>) attributes {dimension_semantics = [#tpu.dimension_semantics<parallel>, #tpu.dimension_semantics<arbitrary>], iteration_bounds = array<i64: 1, 2>, scalar_prefetch = 0 : i64, scratch_operands = 1 : i64, tpu.core_type = #tpu.core_type<tc>, window_params = [{transform_indices = @transform_0, window_bounds = array<i64: 8192, 128>}, {transform_indices = @transform_1, window_bounds = array<i64: 8, 128>}]} {
    %c0_i32 = arith.constant 0 : i32
    %0 = arith.cmpi eq, %arg1, %c0_i32 : i32
    %1 = arith.extui %0 : i1 to i32
    %c0_i32_0 = arith.constant 0 : i32
    %2 = arith.cmpi ne, %1, %c0_i32_0 : i32
    scf.if %2 {
      %cst = arith.constant 0.000000e+00 : f32
      %15 = vector.broadcast %cst : f32 to vector<512x128xf32>
      %c0_7 = arith.constant 0 : index
      %c0_8 = arith.constant 0 : index
      %16 = vector.load %arg4[%c0_7, %c0_8] : memref<512x128xf32, #tpu.memory_space<vmem>>, vector<512x128xf32>
      tpu.vector_store %arg4[%c0_7, %c0_8], %15 {strides = array<i32>} : memref<512x128xf32, #tpu.memory_space<vmem>>, vector<512x128xf32>,
    } else {
    }
    %c2_i32 = arith.constant 2 : i32
    %3 = arith.muli %arg0, %c2_i32 : i32
    %4 = arith.addi %3, %arg1 : i32
    %c0 = arith.constant 0 : index
    %c0_1 = arith.constant 0 : index
    %5 = vector.load %arg2[%c0, %c0_1] : memref<8192x128xf32, #tpu.memory_space<vmem>>, vector<8192x128xf32>
    %c1_i32 = arith.constant 1 : i32
    %6 = arith.cmpi slt, %4, %c1_i32 : i32
    %7 = arith.extui %6 : i1 to i32
    %c0_i32_2 = arith.constant 0 : i32
    %8 = arith.cmpi ne, %7, %c0_i32_2 : i32
    scf.if %8 {
      %15 = vector.extract_strided_slice %5 {offsets = [0, 0], sizes = [512, 128], strides = [1, 1]} : vector<8192x128xf32> to vector<512x128xf32>
      %16 = vector.extract_strided_slice %5 {offsets = [512, 0], sizes = [512, 128], strides = [1, 1]} : vector<8192x128xf32> to vector<512x128xf32>
      %17 = arith.addf %15, %16 : vector<512x128xf32>
      %18 = vector.extract_strided_slice %5 {offsets = [1024, 0], sizes = [512, 128], strides = [1, 1]} : vector<8192x128xf32> to vector<512x128xf32>
      %19 = arith.addf %17, %18 : vector<512x128xf32>
      %20 = vector.extract_strided_slice %5 {offsets = [1536, 0], sizes = [512, 128], strides = [1, 1]} : vector<8192x128xf32> to vector<512x128xf32>
      %21 = arith.addf %19, %20 : vector<512x128xf32>
      %22 = vector.extract_strided_slice %5 {offsets = [2048, 0], sizes = [512, 128], strides = [1, 1]} : vector<8192x128xf32> to vector<512x128xf32>
      %23 = arith.addf %21, %22 : vector<512x128xf32>
      %24 = vector.extract_strided_slice %5 {offsets = [2560, 0], sizes = [512, 128], strides = [1, 1]} : vector<8192x128xf32> to vector<512x128xf32>
      %25 = arith.addf %23, %24 : vector<512x128xf32>
      %26 = vector.extract_strided_slice %5 {offsets = [3072, 0], sizes = [512, 128], strides = [1, 1]} : vector<8192x128xf32> to vector<512x128xf32>
      %27 = arith.addf %25, %26 : vector<512x128xf32>
      %28 = vector.extract_strided_slice %5 {offsets = [3584, 0], sizes = [512, 128], strides = [1, 1]} : vector<8192x128xf32> to vector<512x128xf32>
      %29 = arith.addf %27, %28 : vector<512x128xf32>
      %30 = vector.extract_strided_slice %5 {offsets = [4096, 0], sizes = [512, 128], strides = [1, 1]} : vector<8192x128xf32> to vector<512x128xf32>
      %31 = arith.addf %29, %30 : vector<512x128xf32>
      %32 = vector.extract_strided_slice %5 {offsets = [4608, 0], sizes = [512, 128], strides = [1, 1]} : vector<8192x128xf32> to vector<512x128xf32>
      %33 = arith.addf %31, %32 : vector<512x128xf32>
      %34 = vector.extract_strided_slice %5 {offsets = [5120, 0], sizes = [512, 128], strides = [1, 1]} : vector<8192x128xf32> to vector<512x128xf32>
      %35 = arith.addf %33, %34 : vector<512x128xf32>
      %36 = vector.extract_strided_slice %5 {offsets = [5632, 0], sizes = [512, 128], strides = [1, 1]} : vector<8192x128xf32> to vector<512x128xf32>
      %37 = arith.addf %35, %36 : vector<512x128xf32>
      %38 = vector.extract_strided_slice %5 {offsets = [6144, 0], sizes = [512, 128], strides = [1, 1]} : vector<8192x128xf32> to vector<512x128xf32>
      %39 = arith.addf %37, %38 : vector<512x128xf32>
      %40 = vector.extract_strided_slice %5 {offsets = [6656, 0], sizes = [512, 128], strides = [1, 1]} : vector<8192x128xf32> to vector<512x128xf32>
      %41 = arith.addf %39, %40 : vector<512x128xf32>
      %42 = vector.extract_strided_slice %5 {offsets = [7168, 0], sizes = [512, 128], strides = [1, 1]} : vector<8192x128xf32> to vector<512x128xf32>
      %43 = arith.addf %41, %42 : vector<512x128xf32>
      %44 = vector.extract_strided_slice %5 {offsets = [7680, 0], sizes = [512, 128], strides = [1, 1]} : vector<8192x128xf32> to vector<512x128xf32>
      %45 = arith.addf %43, %44 : vector<512x128xf32>
      %c0_7 = arith.constant 0 : index
      %c0_8 = arith.constant 0 : index
      %46 = vector.load %arg4[%c0_7, %c0_8] : memref<512x128xf32, #tpu.memory_space<vmem>>, vector<512x128xf32>
      %47 = arith.addf %46, %45 : vector<512x128xf32>
      %c0_9 = arith.constant 0 : index
      %c0_10 = arith.constant 0 : index
      %48 = vector.load %arg4[%c0_9, %c0_10] : memref<512x128xf32, #tpu.memory_space<vmem>>, vector<512x128xf32>
      tpu.vector_store %arg4[%c0_9, %c0_10], %47 {strides = array<i32>} : memref<512x128xf32, #tpu.memory_space<vmem>>, vector<512x128xf32>,
    } else {
    }
    %c1_i32_3 = arith.constant 1 : i32
    %9 = arith.cmpi eq, %4, %c1_i32_3 : i32
    %10 = arith.extui %9 : i1 to i32
    %c0_i32_4 = arith.constant 0 : i32
    %11 = arith.cmpi ne, %10, %c0_i32_4 : i32
    scf.if %11 {
      %15 = tpu.iota {dimensions = array<i32: 0>} : vector<8192x128xi32>
      %c8192_i32 = arith.constant 8192 : i32
      %16 = vector.broadcast %c8192_i32 : i32 to vector<8192x128xi32>
      %17 = arith.addi %16, %15 : vector<8192x128xi32>
      %c10240_i32 = arith.constant 10240 : i32
      %18 = vector.broadcast %c10240_i32 : i32 to vector<8192x128xi32>
      %19 = arith.cmpi slt, %17, %18 : vector<8192x128xi32>
      %cst = arith.constant 0.000000e+00 : f32
      %20 = vector.broadcast %cst : f32 to vector<8192x128xf32>
      %21 = arith.select %19, %5, %20 : vector<8192x128xi1>, vector<8192x128xf32>
      %22 = vector.extract_strided_slice %21 {offsets = [0, 0], sizes = [512, 128], strides = [1, 1]} : vector<8192x128xf32> to vector<512x128xf32>
      %23 = vector.extract_strided_slice %21 {offsets = [512, 0], sizes = [512, 128], strides = [1, 1]} : vector<8192x128xf32> to vector<512x128xf32>
      %24 = arith.addf %22, %23 : vector<512x128xf32>
      %25 = vector.extract_strided_slice %21 {offsets = [1024, 0], sizes = [512, 128], strides = [1, 1]} : vector<8192x128xf32> to vector<512x128xf32>
      %26 = arith.addf %24, %25 : vector<512x128xf32>
      %27 = vector.extract_strided_slice %21 {offsets = [1536, 0], sizes = [512, 128], strides = [1, 1]} : vector<8192x128xf32> to vector<512x128xf32>
      %28 = arith.addf %26, %27 : vector<512x128xf32>
      %29 = vector.extract_strided_slice %21 {offsets = [2048, 0], sizes = [512, 128], strides = [1, 1]} : vector<8192x128xf32> to vector<512x128xf32>
      %30 = arith.addf %28, %29 : vector<512x128xf32>
      %31 = vector.extract_strided_slice %21 {offsets = [2560, 0], sizes = [512, 128], strides = [1, 1]} : vector<8192x128xf32> to vector<512x128xf32>
      %32 = arith.addf %30, %31 : vector<512x128xf32>
      %33 = vector.extract_strided_slice %21 {offsets = [3072, 0], sizes = [512, 128], strides = [1, 1]} : vector<8192x128xf32> to vector<512x128xf32>
      %34 = arith.addf %32, %33 : vector<512x128xf32>
      %35 = vector.extract_strided_slice %21 {offsets = [3584, 0], sizes = [512, 128], strides = [1, 1]} : vector<8192x128xf32> to vector<512x128xf32>
      %36 = arith.addf %34, %35 : vector<512x128xf32>
      %37 = vector.extract_strided_slice %21 {offsets = [4096, 0], sizes = [512, 128], strides = [1, 1]} : vector<8192x128xf32> to vector<512x128xf32>
      %38 = arith.addf %36, %37 : vector<512x128xf32>
      %39 = vector.extract_strided_slice %21 {offsets = [4608, 0], sizes = [512, 128], strides = [1, 1]} : vector<8192x128xf32> to vector<512x128xf32>
      %40 = arith.addf %38, %39 : vector<512x128xf32>
      %41 = vector.extract_strided_slice %21 {offsets = [5120, 0], sizes = [512, 128], strides = [1, 1]} : vector<8192x128xf32> to vector<512x128xf32>
      %42 = arith.addf %40, %41 : vector<512x128xf32>
      %43 = vector.extract_strided_slice %21 {offsets = [5632, 0], sizes = [512, 128], strides = [1, 1]} : vector<8192x128xf32> to vector<512x128xf32>
      %44 = arith.addf %42, %43 : vector<512x128xf32>
      %45 = vector.extract_strided_slice %21 {offsets = [6144, 0], sizes = [512, 128], strides = [1, 1]} : vector<8192x128xf32> to vector<512x128xf32>
      %46 = arith.addf %44, %45 : vector<512x128xf32>
      %47 = vector.extract_strided_slice %21 {offsets = [6656, 0], sizes = [512, 128], strides = [1, 1]} : vector<8192x128xf32> to vector<512x128xf32>
      %48 = arith.addf %46, %47 : vector<512x128xf32>
      %49 = vector.extract_strided_slice %21 {offsets = [7168, 0], sizes = [512, 128], strides = [1, 1]} : vector<8192x128xf32> to vector<512x128xf32>
      %50 = arith.addf %48, %49 : vector<512x128xf32>
      %51 = vector.extract_strided_slice %21 {offsets = [7680, 0], sizes = [512, 128], strides = [1, 1]} : vector<8192x128xf32> to vector<512x128xf32>
      %52 = arith.addf %50, %51 : vector<512x128xf32>
      %c0_7 = arith.constant 0 : index
      %c0_8 = arith.constant 0 : index
      %53 = vector.load %arg4[%c0_7, %c0_8] : memref<512x128xf32, #tpu.memory_space<vmem>>, vector<512x128xf32>
      %54 = arith.addf %53, %52 : vector<512x128xf32>
      %c0_9 = arith.constant 0 : index
      %c0_10 = arith.constant 0 : index
      %55 = vector.load %arg4[%c0_9, %c0_10] : memref<512x128xf32, #tpu.memory_space<vmem>>, vector<512x128xf32>
      tpu.vector_store %arg4[%c0_9, %c0_10], %54 {strides = array<i32>} : memref<512x128xf32, #tpu.memory_space<vmem>>, vector<512x128xf32>,
    } else {
    }
    %c1_i32_5 = arith.constant 1 : i32
    %12 = arith.cmpi eq, %arg1, %c1_i32_5 : i32
    %13 = arith.extui %12 : i1 to i32
    %c0_i32_6 = arith.constant 0 : i32
    %14 = arith.cmpi ne, %13, %c0_i32_6 : i32
    scf.if %14 {
      %15 = tpu.iota {dimensions = array<i32: 0>} : vector<8x128xi32>
      %16 = tpu.iota {dimensions = array<i32: 1>} : vector<8x128xi32>
      %c0_i32_7 = arith.constant 0 : i32
      %17 = vector.broadcast %c0_i32_7 : i32 to vector<8x128xi32>
      %18 = arith.cmpi eq, %15, %17 : vector<8x128xi32>
      %c0_i32_8 = arith.constant 0 : i32
      %19 = vector.broadcast %c0_i32_8 : i32 to vector<8x128xi32>
      %20 = arith.cmpi eq, %16, %19 : vector<8x128xi32>
      %21 = arith.andi %18, %20 : vector<8x128xi1>
      %c0_9 = arith.constant 0 : index
      %c0_10 = arith.constant 0 : index
      %22 = vector.load %arg4[%c0_9, %c0_10] : memref<512x128xf32, #tpu.memory_space<vmem>>, vector<512x128xf32>
      %23 = vector.shape_cast %22 : vector<512x128xf32> to vector<1x512x128xf32>
      %cst = arith.constant dense<0.000000e+00> : vector<1xf32>
      %24 = vector.multi_reduction <add>, %23, %cst [1, 2] : vector<1x512x128xf32> to vector<1xf32>
      %25 = vector.shape_cast %24 : vector<1xf32> to vector<1x1x1xf32>
      %26 = vector.extract %25[0, 0, 0] : f32 from vector<1x1x1xf32>
      %cst_11 = arith.constant 0.000000e+00 : f32
      %27 = vector.broadcast %26 : f32 to vector<8x128xf32>
      %28 = vector.broadcast %cst_11 : f32 to vector<8x128xf32>
      %29 = arith.select %21, %27, %28 : vector<8x128xi1>, vector<8x128xf32>
      %c0_12 = arith.constant 0 : index
      %c0_13 = arith.constant 0 : index
      %30 = vector.load %arg3[%c0_12, %c0_13] : memref<8x128xf32, #tpu.memory_space<vmem>>, vector<8x128xf32>
      tpu.vector_store %arg3[%c0_12, %c0_13], %29 {strides = array<i32>} : memref<8x128xf32, #tpu.memory_space<vmem>>, vector<8x128xf32>,
    } else {
    }
    return
  }
  func.func @transform_0(%arg0: i32, %arg1: i32) -> (i32, i32) {
    %c2_i32 = arith.constant 2 : i32
    %0 = arith.muli %arg0, %c2_i32 : i32
    %1 = arith.addi %0, %arg1 : i32
    %c1_i32 = arith.constant 1 : i32
    %2 = arith.minsi %1, %c1_i32 : i32
    %c0_i32 = arith.constant 0 : i32
    %c0_i32_0 = arith.constant 0 : i32
    return %2, %c0_i32 : i32, i32
  }
  func.func @transform_1(%arg0: i32, %arg1: i32) -> (i32, i32) {
    %c0_i32 = arith.constant 0 : i32
    %c0_i32_0 = arith.constant 0 : i32
    return %arg0, %c0_i32 : i32, i32
  }
}

</mosaic_0001>

<bundles_post_ra>
// kernel: _sum_all.1
= control target key start
LH: loop header
LB: loop body
LE: loop exit
PB: predicated region body
PF: predicated region fallthrough
CT: control target
= control target key end

     0   :  { %s7964_s6 = smov 0   ;;  %s7966_s7 = smov 0   ;;  %s12426_s0 = inlined_call_operand.vmem [shape: f32[10240,128], index: 0, kind: input, shape index: {}]   ;;  %s12427_s1 = inlined_call_operand.vmem [shape: f32[8,128], index: 1, kind: output, shape index: {}]  }
   0x1   :  { %s7968_s8 = smov 0  }
   0x2 LB: > { %s20_s9 = sadd.s32 1, %s7947_s7  ;;  %p7892_p0 = scmp.ge.s32.totalorder %s7951_s8, 1  ;;  %s7951_s8 = sphi %s7968_s8, %s11_s8   ;;  %s7947_s7 = sphi %s7966_s7, %s14620_s7   ;;  %s7943_s6 = sphi %s7964_s6, %s14619_s6  }
   0x3   : > { %p21_p1 = scmp.ge.s32.totalorder %s20_s9, 2  ;;  %p124_p2 = scmp.lt.s32.totalorder %s7951_s8, 3 }
   0x5   : > { %s14622_s9 = smov (%p21_p1, %s20_s9), 0  ;;  %p125_p3 = pnand %p7892_p0, %p124_p2 }
   0x7   : > { %128 = sbr.rel (%p125_p3) target bundleno = 1379 (0x563), region = 24 }
   0xc   : > { %p153_p4 = scmp.lt.s32.totalorder %s7943_s6, 1  ;;  %p7895_p6 = scmp.ne.s32.totalorder %s7943_s6, 0 }
   0xe   : > { %s154_s10 = scalar_select %p153_p4, %s7943_s6, 1 }
  0x10   : > { %s7893_s11 = sshll.u32 %s154_s10, 10 }
  0x11   : > { %p160_p5 = scmp.lt.s32.totalorder %s7893_s11, 1279  ;;  %180 = sbr.rel (%p7895_p6) target bundleno = 55 (0x37), region = 28 }
  0x13   : > { %s14624_s11 = smov (!%p160_p5, %s7893_s11), 1279 }
  0x14   : > { %s7894_s12 = sshll.u32 %s14624_s11, 3 }
  0x15   : > { %s7989_s15 = scalar_lea.vmem %s12426_s0, %s7894_s12 }
  0x16   : > { %v7953_v0 = vmov 0.0  }
  0x17   : > { %181 = vst [vmem:[#allocation2 + $0xb0] sm:$0xff] %v7953_v0  ;;  %182 = vst [vmem:[#allocation2 + $0x1b0] sm:$0xff] %v7953_v0 }
  0x18   : > { %183 = vst [vmem:[#allocation2 + $0xd8] sm:$0xff] %v7953_v0  ;;  %184 = vst [vmem:[#allocation2 + $0x18] sm:$0xff] %v7953_v0 }
  0x19   : > { %185 = vst [vmem:[#allocation2 + $0x50] sm:$0xff] %v7953_v0  ;;  %186 = vst [vmem:[#allocation2 + $0x168] sm:$0xff] %v7953_v0 }
  0x1a   : > { %187 = vst [vmem:[#allocation2 + $0x130] sm:$0xff] %v7953_v0  ;;  %188 = vst [vmem:[#allocation2 + $0x48] sm:$0xff] %v7953_v0 }
  0x1b   : > { %189 = vst [vmem:[#allocation2 + $0x180] sm:$0xff] %v7953_v0  ;;  %190 = vst [vmem:[#allocation2 + $0x110] sm:$0xff] %v7953_v0 }
  0x1c   : > { %191 = vst [vmem:[#allocation2 + $0x118] sm:$0xff] %v7953_v0  ;;  %192 = vst [vmem:[#allocation2 + $0x98] sm:$0xff] %v7953_v0 }
  0x1d   : > { %193 = vst [vmem:[#allocation2 + $0x120] sm:$0xff] %v7953_v0  ;;  %194 = vst [vmem:[#allocation2 + $0x150] sm:$0xff] %v7953_v0 }
  0x1e   : > { %195 = vst [vmem:[#allocation2 + $0x108] sm:$0xff] %v7953_v0  ;;  %196 = vst [vmem:[#allocation2 + $0x60] sm:$0xff] %v7953_v0 }
  0x1f   : > { %197 = vst [vmem:[#allocation2 + $0xe0] sm:$0xff] %v7953_v0  ;;  %198 = vst [vmem:[#allocation2 + $0x188] sm:$0xff] %v7953_v0 }
  0x20   : > { %199 = vst [vmem:[#allocation2 + $0x138] sm:$0xff] %v7953_v0  ;;  %200 = vst [vmem:[#allocation2 + $0x140] sm:$0xff] %v7953_v0 }
  0x21   : > { %201 = vst [vmem:[#allocation2 + $0x80] sm:$0xff] %v7953_v0  ;;  %202 = vst [vmem:[#allocation2 + $0x1a8] sm:$0xff] %v7953_v0 }
  0x22   : > { %203 = vst [vmem:[#allocation2 + $0x1b8] sm:$0xff] %v7953_v0  ;;  %204 = vst [vmem:[#allocation2 + $0x28] sm:$0xff] %v7953_v0 }
  0x23   : > { %205 = vst [vmem:[#allocation2 + $0x1e8] sm:$0xff] %v7953_v0  ;;  %206 = vst [vmem:[#allocation2 + $0xf8] sm:$0xff] %v7953_v0 }
  0x24   : > { %207 = vst [vmem:[#allocation2 + $0x160] sm:$0xff] %v7953_v0  ;;  %208 = vst [vmem:[#allocation2 + $0x30] sm:$0xff] %v7953_v0 }
  0x25   : > { %209 = vst [vmem:[#allocation2 + $0x1e0] sm:$0xff] %v7953_v0  ;;  %210 = vst [vmem:[#allocation2] sm:$0xff] %v7953_v0 }
  0x26   : > { %211 = vst [vmem:[#allocation2 + $0xf0] sm:$0xff] %v7953_v0  ;;  %212 = vst [vmem:[#allocation2 + $0x8] sm:$0xff] %v7953_v0 }
  0x27   : > { %213 = vst [vmem:[#allocation2 + $0x148] sm:$0xff] %v7953_v0  ;;  %214 = vst [vmem:[#allocation2 + $0x1d0] sm:$0xff] %v7953_v0 }
  0x28   : > { %215 = vst [vmem:[#allocation2 + $0x100] sm:$0xff] %v7953_v0  ;;  %216 = vst [vmem:[#allocation2 + $0xc8] sm:$0xff] %v7953_v0 }
  0x29   : > { %217 = vst [vmem:[#allocation2 + $0x40] sm:$0xff] %v7953_v0  ;;  %218 = vst [vmem:[#allocation2 + $0x1f8] sm:$0xff] %v7953_v0 }
  0x2a   : > { %219 = vst [vmem:[#allocation2 + $0x20] sm:$0xff] %v7953_v0  ;;  %220 = vst [vmem:[#allocation2 + $0x128] sm:$0xff] %v7953_v0 }
  0x2b   : > { %221 = vst [vmem:[#allocation2 + $0x1a0] sm:$0xff] %v7953_v0  ;;  %222 = vst [vmem:[#allocation2 + $0x1f0] sm:$0xff] %v7953_v0 }
  0x2c   : > { %223 = vst [vmem:[#allocation2 + $0xe8] sm:$0xff] %v7953_v0  ;;  %224 = vst [vmem:[#allocation2 + $0x78] sm:$0xff] %v7953_v0 }
  0x2d   : > { %225 = vst [vmem:[#allocation2 + $0x70] sm:$0xff] %v7953_v0  ;;  %226 = vst [vmem:[#allocation2 + $0x90] sm:$0xff] %v7953_v0 }
  0x2e   : > { %227 = vst [vmem:[#allocation2 + $0x1d8] sm:$0xff] %v7953_v0  ;;  %228 = vst [vmem:[#allocation2 + $0xd0] sm:$0xff] %v7953_v0 }
  0x2f   : > { %229 = vst [vmem:[#allocation2 + $0xb8] sm:$0xff] %v7953_v0  ;;  %230 = vst [vmem:[#allocation2 + $0x88] sm:$0xff] %v7953_v0 }
  0x30   : > { %231 = vst [vmem:[#allocation2 + $0xa8] sm:$0xff] %v7953_v0  ;;  %232 = vst [vmem:[#allocation2 + $0x1c8] sm:$0xff] %v7953_v0 }
  0x31   : > { %233 = vst [vmem:[#allocation2 + $0x170] sm:$0xff] %v7953_v0  ;;  %234 = vst [vmem:[#allocation2 + $0x178] sm:$0xff] %v7953_v0 }
  0x32   : > { %235 = vst [vmem:[#allocation2 + $0x68] sm:$0xff] %v7953_v0  ;;  %236 = vst [vmem:[#allocation2 + $0x190] sm:$0xff] %v7953_v0 }
  0x33   : > { %237 = vst [vmem:[#allocation2 + $0x198] sm:$0xff] %v7953_v0  ;;  %238 = vst [vmem:[#allocation2 + $0x38] sm:$0xff] %v7953_v0 }
  0x34   : > { %239 = vst [vmem:[#allocation2 + $0xc0] sm:$0xff] %v7953_v0  ;;  %240 = vst [vmem:[#allocation2 + $0x1c0] sm:$0xff] %v7953_v0 }
  0x35   : > { %241 = vst [vmem:[#allocation2 + $0x158] sm:$0xff] %v7953_v0  ;;  %242 = vst [vmem:[#allocation2 + $0x10] sm:$0xff] %v7953_v0 }
  0x36   : > { %243 = vst [vmem:[#allocation2 + $0x58] sm:$0xff] %v7953_v0  ;;  %244 = vst [vmem:[#allocation2 + $0xa0] sm:$0xff] %v7953_v0 }
  0x37 PF: > { %v8057_v1 = vld [vmem:[%s7989_s15] sm:$0xff]  ;;  %v8060_v2 = vld [vmem:[%s7989_s15 + $0x8] sm:$0xff]  ;;  %v8063_v3 = vld [vmem:[%s7989_s15 + $0x10] sm:$0xff]  ;;  %p7896_p7 = scmp.ge.s32.totalorder %s7943_s6, 1 }
  0x38   : > { %12439 = vst [vmem:[#allocation3_spill] sm:$0xff] %v8060_v2  ;;  %v8066_v4 = vld [vmem:[%s7989_s15 + $0x18] sm:$0xff]  ;;  %v8069_v5 = vld [vmem:[%s7989_s15 + $0x20] sm:$0xff]  ;;  %v8072_v6 = vld [vmem:[%s7989_s15 + $0x28] sm:$0xff] }
  0x39   : > { %12440 = vst [vmem:[#allocation4_spill] sm:$0xff] %v8066_v4  ;;  %12441 = vst [vmem:[#allocation5_spill] sm:$0xff] %v8072_v6  ;;  %v8075_v7 = vld [vmem:[%s7989_s15 + $0x30] sm:$0xff]  ;;  %v8078_v8 = vld [vmem:[%s7989_s15 + $0x38] sm:$0xff] }
  0x3a   : > { %v8081_v9 = vld [vmem:[%s7989_s15 + $0x40] sm:$0xff]  ;;  %v8084_v10 = vld [vmem:[%s7989_s15 + $0x48] sm:$0xff]  ;;  %v8087_v11 = vld [vmem:[%s7989_s15 + $0x50] sm:$0xff] }
  0x3b   : > { %12442 = vst [vmem:[#allocation6_spill] sm:$0xff] %v8081_v9  ;;  %12443 = vst [vmem:[#allocation7_spill] sm:$0xff] %v8084_v10  ;;  %v8090_v12 = vld [vmem:[%s7989_s15 + $0x58] sm:$0xff]  ;;  %v8093_v13 = vld [vmem:[%s7989_s15 + $0x60] sm:$0xff] }
  0x3c   : > { %12444 = vst [vmem:[#allocation8_spill] sm:$0xff] %v8087_v11  ;;  %12445 = vst [vmem:[#allocation9_spill] sm:$0xff] %v8090_v12  ;;  %v8096_v14 = vld [vmem:[%s7989_s15 + $0x68] sm:$0xff]  ;;  %v8099_v15 = vld [vmem:[%s7989_s15 + $0x70] sm:$0xff] }
  0x3d   : > { %12446 = vst [vmem:[#allocation10_spill] sm:$0xff] %v8093_v13  ;;  %12447 = vst [vmem:[#allocation11_spill] sm:$0xff] %v8096_v14  ;;  %v8102_v16 = vld [vmem:[%s7989_s15 + $0x78] sm:$0xff]  ;;  %v8105_v17 = vld [vmem:[%s7989_s15 + $0x80] sm:$0xff] }
  0x3e   : > { %12448 = vst [vmem:[#allocation12_spill] sm:$0xff] %v8099_v15  ;;  %12449 = vst [vmem:[#allocation13_spill] sm:$0xff] %v8102_v16  ;;  %v8108_v18 = vld [vmem:[%s7989_s15 + $0x88] sm:$0xff]  ;;  %v8111_v19 = vld [vmem:[%s7989_s15 + $0x90] sm:$0xff] }
  0x3f   : > { %12450 = vst [vmem:[#allocation14_spill] sm:$0xff] %v8105_v17  ;;  %12451 = vst [vmem:[#allocation15_spill] sm:$0xff] %v8108_v18  ;;  %v8114_v20 = vld [vmem:[%s7989_s15 + $0x98] sm:$0xff]  ;;  %v8117_v21 = vld [vmem:[%s7989_s15 + $0xa0] sm:$0xff] }
  0x40   : > { %12452 = vst [vmem:[#allocation16_spill] sm:$0xff] %v8111_v19  ;;  %12453 = vst [vmem:[#allocation17_spill] sm:$0xff] %v8114_v20  ;;  %v8120_v22 = vld [vmem:[%s7989_s15 + $0xa8] sm:$0xff]  ;;  %v8123_v23 = vld [vmem:[%s7989_s15 + $0xb0] sm:$0xff] }
  0x41   : > { %12454 = vst [vmem:[#allocation18_spill] sm:$0xff] %v8117_v21  ;;  %12455 = vst [vmem:[#allocation19_spill] sm:$0xff] %v8120_v22  ;;  %v8126_v24 = vld [vmem:[%s7989_s15 + $0xb8] sm:$0xff]  ;;  %v8129_v25 = vld [vmem:[%s7989_s15 + $0xc0] sm:$0xff] }
  0x42   : > { %12456 = vst [vmem:[#allocation20_spill] sm:$0xff] %v8123_v23  ;;  %12457 = vst [vmem:[#allocation21_spill] sm:$0xff] %v8126_v24  ;;  %v8132_v26 = vld [vmem:[%s7989_s15 + $0xc8] sm:$0xff]  ;;  %v8135_v27 = vld [vmem:[%s7989_s15 + $0xd0] sm:$0xff] }
  0x43   : > { %12458 = vst [vmem:[#allocation22_spill] sm:$0xff] %v8129_v25  ;;  %12459 = vst [vmem:[#allocation23_spill] sm:$0xff] %v8132_v26  ;;  %v8138_v28 = vld [vmem:[%s7989_s15 + $0xd8] sm:$0xff]  ;;  %v8141_v29 = vld [vmem:[%s7989_s15 + $0xe0] sm:$0xff] }
  0x44   : > { %12460 = vst [vmem:[#allocation24_spill] sm:$0xff] %v8135_v27  ;;  %12461 = vst [vmem:[#allocation25_spill] sm:$0xff] %v8138_v28  ;;  %v8144_v30 = vld [vmem:[%s7989_s15 + $0xe8] sm:$0xff]  ;;  %v8147_v31 = vld [vmem:[%s7989_s15 + $0xf0] sm:$0xff] }
  0x45   : > { %12462 = vst [vmem:[#allocation26_spill] sm:$0xff] %v8141_v29  ;;  %12463 = vst [vmem:[#allocation27_spill] sm:$0xff] %v8144_v30  ;;  %v8150_v32 = vld [vmem:[%s7989_s15 + $0xf8] sm:$0xff]  ;;  %v8153_v33 = vld [vmem:[%s7989_s15 + $0x100] sm:$0xff] }
  0x46   : > { %12464 = vst [vmem:[#allocation28_spill] sm:$0xff] %v8147_v31  ;;  %12465 = vst [vmem:[#allocation29_spill] sm:$0xff] %v8150_v32  ;;  %v8156_v34 = vld [vmem:[%s7989_s15 + $0x108] sm:$0xff]  ;;  %v8159_v35 = vld [vmem:[%s7989_s15 + $0x110] sm:$0xff] }
  0x47   : > { %12466 = vst [vmem:[#allocation30_spill] sm:$0xff] %v8153_v33  ;;  %12467 = vst [vmem:[#allocation31_spill] sm:$0xff] %v8156_v34  ;;  %v8162_v36 = vld [vmem:[%s7989_s15 + $0x118] sm:$0xff]  ;;  %v8165_v37 = vld [vmem:[%s7989_s15 + $0x120] sm:$0xff] }
  0x48   : > { %12468 = vst [vmem:[#allocation32_spill] sm:$0xff] %v8159_v35  ;;  %12469 = vst [vmem:[#allocation33_spill] sm:$0xff] %v8162_v36  ;;  %v8168_v38 = vld [vmem:[%s7989_s15 + $0x128] sm:$0xff]  ;;  %v8171_v39 = vld [vmem:[%s7989_s15 + $0x130] sm:$0xff] }
  0x49   : > { %12470 = vst [vmem:[#allocation34_spill] sm:$0xff] %v8165_v37  ;;  %12471 = vst [vmem:[#allocation35_spill] sm:$0xff] %v8168_v38  ;;  %v8174_v40 = vld [vmem:[%s7989_s15 + $0x138] sm:$0xff]  ;;  %v8177_v41 = vld [vmem:[%s7989_s15 + $0x140] sm:$0xff] }
  0x4a   : > { %12472 = vst [vmem:[#allocation36_spill] sm:$0xff] %v8171_v39  ;;  %12473 = vst [vmem:[#allocation37_spill] sm:$0xff] %v8174_v40  ;;  %v8180_v42 = vld [vmem:[%s7989_s15 + $0x148] sm:$0xff]  ;;  %v8183_v43 = vld [vmem:[%s7989_s15 + $0x150] sm:$0xff] }
  0x4b   : > { %12474 = vst [vmem:[#allocation38_spill] sm:$0xff] %v8177_v41  ;;  %12475 = vst [vmem:[#allocation39_spill] sm:$0xff] %v8180_v42  ;;  %v8186_v44 = vld [vmem:[%s7989_s15 + $0x158] sm:$0xff]  ;;  %v8189_v45 = vld [vmem:[%s7989_s15 + $0x160] sm:$0xff] }
  0x4c   : > { %12476 = vst [vmem:[#allocation40_spill] sm:$0xff] %v8183_v43  ;;  %12477 = vst [vmem:[#allocation41_spill] sm:$0xff] %v8186_v44  ;;  %v8192_v46 = vld [vmem:[%s7989_s15 + $0x168] sm:$0xff]  ;;  %v8195_v47 = vld [vmem:[%s7989_s15 + $0x170] sm:$0xff] }
  0x4d   : > { %12478 = vst [vmem:[#allocation42_spill] sm:$0xff] %v8189_v45  ;;  %12479 = vst [vmem:[#allocation43_spill] sm:$0xff] %v8192_v46  ;;  %v8198_v48 = vld [vmem:[%s7989_s15 + $0x178] sm:$0xff]  ;;  %v8201_v49 = vld [vmem:[%s7989_s15 + $0x180] sm:$0xff] }
  0x4e   : > { %12480 = vst [vmem:[#allocation44_spill] sm:$0xff] %v8195_v47  ;;  %12481 = vst [vmem:[#allocation45_spill] sm:$0xff] %v8198_v48  ;;  %v8204_v50 = vld [vmem:[%s7989_s15 + $0x188] sm:$0xff]  ;;  %v8207_v51 = vld [vmem:[%s7989_s15 + $0x190] sm:$0xff] }
  0x4f   : > { %12482 = vst [vmem:[#allocation46_spill] sm:$0xff] %v8201_v49  ;;  %12483 = vst [vmem:[#allocation47_spill] sm:$0xff] %v8204_v50  ;;  %v8210_v52 = vld [vmem:[%s7989_s15 + $0x198] sm:$0xff]  ;;  %v8213_v53 = vld [vmem:[%s7989_s15 + $0x1a0] sm:$0xff] }
  0x50   : > { %12484 = vst [vmem:[#allocation48_spill] sm:$0xff] %v8207_v51  ;;  %12485 = vst [vmem:[#allocation49_spill] sm:$0xff] %v8210_v52  ;;  %v8216_v54 = vld [vmem:[%s7989_s15 + $0x1a8] sm:$0xff]  ;;  %v8219_v55 = vld [vmem:[%s7989_s15 + $0x1b0] sm:$0xff] }
  0x51   : > { %12486 = vst [vmem:[#allocation50_spill] sm:$0xff] %v8213_v53  ;;  %12487 = vst [vmem:[#allocation51_spill] sm:$0xff] %v8216_v54  ;;  %v8222_v56 = vld [vmem:[%s7989_s15 + $0x1b8] sm:$0xff]  ;;  %v8225_v57 = vld [vmem:[%s7989_s15 + $0x1c0] sm:$0xff] }
  0x52   : > { %12488 = vst [vmem:[#allocation52_spill] sm:$0xff] %v8219_v55  ;;  %12489 = vst [vmem:[#allocation53_spill] sm:$0xff] %v8222_v56  ;;  %v8228_v58 = vld [vmem:[%s7989_s15 + $0x1c8] sm:$0xff]  ;;  %v8231_v59 = vld [vmem:[%s7989_s15 + $0x1d0] sm:$0xff] }
  0x53   : > { %12490 = vst [vmem:[#allocation54_spill] sm:$0xff] %v8225_v57  ;;  %12491 = vst [vmem:[#allocation55_spill] sm:$0xff] %v8228_v58  ;;  %v8234_v60 = vld [vmem:[%s7989_s15 + $0x1d8] sm:$0xff]  ;;  %v8237_v61 = vld [vmem:[%s7989_s15 + $0x1e0] sm:$0xff] }
  0x54   : > { %12492 = vst [vmem:[#allocation56_spill] sm:$0xff] %v8231_v59  ;;  %12493 = vst [vmem:[#allocation57_spill] sm:$0xff] %v8234_v60  ;;  %v8240_v62 = vld [vmem:[%s7989_s15 + $0x1e8] sm:$0xff]  ;;  %v8243_v63 = vld [vmem:[%s7989_s15 + $0x1f0] sm:$0xff] }
  0x55   : > { %12494 = vst [vmem:[#allocation58_spill] sm:$0xff] %v8237_v61  ;;  %12495 = vst [vmem:[#allocation59_spill] sm:$0xff] %v8240_v62  ;;  %v8246_v0 = vld [vmem:[%s7989_s15 + $0x1f8] sm:$0xff]  ;;  %v8249_v58 = vld [vmem:[%s7989_s15 + $0x200] sm:$0xff] }
  0x56   : > { %12496 = vst [vmem:[#allocation60_spill] sm:$0xff] %v8243_v63  ;;  %12497 = vst [vmem:[#allocation61_spill] sm:$0xff] %v8246_v0  ;;  %v8252_v59 = vld [vmem:[%s7989_s15 + $0x208] sm:$0xff]  ;;  %v8255_v60 = vld [vmem:[%s7989_s15 + $0x210] sm:$0xff] }
  0x57   : > { %12498 = vst [vmem:[#allocation62_spill] sm:$0xff] %v8249_v58  ;;  %12499 = vst [vmem:[#allocation63_spill] sm:$0xff] %v8252_v59  ;;  %v8258_v61 = vld [vmem:[%s7989_s15 + $0x218] sm:$0xff]  ;;  %v8261_v62 = vld [vmem:[%s7989_s15 + $0x220] sm:$0xff] }
  0x58   : > { %12500 = vst [vmem:[#allocation64_spill] sm:$0xff] %v8255_v60  ;;  %12501 = vst [vmem:[#allocation65_spill] sm:$0xff] %v8258_v61  ;;  %v8264_v63 = vld [vmem:[%s7989_s15 + $0x228] sm:$0xff]  ;;  %v8267_v0 = vld [vmem:[%s7989_s15 + $0x230] sm:$0xff] }
  0x59   : > { %12502 = vst [vmem:[#allocation66_spill] sm:$0xff] %v8261_v62  ;;  %12503 = vst [vmem:[#allocation67_spill] sm:$0xff] %v8264_v63  ;;  %v8270_v57 = vld [vmem:[%s7989_s15 + $0x238] sm:$0xff]  ;;  %v8273_v56 = vld [vmem:[%s7989_s15 + $0x240] sm:$0xff] }
  0x5a   : > { %12504 = vst [vmem:[#allocation68_spill] sm:$0xff] %v8267_v0  ;;  %12505 = vst [vmem:[#allocation69_spill] sm:$0xff] %v8270_v57  ;;  %v8276_v55 = vld [vmem:[%s7989_s15 + $0x248] sm:$0xff]  ;;  %v8279_v54 = vld [vmem:[%s7989_s15 + $0x250] sm:$0xff] }
  0x5b   : > { %12506 = vst [vmem:[#allocation70_spill] sm:$0xff] %v8273_v56  ;;  %12507 = vst [vmem:[#allocation71_spill] sm:$0xff] %v8276_v55  ;;  %v8282_v53 = vld [vmem:[%s7989_s15 + $0x258] sm:$0xff]  ;;  %v8285_v52 = vld [vmem:[%s7989_s15 + $0x260] sm:$0xff] }
  0x5c   : > { %12508 = vst [vmem:[#allocation72_spill] sm:$0xff] %v8279_v54  ;;  %12509 = vst [vmem:[#allocation73_spill] sm:$0xff] %v8282_v53  ;;  %v8288_v51 = vld [vmem:[%s7989_s15 + $0x268] sm:$0xff]  ;;  %v8291_v50 = vld [vmem:[%s7989_s15 + $0x270] sm:$0xff] }
  0x5d   : > { %12510 = vst [vmem:[#allocation74_spill] sm:$0xff] %v8285_v52  ;;  %12511 = vst [vmem:[#allocation75_spill] sm:$0xff] %v8288_v51  ;;  %v8294_v49 = vld [vmem:[%s7989_s15 + $0x278] sm:$0xff]  ;;  %v8297_v48 = vld [vmem:[%s7989_s15 + $0x280] sm:$0xff] }
  0x5e   : > { %12512 = vst [vmem:[#allocation76_spill] sm:$0xff] %v8291_v50  ;;  %12513 = vst [vmem:[#allocation77_spill] sm:$0xff] %v8294_v49  ;;  %v8300_v47 = vld [vmem:[%s7989_s15 + $0x288] sm:$0xff]  ;;  %v8303_v46 = vld [vmem:[%s7989_s15 + $0x290] sm:$0xff] }
  0x5f   : > { %12514 = vst [vmem:[#allocation78_spill] sm:$0xff] %v8297_v48  ;;  %12515 = vst [vmem:[#allocation79_spill] sm:$0xff] %v8300_v47  ;;  %v8306_v45 = vld [vmem:[%s7989_s15 + $0x298] sm:$0xff]  ;;  %v8309_v44 = vld [vmem:[%s7989_s15 + $0x2a0] sm:$0xff] }
  0x60   : > { %12516 = vst [vmem:[#allocation80_spill] sm:$0xff] %v8303_v46  ;;  %12517 = vst [vmem:[#allocation81_spill] sm:$0xff] %v8306_v45  ;;  %v8312_v43 = vld [vmem:[%s7989_s15 + $0x2a8] sm:$0xff]  ;;  %v8315_v42 = vld [vmem:[%s7989_s15 + $0x2b0] sm:$0xff] }
  0x61   : > { %12518 = vst [vmem:[#allocation82_spill] sm:$0xff] %v8309_v44  ;;  %12519 = vst [vmem:[#allocation83_spill] sm:$0xff] %v8312_v43  ;;  %v8318_v41 = vld [vmem:[%s7989_s15 + $0x2b8] sm:$0xff]  ;;  %v8321_v40 = vld [vmem:[%s7989_s15 + $0x2c0] sm:$0xff] }
  0x62   : > { %12520 = vst [vmem:[#allocation84_spill] sm:$0xff] %v8315_v42  ;;  %12521 = vst [vmem:[#allocation85_spill] sm:$0xff] %v8318_v41  ;;  %v8324_v39 = vld [vmem:[%s7989_s15 + $0x2c8] sm:$0xff]  ;;  %v8327_v38 = vld [vmem:[%s7989_s15 + $0x2d0] sm:$0xff] }
  0x63   : > { %12522 = vst [vmem:[#allocation86_spill] sm:$0xff] %v8321_v40  ;;  %12523 = vst [vmem:[#allocation87_spill] sm:$0xff] %v8324_v39  ;;  %v8330_v37 = vld [vmem:[%s7989_s15 + $0x2d8] sm:$0xff]  ;;  %v8333_v36 = vld [vmem:[%s7989_s15 + $0x2e0] sm:$0xff] }
  0x64   : > { %12524 = vst [vmem:[#allocation88_spill] sm:$0xff] %v8327_v38  ;;  %12525 = vst [vmem:[#allocation89_spill] sm:$0xff] %v8330_v37  ;;  %v8336_v35 = vld [vmem:[%s7989_s15 + $0x2e8] sm:$0xff]  ;;  %v8339_v34 = vld [vmem:[%s7989_s15 + $0x2f0] sm:$0xff] }
  0x65   : > { %12526 = vst [vmem:[#allocation90_spill] sm:$0xff] %v8333_v36  ;;  %12527 = vst [vmem:[#allocation91_spill] sm:$0xff] %v8336_v35  ;;  %v8342_v33 = vld [vmem:[%s7989_s15 + $0x2f8] sm:$0xff]  ;;  %v8345_v32 = vld [vmem:[%s7989_s15 + $0x300] sm:$0xff] }
  0x66   : > { %12528 = vst [vmem:[#allocation92_spill] sm:$0xff] %v8339_v34  ;;  %12529 = vst [vmem:[#allocation93_spill] sm:$0xff] %v8342_v33  ;;  %v8348_v31 = vld [vmem:[%s7989_s15 + $0x308] sm:$0xff]  ;;  %v8351_v30 = vld [vmem:[%s7989_s15 + $0x310] sm:$0xff] }
  0x67   : > { %12530 = vst [vmem:[#allocation94_spill] sm:$0xff] %v8345_v32  ;;  %12531 = vst [vmem:[#allocation95_spill] sm:$0xff] %v8348_v31  ;;  %v8354_v36 = vld [vmem:[%s7989_s15 + $0x318] sm:$0xff]  ;;  %v8357_v35 = vld [vmem:[%s7989_s15 + $0x320] sm:$0xff] }
  0x68   : > { %12532 = vst [vmem:[#allocation96_spill] sm:$0xff] %v8351_v30  ;;  %12533 = vst [vmem:[#allocation97_spill] sm:$0xff] %v8354_v36  ;;  %v8360_v34 = vld [vmem:[%s7989_s15 + $0x328] sm:$0xff]  ;;  %v8363_v33 = vld [vmem:[%s7989_s15 + $0x330] sm:$0xff] }
  0x69   : > { %12534 = vst [vmem:[#allocation98_spill] sm:$0xff] %v8357_v35  ;;  %12535 = vst [vmem:[#allocation99_spill] sm:$0xff] %v8360_v34  ;;  %v8366_v32 = vld [vmem:[%s7989_s15 + $0x338] sm:$0xff]  ;;  %v8369_v31 = vld [vmem:[%s7989_s15 + $0x340] sm:$0xff] }
  0x6a   : > { %12536 = vst [vmem:[#allocation100_spill] sm:$0xff] %v8363_v33  ;;  %12537 = vst [vmem:[#allocation101_spill] sm:$0xff] %v8366_v32  ;;  %v8372_v30 = vld [vmem:[%s7989_s15 + $0x348] sm:$0xff]  ;;  %v8375_v36 = vld [vmem:[%s7989_s15 + $0x350] sm:$0xff] }
  0x6b   : > { %12538 = vst [vmem:[#allocation102_spill] sm:$0xff] %v8369_v31  ;;  %12539 = vst [vmem:[#allocation103_spill] sm:$0xff] %v8372_v30  ;;  %v8378_v35 = vld [vmem:[%s7989_s15 + $0x358] sm:$0xff]  ;;  %v8381_v34 = vld [vmem:[%s7989_s15 + $0x360] sm:$0xff] }
  0x6c   : > { %12540 = vst [vmem:[#allocation104_spill] sm:$0xff] %v8375_v36  ;;  %12541 = vst [vmem:[#allocation105_spill] sm:$0xff] %v8378_v35  ;;  %v8384_v33 = vld [vmem:[%s7989_s15 + $0x368] sm:$0xff]  ;;  %v8387_v32 = vld [vmem:[%s7989_s15 + $0x370] sm:$0xff] }
  0x6d   : > { %12542 = vst [vmem:[#allocation106_spill] sm:$0xff] %v8381_v34  ;;  %12543 = vst [vmem:[#allocation107_spill] sm:$0xff] %v8384_v33  ;;  %v8390_v31 = vld [vmem:[%s7989_s15 + $0x378] sm:$0xff]  ;;  %v8393_v30 = vld [vmem:[%s7989_s15 + $0x380] sm:$0xff] }
  0x6e   : > { %12544 = vst [vmem:[#allocation108_spill] sm:$0xff] %v8387_v32  ;;  %12545 = vst [vmem:[#allocation109_spill] sm:$0xff] %v8390_v31  ;;  %v8396_v36 = vld [vmem:[%s7989_s15 + $0x388] sm:$0xff]  ;;  %v8399_v35 = vld [vmem:[%s7989_s15 + $0x390] sm:$0xff] }
  0x6f   : > { %12546 = vst [vmem:[#allocation110_spill] sm:$0xff] %v8393_v30  ;;  %12547 = vst [vmem:[#allocation111_spill] sm:$0xff] %v8396_v36  ;;  %v8402_v34 = vld [vmem:[%s7989_s15 + $0x398] sm:$0xff]  ;;  %v8405_v33 = vld [vmem:[%s7989_s15 + $0x3a0] sm:$0xff] }
  0x70   : > { %12548 = vst [vmem:[#allocation112_spill] sm:$0xff] %v8399_v35  ;;  %12549 = vst [vmem:[#allocation113_spill] sm:$0xff] %v8402_v34  ;;  %v8408_v32 = vld [vmem:[%s7989_s15 + $0x3a8] sm:$0xff]  ;;  %v8411_v31 = vld [vmem:[%s7989_s15 + $0x3b0] sm:$0xff] }
  0x71   : > { %12550 = vst [vmem:[#allocation114_spill] sm:$0xff] %v8405_v33  ;;  %12551 = vst [vmem:[#allocation115_spill] sm:$0xff] %v8408_v32  ;;  %v8414_v30 = vld [vmem:[%s7989_s15 + $0x3b8] sm:$0xff]  ;;  %v8417_v36 = vld [vmem:[%s7989_s15 + $0x3c0] sm:$0xff] }
  0x72   : > { %12552 = vst [vmem:[#allocation116_spill] sm:$0xff] %v8411_v31  ;;  %12553 = vst [vmem:[#allocation117_spill] sm:$0xff] %v8414_v30  ;;  %v8420_v35 = vld [vmem:[%s7989_s15 + $0x3c8] sm:$0xff]  ;;  %v8423_v34 = vld [vmem:[%s7989_s15 + $0x3d0] sm:$0xff] }
  0x73   : > { %12554 = vst [vmem:[#allocation118_spill] sm:$0xff] %v8417_v36  ;;  %12555 = vst [vmem:[#allocation119_spill] sm:$0xff] %v8420_v35  ;;  %v8426_v33 = vld [vmem:[%s7989_s15 + $0x3d8] sm:$0xff]  ;;  %v8429_v32 = vld [vmem:[%s7989_s15 + $0x3e0] sm:$0xff] }
  0x74   : > { %12556 = vst [vmem:[#allocation120_spill] sm:$0xff] %v8423_v34  ;;  %12557 = vst [vmem:[#allocation121_spill] sm:$0xff] %v8426_v33  ;;  %v8432_v31 = vld [vmem:[%s7989_s15 + $0x3e8] sm:$0xff]  ;;  %v8435_v30 = vld [vmem:[%s7989_s15 + $0x3f0] sm:$0xff] }
  0x75   : > { %12558 = vst [vmem:[#allocation122_spill] sm:$0xff] %v8429_v32  ;;  %12559 = vst [vmem:[#allocation123_spill] sm:$0xff] %v8432_v31  ;;  %v8438_v36 = vld [vmem:[%s7989_s15 + $0x3f8] sm:$0xff]  ;;  %v8441_v35 = vld [vmem:[%s7989_s15 + $0x400] sm:$0xff] }
  0x76   : > { %12560 = vst [vmem:[#allocation124_spill] sm:$0xff] %v8435_v30  ;;  %12561 = vst [vmem:[#allocation125_spill] sm:$0xff] %v8438_v36  ;;  %v8444_v34 = vld [vmem:[%s7989_s15 + $0x408] sm:$0xff]  ;;  %v8447_v33 = vld [vmem:[%s7989_s15 + $0x410] sm:$0xff] }
  0x77   : > { %v8450_v32 = vld [vmem:[%s7989_s15 + $0x418] sm:$0xff]  ;;  %v8453_v31 = vld [vmem:[%s7989_s15 + $0x420] sm:$0xff]  ;;  %v8456_v30 = vld [vmem:[%s7989_s15 + $0x428] sm:$0xff] }
  0x78   : > { %v8459_v36 = vld [vmem:[%s7989_s15 + $0x430] sm:$0xff]  ;;  %v8462_v29 = vld [vmem:[%s7989_s15 + $0x438] sm:$0xff]  ;;  %v8465_v37 = vld [vmem:[%s7989_s15 + $0x440] sm:$0xff] }
  0x79   : > { %12562 = vst [vmem:[#allocation126_spill] sm:$0xff] %v8465_v37  ;;  %v8468_v28 = vld [vmem:[%s7989_s15 + $0x448] sm:$0xff]  ;;  %v8471_v38 = vld [vmem:[%s7989_s15 + $0x450] sm:$0xff]  ;;  %v8474_v27 = vld [vmem:[%s7989_s15 + $0x458] sm:$0xff] }
  0x7a   : > { %12563 = vst [vmem:[#allocation127_spill] sm:$0xff] %v8468_v28  ;;  %12564 = vst [vmem:[#allocation128_spill] sm:$0xff] %v8471_v38  ;;  %v8477_v39 = vld [vmem:[%s7989_s15 + $0x460] sm:$0xff]  ;;  %v8480_v26 = vld [vmem:[%s7989_s15 + $0x468] sm:$0xff] }
  0x7b   : > { %12565 = vst [vmem:[#allocation129_spill] sm:$0xff] %v8474_v27  ;;  %12566 = vst [vmem:[#allocation130_spill] sm:$0xff] %v8477_v39  ;;  %v8483_v40 = vld [vmem:[%s7989_s15 + $0x470] sm:$0xff]  ;;  %v8486_v25 = vld [vmem:[%s7989_s15 + $0x478] sm:$0xff] }
  0x7c   : > { %12567 = vst [vmem:[#allocation131_spill] sm:$0xff] %v8480_v26  ;;  %12568 = vst [vmem:[#allocation132_spill] sm:$0xff] %v8483_v40  ;;  %v8489_v41 = vld [vmem:[%s7989_s15 + $0x480] sm:$0xff]  ;;  %v8492_v24 = vld [vmem:[%s7989_s15 + $0x488] sm:$0xff] }
  0x7d   : > { %12569 = vst [vmem:[#allocation133_spill] sm:$0xff] %v8486_v25  ;;  %12570 = vst [vmem:[#allocation134_spill] sm:$0xff] %v8489_v41  ;;  %v8495_v42 = vld [vmem:[%s7989_s15 + $0x490] sm:$0xff]  ;;  %v8498_v23 = vld [vmem:[%s7989_s15 + $0x498] sm:$0xff] }
  0x7e   : > { %12571 = vst [vmem:[#allocation135_spill] sm:$0xff] %v8492_v24  ;;  %12572 = vst [vmem:[#allocation136_spill] sm:$0xff] %v8495_v42  ;;  %v8501_v43 = vld [vmem:[%s7989_s15 + $0x4a0] sm:$0xff]  ;;  %v8504_v22 = vld [vmem:[%s7989_s15 + $0x4a8] sm:$0xff] }
  0x7f   : > { %12573 = vst [vmem:[#allocation137_spill] sm:$0xff] %v8498_v23  ;;  %12574 = vst [vmem:[#allocation138_spill] sm:$0xff] %v8501_v43  ;;  %v8507_v44 = vld [vmem:[%s7989_s15 + $0x4b0] sm:$0xff]  ;;  %v8510_v41 = vld [vmem:[%s7989_s15 + $0x4b8] sm:$0xff] }
  0x80   : > { %12575 = vst [vmem:[#allocation139_spill] sm:$0xff] %v8504_v22  ;;  %12576 = vst [vmem:[#allocation140_spill] sm:$0xff] %v8507_v44  ;;  %v8513_v24 = vld [vmem:[%s7989_s15 + $0x4c0] sm:$0xff]  ;;  %v8516_v42 = vld [vmem:[%s7989_s15 + $0x4c8] sm:$0xff] }
  0x81   : > { %12577 = vst [vmem:[#allocation141_spill] sm:$0xff] %v8510_v41  ;;  %12578 = vst [vmem:[#allocation142_spill] sm:$0xff] %v8513_v24  ;;  %v8519_v23 = vld [vmem:[%s7989_s15 + $0x4d0] sm:$0xff]  ;;  %v8522_v43 = vld [vmem:[%s7989_s15 + $0x4d8] sm:$0xff] }
  0x82   : > { %12579 = vst [vmem:[#allocation143_spill] sm:$0xff] %v8516_v42  ;;  %12580 = vst [vmem:[#allocation144_spill] sm:$0xff] %v8519_v23  ;;  %v8525_v22 = vld [vmem:[%s7989_s15 + $0x4e0] sm:$0xff]  ;;  %v8528_v44 = vld [vmem:[%s7989_s15 + $0x4e8] sm:$0xff] }
  0x83   : > { %12581 = vst [vmem:[#allocation145_spill] sm:$0xff] %v8522_v43  ;;  %12582 = vst [vmem:[#allocation146_spill] sm:$0xff] %v8525_v22  ;;  %v8531_v41 = vld [vmem:[%s7989_s15 + $0x4f0] sm:$0xff]  ;;  %v8534_v24 = vld [vmem:[%s7989_s15 + $0x4f8] sm:$0xff] }
  0x84   : > { %12583 = vst [vmem:[#allocation147_spill] sm:$0xff] %v8528_v44  ;;  %12584 = vst [vmem:[#allocation148_spill] sm:$0xff] %v8531_v41  ;;  %v8537_v42 = vld [vmem:[%s7989_s15 + $0x500] sm:$0xff]  ;;  %v8540_v23 = vld [vmem:[%s7989_s15 + $0x508] sm:$0xff] }
  0x85   : > { %12585 = vst [vmem:[#allocation149_spill] sm:$0xff] %v8534_v24  ;;  %12586 = vst [vmem:[#allocation150_spill] sm:$0xff] %v8537_v42  ;;  %v8543_v43 = vld [vmem:[%s7989_s15 + $0x510] sm:$0xff]  ;;  %v8546_v22 = vld [vmem:[%s7989_s15 + $0x518] sm:$0xff] }
  0x86   : > { %12587 = vst [vmem:[#allocation151_spill] sm:$0xff] %v8540_v23  ;;  %12588 = vst [vmem:[#allocation152_spill] sm:$0xff] %v8543_v43  ;;  %v8549_v44 = vld [vmem:[%s7989_s15 + $0x520] sm:$0xff]  ;;  %v8552_v41 = vld [vmem:[%s7989_s15 + $0x528] sm:$0xff] }
  0x87   : > { %12589 = vst [vmem:[#allocation153_spill] sm:$0xff] %v8546_v22  ;;  %12590 = vst [vmem:[#allocation154_spill] sm:$0xff] %v8549_v44  ;;  %v8555_v24 = vld [vmem:[%s7989_s15 + $0x530] sm:$0xff]  ;;  %v8558_v42 = vld [vmem:[%s7989_s15 + $0x538] sm:$0xff] }
  0x88   : > { %12591 = vst [vmem:[#allocation155_spill] sm:$0xff] %v8552_v41  ;;  %12592 = vst [vmem:[#allocation156_spill] sm:$0xff] %v8555_v24  ;;  %v8561_v23 = vld [vmem:[%s7989_s15 + $0x540] sm:$0xff]  ;;  %v8564_v43 = vld [vmem:[%s7989_s15 + $0x548] sm:$0xff] }
  0x89   : > { %12593 = vst [vmem:[#allocation157_spill] sm:$0xff] %v8558_v42  ;;  %12594 = vst [vmem:[#allocation158_spill] sm:$0xff] %v8561_v23  ;;  %v8567_v22 = vld [vmem:[%s7989_s15 + $0x550] sm:$0xff]  ;;  %v8570_v44 = vld [vmem:[%s7989_s15 + $0x558] sm:$0xff] }
  0x8a   : > { %12595 = vst [vmem:[#allocation159_spill] sm:$0xff] %v8564_v43  ;;  %12596 = vst [vmem:[#allocation160_spill] sm:$0xff] %v8567_v22  ;;  %v8573_v41 = vld [vmem:[%s7989_s15 + $0x560] sm:$0xff]  ;;  %v8576_v24 = vld [vmem:[%s7989_s15 + $0x568] sm:$0xff] }
  0x8b   : > { %12597 = vst [vmem:[#allocation161_spill] sm:$0xff] %v8570_v44  ;;  %12598 = vst [vmem:[#allocation162_spill] sm:$0xff] %v8573_v41  ;;  %v8579_v42 = vld [vmem:[%s7989_s15 + $0x570] sm:$0xff]  ;;  %v8582_v23 = vld [vmem:[%s7989_s15 + $0x578] sm:$0xff] }
  0x8c   : > { %12599 = vst [vmem:[#allocation163_spill] sm:$0xff] %v8576_v24  ;;  %12600 = vst [vmem:[#allocation164_spill] sm:$0xff] %v8579_v42  ;;  %v8585_v43 = vld [vmem:[%s7989_s15 + $0x580] sm:$0xff]  ;;  %v8588_v22 = vld [vmem:[%s7989_s15 + $0x588] sm:$0xff] }
  0x8d   : > { %12601 = vst [vmem:[#allocation165_spill] sm:$0xff] %v8582_v23  ;;  %12602 = vst [vmem:[#allocation166_spill] sm:$0xff] %v8585_v43  ;;  %v8591_v44 = vld [vmem:[%s7989_s15 + $0x590] sm:$0xff]  ;;  %v8594_v41 = vld [vmem:[%s7989_s15 + $0x598] sm:$0xff] }
  0x8e   : > { %12603 = vst [vmem:[#allocation167_spill] sm:$0xff] %v8588_v22  ;;  %12604 = vst [vmem:[#allocation168_spill] sm:$0xff] %v8591_v44  ;;  %v8597_v24 = vld [vmem:[%s7989_s15 + $0x5a0] sm:$0xff]  ;;  %v8600_v42 = vld [vmem:[%s7989_s15 + $0x5a8] sm:$0xff] }
  0x8f   : > { %12605 = vst [vmem:[#allocation169_spill] sm:$0xff] %v8594_v41  ;;  %12606 = vst [vmem:[#allocation170_spill] sm:$0xff] %v8597_v24  ;;  %v8603_v23 = vld [vmem:[%s7989_s15 + $0x5b0] sm:$0xff]  ;;  %v8606_v43 = vld [vmem:[%s7989_s15 + $0x5b8] sm:$0xff] }
  0x90   : > { %12607 = vst [vmem:[#allocation171_spill] sm:$0xff] %v8600_v42  ;;  %12608 = vst [vmem:[#allocation172_spill] sm:$0xff] %v8603_v23  ;;  %v8609_v22 = vld [vmem:[%s7989_s15 + $0x5c0] sm:$0xff]  ;;  %v8612_v44 = vld [vmem:[%s7989_s15 + $0x5c8] sm:$0xff] }
  0x91   : > { %12609 = vst [vmem:[#allocation173_spill] sm:$0xff] %v8606_v43  ;;  %12610 = vst [vmem:[#allocation174_spill] sm:$0xff] %v8609_v22  ;;  %v8615_v41 = vld [vmem:[%s7989_s15 + $0x5d0] sm:$0xff]  ;;  %v8618_v24 = vld [vmem:[%s7989_s15 + $0x5d8] sm:$0xff] }
  0x92   : > { %12611 = vst [vmem:[#allocation175_spill] sm:$0xff] %v8612_v44  ;;  %12612 = vst [vmem:[#allocation176_spill] sm:$0xff] %v8615_v41  ;;  %v8621_v42 = vld [vmem:[%s7989_s15 + $0x5e0] sm:$0xff]  ;;  %v8624_v23 = vld [vmem:[%s7989_s15 + $0x5e8] sm:$0xff] }
  0x93   : > { %12613 = vst [vmem:[#allocation177_spill] sm:$0xff] %v8618_v24  ;;  %12614 = vst [vmem:[#allocation178_spill] sm:$0xff] %v8621_v42  ;;  %v8627_v43 = vld [vmem:[%s7989_s15 + $0x5f0] sm:$0xff]  ;;  %v8630_v22 = vld [vmem:[%s7989_s15 + $0x5f8] sm:$0xff] }
  0x94   : > { %12615 = vst [vmem:[#allocation179_spill] sm:$0xff] %v8624_v23  ;;  %12616 = vst [vmem:[#allocation180_spill] sm:$0xff] %v8627_v43  ;;  %v8633_v44 = vld [vmem:[%s7989_s15 + $0x600] sm:$0xff]  ;;  %v8636_v41 = vld [vmem:[%s7989_s15 + $0x608] sm:$0xff] }
  0x95   : > { %12617 = vst [vmem:[#allocation181_spill] sm:$0xff] %v8630_v22  ;;  %v8639_v24 = vld [vmem:[%s7989_s15 + $0x610] sm:$0xff]  ;;  %v8642_v42 = vld [vmem:[%s7989_s15 + $0x618] sm:$0xff]  ;;  %v8645_v23 = vld [vmem:[%s7989_s15 + $0x620] sm:$0xff] }
  0x96   : > { %v8648_v43 = vld [vmem:[%s7989_s15 + $0x628] sm:$0xff]  ;;  %v8651_v22 = vld [vmem:[%s7989_s15 + $0x630] sm:$0xff]  ;;  %v8654_v21 = vld [vmem:[%s7989_s15 + $0x638] sm:$0xff] }
  0x97   : > { %v8657_v45 = vld [vmem:[%s7989_s15 + $0x640] sm:$0xff]  ;;  %v8660_v20 = vld [vmem:[%s7989_s15 + $0x648] sm:$0xff]  ;;  %v8663_v46 = vld [vmem:[%s7989_s15 + $0x650] sm:$0xff] }
  0x98   : > { %12618 = vst [vmem:[#allocation182_spill] sm:$0xff] %v8657_v45  ;;  %12619 = vst [vmem:[#allocation183_spill] sm:$0xff] %v8660_v20  ;;  %v8666_v19 = vld [vmem:[%s7989_s15 + $0x658] sm:$0xff]  ;;  %v8669_v47 = vld [vmem:[%s7989_s15 + $0x660] sm:$0xff] }
  0x99   : > { %12620 = vst [vmem:[#allocation184_spill] sm:$0xff] %v8663_v46  ;;  %12621 = vst [vmem:[#allocation185_spill] sm:$0xff] %v8666_v19  ;;  %v8672_v18 = vld [vmem:[%s7989_s15 + $0x668] sm:$0xff]  ;;  %v8675_v48 = vld [vmem:[%s7989_s15 + $0x670] sm:$0xff] }
  0x9a   : > { %12622 = vst [vmem:[#allocation186_spill] sm:$0xff] %v8669_v47  ;;  %12623 = vst [vmem:[#allocation187_spill] sm:$0xff] %v8672_v18  ;;  %v8678_v17 = vld [vmem:[%s7989_s15 + $0x678] sm:$0xff]  ;;  %v8681_v20 = vld [vmem:[%s7989_s15 + $0x680] sm:$0xff] }
  0x9b   : > { %12624 = vst [vmem:[#allocation188_spill] sm:$0xff] %v8675_v48  ;;  %12625 = vst [vmem:[#allocation189_spill] sm:$0xff] %v8678_v17  ;;  %v8684_v46 = vld [vmem:[%s7989_s15 + $0x688] sm:$0xff]  ;;  %v8687_v19 = vld [vmem:[%s7989_s15 + $0x690] sm:$0xff] }
  0x9c   : > { %12626 = vst [vmem:[#allocation190_spill] sm:$0xff] %v8681_v20  ;;  %12627 = vst [vmem:[#allocation191_spill] sm:$0xff] %v8684_v46  ;;  %v8690_v47 = vld [vmem:[%s7989_s15 + $0x698] sm:$0xff]  ;;  %v8693_v18 = vld [vmem:[%s7989_s15 + $0x6a0] sm:$0xff] }
  0x9d   : > { %12628 = vst [vmem:[#allocation192_spill] sm:$0xff] %v8687_v19  ;;  %12629 = vst [vmem:[#allocation193_spill] sm:$0xff] %v8690_v47  ;;  %v8696_v48 = vld [vmem:[%s7989_s15 + $0x6a8] sm:$0xff]  ;;  %v8699_v17 = vld [vmem:[%s7989_s15 + $0x6b0] sm:$0xff] }
  0x9e   : > { %12630 = vst [vmem:[#allocation194_spill] sm:$0xff] %v8693_v18  ;;  %12631 = vst [vmem:[#allocation195_spill] sm:$0xff] %v8696_v48  ;;  %v8702_v20 = vld [vmem:[%s7989_s15 + $0x6b8] sm:$0xff]  ;;  %v8705_v46 = vld [vmem:[%s7989_s15 + $0x6c0] sm:$0xff] }
  0x9f   : > { %12632 = vst [vmem:[#allocation196_spill] sm:$0xff] %v8699_v17  ;;  %12633 = vst [vmem:[#allocation197_spill] sm:$0xff] %v8702_v20  ;;  %v8708_v19 = vld [vmem:[%s7989_s15 + $0x6c8] sm:$0xff]  ;;  %v8711_v47 = vld [vmem:[%s7989_s15 + $0x6d0] sm:$0xff] }
  0xa0   : > { %12634 = vst [vmem:[#allocation198_spill] sm:$0xff] %v8705_v46  ;;  %12635 = vst [vmem:[#allocation199_spill] sm:$0xff] %v8708_v19  ;;  %v8714_v18 = vld [vmem:[%s7989_s15 + $0x6d8] sm:$0xff]  ;;  %v8717_v48 = vld [vmem:[%s7989_s15 + $0x6e0] sm:$0xff] }
  0xa1   : > { %12636 = vst [vmem:[#allocation200_spill] sm:$0xff] %v8711_v47  ;;  %12637 = vst [vmem:[#allocation201_spill] sm:$0xff] %v8714_v18  ;;  %v8720_v17 = vld [vmem:[%s7989_s15 + $0x6e8] sm:$0xff]  ;;  %v8723_v20 = vld [vmem:[%s7989_s15 + $0x6f0] sm:$0xff] }
  0xa2   : > { %12638 = vst [vmem:[#allocation202_spill] sm:$0xff] %v8717_v48  ;;  %12639 = vst [vmem:[#allocation203_spill] sm:$0xff] %v8720_v17  ;;  %v8726_v46 = vld [vmem:[%s7989_s15 + $0x6f8] sm:$0xff]  ;;  %v8729_v19 = vld [vmem:[%s7989_s15 + $0x700] sm:$0xff] }
  0xa3   : > { %12640 = vst [vmem:[#allocation204_spill] sm:$0xff] %v8723_v20  ;;  %12641 = vst [vmem:[#allocation205_spill] sm:$0xff] %v8726_v46  ;;  %v8732_v47 = vld [vmem:[%s7989_s15 + $0x708] sm:$0xff]  ;;  %v8735_v18 = vld [vmem:[%s7989_s15 + $0x710] sm:$0xff] }
  0xa4   : > { %12642 = vst [vmem:[#allocation206_spill] sm:$0xff] %v8729_v19  ;;  %12643 = vst [vmem:[#allocation207_spill] sm:$0xff] %v8732_v47  ;;  %v8738_v48 = vld [vmem:[%s7989_s15 + $0x718] sm:$0xff]  ;;  %v8741_v17 = vld [vmem:[%s7989_s15 + $0x720] sm:$0xff] }
  0xa5   : > { %12644 = vst [vmem:[#allocation208_spill] sm:$0xff] %v8735_v18  ;;  %12645 = vst [vmem:[#allocation209_spill] sm:$0xff] %v8738_v48  ;;  %v8744_v20 = vld [vmem:[%s7989_s15 + $0x728] sm:$0xff]  ;;  %v8747_v46 = vld [vmem:[%s7989_s15 + $0x730] sm:$0xff] }
  0xa6   : > { %12646 = vst [vmem:[#allocation210_spill] sm:$0xff] %v8741_v17  ;;  %12647 = vst [vmem:[#allocation211_spill] sm:$0xff] %v8744_v20  ;;  %v8750_v19 = vld [vmem:[%s7989_s15 + $0x738] sm:$0xff]  ;;  %v8753_v47 = vld [vmem:[%s7989_s15 + $0x740] sm:$0xff] }
  0xa7   : > { %12648 = vst [vmem:[#allocation212_spill] sm:$0xff] %v8747_v46  ;;  %12649 = vst [vmem:[#allocation213_spill] sm:$0xff] %v8750_v19  ;;  %v8756_v18 = vld [vmem:[%s7989_s15 + $0x748] sm:$0xff]  ;;  %v8759_v48 = vld [vmem:[%s7989_s15 + $0x750] sm:$0xff] }
  0xa8   : > { %12650 = vst [vmem:[#allocation214_spill] sm:$0xff] %v8753_v47  ;;  %12651 = vst [vmem:[#allocation215_spill] sm:$0xff] %v8756_v18  ;;  %v8762_v17 = vld [vmem:[%s7989_s15 + $0x758] sm:$0xff]  ;;  %v8765_v20 = vld [vmem:[%s7989_s15 + $0x760] sm:$0xff] }
  0xa9   : > { %12652 = vst [vmem:[#allocation216_spill] sm:$0xff] %v8759_v48  ;;  %12653 = vst [vmem:[#allocation217_spill] sm:$0xff] %v8762_v17  ;;  %v8768_v46 = vld [vmem:[%s7989_s15 + $0x768] sm:$0xff]  ;;  %v8771_v19 = vld [vmem:[%s7989_s15 + $0x770] sm:$0xff] }
  0xaa   : > { %12654 = vst [vmem:[#allocation218_spill] sm:$0xff] %v8765_v20  ;;  %12655 = vst [vmem:[#allocation219_spill] sm:$0xff] %v8768_v46  ;;  %v8774_v47 = vld [vmem:[%s7989_s15 + $0x778] sm:$0xff]  ;;  %v8777_v18 = vld [vmem:[%s7989_s15 + $0x780] sm:$0xff] }
  0xab   : > { %12656 = vst [vmem:[#allocation220_spill] sm:$0xff] %v8771_v19  ;;  %12657 = vst [vmem:[#allocation221_spill] sm:$0xff] %v8774_v47  ;;  %v8780_v48 = vld [vmem:[%s7989_s15 + $0x788] sm:$0xff]  ;;  %v8783_v17 = vld [vmem:[%s7989_s15 + $0x790] sm:$0xff] }
  0xac   : > { %12658 = vst [vmem:[#allocation222_spill] sm:$0xff] %v8777_v18  ;;  %12659 = vst [vmem:[#allocation223_spill] sm:$0xff] %v8780_v48  ;;  %v8786_v20 = vld [vmem:[%s7989_s15 + $0x798] sm:$0xff]  ;;  %v8789_v46 = vld [vmem:[%s7989_s15 + $0x7a0] sm:$0xff] }
  0xad   : > { %12660 = vst [vmem:[#allocation224_spill] sm:$0xff] %v8783_v17  ;;  %12661 = vst [vmem:[#allocation225_spill] sm:$0xff] %v8786_v20  ;;  %v8792_v19 = vld [vmem:[%s7989_s15 + $0x7a8] sm:$0xff]  ;;  %v8795_v47 = vld [vmem:[%s7989_s15 + $0x7b0] sm:$0xff] }
  0xae   : > { %12662 = vst [vmem:[#allocation226_spill] sm:$0xff] %v8789_v46  ;;  %12663 = vst [vmem:[#allocation227_spill] sm:$0xff] %v8792_v19  ;;  %v8798_v18 = vld [vmem:[%s7989_s15 + $0x7b8] sm:$0xff]  ;;  %v8801_v48 = vld [vmem:[%s7989_s15 + $0x7c0] sm:$0xff] }
  0xaf   : > { %12664 = vst [vmem:[#allocation228_spill] sm:$0xff] %v8795_v47  ;;  %12665 = vst [vmem:[#allocation229_spill] sm:$0xff] %v8798_v18  ;;  %v8804_v17 = vld [vmem:[%s7989_s15 + $0x7c8] sm:$0xff]  ;;  %v8807_v20 = vld [vmem:[%s7989_s15 + $0x7d0] sm:$0xff] }
  0xb0   : > { %12666 = vst [vmem:[#allocation230_spill] sm:$0xff] %v8801_v48  ;;  %12667 = vst [vmem:[#allocation231_spill] sm:$0xff] %v8804_v17  ;;  %v8810_v46 = vld [vmem:[%s7989_s15 + $0x7d8] sm:$0xff]  ;;  %v8813_v19 = vld [vmem:[%s7989_s15 + $0x7e0] sm:$0xff] }
  0xb1   : > { %12668 = vst [vmem:[#allocation232_spill] sm:$0xff] %v8807_v20  ;;  %12669 = vst [vmem:[#allocation233_spill] sm:$0xff] %v8810_v46  ;;  %v8816_v47 = vld [vmem:[%s7989_s15 + $0x7e8] sm:$0xff]  ;;  %v8819_v18 = vld [vmem:[%s7989_s15 + $0x7f0] sm:$0xff] }
  0xb2   : > { %12670 = vst [vmem:[#allocation234_spill] sm:$0xff] %v8813_v19  ;;  %12671 = vst [vmem:[#allocation235_spill] sm:$0xff] %v8816_v47  ;;  %v8822_v48 = vld [vmem:[%s7989_s15 + $0x7f8] sm:$0xff]  ;;  %v8825_v17 = vld [vmem:[%s7989_s15 + $0x800] sm:$0xff] }
  0xb3   : > { %12672 = vst [vmem:[#allocation236_spill] sm:$0xff] %v8819_v18  ;;  %12673 = vst [vmem:[#allocation237_spill] sm:$0xff] %v8822_v48  ;;  %v8828_v20 = vld [vmem:[%s7989_s15 + $0x808] sm:$0xff]  ;;  %v8831_v46 = vld [vmem:[%s7989_s15 + $0x810] sm:$0xff] }
  0xb4   : > { %v8834_v19 = vld [vmem:[%s7989_s15 + $0x818] sm:$0xff]  ;;  %v8837_v47 = vld [vmem:[%s7989_s15 + $0x820] sm:$0xff]  ;;  %v8840_v18 = vld [vmem:[%s7989_s15 + $0x828] sm:$0xff] }
  0xb5   : > { %v8843_v48 = vld [vmem:[%s7989_s15 + $0x830] sm:$0xff]  ;;  %v8846_v45 = vld [vmem:[%s7989_s15 + $0x838] sm:$0xff]  ;;  %v8849_v25 = vld [vmem:[%s7989_s15 + $0x840] sm:$0xff] }
  0xb6   : > { %12674 = vst [vmem:[#allocation238_spill] sm:$0xff] %v8849_v25  ;;  %v8852_v40 = vld [vmem:[%s7989_s15 + $0x848] sm:$0xff]  ;;  %v8855_v26 = vld [vmem:[%s7989_s15 + $0x850] sm:$0xff]  ;;  %v8858_v39 = vld [vmem:[%s7989_s15 + $0x858] sm:$0xff] }
  0xb7   : > { %12675 = vst [vmem:[#allocation239_spill] sm:$0xff] %v8852_v40  ;;  %12676 = vst [vmem:[#allocation240_spill] sm:$0xff] %v8855_v26  ;;  %v8861_v27 = vld [vmem:[%s7989_s15 + $0x860] sm:$0xff]  ;;  %v8864_v38 = vld [vmem:[%s7989_s15 + $0x868] sm:$0xff] }
  0xb8   : > { %12677 = vst [vmem:[#allocation241_spill] sm:$0xff] %v8858_v39  ;;  %12678 = vst [vmem:[#allocation242_spill] sm:$0xff] %v8861_v27  ;;  %v8867_v28 = vld [vmem:[%s7989_s15 + $0x870] sm:$0xff]  ;;  %v8870_v25 = vld [vmem:[%s7989_s15 + $0x878] sm:$0xff] }
  0xb9   : > { %12679 = vst [vmem:[#allocation243_spill] sm:$0xff] %v8864_v38  ;;  %12680 = vst [vmem:[#allocation244_spill] sm:$0xff] %v8867_v28  ;;  %v8873_v40 = vld [vmem:[%s7989_s15 + $0x880] sm:$0xff]  ;;  %v8876_v26 = vld [vmem:[%s7989_s15 + $0x888] sm:$0xff] }
  0xba   : > { %12681 = vst [vmem:[#allocation245_spill] sm:$0xff] %v8870_v25  ;;  %12682 = vst [vmem:[#allocation246_spill] sm:$0xff] %v8873_v40  ;;  %v8879_v39 = vld [vmem:[%s7989_s15 + $0x890] sm:$0xff]  ;;  %v8882_v27 = vld [vmem:[%s7989_s15 + $0x898] sm:$0xff] }
  0xbb   : > { %12683 = vst [vmem:[#allocation247_spill] sm:$0xff] %v8876_v26  ;;  %12684 = vst [vmem:[#allocation248_spill] sm:$0xff] %v8879_v39  ;;  %v8885_v38 = vld [vmem:[%s7989_s15 + $0x8a0] sm:$0xff]  ;;  %v8888_v28 = vld [vmem:[%s7989_s15 + $0x8a8] sm:$0xff] }
  0xbc   : > { %12685 = vst [vmem:[#allocation249_spill] sm:$0xff] %v8882_v27  ;;  %12686 = vst [vmem:[#allocation250_spill] sm:$0xff] %v8885_v38  ;;  %v8891_v25 = vld [vmem:[%s7989_s15 + $0x8b0] sm:$0xff]  ;;  %v8894_v40 = vld [vmem:[%s7989_s15 + $0x8b8] sm:$0xff] }
  0xbd   : > { %12687 = vst [vmem:[#allocation251_spill] sm:$0xff] %v8888_v28  ;;  %12688 = vst [vmem:[#allocation252_spill] sm:$0xff] %v8891_v25  ;;  %v8897_v26 = vld [vmem:[%s7989_s15 + $0x8c0] sm:$0xff]  ;;  %v8900_v39 = vld [vmem:[%s7989_s15 + $0x8c8] sm:$0xff] }
  0xbe   : > { %12689 = vst [vmem:[#allocation253_spill] sm:$0xff] %v8894_v40  ;;  %12690 = vst [vmem:[#allocation254_spill] sm:$0xff] %v8897_v26  ;;  %v8903_v27 = vld [vmem:[%s7989_s15 + $0x8d0] sm:$0xff]  ;;  %v8906_v38 = vld [vmem:[%s7989_s15 + $0x8d8] sm:$0xff] }
  0xbf   : > { %12691 = vst [vmem:[#allocation255_spill] sm:$0xff] %v8900_v39  ;;  %12692 = vst [vmem:[#allocation256_spill] sm:$0xff] %v8903_v27  ;;  %v8909_v28 = vld [vmem:[%s7989_s15 + $0x8e0] sm:$0xff]  ;;  %v8912_v25 = vld [vmem:[%s7989_s15 + $0x8e8] sm:$0xff] }
  0xc0   : > { %12693 = vst [vmem:[#allocation257_spill] sm:$0xff] %v8906_v38  ;;  %12694 = vst [vmem:[#allocation258_spill] sm:$0xff] %v8909_v28  ;;  %v8915_v40 = vld [vmem:[%s7989_s15 + $0x8f0] sm:$0xff]  ;;  %v8918_v26 = vld [vmem:[%s7989_s15 + $0x8f8] sm:$0xff] }
  0xc1   : > { %12695 = vst [vmem:[#allocation259_spill] sm:$0xff] %v8912_v25  ;;  %12696 = vst [vmem:[#allocation260_spill] sm:$0xff] %v8915_v40  ;;  %v8921_v39 = vld [vmem:[%s7989_s15 + $0x900] sm:$0xff]  ;;  %v8924_v27 = vld [vmem:[%s7989_s15 + $0x908] sm:$0xff] }
  0xc2   : > { %12697 = vst [vmem:[#allocation261_spill] sm:$0xff] %v8918_v26  ;;  %12698 = vst [vmem:[#allocation262_spill] sm:$0xff] %v8921_v39  ;;  %v8927_v38 = vld [vmem:[%s7989_s15 + $0x910] sm:$0xff]  ;;  %v8930_v28 = vld [vmem:[%s7989_s15 + $0x918] sm:$0xff] }
  0xc3   : > { %12699 = vst [vmem:[#allocation263_spill] sm:$0xff] %v8924_v27  ;;  %12700 = vst [vmem:[#allocation264_spill] sm:$0xff] %v8927_v38  ;;  %v8933_v25 = vld [vmem:[%s7989_s15 + $0x920] sm:$0xff]  ;;  %v8936_v40 = vld [vmem:[%s7989_s15 + $0x928] sm:$0xff] }
  0xc4   : > { %12701 = vst [vmem:[#allocation265_spill] sm:$0xff] %v8930_v28  ;;  %12702 = vst [vmem:[#allocation266_spill] sm:$0xff] %v8933_v25  ;;  %v8939_v26 = vld [vmem:[%s7989_s15 + $0x930] sm:$0xff]  ;;  %v8942_v39 = vld [vmem:[%s7989_s15 + $0x938] sm:$0xff] }
  0xc5   : > { %12703 = vst [vmem:[#allocation267_spill] sm:$0xff] %v8936_v40  ;;  %12704 = vst [vmem:[#allocation268_spill] sm:$0xff] %v8939_v26  ;;  %v8945_v27 = vld [vmem:[%s7989_s15 + $0x940] sm:$0xff]  ;;  %v8948_v38 = vld [vmem:[%s7989_s15 + $0x948] sm:$0xff] }
  0xc6   : > { %12705 = vst [vmem:[#allocation269_spill] sm:$0xff] %v8942_v39  ;;  %12706 = vst [vmem:[#allocation270_spill] sm:$0xff] %v8945_v27  ;;  %v8951_v28 = vld [vmem:[%s7989_s15 + $0x950] sm:$0xff]  ;;  %v8954_v25 = vld [vmem:[%s7989_s15 + $0x958] sm:$0xff] }
  0xc7   : > { %12707 = vst [vmem:[#allocation271_spill] sm:$0xff] %v8948_v38  ;;  %12708 = vst [vmem:[#allocation272_spill] sm:$0xff] %v8951_v28  ;;  %v8957_v40 = vld [vmem:[%s7989_s15 + $0x960] sm:$0xff]  ;;  %v8960_v26 = vld [vmem:[%s7989_s15 + $0x968] sm:$0xff] }
  0xc8   : > { %12709 = vst [vmem:[#allocation273_spill] sm:$0xff] %v8954_v25  ;;  %12710 = vst [vmem:[#allocation274_spill] sm:$0xff] %v8957_v40  ;;  %v8963_v39 = vld [vmem:[%s7989_s15 + $0x970] sm:$0xff]  ;;  %v8966_v27 = vld [vmem:[%s7989_s15 + $0x978] sm:$0xff] }
  0xc9   : > { %12711 = vst [vmem:[#allocation275_spill] sm:$0xff] %v8960_v26  ;;  %12712 = vst [vmem:[#allocation276_spill] sm:$0xff] %v8963_v39  ;;  %v8969_v38 = vld [vmem:[%s7989_s15 + $0x980] sm:$0xff]  ;;  %v8972_v28 = vld [vmem:[%s7989_s15 + $0x988] sm:$0xff] }
  0xca   : > { %12713 = vst [vmem:[#allocation277_spill] sm:$0xff] %v8966_v27  ;;  %12714 = vst [vmem:[#allocation278_spill] sm:$0xff] %v8969_v38  ;;  %v8975_v25 = vld [vmem:[%s7989_s15 + $0x990] sm:$0xff]  ;;  %v8978_v40 = vld [vmem:[%s7989_s15 + $0x998] sm:$0xff] }
  0xcb   : > { %12715 = vst [vmem:[#allocation279_spill] sm:$0xff] %v8972_v28  ;;  %12716 = vst [vmem:[#allocation280_spill] sm:$0xff] %v8975_v25  ;;  %v8981_v26 = vld [vmem:[%s7989_s15 + $0x9a0] sm:$0xff]  ;;  %v8984_v39 = vld [vmem:[%s7989_s15 + $0x9a8] sm:$0xff] }
  0xcc   : > { %12717 = vst [vmem:[#allocation281_spill] sm:$0xff] %v8978_v40  ;;  %12718 = vst [vmem:[#allocation282_spill] sm:$0xff] %v8981_v26  ;;  %v8987_v27 = vld [vmem:[%s7989_s15 + $0x9b0] sm:$0xff]  ;;  %v8990_v38 = vld [vmem:[%s7989_s15 + $0x9b8] sm:$0xff] }
  0xcd   : > { %12719 = vst [vmem:[#allocation283_spill] sm:$0xff] %v8984_v39  ;;  %12720 = vst [vmem:[#allocation284_spill] sm:$0xff] %v8987_v27  ;;  %v8993_v28 = vld [vmem:[%s7989_s15 + $0x9c0] sm:$0xff]  ;;  %v8996_v25 = vld [vmem:[%s7989_s15 + $0x9c8] sm:$0xff] }
  0xce   : > { %12721 = vst [vmem:[#allocation285_spill] sm:$0xff] %v8990_v38  ;;  %12722 = vst [vmem:[#allocation286_spill] sm:$0xff] %v8993_v28  ;;  %v8999_v40 = vld [vmem:[%s7989_s15 + $0x9d0] sm:$0xff]  ;;  %v9002_v26 = vld [vmem:[%s7989_s15 + $0x9d8] sm:$0xff] }
  0xcf   : > { %12723 = vst [vmem:[#allocation287_spill] sm:$0xff] %v8996_v25  ;;  %12724 = vst [vmem:[#allocation288_spill] sm:$0xff] %v8999_v40  ;;  %v9005_v39 = vld [vmem:[%s7989_s15 + $0x9e0] sm:$0xff]  ;;  %v9008_v27 = vld [vmem:[%s7989_s15 + $0x9e8] sm:$0xff] }
  0xd0   : > { %12725 = vst [vmem:[#allocation289_spill] sm:$0xff] %v9002_v26  ;;  %12726 = vst [vmem:[#allocation290_spill] sm:$0xff] %v9005_v39  ;;  %v9011_v38 = vld [vmem:[%s7989_s15 + $0x9f0] sm:$0xff]  ;;  %v9014_v28 = vld [vmem:[%s7989_s15 + $0x9f8] sm:$0xff] }
  0xd1   : > { %12727 = vst [vmem:[#allocation291_spill] sm:$0xff] %v9008_v27  ;;  %12728 = vst [vmem:[#allocation292_spill] sm:$0xff] %v9011_v38  ;;  %v9017_v25 = vld [vmem:[%s7989_s15 + $0xa00] sm:$0xff]  ;;  %v9020_v40 = vld [vmem:[%s7989_s15 + $0xa08] sm:$0xff] }
  0xd2   : > { %12729 = vst [vmem:[#allocation293_spill] sm:$0xff] %v9014_v28  ;;  %v9023_v26 = vld [vmem:[%s7989_s15 + $0xa10] sm:$0xff]  ;;  %v9026_v39 = vld [vmem:[%s7989_s15 + $0xa18] sm:$0xff]  ;;  %v9029_v27 = vld [vmem:[%s7989_s15 + $0xa20] sm:$0xff] }
  0xd3   : > { %v9032_v38 = vld [vmem:[%s7989_s15 + $0xa28] sm:$0xff]  ;;  %v9035_v28 = vld [vmem:[%s7989_s15 + $0xa30] sm:$0xff]  ;;  %v9038_v37 = vld [vmem:[%s7989_s15 + $0xa38] sm:$0xff] }
  0xd4   : > { %v9041_v49 = vld [vmem:[%s7989_s15 + $0xa40] sm:$0xff]  ;;  %v9044_v16 = vld [vmem:[%s7989_s15 + $0xa48] sm:$0xff]  ;;  %v9047_v50 = vld [vmem:[%s7989_s15 + $0xa50] sm:$0xff] }
  0xd5   : > { %12730 = vst [vmem:[#allocation294_spill] sm:$0xff] %v9041_v49  ;;  %12731 = vst [vmem:[#allocation295_spill] sm:$0xff] %v9044_v16  ;;  %v9050_v15 = vld [vmem:[%s7989_s15 + $0xa58] sm:$0xff]  ;;  %v9053_v51 = vld [vmem:[%s7989_s15 + $0xa60] sm:$0xff] }
  0xd6   : > { %12732 = vst [vmem:[#allocation296_spill] sm:$0xff] %v9047_v50  ;;  %12733 = vst [vmem:[#allocation297_spill] sm:$0xff] %v9050_v15  ;;  %v9056_v14 = vld [vmem:[%s7989_s15 + $0xa68] sm:$0xff]  ;;  %v9059_v52 = vld [vmem:[%s7989_s15 + $0xa70] sm:$0xff] }
  0xd7   : > { %12734 = vst [vmem:[#allocation298_spill] sm:$0xff] %v9053_v51  ;;  %12735 = vst [vmem:[#allocation299_spill] sm:$0xff] %v9056_v14  ;;  %v9062_v49 = vld [vmem:[%s7989_s15 + $0xa78] sm:$0xff]  ;;  %v9065_v16 = vld [vmem:[%s7989_s15 + $0xa80] sm:$0xff] }
  0xd8   : > { %12736 = vst [vmem:[#allocation300_spill] sm:$0xff] %v9059_v52  ;;  %12737 = vst [vmem:[#allocation301_spill] sm:$0xff] %v9062_v49  ;;  %v9068_v50 = vld [vmem:[%s7989_s15 + $0xa88] sm:$0xff]  ;;  %v9071_v15 = vld [vmem:[%s7989_s15 + $0xa90] sm:$0xff] }
  0xd9   : > { %12738 = vst [vmem:[#allocation302_spill] sm:$0xff] %v9065_v16  ;;  %12739 = vst [vmem:[#allocation303_spill] sm:$0xff] %v9068_v50  ;;  %v9074_v51 = vld [vmem:[%s7989_s15 + $0xa98] sm:$0xff]  ;;  %v9077_v14 = vld [vmem:[%s7989_s15 + $0xaa0] sm:$0xff] }
  0xda   : > { %12740 = vst [vmem:[#allocation304_spill] sm:$0xff] %v9071_v15  ;;  %12741 = vst [vmem:[#allocation305_spill] sm:$0xff] %v9074_v51  ;;  %v9080_v52 = vld [vmem:[%s7989_s15 + $0xaa8] sm:$0xff]  ;;  %v9083_v49 = vld [vmem:[%s7989_s15 + $0xab0] sm:$0xff] }
  0xdb   : > { %12742 = vst [vmem:[#allocation306_spill] sm:$0xff] %v9077_v14  ;;  %12743 = vst [vmem:[#allocation307_spill] sm:$0xff] %v9080_v52  ;;  %v9086_v16 = vld [vmem:[%s7989_s15 + $0xab8] sm:$0xff]  ;;  %v9089_v50 = vld [vmem:[%s7989_s15 + $0xac0] sm:$0xff] }
  0xdc   : > { %12744 = vst [vmem:[#allocation308_spill] sm:$0xff] %v9083_v49  ;;  %12745 = vst [vmem:[#allocation309_spill] sm:$0xff] %v9086_v16  ;;  %v9092_v15 = vld [vmem:[%s7989_s15 + $0xac8] sm:$0xff]  ;;  %v9095_v51 = vld [vmem:[%s7989_s15 + $0xad0] sm:$0xff] }
  0xdd   : > { %12746 = vst [vmem:[#allocation310_spill] sm:$0xff] %v9089_v50  ;;  %12747 = vst [vmem:[#allocation311_spill] sm:$0xff] %v9092_v15  ;;  %v9098_v14 = vld [vmem:[%s7989_s15 + $0xad8] sm:$0xff]  ;;  %v9101_v52 = vld [vmem:[%s7989_s15 + $0xae0] sm:$0xff] }
  0xde   : > { %12748 = vst [vmem:[#allocation312_spill] sm:$0xff] %v9095_v51  ;;  %12749 = vst [vmem:[#allocation313_spill] sm:$0xff] %v9098_v14  ;;  %v9104_v49 = vld [vmem:[%s7989_s15 + $0xae8] sm:$0xff]  ;;  %v9107_v16 = vld [vmem:[%s7989_s15 + $0xaf0] sm:$0xff] }
  0xdf   : > { %12750 = vst [vmem:[#allocation314_spill] sm:$0xff] %v9101_v52  ;;  %12751 = vst [vmem:[#allocation315_spill] sm:$0xff] %v9104_v49  ;;  %v9110_v50 = vld [vmem:[%s7989_s15 + $0xaf8] sm:$0xff]  ;;  %v9113_v15 = vld [vmem:[%s7989_s15 + $0xb00] sm:$0xff] }
  0xe0   : > { %12752 = vst [vmem:[#allocation316_spill] sm:$0xff] %v9107_v16  ;;  %12753 = vst [vmem:[#allocation317_spill] sm:$0xff] %v9110_v50  ;;  %v9116_v51 = vld [vmem:[%s7989_s15 + $0xb08] sm:$0xff]  ;;  %v9119_v14 = vld [vmem:[%s7989_s15 + $0xb10] sm:$0xff] }
  0xe1   : > { %12754 = vst [vmem:[#allocation318_spill] sm:$0xff] %v9113_v15  ;;  %12755 = vst [vmem:[#allocation319_spill] sm:$0xff] %v9116_v51  ;;  %v9122_v52 = vld [vmem:[%s7989_s15 + $0xb18] sm:$0xff]  ;;  %v9125_v49 = vld [vmem:[%s7989_s15 + $0xb20] sm:$0xff] }
  0xe2   : > { %12756 = vst [vmem:[#allocation320_spill] sm:$0xff] %v9119_v14  ;;  %12757 = vst [vmem:[#allocation321_spill] sm:$0xff] %v9122_v52  ;;  %v9128_v16 = vld [vmem:[%s7989_s15 + $0xb28] sm:$0xff]  ;;  %v9131_v50 = vld [vmem:[%s7989_s15 + $0xb30] sm:$0xff] }
  0xe3   : > { %12758 = vst [vmem:[#allocation322_spill] sm:$0xff] %v9125_v49  ;;  %12759 = vst [vmem:[#allocation323_spill] sm:$0xff] %v9128_v16  ;;  %v9134_v15 = vld [vmem:[%s7989_s15 + $0xb38] sm:$0xff]  ;;  %v9137_v51 = vld [vmem:[%s7989_s15 + $0xb40] sm:$0xff] }
  0xe4   : > { %12760 = vst [vmem:[#allocation324_spill] sm:$0xff] %v9131_v50  ;;  %12761 = vst [vmem:[#allocation325_spill] sm:$0xff] %v9134_v15  ;;  %v9140_v14 = vld [vmem:[%s7989_s15 + $0xb48] sm:$0xff]  ;;  %v9143_v52 = vld [vmem:[%s7989_s15 + $0xb50] sm:$0xff] }
  0xe5   : > { %12762 = vst [vmem:[#allocation326_spill] sm:$0xff] %v9137_v51  ;;  %12763 = vst [vmem:[#allocation327_spill] sm:$0xff] %v9140_v14  ;;  %v9146_v49 = vld [vmem:[%s7989_s15 + $0xb58] sm:$0xff]  ;;  %v9149_v16 = vld [vmem:[%s7989_s15 + $0xb60] sm:$0xff] }
  0xe6   : > { %12764 = vst [vmem:[#allocation328_spill] sm:$0xff] %v9143_v52  ;;  %12765 = vst [vmem:[#allocation329_spill] sm:$0xff] %v9146_v49  ;;  %v9152_v50 = vld [vmem:[%s7989_s15 + $0xb68] sm:$0xff]  ;;  %v9155_v15 = vld [vmem:[%s7989_s15 + $0xb70] sm:$0xff] }
  0xe7   : > { %12766 = vst [vmem:[#allocation330_spill] sm:$0xff] %v9149_v16  ;;  %12767 = vst [vmem:[#allocation331_spill] sm:$0xff] %v9152_v50  ;;  %v9158_v51 = vld [vmem:[%s7989_s15 + $0xb78] sm:$0xff]  ;;  %v9161_v14 = vld [vmem:[%s7989_s15 + $0xb80] sm:$0xff] }
  0xe8   : > { %12768 = vst [vmem:[#allocation332_spill] sm:$0xff] %v9155_v15  ;;  %12769 = vst [vmem:[#allocation333_spill] sm:$0xff] %v9158_v51  ;;  %v9164_v52 = vld [vmem:[%s7989_s15 + $0xb88] sm:$0xff]  ;;  %v9167_v49 = vld [vmem:[%s7989_s15 + $0xb90] sm:$0xff] }
  0xe9   : > { %12770 = vst [vmem:[#allocation334_spill] sm:$0xff] %v9161_v14  ;;  %12771 = vst [vmem:[#allocation335_spill] sm:$0xff] %v9164_v52  ;;  %v9170_v16 = vld [vmem:[%s7989_s15 + $0xb98] sm:$0xff]  ;;  %v9173_v50 = vld [vmem:[%s7989_s15 + $0xba0] sm:$0xff] }
  0xea   : > { %12772 = vst [vmem:[#allocation336_spill] sm:$0xff] %v9167_v49  ;;  %12773 = vst [vmem:[#allocation337_spill] sm:$0xff] %v9170_v16  ;;  %v9176_v15 = vld [vmem:[%s7989_s15 + $0xba8] sm:$0xff]  ;;  %v9179_v51 = vld [vmem:[%s7989_s15 + $0xbb0] sm:$0xff] }
  0xeb   : > { %12774 = vst [vmem:[#allocation338_spill] sm:$0xff] %v9173_v50  ;;  %12775 = vst [vmem:[#allocation339_spill] sm:$0xff] %v9176_v15  ;;  %v9182_v14 = vld [vmem:[%s7989_s15 + $0xbb8] sm:$0xff]  ;;  %v9185_v52 = vld [vmem:[%s7989_s15 + $0xbc0] sm:$0xff] }
  0xec   : > { %12776 = vst [vmem:[#allocation340_spill] sm:$0xff] %v9179_v51  ;;  %12777 = vst [vmem:[#allocation341_spill] sm:$0xff] %v9182_v14  ;;  %v9188_v49 = vld [vmem:[%s7989_s15 + $0xbc8] sm:$0xff]  ;;  %v9191_v16 = vld [vmem:[%s7989_s15 + $0xbd0] sm:$0xff] }
  0xed   : > { %12778 = vst [vmem:[#allocation342_spill] sm:$0xff] %v9185_v52  ;;  %12779 = vst [vmem:[#allocation343_spill] sm:$0xff] %v9188_v49  ;;  %v9194_v50 = vld [vmem:[%s7989_s15 + $0xbd8] sm:$0xff]  ;;  %v9197_v15 = vld [vmem:[%s7989_s15 + $0xbe0] sm:$0xff] }
  0xee   : > { %12780 = vst [vmem:[#allocation344_spill] sm:$0xff] %v9191_v16  ;;  %12781 = vst [vmem:[#allocation345_spill] sm:$0xff] %v9194_v50  ;;  %v9200_v51 = vld [vmem:[%s7989_s15 + $0xbe8] sm:$0xff]  ;;  %v9203_v14 = vld [vmem:[%s7989_s15 + $0xbf0] sm:$0xff] }
  0xef   : > { %12782 = vst [vmem:[#allocation346_spill] sm:$0xff] %v9197_v15  ;;  %12783 = vst [vmem:[#allocation347_spill] sm:$0xff] %v9200_v51  ;;  %v9206_v52 = vld [vmem:[%s7989_s15 + $0xbf8] sm:$0xff]  ;;  %v9209_v49 = vld [vmem:[%s7989_s15 + $0xc00] sm:$0xff] }
  0xf0   : > { %12784 = vst [vmem:[#allocation348_spill] sm:$0xff] %v9203_v14  ;;  %12785 = vst [vmem:[#allocation349_spill] sm:$0xff] %v9206_v52  ;;  %v9212_v16 = vld [vmem:[%s7989_s15 + $0xc08] sm:$0xff]  ;;  %v9215_v50 = vld [vmem:[%s7989_s15 + $0xc10] sm:$0xff] }
  0xf1   : > { %v9218_v15 = vld [vmem:[%s7989_s15 + $0xc18] sm:$0xff]  ;;  %v9221_v51 = vld [vmem:[%s7989_s15 + $0xc20] sm:$0xff]  ;;  %v9224_v14 = vld [vmem:[%s7989_s15 + $0xc28] sm:$0xff] }
  0xf2   : > { %12786 = vst [vmem:[#allocation350_spill] sm:$0xff] %v9224_v14  ;;  %v9227_v52 = vld [vmem:[%s7989_s15 + $0xc30] sm:$0xff]  ;;  %v9230_v13 = vld [vmem:[%s7989_s15 + $0xc38] sm:$0xff]  ;;  %v9233_v53 = vld [vmem:[%s7989_s15 + $0xc40] sm:$0xff] }
  0xf3   : > { %12787 = vst [vmem:[#allocation351_spill] sm:$0xff] %v9227_v52  ;;  %12788 = vst [vmem:[#allocation352_spill] sm:$0xff] %v9230_v13  ;;  %v9236_v12 = vld [vmem:[%s7989_s15 + $0xc48] sm:$0xff]  ;;  %v9239_v54 = vld [vmem:[%s7989_s15 + $0xc50] sm:$0xff] }
  0xf4   : > { %12789 = vst [vmem:[#allocation353_spill] sm:$0xff] %v9233_v53  ;;  %12790 = vst [vmem:[#allocation354_spill] sm:$0xff] %v9236_v12  ;;  %v9242_v11 = vld [vmem:[%s7989_s15 + $0xc58] sm:$0xff]  ;;  %v9245_v55 = vld [vmem:[%s7989_s15 + $0xc60] sm:$0xff] }
  0xf5   : > { %12791 = vst [vmem:[#allocation355_spill] sm:$0xff] %v9239_v54  ;;  %12792 = vst [vmem:[#allocation356_spill] sm:$0xff] %v9242_v11  ;;  %v9248_v10 = vld [vmem:[%s7989_s15 + $0xc68] sm:$0xff]  ;;  %v9251_v56 = vld [vmem:[%s7989_s15 + $0xc70] sm:$0xff] }
  0xf6   : > { %12793 = vst [vmem:[#allocation357_spill] sm:$0xff] %v9245_v55  ;;  %12794 = vst [vmem:[#allocation358_spill] sm:$0xff] %v9248_v10  ;;  %v9254_v53 = vld [vmem:[%s7989_s15 + $0xc78] sm:$0xff]  ;;  %v9257_v12 = vld [vmem:[%s7989_s15 + $0xc80] sm:$0xff] }
  0xf7   : > { %12795 = vst [vmem:[#allocation359_spill] sm:$0xff] %v9251_v56  ;;  %12796 = vst [vmem:[#allocation360_spill] sm:$0xff] %v9254_v53  ;;  %v9260_v54 = vld [vmem:[%s7989_s15 + $0xc88] sm:$0xff]  ;;  %v9263_v11 = vld [vmem:[%s7989_s15 + $0xc90] sm:$0xff] }
  0xf8   : > { %12797 = vst [vmem:[#allocation361_spill] sm:$0xff] %v9257_v12  ;;  %12798 = vst [vmem:[#allocation362_spill] sm:$0xff] %v9260_v54  ;;  %v9266_v55 = vld [vmem:[%s7989_s15 + $0xc98] sm:$0xff]  ;;  %v9269_v10 = vld [vmem:[%s7989_s15 + $0xca0] sm:$0xff] }
  0xf9   : > { %12799 = vst [vmem:[#allocation363_spill] sm:$0xff] %v9263_v11  ;;  %12800 = vst [vmem:[#allocation364_spill] sm:$0xff] %v9266_v55  ;;  %v9272_v56 = vld [vmem:[%s7989_s15 + $0xca8] sm:$0xff]  ;;  %v9275_v53 = vld [vmem:[%s7989_s15 + $0xcb0] sm:$0xff] }
  0xfa   : > { %12801 = vst [vmem:[#allocation365_spill] sm:$0xff] %v9269_v10  ;;  %12802 = vst [vmem:[#allocation366_spill] sm:$0xff] %v9272_v56  ;;  %v9278_v12 = vld [vmem:[%s7989_s15 + $0xcb8] sm:$0xff]  ;;  %v9281_v54 = vld [vmem:[%s7989_s15 + $0xcc0] sm:$0xff] }
  0xfb   : > { %12803 = vst [vmem:[#allocation367_spill] sm:$0xff] %v9275_v53  ;;  %12804 = vst [vmem:[#allocation368_spill] sm:$0xff] %v9278_v12  ;;  %v9284_v11 = vld [vmem:[%s7989_s15 + $0xcc8] sm:$0xff]  ;;  %v9287_v55 = vld [vmem:[%s7989_s15 + $0xcd0] sm:$0xff] }
  0xfc   : > { %12805 = vst [vmem:[#allocation369_spill] sm:$0xff] %v9281_v54  ;;  %12806 = vst [vmem:[#allocation370_spill] sm:$0xff] %v9284_v11  ;;  %v9290_v10 = vld [vmem:[%s7989_s15 + $0xcd8] sm:$0xff]  ;;  %v9293_v56 = vld [vmem:[%s7989_s15 + $0xce0] sm:$0xff] }
  0xfd   : > { %12807 = vst [vmem:[#allocation371_spill] sm:$0xff] %v9287_v55  ;;  %12808 = vst [vmem:[#allocation372_spill] sm:$0xff] %v9290_v10  ;;  %v9296_v53 = vld [vmem:[%s7989_s15 + $0xce8] sm:$0xff]  ;;  %v9299_v12 = vld [vmem:[%s7989_s15 + $0xcf0] sm:$0xff] }
  0xfe   : > { %12809 = vst [vmem:[#allocation373_spill] sm:$0xff] %v9293_v56  ;;  %12810 = vst [vmem:[#allocation374_spill] sm:$0xff] %v9296_v53  ;;  %v9302_v54 = vld [vmem:[%s7989_s15 + $0xcf8] sm:$0xff]  ;;  %v9305_v11 = vld [vmem:[%s7989_s15 + $0xd00] sm:$0xff] }
  0xff   : > { %12811 = vst [vmem:[#allocation375_spill] sm:$0xff] %v9299_v12  ;;  %12812 = vst [vmem:[#allocation376_spill] sm:$0xff] %v9302_v54  ;;  %v9308_v55 = vld [vmem:[%s7989_s15 + $0xd08] sm:$0xff]  ;;  %v9311_v10 = vld [vmem:[%s7989_s15 + $0xd10] sm:$0xff] }
 0x100   : > { %12813 = vst [vmem:[#allocation377_spill] sm:$0xff] %v9305_v11  ;;  %12814 = vst [vmem:[#allocation378_spill] sm:$0xff] %v9308_v55  ;;  %v9314_v56 = vld [vmem:[%s7989_s15 + $0xd18] sm:$0xff]  ;;  %v9317_v53 = vld [vmem:[%s7989_s15 + $0xd20] sm:$0xff] }
 0x101   : > { %12815 = vst [vmem:[#allocation379_spill] sm:$0xff] %v9311_v10  ;;  %12816 = vst [vmem:[#allocation380_spill] sm:$0xff] %v9314_v56  ;;  %v9320_v12 = vld [vmem:[%s7989_s15 + $0xd28] sm:$0xff]  ;;  %v9323_v54 = vld [vmem:[%s7989_s15 + $0xd30] sm:$0xff] }
 0x102   : > { %12817 = vst [vmem:[#allocation381_spill] sm:$0xff] %v9317_v53  ;;  %12818 = vst [vmem:[#allocation382_spill] sm:$0xff] %v9320_v12  ;;  %v9326_v11 = vld [vmem:[%s7989_s15 + $0xd38] sm:$0xff]  ;;  %v9329_v55 = vld [vmem:[%s7989_s15 + $0xd40] sm:$0xff] }
 0x103   : > { %12819 = vst [vmem:[#allocation383_spill] sm:$0xff] %v9323_v54  ;;  %12820 = vst [vmem:[#allocation384_spill] sm:$0xff] %v9326_v11  ;;  %v9332_v10 = vld [vmem:[%s7989_s15 + $0xd48] sm:$0xff]  ;;  %v9335_v56 = vld [vmem:[%s7989_s15 + $0xd50] sm:$0xff] }
 0x104   : > { %12821 = vst [vmem:[#allocation385_spill] sm:$0xff] %v9329_v55  ;;  %12822 = vst [vmem:[#allocation386_spill] sm:$0xff] %v9332_v10  ;;  %v9338_v53 = vld [vmem:[%s7989_s15 + $0xd58] sm:$0xff]  ;;  %v9341_v12 = vld [vmem:[%s7989_s15 + $0xd60] sm:$0xff] }
 0x105   : > { %12823 = vst [vmem:[#allocation387_spill] sm:$0xff] %v9335_v56  ;;  %12824 = vst [vmem:[#allocation388_spill] sm:$0xff] %v9338_v53  ;;  %v9344_v54 = vld [vmem:[%s7989_s15 + $0xd68] sm:$0xff]  ;;  %v9347_v11 = vld [vmem:[%s7989_s15 + $0xd70] sm:$0xff] }
 0x106   : > { %12825 = vst [vmem:[#allocation389_spill] sm:$0xff] %v9341_v12  ;;  %12826 = vst [vmem:[#allocation390_spill] sm:$0xff] %v9344_v54  ;;  %v9350_v55 = vld [vmem:[%s7989_s15 + $0xd78] sm:$0xff]  ;;  %v9353_v10 = vld [vmem:[%s7989_s15 + $0xd80] sm:$0xff] }
 0x107   : > { %12827 = vst [vmem:[#allocation391_spill] sm:$0xff] %v9347_v11  ;;  %12828 = vst [vmem:[#allocation392_spill] sm:$0xff] %v9350_v55  ;;  %v9356_v56 = vld [vmem:[%s7989_s15 + $0xd88] sm:$0xff]  ;;  %v9359_v53 = vld [vmem:[%s7989_s15 + $0xd90] sm:$0xff] }
 0x108   : > { %12829 = vst [vmem:[#allocation393_spill] sm:$0xff] %v9353_v10  ;;  %12830 = vst [vmem:[#allocation394_spill] sm:$0xff] %v9356_v56  ;;  %v9362_v12 = vld [vmem:[%s7989_s15 + $0xd98] sm:$0xff]  ;;  %v9365_v54 = vld [vmem:[%s7989_s15 + $0xda0] sm:$0xff] }
 0x109   : > { %12831 = vst [vmem:[#allocation395_spill] sm:$0xff] %v9359_v53  ;;  %12832 = vst [vmem:[#allocation396_spill] sm:$0xff] %v9362_v12  ;;  %v9368_v11 = vld [vmem:[%s7989_s15 + $0xda8] sm:$0xff]  ;;  %v9371_v55 = vld [vmem:[%s7989_s15 + $0xdb0] sm:$0xff] }
 0x10a   : > { %12833 = vst [vmem:[#allocation397_spill] sm:$0xff] %v9365_v54  ;;  %12834 = vst [vmem:[#allocation398_spill] sm:$0xff] %v9368_v11  ;;  %v9374_v10 = vld [vmem:[%s7989_s15 + $0xdb8] sm:$0xff]  ;;  %v9377_v56 = vld [vmem:[%s7989_s15 + $0xdc0] sm:$0xff] }
 0x10b   : > { %12835 = vst [vmem:[#allocation399_spill] sm:$0xff] %v9371_v55  ;;  %12836 = vst [vmem:[#allocation400_spill] sm:$0xff] %v9374_v10  ;;  %v9380_v53 = vld [vmem:[%s7989_s15 + $0xdc8] sm:$0xff]  ;;  %v9383_v12 = vld [vmem:[%s7989_s15 + $0xdd0] sm:$0xff] }
 0x10c   : > { %12837 = vst [vmem:[#allocation401_spill] sm:$0xff] %v9377_v56  ;;  %12838 = vst [vmem:[#allocation402_spill] sm:$0xff] %v9380_v53  ;;  %v9386_v54 = vld [vmem:[%s7989_s15 + $0xdd8] sm:$0xff]  ;;  %v9389_v11 = vld [vmem:[%s7989_s15 + $0xde0] sm:$0xff] }
 0x10d   : > { %12839 = vst [vmem:[#allocation403_spill] sm:$0xff] %v9383_v12  ;;  %12840 = vst [vmem:[#allocation404_spill] sm:$0xff] %v9386_v54  ;;  %v9392_v55 = vld [vmem:[%s7989_s15 + $0xde8] sm:$0xff]  ;;  %v9395_v10 = vld [vmem:[%s7989_s15 + $0xdf0] sm:$0xff] }
 0x10e   : > { %12841 = vst [vmem:[#allocation405_spill] sm:$0xff] %v9389_v11  ;;  %12842 = vst [vmem:[#allocation406_spill] sm:$0xff] %v9392_v55  ;;  %v9398_v56 = vld [vmem:[%s7989_s15 + $0xdf8] sm:$0xff]  ;;  %v9401_v53 = vld [vmem:[%s7989_s15 + $0xe00] sm:$0xff] }
 0x10f   : > { %12843 = vst [vmem:[#allocation407_spill] sm:$0xff] %v9395_v10  ;;  %12844 = vst [vmem:[#allocation408_spill] sm:$0xff] %v9398_v56  ;;  %v9404_v12 = vld [vmem:[%s7989_s15 + $0xe08] sm:$0xff]  ;;  %v9407_v54 = vld [vmem:[%s7989_s15 + $0xe10] sm:$0xff] }
 0x110   : > { %12845 = vst [vmem:[#allocation409_spill] sm:$0xff] %v9401_v53  ;;  %12846 = vst [vmem:[#allocation410_spill] sm:$0xff] %v9404_v12  ;;  %v9410_v11 = vld [vmem:[%s7989_s15 + $0xe18] sm:$0xff]  ;;  %v9413_v55 = vld [vmem:[%s7989_s15 + $0xe20] sm:$0xff] }
 0x111   : > { %12847 = vst [vmem:[#allocation411_spill] sm:$0xff] %v9407_v54  ;;  %12848 = vst [vmem:[#allocation412_spill] sm:$0xff] %v9410_v11  ;;  %v9416_v10 = vld [vmem:[%s7989_s15 + $0xe28] sm:$0xff]  ;;  %v9419_v56 = vld [vmem:[%s7989_s15 + $0xe30] sm:$0xff] }
 0x112   : > { %12849 = vst [vmem:[#allocation413_spill] sm:$0xff] %v9413_v55  ;;  %12850 = vst [vmem:[#allocation414_spill] sm:$0xff] %v9416_v10  ;;  %v9422_v9 = vld [vmem:[%s7989_s15 + $0xe38] sm:$0xff]  ;;  %v9425_v12 = vld [vmem:[%s7989_s15 + $0xe40] sm:$0xff] }
 0x113   : > { %12851 = vst [vmem:[#allocation415_spill] sm:$0xff] %v9419_v56  ;;  %12852 = vst [vmem:[#allocation416_spill] sm:$0xff] %v9422_v9  ;;  %v9428_v54 = vld [vmem:[%s7989_s15 + $0xe48] sm:$0xff]  ;;  %v9431_v11 = vld [vmem:[%s7989_s15 + $0xe50] sm:$0xff] }
 0x114   : > { %12853 = vst [vmem:[#allocation417_spill] sm:$0xff] %v9425_v12  ;;  %12854 = vst [vmem:[#allocation418_spill] sm:$0xff] %v9428_v54  ;;  %v9434_v55 = vld [vmem:[%s7989_s15 + $0xe58] sm:$0xff]  ;;  %v9437_v10 = vld [vmem:[%s7989_s15 + $0xe60] sm:$0xff] }
 0x115   : > { %12855 = vst [vmem:[#allocation419_spill] sm:$0xff] %v9431_v11  ;;  %12856 = vst [vmem:[#allocation420_spill] sm:$0xff] %v9434_v55  ;;  %v9440_v56 = vld [vmem:[%s7989_s15 + $0xe68] sm:$0xff]  ;;  %v9443_v9 = vld [vmem:[%s7989_s15 + $0xe70] sm:$0xff] }
 0x116   : > { %12857 = vst [vmem:[#allocation421_spill] sm:$0xff] %v9437_v10  ;;  %12858 = vst [vmem:[#allocation422_spill] sm:$0xff] %v9440_v56  ;;  %v9446_v12 = vld [vmem:[%s7989_s15 + $0xe78] sm:$0xff]  ;;  %v9449_v54 = vld [vmem:[%s7989_s15 + $0xe80] sm:$0xff] }
 0x117   : > { %12859 = vst [vmem:[#allocation423_spill] sm:$0xff] %v9443_v9  ;;  %12860 = vst [vmem:[#allocation424_spill] sm:$0xff] %v9446_v12  ;;  %v9452_v11 = vld [vmem:[%s7989_s15 + $0xe88] sm:$0xff]  ;;  %v9455_v55 = vld [vmem:[%s7989_s15 + $0xe90] sm:$0xff] }
 0x118   : > { %12861 = vst [vmem:[#allocation425_spill] sm:$0xff] %v9449_v54  ;;  %12862 = vst [vmem:[#allocation426_spill] sm:$0xff] %v9452_v11  ;;  %v9458_v10 = vld [vmem:[%s7989_s15 + $0xe98] sm:$0xff]  ;;  %v9461_v56 = vld [vmem:[%s7989_s15 + $0xea0] sm:$0xff] }
 0x119   : > { %12863 = vst [vmem:[#allocation427_spill] sm:$0xff] %v9455_v55  ;;  %12864 = vst [vmem:[#allocation428_spill] sm:$0xff] %v9458_v10  ;;  %v9464_v9 = vld [vmem:[%s7989_s15 + $0xea8] sm:$0xff]  ;;  %v9467_v12 = vld [vmem:[%s7989_s15 + $0xeb0] sm:$0xff] }
 0x11a   : > { %12865 = vst [vmem:[#allocation429_spill] sm:$0xff] %v9461_v56  ;;  %12866 = vst [vmem:[#allocation430_spill] sm:$0xff] %v9464_v9  ;;  %v9470_v54 = vld [vmem:[%s7989_s15 + $0xeb8] sm:$0xff]  ;;  %v9473_v11 = vld [vmem:[%s7989_s15 + $0xec0] sm:$0xff] }
 0x11b   : > { %12867 = vst [vmem:[#allocation431_spill] sm:$0xff] %v9467_v12  ;;  %12868 = vst [vmem:[#allocation432_spill] sm:$0xff] %v9470_v54  ;;  %v9476_v55 = vld [vmem:[%s7989_s15 + $0xec8] sm:$0xff]  ;;  %v9479_v10 = vld [vmem:[%s7989_s15 + $0xed0] sm:$0xff] }
 0x11c   : > { %12869 = vst [vmem:[#allocation433_spill] sm:$0xff] %v9473_v11  ;;  %12870 = vst [vmem:[#allocation434_spill] sm:$0xff] %v9476_v55  ;;  %v9482_v56 = vld [vmem:[%s7989_s15 + $0xed8] sm:$0xff]  ;;  %v9485_v9 = vld [vmem:[%s7989_s15 + $0xee0] sm:$0xff] }
 0x11d   : > { %12871 = vst [vmem:[#allocation435_spill] sm:$0xff] %v9479_v10  ;;  %12872 = vst [vmem:[#allocation436_spill] sm:$0xff] %v9482_v56  ;;  %v9488_v12 = vld [vmem:[%s7989_s15 + $0xee8] sm:$0xff]  ;;  %v9491_v54 = vld [vmem:[%s7989_s15 + $0xef0] sm:$0xff] }
 0x11e   : > { %12873 = vst [vmem:[#allocation437_spill] sm:$0xff] %v9485_v9  ;;  %12874 = vst [vmem:[#allocation438_spill] sm:$0xff] %v9488_v12  ;;  %v9494_v11 = vld [vmem:[%s7989_s15 + $0xef8] sm:$0xff]  ;;  %v9497_v55 = vld [vmem:[%s7989_s15 + $0xf00] sm:$0xff] }
 0x11f   : > { %12875 = vst [vmem:[#allocation439_spill] sm:$0xff] %v9491_v54  ;;  %12876 = vst [vmem:[#allocation440_spill] sm:$0xff] %v9494_v11  ;;  %v9500_v10 = vld [vmem:[%s7989_s15 + $0xf08] sm:$0xff]  ;;  %v9503_v56 = vld [vmem:[%s7989_s15 + $0xf10] sm:$0xff] }
 0x120   : > { %12877 = vst [vmem:[#allocation441_spill] sm:$0xff] %v9497_v55  ;;  %12878 = vst [vmem:[#allocation442_spill] sm:$0xff] %v9500_v10  ;;  %v9506_v9 = vld [vmem:[%s7989_s15 + $0xf18] sm:$0xff]  ;;  %v9509_v12 = vld [vmem:[%s7989_s15 + $0xf20] sm:$0xff] }
 0x121   : > { %12879 = vst [vmem:[#allocation443_spill] sm:$0xff] %v9503_v56  ;;  %12880 = vst [vmem:[#allocation444_spill] sm:$0xff] %v9506_v9  ;;  %v9512_v54 = vld [vmem:[%s7989_s15 + $0xf28] sm:$0xff]  ;;  %v9515_v11 = vld [vmem:[%s7989_s15 + $0xf30] sm:$0xff] }
 0x122   : > { %12881 = vst [vmem:[#allocation445_spill] sm:$0xff] %v9509_v12  ;;  %12882 = vst [vmem:[#allocation446_spill] sm:$0xff] %v9512_v54  ;;  %v9518_v55 = vld [vmem:[%s7989_s15 + $0xf38] sm:$0xff]  ;;  %v9521_v10 = vld [vmem:[%s7989_s15 + $0xf40] sm:$0xff] }
 0x123   : > { %12883 = vst [vmem:[#allocation447_spill] sm:$0xff] %v9515_v11  ;;  %12884 = vst [vmem:[#allocation448_spill] sm:$0xff] %v9518_v55  ;;  %v9524_v56 = vld [vmem:[%s7989_s15 + $0xf48] sm:$0xff]  ;;  %v9527_v9 = vld [vmem:[%s7989_s15 + $0xf50] sm:$0xff] }
 0x124   : > { %12885 = vst [vmem:[#allocation449_spill] sm:$0xff] %v9521_v10  ;;  %12886 = vst [vmem:[#allocation450_spill] sm:$0xff] %v9524_v56  ;;  %v9530_v12 = vld [vmem:[%s7989_s15 + $0xf58] sm:$0xff]  ;;  %v9533_v54 = vld [vmem:[%s7989_s15 + $0xf60] sm:$0xff] }
 0x125   : > { %12887 = vst [vmem:[#allocation451_spill] sm:$0xff] %v9527_v9  ;;  %12888 = vst [vmem:[#allocation452_spill] sm:$0xff] %v9530_v12  ;;  %v9536_v11 = vld [vmem:[%s7989_s15 + $0xf68] sm:$0xff]  ;;  %v9539_v55 = vld [vmem:[%s7989_s15 + $0xf70] sm:$0xff] }
 0x126   : > { %12889 = vst [vmem:[#allocation453_spill] sm:$0xff] %v9533_v54  ;;  %12890 = vst [vmem:[#allocation454_spill] sm:$0xff] %v9536_v11  ;;  %v9542_v10 = vld [vmem:[%s7989_s15 + $0xf78] sm:$0xff]  ;;  %v9545_v56 = vld [vmem:[%s7989_s15 + $0xf80] sm:$0xff] }
 0x127   : > { %12891 = vst [vmem:[#allocation455_spill] sm:$0xff] %v9539_v55  ;;  %12892 = vst [vmem:[#allocation456_spill] sm:$0xff] %v9542_v10  ;;  %v9548_v9 = vld [vmem:[%s7989_s15 + $0xf88] sm:$0xff]  ;;  %v9551_v12 = vld [vmem:[%s7989_s15 + $0xf90] sm:$0xff] }
 0x128   : > { %12893 = vst [vmem:[#allocation457_spill] sm:$0xff] %v9545_v56  ;;  %12894 = vst [vmem:[#allocation458_spill] sm:$0xff] %v9548_v9  ;;  %v9554_v54 = vld [vmem:[%s7989_s15 + $0xf98] sm:$0xff]  ;;  %v9557_v11 = vld [vmem:[%s7989_s15 + $0xfa0] sm:$0xff] }
 0x129   : > { %12895 = vst [vmem:[#allocation459_spill] sm:$0xff] %v9551_v12  ;;  %12896 = vst [vmem:[#allocation460_spill] sm:$0xff] %v9554_v54  ;;  %v9560_v55 = vld [vmem:[%s7989_s15 + $0xfa8] sm:$0xff]  ;;  %v9563_v10 = vld [vmem:[%s7989_s15 + $0xfb0] sm:$0xff] }
 0x12a   : > { %12897 = vst [vmem:[#allocation461_spill] sm:$0xff] %v9557_v11  ;;  %12898 = vst [vmem:[#allocation462_spill] sm:$0xff] %v9560_v55  ;;  %v9566_v56 = vld [vmem:[%s7989_s15 + $0xfb8] sm:$0xff]  ;;  %v9569_v9 = vld [vmem:[%s7989_s15 + $0xfc0] sm:$0xff] }
 0x12b   : > { %12899 = vst [vmem:[#allocation463_spill] sm:$0xff] %v9563_v10  ;;  %12900 = vst [vmem:[#allocation464_spill] sm:$0xff] %v9566_v56  ;;  %v9572_v12 = vld [vmem:[%s7989_s15 + $0xfc8] sm:$0xff]  ;;  %v9575_v54 = vld [vmem:[%s7989_s15 + $0xfd0] sm:$0xff] }
 0x12c   : > { %12901 = vst [vmem:[#allocation465_spill] sm:$0xff] %v9569_v9  ;;  %12902 = vst [vmem:[#allocation466_spill] sm:$0xff] %v9572_v12  ;;  %v9578_v11 = vld [vmem:[%s7989_s15 + $0xfd8] sm:$0xff]  ;;  %v9581_v55 = vld [vmem:[%s7989_s15 + $0xfe0] sm:$0xff] }
 0x12d   : > { %12903 = vst [vmem:[#allocation467_spill] sm:$0xff] %v9575_v54  ;;  %12904 = vst [vmem:[#allocation468_spill] sm:$0xff] %v9578_v11  ;;  %v9584_v10 = vld [vmem:[%s7989_s15 + $0xfe8] sm:$0xff]  ;;  %v9587_v56 = vld [vmem:[%s7989_s15 + $0xff0] sm:$0xff] }
 0x12e   : > { %12905 = vst [vmem:[#allocation469_spill] sm:$0xff] %v9581_v55  ;;  %12906 = vst [vmem:[#allocation470_spill] sm:$0xff] %v9584_v10  ;;  %v9590_v9 = vld [vmem:[%s7989_s15 + $0xff8] sm:$0xff]  ;;  %v9593_v12 = vld [vmem:[%s7989_s15 + $0x1000] sm:$0xff] }
 0x12f   : > { %12907 = vst [vmem:[#allocation471_spill] sm:$0xff] %v9587_v56  ;;  %12908 = vst [vmem:[#allocation472_spill] sm:$0xff] %v9590_v9  ;;  %v9596_v54 = vld [vmem:[%s7989_s15 + $0x1008] sm:$0xff]  ;;  %v9599_v11 = vld [vmem:[%s7989_s15 + $0x1010] sm:$0xff] }
 0x130   : > { %12909 = vst [vmem:[#allocation473_spill] sm:$0xff] %v9593_v12  ;;  %12910 = vst [vmem:[#allocation474_spill] sm:$0xff] %v9596_v54  ;;  %v9602_v55 = vld [vmem:[%s7989_s15 + $0x1018] sm:$0xff]  ;;  %v9605_v10 = vld [vmem:[%s7989_s15 + $0x1020] sm:$0xff] }
 0x131   : > { %12911 = vst [vmem:[#allocation475_spill] sm:$0xff] %v9599_v11  ;;  %12912 = vst [vmem:[#allocation476_spill] sm:$0xff] %v9602_v55  ;;  %v9608_v56 = vld [vmem:[%s7989_s15 + $0x1028] sm:$0xff]  ;;  %v9611_v9 = vld [vmem:[%s7989_s15 + $0x1030] sm:$0xff] }
 0x132   : > { %12913 = vst [vmem:[#allocation477_spill] sm:$0xff] %v9605_v10  ;;  %12914 = vst [vmem:[#allocation478_spill] sm:$0xff] %v9608_v56  ;;  %v9614_v12 = vld [vmem:[%s7989_s15 + $0x1038] sm:$0xff]  ;;  %v9617_v54 = vld [vmem:[%s7989_s15 + $0x1040] sm:$0xff] }
 0x133   : > { %12915 = vst [vmem:[#allocation479_spill] sm:$0xff] %v9611_v9  ;;  %12916 = vst [vmem:[#allocation480_spill] sm:$0xff] %v9614_v12  ;;  %v9620_v11 = vld [vmem:[%s7989_s15 + $0x1048] sm:$0xff]  ;;  %v9623_v55 = vld [vmem:[%s7989_s15 + $0x1050] sm:$0xff] }
 0x134   : > { %12917 = vst [vmem:[#allocation481_spill] sm:$0xff] %v9617_v54  ;;  %12918 = vst [vmem:[#allocation482_spill] sm:$0xff] %v9620_v11  ;;  %v9626_v10 = vld [vmem:[%s7989_s15 + $0x1058] sm:$0xff]  ;;  %v9629_v56 = vld [vmem:[%s7989_s15 + $0x1060] sm:$0xff] }
 0x135   : > { %12919 = vst [vmem:[#allocation483_spill] sm:$0xff] %v9623_v55  ;;  %12920 = vst [vmem:[#allocation484_spill] sm:$0xff] %v9626_v10  ;;  %v9632_v9 = vld [vmem:[%s7989_s15 + $0x1068] sm:$0xff]  ;;  %v9635_v12 = vld [vmem:[%s7989_s15 + $0x1070] sm:$0xff] }
 0x136   : > { %12921 = vst [vmem:[#allocation485_spill] sm:$0xff] %v9629_v56  ;;  %12922 = vst [vmem:[#allocation486_spill] sm:$0xff] %v9632_v9  ;;  %v9638_v54 = vld [vmem:[%s7989_s15 + $0x1078] sm:$0xff]  ;;  %v9641_v11 = vld [vmem:[%s7989_s15 + $0x1080] sm:$0xff] }
 0x137   : > { %12923 = vst [vmem:[#allocation487_spill] sm:$0xff] %v9635_v12  ;;  %12924 = vst [vmem:[#allocation488_spill] sm:$0xff] %v9638_v54  ;;  %v9644_v55 = vld [vmem:[%s7989_s15 + $0x1088] sm:$0xff]  ;;  %v9647_v10 = vld [vmem:[%s7989_s15 + $0x1090] sm:$0xff] }
 0x138   : > { %12925 = vst [vmem:[#allocation489_spill] sm:$0xff] %v9641_v11  ;;  %12926 = vst [vmem:[#allocation490_spill] sm:$0xff] %v9644_v55  ;;  %v9650_v56 = vld [vmem:[%s7989_s15 + $0x1098] sm:$0xff]  ;;  %v9653_v9 = vld [vmem:[%s7989_s15 + $0x10a0] sm:$0xff] }
 0x139   : > { %12927 = vst [vmem:[#allocation491_spill] sm:$0xff] %v9647_v10  ;;  %12928 = vst [vmem:[#allocation492_spill] sm:$0xff] %v9650_v56  ;;  %v9656_v12 = vld [vmem:[%s7989_s15 + $0x10a8] sm:$0xff]  ;;  %v9659_v54 = vld [vmem:[%s7989_s15 + $0x10b0] sm:$0xff] }
 0x13a   : > { %12929 = vst [vmem:[#allocation493_spill] sm:$0xff] %v9653_v9  ;;  %12930 = vst [vmem:[#allocation494_spill] sm:$0xff] %v9656_v12  ;;  %v9662_v11 = vld [vmem:[%s7989_s15 + $0x10b8] sm:$0xff]  ;;  %v9665_v55 = vld [vmem:[%s7989_s15 + $0x10c0] sm:$0xff] }
 0x13b   : > { %12931 = vst [vmem:[#allocation495_spill] sm:$0xff] %v9659_v54  ;;  %12932 = vst [vmem:[#allocation496_spill] sm:$0xff] %v9662_v11  ;;  %v9668_v10 = vld [vmem:[%s7989_s15 + $0x10c8] sm:$0xff]  ;;  %v9671_v56 = vld [vmem:[%s7989_s15 + $0x10d0] sm:$0xff] }
 0x13c   : > { %12933 = vst [vmem:[#allocation497_spill] sm:$0xff] %v9665_v55  ;;  %12934 = vst [vmem:[#allocation498_spill] sm:$0xff] %v9668_v10  ;;  %v9674_v9 = vld [vmem:[%s7989_s15 + $0x10d8] sm:$0xff]  ;;  %v9677_v12 = vld [vmem:[%s7989_s15 + $0x10e0] sm:$0xff] }
 0x13d   : > { %12935 = vst [vmem:[#allocation499_spill] sm:$0xff] %v9671_v56  ;;  %12936 = vst [vmem:[#allocation500_spill] sm:$0xff] %v9674_v9  ;;  %v9680_v54 = vld [vmem:[%s7989_s15 + $0x10e8] sm:$0xff]  ;;  %v9683_v11 = vld [vmem:[%s7989_s15 + $0x10f0] sm:$0xff] }
 0x13e   : > { %12937 = vst [vmem:[#allocation501_spill] sm:$0xff] %v9677_v12  ;;  %12938 = vst [vmem:[#allocation502_spill] sm:$0xff] %v9680_v54  ;;  %v9686_v55 = vld [vmem:[%s7989_s15 + $0x10f8] sm:$0xff]  ;;  %v9689_v10 = vld [vmem:[%s7989_s15 + $0x1100] sm:$0xff] }
 0x13f   : > { %12939 = vst [vmem:[#allocation503_spill] sm:$0xff] %v9683_v11  ;;  %12940 = vst [vmem:[#allocation504_spill] sm:$0xff] %v9686_v55  ;;  %v9692_v56 = vld [vmem:[%s7989_s15 + $0x1108] sm:$0xff]  ;;  %v9695_v9 = vld [vmem:[%s7989_s15 + $0x1110] sm:$0xff] }
 0x140   : > { %12941 = vst [vmem:[#allocation505_spill] sm:$0xff] %v9689_v10  ;;  %12942 = vst [vmem:[#allocation506_spill] sm:$0xff] %v9692_v56  ;;  %v9698_v12 = vld [vmem:[%s7989_s15 + $0x1118] sm:$0xff]  ;;  %v9701_v54 = vld [vmem:[%s7989_s15 + $0x1120] sm:$0xff] }
 0x141   : > { %12943 = vst [vmem:[#allocation507_spill] sm:$0xff] %v9695_v9  ;;  %12944 = vst [vmem:[#allocation508_spill] sm:$0xff] %v9698_v12  ;;  %v9704_v11 = vld [vmem:[%s7989_s15 + $0x1128] sm:$0xff]  ;;  %v9707_v55 = vld [vmem:[%s7989_s15 + $0x1130] sm:$0xff] }
 0x142   : > { %12945 = vst [vmem:[#allocation509_spill] sm:$0xff] %v9701_v54  ;;  %12946 = vst [vmem:[#allocation510_spill] sm:$0xff] %v9704_v11  ;;  %v9710_v10 = vld [vmem:[%s7989_s15 + $0x1138] sm:$0xff]  ;;  %v9713_v56 = vld [vmem:[%s7989_s15 + $0x1140] sm:$0xff] }
 0x143   : > { %12947 = vst [vmem:[#allocation511_spill] sm:$0xff] %v9707_v55  ;;  %12948 = vst [vmem:[#allocation512_spill] sm:$0xff] %v9710_v10  ;;  %v9716_v9 = vld [vmem:[%s7989_s15 + $0x1148] sm:$0xff]  ;;  %v9719_v12 = vld [vmem:[%s7989_s15 + $0x1150] sm:$0xff] }
 0x144   : > { %12949 = vst [vmem:[#allocation513_spill] sm:$0xff] %v9713_v56  ;;  %12950 = vst [vmem:[#allocation514_spill] sm:$0xff] %v9716_v9  ;;  %v9722_v54 = vld [vmem:[%s7989_s15 + $0x1158] sm:$0xff]  ;;  %v9725_v11 = vld [vmem:[%s7989_s15 + $0x1160] sm:$0xff] }
 0x145   : > { %12951 = vst [vmem:[#allocation515_spill] sm:$0xff] %v9719_v12  ;;  %12952 = vst [vmem:[#allocation516_spill] sm:$0xff] %v9722_v54  ;;  %v9728_v55 = vld [vmem:[%s7989_s15 + $0x1168] sm:$0xff]  ;;  %v9731_v10 = vld [vmem:[%s7989_s15 + $0x1170] sm:$0xff] }
 0x146   : > { %12953 = vst [vmem:[#allocation517_spill] sm:$0xff] %v9725_v11  ;;  %12954 = vst [vmem:[#allocation518_spill] sm:$0xff] %v9728_v55  ;;  %v9734_v56 = vld [vmem:[%s7989_s15 + $0x1178] sm:$0xff]  ;;  %v9737_v9 = vld [vmem:[%s7989_s15 + $0x1180] sm:$0xff] }
 0x147   : > { %12955 = vst [vmem:[#allocation519_spill] sm:$0xff] %v9731_v10  ;;  %12956 = vst [vmem:[#allocation520_spill] sm:$0xff] %v9734_v56  ;;  %v9740_v12 = vld [vmem:[%s7989_s15 + $0x1188] sm:$0xff]  ;;  %v9743_v54 = vld [vmem:[%s7989_s15 + $0x1190] sm:$0xff] }
 0x148   : > { %12957 = vst [vmem:[#allocation521_spill] sm:$0xff] %v9737_v9  ;;  %12958 = vst [vmem:[#allocation522_spill] sm:$0xff] %v9740_v12  ;;  %v9746_v11 = vld [vmem:[%s7989_s15 + $0x1198] sm:$0xff]  ;;  %v9749_v55 = vld [vmem:[%s7989_s15 + $0x11a0] sm:$0xff] }
 0x149   : > { %12959 = vst [vmem:[#allocation523_spill] sm:$0xff] %v9743_v54  ;;  %12960 = vst [vmem:[#allocation524_spill] sm:$0xff] %v9746_v11  ;;  %v9752_v10 = vld [vmem:[%s7989_s15 + $0x11a8] sm:$0xff]  ;;  %v9755_v56 = vld [vmem:[%s7989_s15 + $0x11b0] sm:$0xff] }
 0x14a   : > { %12961 = vst [vmem:[#allocation525_spill] sm:$0xff] %v9749_v55  ;;  %12962 = vst [vmem:[#allocation526_spill] sm:$0xff] %v9752_v10  ;;  %v9758_v9 = vld [vmem:[%s7989_s15 + $0x11b8] sm:$0xff]  ;;  %v9761_v12 = vld [vmem:[%s7989_s15 + $0x11c0] sm:$0xff] }
 0x14b   : > { %12963 = vst [vmem:[#allocation527_spill] sm:$0xff] %v9755_v56  ;;  %12964 = vst [vmem:[#allocation528_spill] sm:$0xff] %v9758_v9  ;;  %v9764_v54 = vld [vmem:[%s7989_s15 + $0x11c8] sm:$0xff]  ;;  %v9767_v11 = vld [vmem:[%s7989_s15 + $0x11d0] sm:$0xff] }
 0x14c   : > { %12965 = vst [vmem:[#allocation529_spill] sm:$0xff] %v9761_v12  ;;  %12966 = vst [vmem:[#allocation530_spill] sm:$0xff] %v9764_v54  ;;  %v9770_v55 = vld [vmem:[%s7989_s15 + $0x11d8] sm:$0xff]  ;;  %v9773_v10 = vld [vmem:[%s7989_s15 + $0x11e0] sm:$0xff] }
 0x14d   : > { %12967 = vst [vmem:[#allocation531_spill] sm:$0xff] %v9767_v11  ;;  %12968 = vst [vmem:[#allocation532_spill] sm:$0xff] %v9770_v55  ;;  %v9776_v56 = vld [vmem:[%s7989_s15 + $0x11e8] sm:$0xff]  ;;  %v9779_v9 = vld [vmem:[%s7989_s15 + $0x11f0] sm:$0xff] }
 0x14e   : > { %12969 = vst [vmem:[#allocation533_spill] sm:$0xff] %v9773_v10  ;;  %12970 = vst [vmem:[#allocation534_spill] sm:$0xff] %v9776_v56  ;;  %v9782_v12 = vld [vmem:[%s7989_s15 + $0x11f8] sm:$0xff]  ;;  %v9785_v54 = vld [vmem:[%s7989_s15 + $0x1200] sm:$0xff] }
 0x14f   : > { %12971 = vst [vmem:[#allocation535_spill] sm:$0xff] %v9779_v9  ;;  %12972 = vst [vmem:[#allocation536_spill] sm:$0xff] %v9782_v12  ;;  %v9788_v11 = vld [vmem:[%s7989_s15 + $0x1208] sm:$0xff]  ;;  %v9791_v55 = vld [vmem:[%s7989_s15 + $0x1210] sm:$0xff] }
 0x150   : > { %12973 = vst [vmem:[#allocation537_spill] sm:$0xff] %v9785_v54  ;;  %12974 = vst [vmem:[#allocation538_spill] sm:$0xff] %v9788_v11  ;;  %v9794_v10 = vld [vmem:[%s7989_s15 + $0x1218] sm:$0xff]  ;;  %v9797_v56 = vld [vmem:[%s7989_s15 + $0x1220] sm:$0xff] }
 0x151   : > { %12975 = vst [vmem:[#allocation539_spill] sm:$0xff] %v9791_v55  ;;  %12976 = vst [vmem:[#allocation540_spill] sm:$0xff] %v9794_v10  ;;  %v9800_v9 = vld [vmem:[%s7989_s15 + $0x1228] sm:$0xff]  ;;  %v9803_v12 = vld [vmem:[%s7989_s15 + $0x1230] sm:$0xff] }
 0x152   : > { %12977 = vst [vmem:[#allocation541_spill] sm:$0xff] %v9797_v56  ;;  %12978 = vst [vmem:[#allocation542_spill] sm:$0xff] %v9800_v9  ;;  %v9806_v54 = vld [vmem:[%s7989_s15 + $0x1238] sm:$0xff]  ;;  %v9809_v11 = vld [vmem:[%s7989_s15 + $0x1240] sm:$0xff] }
 0x153   : > { %12979 = vst [vmem:[#allocation543_spill] sm:$0xff] %v9803_v12  ;;  %12980 = vst [vmem:[#allocation544_spill] sm:$0xff] %v9806_v54  ;;  %v9812_v55 = vld [vmem:[%s7989_s15 + $0x1248] sm:$0xff]  ;;  %v9815_v10 = vld [vmem:[%s7989_s15 + $0x1250] sm:$0xff] }
 0x154   : > { %12981 = vst [vmem:[#allocation545_spill] sm:$0xff] %v9809_v11  ;;  %12982 = vst [vmem:[#allocation546_spill] sm:$0xff] %v9812_v55  ;;  %v9818_v56 = vld [vmem:[%s7989_s15 + $0x1258] sm:$0xff]  ;;  %v9821_v9 = vld [vmem:[%s7989_s15 + $0x1260] sm:$0xff] }
 0x155   : > { %12983 = vst [vmem:[#allocation547_spill] sm:$0xff] %v9815_v10  ;;  %12984 = vst [vmem:[#allocation548_spill] sm:$0xff] %v9818_v56  ;;  %v9824_v12 = vld [vmem:[%s7989_s15 + $0x1268] sm:$0xff]  ;;  %v9827_v54 = vld [vmem:[%s7989_s15 + $0x1270] sm:$0xff] }
 0x156   : > { %12985 = vst [vmem:[#allocation549_spill] sm:$0xff] %v9821_v9  ;;  %12986 = vst [vmem:[#allocation550_spill] sm:$0xff] %v9824_v12  ;;  %v9830_v11 = vld [vmem:[%s7989_s15 + $0x1278] sm:$0xff]  ;;  %v9833_v55 = vld [vmem:[%s7989_s15 + $0x1280] sm:$0xff] }
 0x157   : > { %12987 = vst [vmem:[#allocation551_spill] sm:$0xff] %v9827_v54  ;;  %12988 = vst [vmem:[#allocation552_spill] sm:$0xff] %v9830_v11  ;;  %v9836_v10 = vld [vmem:[%s7989_s15 + $0x1288] sm:$0xff]  ;;  %v9839_v56 = vld [vmem:[%s7989_s15 + $0x1290] sm:$0xff] }
 0x158   : > { %12989 = vst [vmem:[#allocation553_spill] sm:$0xff] %v9833_v55  ;;  %12990 = vst [vmem:[#allocation554_spill] sm:$0xff] %v9836_v10  ;;  %v9842_v9 = vld [vmem:[%s7989_s15 + $0x1298] sm:$0xff]  ;;  %v9845_v12 = vld [vmem:[%s7989_s15 + $0x12a0] sm:$0xff] }
 0x159   : > { %12991 = vst [vmem:[#allocation555_spill] sm:$0xff] %v9839_v56  ;;  %12992 = vst [vmem:[#allocation556_spill] sm:$0xff] %v9842_v9  ;;  %v9848_v54 = vld [vmem:[%s7989_s15 + $0x12a8] sm:$0xff]  ;;  %v9851_v11 = vld [vmem:[%s7989_s15 + $0x12b0] sm:$0xff] }
 0x15a   : > { %12993 = vst [vmem:[#allocation557_spill] sm:$0xff] %v9845_v12  ;;  %12994 = vst [vmem:[#allocation558_spill] sm:$0xff] %v9848_v54  ;;  %v9854_v55 = vld [vmem:[%s7989_s15 + $0x12b8] sm:$0xff]  ;;  %v9857_v10 = vld [vmem:[%s7989_s15 + $0x12c0] sm:$0xff] }
 0x15b   : > { %12995 = vst [vmem:[#allocation559_spill] sm:$0xff] %v9851_v11  ;;  %12996 = vst [vmem:[#allocation560_spill] sm:$0xff] %v9854_v55  ;;  %v9860_v56 = vld [vmem:[%s7989_s15 + $0x12c8] sm:$0xff]  ;;  %v9863_v9 = vld [vmem:[%s7989_s15 + $0x12d0] sm:$0xff] }
 0x15c   : > { %12997 = vst [vmem:[#allocation561_spill] sm:$0xff] %v9857_v10  ;;  %12998 = vst [vmem:[#allocation562_spill] sm:$0xff] %v9860_v56  ;;  %v9866_v12 = vld [vmem:[%s7989_s15 + $0x12d8] sm:$0xff]  ;;  %v9869_v54 = vld [vmem:[%s7989_s15 + $0x12e0] sm:$0xff] }
 0x15d   : > { %12999 = vst [vmem:[#allocation563_spill] sm:$0xff] %v9863_v9  ;;  %13000 = vst [vmem:[#allocation564_spill] sm:$0xff] %v9866_v12  ;;  %v9872_v11 = vld [vmem:[%s7989_s15 + $0x12e8] sm:$0xff]  ;;  %v9875_v55 = vld [vmem:[%s7989_s15 + $0x12f0] sm:$0xff] }
 0x15e   : > { %13001 = vst [vmem:[#allocation565_spill] sm:$0xff] %v9869_v54  ;;  %13002 = vst [vmem:[#allocation566_spill] sm:$0xff] %v9872_v11  ;;  %v9878_v10 = vld [vmem:[%s7989_s15 + $0x12f8] sm:$0xff]  ;;  %v9881_v56 = vld [vmem:[%s7989_s15 + $0x1300] sm:$0xff] }
 0x15f   : > { %13003 = vst [vmem:[#allocation567_spill] sm:$0xff] %v9875_v55  ;;  %13004 = vst [vmem:[#allocation568_spill] sm:$0xff] %v9878_v10  ;;  %v9884_v9 = vld [vmem:[%s7989_s15 + $0x1308] sm:$0xff]  ;;  %v9887_v12 = vld [vmem:[%s7989_s15 + $0x1310] sm:$0xff] }
 0x160   : > { %13005 = vst [vmem:[#allocation569_spill] sm:$0xff] %v9881_v56  ;;  %13006 = vst [vmem:[#allocation570_spill] sm:$0xff] %v9884_v9  ;;  %v9890_v54 = vld [vmem:[%s7989_s15 + $0x1318] sm:$0xff]  ;;  %v9893_v11 = vld [vmem:[%s7989_s15 + $0x1320] sm:$0xff] }
 0x161   : > { %13007 = vst [vmem:[#allocation571_spill] sm:$0xff] %v9887_v12  ;;  %13008 = vst [vmem:[#allocation572_spill] sm:$0xff] %v9890_v54  ;;  %v9896_v55 = vld [vmem:[%s7989_s15 + $0x1328] sm:$0xff]  ;;  %v9899_v10 = vld [vmem:[%s7989_s15 + $0x1330] sm:$0xff] }
 0x162   : > { %13009 = vst [vmem:[#allocation573_spill] sm:$0xff] %v9893_v11  ;;  %13010 = vst [vmem:[#allocation574_spill] sm:$0xff] %v9896_v55  ;;  %v9902_v56 = vld [vmem:[%s7989_s15 + $0x1338] sm:$0xff]  ;;  %v9905_v9 = vld [vmem:[%s7989_s15 + $0x1340] sm:$0xff] }
 0x163   : > { %13011 = vst [vmem:[#allocation575_spill] sm:$0xff] %v9899_v10  ;;  %13012 = vst [vmem:[#allocation576_spill] sm:$0xff] %v9902_v56  ;;  %v9908_v12 = vld [vmem:[%s7989_s15 + $0x1348] sm:$0xff]  ;;  %v9911_v54 = vld [vmem:[%s7989_s15 + $0x1350] sm:$0xff] }
 0x164   : > { %13013 = vst [vmem:[#allocation577_spill] sm:$0xff] %v9905_v9  ;;  %13014 = vst [vmem:[#allocation578_spill] sm:$0xff] %v9908_v12  ;;  %v9914_v11 = vld [vmem:[%s7989_s15 + $0x1358] sm:$0xff]  ;;  %v9917_v55 = vld [vmem:[%s7989_s15 + $0x1360] sm:$0xff] }
 0x165   : > { %13015 = vst [vmem:[#allocation579_spill] sm:$0xff] %v9911_v54  ;;  %13016 = vst [vmem:[#allocation580_spill] sm:$0xff] %v9914_v11  ;;  %v9920_v10 = vld [vmem:[%s7989_s15 + $0x1368] sm:$0xff]  ;;  %v9923_v56 = vld [vmem:[%s7989_s15 + $0x1370] sm:$0xff] }
 0x166   : > { %13017 = vst [vmem:[#allocation581_spill] sm:$0xff] %v9917_v55  ;;  %13018 = vst [vmem:[#allocation582_spill] sm:$0xff] %v9920_v10  ;;  %v9926_v9 = vld [vmem:[%s7989_s15 + $0x1378] sm:$0xff]  ;;  %v9929_v12 = vld [vmem:[%s7989_s15 + $0x1380] sm:$0xff] }
 0x167   : > { %13019 = vst [vmem:[#allocation583_spill] sm:$0xff] %v9923_v56  ;;  %13020 = vst [vmem:[#allocation584_spill] sm:$0xff] %v9926_v9  ;;  %v9932_v54 = vld [vmem:[%s7989_s15 + $0x1388] sm:$0xff]  ;;  %v9935_v11 = vld [vmem:[%s7989_s15 + $0x1390] sm:$0xff] }
 0x168   : > { %13021 = vst [vmem:[#allocation585_spill] sm:$0xff] %v9929_v12  ;;  %13022 = vst [vmem:[#allocation586_spill] sm:$0xff] %v9932_v54  ;;  %v9938_v55 = vld [vmem:[%s7989_s15 + $0x1398] sm:$0xff]  ;;  %v9941_v10 = vld [vmem:[%s7989_s15 + $0x13a0] sm:$0xff] }
 0x169   : > { %13023 = vst [vmem:[#allocation587_spill] sm:$0xff] %v9935_v11  ;;  %13024 = vst [vmem:[#allocation588_spill] sm:$0xff] %v9938_v55  ;;  %v9944_v56 = vld [vmem:[%s7989_s15 + $0x13a8] sm:$0xff]  ;;  %v9947_v9 = vld [vmem:[%s7989_s15 + $0x13b0] sm:$0xff] }
 0x16a   : > { %13025 = vst [vmem:[#allocation589_spill] sm:$0xff] %v9941_v10  ;;  %13026 = vst [vmem:[#allocation590_spill] sm:$0xff] %v9944_v56  ;;  %v9950_v12 = vld [vmem:[%s7989_s15 + $0x13b8] sm:$0xff]  ;;  %v9953_v54 = vld [vmem:[%s7989_s15 + $0x13c0] sm:$0xff] }
 0x16b   : > { %13027 = vst [vmem:[#allocation591_spill] sm:$0xff] %v9947_v9  ;;  %13028 = vst [vmem:[#allocation592_spill] sm:$0xff] %v9950_v12  ;;  %v9956_v11 = vld [vmem:[%s7989_s15 + $0x13c8] sm:$0xff]  ;;  %v9959_v55 = vld [vmem:[%s7989_s15 + $0x13d0] sm:$0xff] }
 0x16c   : > { %13029 = vst [vmem:[#allocation593_spill] sm:$0xff] %v9953_v54  ;;  %13030 = vst [vmem:[#allocation594_spill] sm:$0xff] %v9956_v11  ;;  %v9962_v10 = vld [vmem:[%s7989_s15 + $0x13d8] sm:$0xff]  ;;  %v9965_v56 = vld [vmem:[%s7989_s15 + $0x13e0] sm:$0xff] }
 0x16d   : > { %13031 = vst [vmem:[#allocation595_spill] sm:$0xff] %v9959_v55  ;;  %13032 = vst [vmem:[#allocation596_spill] sm:$0xff] %v9962_v10  ;;  %v9968_v9 = vld [vmem:[%s7989_s15 + $0x13e8] sm:$0xff]  ;;  %v9971_v12 = vld [vmem:[%s7989_s15 + $0x13f0] sm:$0xff] }
 0x16e   : > { %13033 = vst [vmem:[#allocation597_spill] sm:$0xff] %v9965_v56  ;;  %13034 = vst [vmem:[#allocation598_spill] sm:$0xff] %v9968_v9  ;;  %v9974_v54 = vld [vmem:[%s7989_s15 + $0x13f8] sm:$0xff]  ;;  %v9977_v11 = vld [vmem:[%s7989_s15 + $0x1400] sm:$0xff] }
 0x16f   : > { %13035 = vst [vmem:[#allocation599_spill] sm:$0xff] %v9971_v12  ;;  %13036 = vst [vmem:[#allocation600_spill] sm:$0xff] %v9974_v54  ;;  %v9980_v55 = vld [vmem:[%s7989_s15 + $0x1408] sm:$0xff]  ;;  %v9983_v10 = vld [vmem:[%s7989_s15 + $0x1410] sm:$0xff] }
 0x170   : > { %13037 = vst [vmem:[#allocation601_spill] sm:$0xff] %v9977_v11  ;;  %13038 = vst [vmem:[#allocation602_spill] sm:$0xff] %v9980_v55  ;;  %v9986_v56 = vld [vmem:[%s7989_s15 + $0x1418] sm:$0xff]  ;;  %v9989_v9 = vld [vmem:[%s7989_s15 + $0x1420] sm:$0xff] }
 0x171   : > { %13039 = vst [vmem:[#allocation603_spill] sm:$0xff] %v9983_v10  ;;  %13040 = vst [vmem:[#allocation604_spill] sm:$0xff] %v9986_v56  ;;  %v9992_v12 = vld [vmem:[%s7989_s15 + $0x1428] sm:$0xff]  ;;  %v9995_v54 = vld [vmem:[%s7989_s15 + $0x1430] sm:$0xff] }
 0x172   : > { %13041 = vst [vmem:[#allocation605_spill] sm:$0xff] %v9989_v9  ;;  %13042 = vst [vmem:[#allocation606_spill] sm:$0xff] %v9992_v12  ;;  %v9998_v11 = vld [vmem:[%s7989_s15 + $0x1438] sm:$0xff]  ;;  %v10001_v55 = vld [vmem:[%s7989_s15 + $0x1440] sm:$0xff] }
 0x173   : > { %13043 = vst [vmem:[#allocation607_spill] sm:$0xff] %v9995_v54  ;;  %13044 = vst [vmem:[#allocation608_spill] sm:$0xff] %v9998_v11  ;;  %v10004_v10 = vld [vmem:[%s7989_s15 + $0x1448] sm:$0xff]  ;;  %v10007_v56 = vld [vmem:[%s7989_s15 + $0x1450] sm:$0xff] }
 0x174   : > { %13045 = vst [vmem:[#allocation609_spill] sm:$0xff] %v10001_v55  ;;  %13046 = vst [vmem:[#allocation610_spill] sm:$0xff] %v10004_v10  ;;  %v10010_v9 = vld [vmem:[%s7989_s15 + $0x1458] sm:$0xff]  ;;  %v10013_v12 = vld [vmem:[%s7989_s15 + $0x1460] sm:$0xff] }
 0x175   : > { %13047 = vst [vmem:[#allocation611_spill] sm:$0xff] %v10007_v56  ;;  %13048 = vst [vmem:[#allocation612_spill] sm:$0xff] %v10010_v9  ;;  %v10016_v54 = vld [vmem:[%s7989_s15 + $0x1468] sm:$0xff]  ;;  %v10019_v11 = vld [vmem:[%s7989_s15 + $0x1470] sm:$0xff] }
 0x176   : > { %13049 = vst [vmem:[#allocation613_spill] sm:$0xff] %v10013_v12  ;;  %13050 = vst [vmem:[#allocation614_spill] sm:$0xff] %v10016_v54  ;;  %v10022_v55 = vld [vmem:[%s7989_s15 + $0x1478] sm:$0xff]  ;;  %v10025_v10 = vld [vmem:[%s7989_s15 + $0x1480] sm:$0xff] }
 0x177   : > { %13051 = vst [vmem:[#allocation615_spill] sm:$0xff] %v10019_v11  ;;  %13052 = vst [vmem:[#allocation616_spill] sm:$0xff] %v10022_v55  ;;  %v10028_v56 = vld [vmem:[%s7989_s15 + $0x1488] sm:$0xff]  ;;  %v10031_v9 = vld [vmem:[%s7989_s15 + $0x1490] sm:$0xff] }
 0x178   : > { %13053 = vst [vmem:[#allocation617_spill] sm:$0xff] %v10025_v10  ;;  %13054 = vst [vmem:[#allocation618_spill] sm:$0xff] %v10028_v56  ;;  %v10034_v12 = vld [vmem:[%s7989_s15 + $0x1498] sm:$0xff]  ;;  %v10037_v54 = vld [vmem:[%s7989_s15 + $0x14a0] sm:$0xff] }
 0x179   : > { %13055 = vst [vmem:[#allocation619_spill] sm:$0xff] %v10031_v9  ;;  %13056 = vst [vmem:[#allocation620_spill] sm:$0xff] %v10034_v12  ;;  %v10040_v11 = vld [vmem:[%s7989_s15 + $0x14a8] sm:$0xff]  ;;  %v10043_v55 = vld [vmem:[%s7989_s15 + $0x14b0] sm:$0xff] }
 0x17a   : > { %13057 = vst [vmem:[#allocation621_spill] sm:$0xff] %v10037_v54  ;;  %13058 = vst [vmem:[#allocation622_spill] sm:$0xff] %v10040_v11  ;;  %v10046_v10 = vld [vmem:[%s7989_s15 + $0x14b8] sm:$0xff]  ;;  %v10049_v56 = vld [vmem:[%s7989_s15 + $0x14c0] sm:$0xff] }
 0x17b   : > { %13059 = vst [vmem:[#allocation623_spill] sm:$0xff] %v10043_v55  ;;  %13060 = vst [vmem:[#allocation624_spill] sm:$0xff] %v10046_v10  ;;  %v10052_v9 = vld [vmem:[%s7989_s15 + $0x14c8] sm:$0xff]  ;;  %v10055_v12 = vld [vmem:[%s7989_s15 + $0x14d0] sm:$0xff] }
 0x17c   : > { %13061 = vst [vmem:[#allocation625_spill] sm:$0xff] %v10049_v56  ;;  %13062 = vst [vmem:[#allocation626_spill] sm:$0xff] %v10052_v9  ;;  %v10058_v54 = vld [vmem:[%s7989_s15 + $0x14d8] sm:$0xff]  ;;  %v10061_v11 = vld [vmem:[%s7989_s15 + $0x14e0] sm:$0xff] }
 0x17d   : > { %13063 = vst [vmem:[#allocation627_spill] sm:$0xff] %v10055_v12  ;;  %13064 = vst [vmem:[#allocation628_spill] sm:$0xff] %v10058_v54  ;;  %v10064_v55 = vld [vmem:[%s7989_s15 + $0x14e8] sm:$0xff]  ;;  %v10067_v10 = vld [vmem:[%s7989_s15 + $0x14f0] sm:$0xff] }
 0x17e   : > { %13065 = vst [vmem:[#allocation629_spill] sm:$0xff] %v10061_v11  ;;  %13066 = vst [vmem:[#allocation630_spill] sm:$0xff] %v10064_v55  ;;  %v10070_v56 = vld [vmem:[%s7989_s15 + $0x14f8] sm:$0xff]  ;;  %v10073_v9 = vld [vmem:[%s7989_s15 + $0x1500] sm:$0xff] }
 0x17f   : > { %13067 = vst [vmem:[#allocation631_spill] sm:$0xff] %v10067_v10  ;;  %13068 = vst [vmem:[#allocation632_spill] sm:$0xff] %v10070_v56  ;;  %v10076_v12 = vld [vmem:[%s7989_s15 + $0x1508] sm:$0xff]  ;;  %v10079_v54 = vld [vmem:[%s7989_s15 + $0x1510] sm:$0xff] }
 0x180   : > { %13069 = vst [vmem:[#allocation633_spill] sm:$0xff] %v10073_v9  ;;  %13070 = vst [vmem:[#allocation634_spill] sm:$0xff] %v10076_v12  ;;  %v10082_v11 = vld [vmem:[%s7989_s15 + $0x1518] sm:$0xff]  ;;  %v10085_v55 = vld [vmem:[%s7989_s15 + $0x1520] sm:$0xff] }
 0x181   : > { %13071 = vst [vmem:[#allocation635_spill] sm:$0xff] %v10079_v54  ;;  %13072 = vst [vmem:[#allocation636_spill] sm:$0xff] %v10082_v11  ;;  %v10088_v10 = vld [vmem:[%s7989_s15 + $0x1528] sm:$0xff]  ;;  %v10091_v56 = vld [vmem:[%s7989_s15 + $0x1530] sm:$0xff] }
 0x182   : > { %13073 = vst [vmem:[#allocation637_spill] sm:$0xff] %v10085_v55  ;;  %13074 = vst [vmem:[#allocation638_spill] sm:$0xff] %v10088_v10  ;;  %v10094_v9 = vld [vmem:[%s7989_s15 + $0x1538] sm:$0xff]  ;;  %v10097_v12 = vld [vmem:[%s7989_s15 + $0x1540] sm:$0xff] }
 0x183   : > { %13075 = vst [vmem:[#allocation639_spill] sm:$0xff] %v10091_v56  ;;  %13076 = vst [vmem:[#allocation640_spill] sm:$0xff] %v10094_v9  ;;  %v10100_v54 = vld [vmem:[%s7989_s15 + $0x1548] sm:$0xff]  ;;  %v10103_v11 = vld [vmem:[%s7989_s15 + $0x1550] sm:$0xff] }
 0x184   : > { %13077 = vst [vmem:[#allocation641_spill] sm:$0xff] %v10097_v12  ;;  %13078 = vst [vmem:[#allocation642_spill] sm:$0xff] %v10100_v54  ;;  %v10106_v55 = vld [vmem:[%s7989_s15 + $0x1558] sm:$0xff]  ;;  %v10109_v10 = vld [vmem:[%s7989_s15 + $0x1560] sm:$0xff] }
 0x185   : > { %13079 = vst [vmem:[#allocation643_spill] sm:$0xff] %v10103_v11  ;;  %13080 = vst [vmem:[#allocation644_spill] sm:$0xff] %v10106_v55  ;;  %v10112_v56 = vld [vmem:[%s7989_s15 + $0x1568] sm:$0xff]  ;;  %v10115_v9 = vld [vmem:[%s7989_s15 + $0x1570] sm:$0xff] }
 0x186   : > { %13081 = vst [vmem:[#allocation645_spill] sm:$0xff] %v10109_v10  ;;  %13082 = vst [vmem:[#allocation646_spill] sm:$0xff] %v10112_v56  ;;  %v10118_v12 = vld [vmem:[%s7989_s15 + $0x1578] sm:$0xff]  ;;  %v10121_v54 = vld [vmem:[%s7989_s15 + $0x1580] sm:$0xff] }
 0x187   : > { %13083 = vst [vmem:[#allocation647_spill] sm:$0xff] %v10115_v9  ;;  %13084 = vst [vmem:[#allocation648_spill] sm:$0xff] %v10118_v12  ;;  %v10124_v11 = vld [vmem:[%s7989_s15 + $0x1588] sm:$0xff]  ;;  %v10127_v55 = vld [vmem:[%s7989_s15 + $0x1590] sm:$0xff] }
 0x188   : > { %13085 = vst [vmem:[#allocation649_spill] sm:$0xff] %v10121_v54  ;;  %13086 = vst [vmem:[#allocation650_spill] sm:$0xff] %v10124_v11  ;;  %v10130_v10 = vld [vmem:[%s7989_s15 + $0x1598] sm:$0xff]  ;;  %v10133_v56 = vld [vmem:[%s7989_s15 + $0x15a0] sm:$0xff] }
 0x189   : > { %13087 = vst [vmem:[#allocation651_spill] sm:$0xff] %v10127_v55  ;;  %13088 = vst [vmem:[#allocation652_spill] sm:$0xff] %v10130_v10  ;;  %v10136_v9 = vld [vmem:[%s7989_s15 + $0x15a8] sm:$0xff]  ;;  %v10139_v12 = vld [vmem:[%s7989_s15 + $0x15b0] sm:$0xff] }
 0x18a   : > { %13089 = vst [vmem:[#allocation653_spill] sm:$0xff] %v10133_v56  ;;  %13090 = vst [vmem:[#allocation654_spill] sm:$0xff] %v10136_v9  ;;  %v10142_v54 = vld [vmem:[%s7989_s15 + $0x15b8] sm:$0xff]  ;;  %v10145_v11 = vld [vmem:[%s7989_s15 + $0x15c0] sm:$0xff] }
 0x18b   : > { %13091 = vst [vmem:[#allocation655_spill] sm:$0xff] %v10139_v12  ;;  %13092 = vst [vmem:[#allocation656_spill] sm:$0xff] %v10142_v54  ;;  %v10148_v55 = vld [vmem:[%s7989_s15 + $0x15c8] sm:$0xff]  ;;  %v10151_v10 = vld [vmem:[%s7989_s15 + $0x15d0] sm:$0xff] }
 0x18c   : > { %13093 = vst [vmem:[#allocation657_spill] sm:$0xff] %v10145_v11  ;;  %13094 = vst [vmem:[#allocation658_spill] sm:$0xff] %v10148_v55  ;;  %v10154_v56 = vld [vmem:[%s7989_s15 + $0x15d8] sm:$0xff]  ;;  %v10157_v9 = vld [vmem:[%s7989_s15 + $0x15e0] sm:$0xff] }
 0x18d   : > { %13095 = vst [vmem:[#allocation659_spill] sm:$0xff] %v10151_v10  ;;  %13096 = vst [vmem:[#allocation660_spill] sm:$0xff] %v10154_v56  ;;  %v10160_v12 = vld [vmem:[%s7989_s15 + $0x15e8] sm:$0xff]  ;;  %v10163_v54 = vld [vmem:[%s7989_s15 + $0x15f0] sm:$0xff] }
 0x18e   : > { %13097 = vst [vmem:[#allocation661_spill] sm:$0xff] %v10157_v9  ;;  %13098 = vst [vmem:[#allocation662_spill] sm:$0xff] %v10160_v12  ;;  %v10166_v11 = vld [vmem:[%s7989_s15 + $0x15f8] sm:$0xff]  ;;  %v10169_v55 = vld [vmem:[%s7989_s15 + $0x1600] sm:$0xff] }
 0x18f   : > { %13099 = vst [vmem:[#allocation663_spill] sm:$0xff] %v10163_v54  ;;  %13100 = vst [vmem:[#allocation664_spill] sm:$0xff] %v10166_v11  ;;  %v10172_v10 = vld [vmem:[%s7989_s15 + $0x1608] sm:$0xff]  ;;  %v10175_v56 = vld [vmem:[%s7989_s15 + $0x1610] sm:$0xff] }
 0x190   : > { %13101 = vst [vmem:[#allocation665_spill] sm:$0xff] %v10169_v55  ;;  %13102 = vst [vmem:[#allocation666_spill] sm:$0xff] %v10172_v10  ;;  %v10178_v9 = vld [vmem:[%s7989_s15 + $0x1618] sm:$0xff]  ;;  %v10181_v12 = vld [vmem:[%s7989_s15 + $0x1620] sm:$0xff] }
 0x191   : > { %13103 = vst [vmem:[#allocation667_spill] sm:$0xff] %v10175_v56  ;;  %13104 = vst [vmem:[#allocation668_spill] sm:$0xff] %v10178_v9  ;;  %v10184_v54 = vld [vmem:[%s7989_s15 + $0x1628] sm:$0xff]  ;;  %v10187_v11 = vld [vmem:[%s7989_s15 + $0x1630] sm:$0xff] }
 0x192   : > { %13105 = vst [vmem:[#allocation669_spill] sm:$0xff] %v10181_v12  ;;  %13106 = vst [vmem:[#allocation670_spill] sm:$0xff] %v10184_v54  ;;  %v10190_v55 = vld [vmem:[%s7989_s15 + $0x1638] sm:$0xff]  ;;  %v10193_v10 = vld [vmem:[%s7989_s15 + $0x1640] sm:$0xff] }
 0x193   : > { %13107 = vst [vmem:[#allocation671_spill] sm:$0xff] %v10187_v11  ;;  %13108 = vst [vmem:[#allocation672_spill] sm:$0xff] %v10190_v55  ;;  %v10196_v56 = vld [vmem:[%s7989_s15 + $0x1648] sm:$0xff]  ;;  %v10199_v9 = vld [vmem:[%s7989_s15 + $0x1650] sm:$0xff] }
 0x194   : > { %13109 = vst [vmem:[#allocation673_spill] sm:$0xff] %v10193_v10  ;;  %13110 = vst [vmem:[#allocation674_spill] sm:$0xff] %v10196_v56  ;;  %v10202_v12 = vld [vmem:[%s7989_s15 + $0x1658] sm:$0xff]  ;;  %v10205_v54 = vld [vmem:[%s7989_s15 + $0x1660] sm:$0xff] }
 0x195   : > { %13111 = vst [vmem:[#allocation675_spill] sm:$0xff] %v10199_v9  ;;  %13112 = vst [vmem:[#allocation676_spill] sm:$0xff] %v10202_v12  ;;  %v10208_v11 = vld [vmem:[%s7989_s15 + $0x1668] sm:$0xff]  ;;  %v10211_v55 = vld [vmem:[%s7989_s15 + $0x1670] sm:$0xff] }
 0x196   : > { %13113 = vst [vmem:[#allocation677_spill] sm:$0xff] %v10205_v54  ;;  %13114 = vst [vmem:[#allocation678_spill] sm:$0xff] %v10208_v11  ;;  %v10214_v10 = vld [vmem:[%s7989_s15 + $0x1678] sm:$0xff]  ;;  %v10217_v56 = vld [vmem:[%s7989_s15 + $0x1680] sm:$0xff] }
 0x197   : > { %13115 = vst [vmem:[#allocation679_spill] sm:$0xff] %v10211_v55  ;;  %13116 = vst [vmem:[#allocation680_spill] sm:$0xff] %v10214_v10  ;;  %v10220_v9 = vld [vmem:[%s7989_s15 + $0x1688] sm:$0xff]  ;;  %v10223_v12 = vld [vmem:[%s7989_s15 + $0x1690] sm:$0xff] }
 0x198   : > { %13117 = vst [vmem:[#allocation681_spill] sm:$0xff] %v10217_v56  ;;  %13118 = vst [vmem:[#allocation682_spill] sm:$0xff] %v10220_v9  ;;  %v10226_v54 = vld [vmem:[%s7989_s15 + $0x1698] sm:$0xff]  ;;  %v10229_v11 = vld [vmem:[%s7989_s15 + $0x16a0] sm:$0xff] }
 0x199   : > { %13119 = vst [vmem:[#allocation683_spill] sm:$0xff] %v10223_v12  ;;  %13120 = vst [vmem:[#allocation684_spill] sm:$0xff] %v10226_v54  ;;  %v10232_v55 = vld [vmem:[%s7989_s15 + $0x16a8] sm:$0xff]  ;;  %v10235_v10 = vld [vmem:[%s7989_s15 + $0x16b0] sm:$0xff] }
 0x19a   : > { %13121 = vst [vmem:[#allocation685_spill] sm:$0xff] %v10229_v11  ;;  %13122 = vst [vmem:[#allocation686_spill] sm:$0xff] %v10232_v55  ;;  %v10238_v56 = vld [vmem:[%s7989_s15 + $0x16b8] sm:$0xff]  ;;  %v10241_v9 = vld [vmem:[%s7989_s15 + $0x16c0] sm:$0xff] }
 0x19b   : > { %13123 = vst [vmem:[#allocation687_spill] sm:$0xff] %v10235_v10  ;;  %13124 = vst [vmem:[#allocation688_spill] sm:$0xff] %v10238_v56  ;;  %v10244_v12 = vld [vmem:[%s7989_s15 + $0x16c8] sm:$0xff]  ;;  %v10247_v54 = vld [vmem:[%s7989_s15 + $0x16d0] sm:$0xff] }
 0x19c   : > { %13125 = vst [vmem:[#allocation689_spill] sm:$0xff] %v10241_v9  ;;  %13126 = vst [vmem:[#allocation690_spill] sm:$0xff] %v10244_v12  ;;  %v10250_v11 = vld [vmem:[%s7989_s15 + $0x16d8] sm:$0xff]  ;;  %v10253_v55 = vld [vmem:[%s7989_s15 + $0x16e0] sm:$0xff] }
 0x19d   : > { %13127 = vst [vmem:[#allocation691_spill] sm:$0xff] %v10247_v54  ;;  %13128 = vst [vmem:[#allocation692_spill] sm:$0xff] %v10250_v11  ;;  %v10256_v10 = vld [vmem:[%s7989_s15 + $0x16e8] sm:$0xff]  ;;  %v10259_v56 = vld [vmem:[%s7989_s15 + $0x16f0] sm:$0xff] }
 0x19e   : > { %13129 = vst [vmem:[#allocation693_spill] sm:$0xff] %v10253_v55  ;;  %13130 = vst [vmem:[#allocation694_spill] sm:$0xff] %v10256_v10  ;;  %v10262_v9 = vld [vmem:[%s7989_s15 + $0x16f8] sm:$0xff]  ;;  %v10265_v12 = vld [vmem:[%s7989_s15 + $0x1700] sm:$0xff] }
 0x19f   : > { %13131 = vst [vmem:[#allocation695_spill] sm:$0xff] %v10259_v56  ;;  %13132 = vst [vmem:[#allocation696_spill] sm:$0xff] %v10262_v9  ;;  %v10268_v54 = vld [vmem:[%s7989_s15 + $0x1708] sm:$0xff]  ;;  %v10271_v11 = vld [vmem:[%s7989_s15 + $0x1710] sm:$0xff] }
 0x1a0   : > { %13133 = vst [vmem:[#allocation697_spill] sm:$0xff] %v10265_v12  ;;  %13134 = vst [vmem:[#allocation698_spill] sm:$0xff] %v10268_v54  ;;  %v10274_v55 = vld [vmem:[%s7989_s15 + $0x1718] sm:$0xff]  ;;  %v10277_v10 = vld [vmem:[%s7989_s15 + $0x1720] sm:$0xff] }
 0x1a1   : > { %13135 = vst [vmem:[#allocation699_spill] sm:$0xff] %v10271_v11  ;;  %13136 = vst [vmem:[#allocation700_spill] sm:$0xff] %v10274_v55  ;;  %v10280_v56 = vld [vmem:[%s7989_s15 + $0x1728] sm:$0xff]  ;;  %v10283_v9 = vld [vmem:[%s7989_s15 + $0x1730] sm:$0xff] }
 0x1a2   : > { %13137 = vst [vmem:[#allocation701_spill] sm:$0xff] %v10277_v10  ;;  %13138 = vst [vmem:[#allocation702_spill] sm:$0xff] %v10280_v56  ;;  %v10286_v12 = vld [vmem:[%s7989_s15 + $0x1738] sm:$0xff]  ;;  %v10289_v54 = vld [vmem:[%s7989_s15 + $0x1740] sm:$0xff] }
 0x1a3   : > { %13139 = vst [vmem:[#allocation703_spill] sm:$0xff] %v10283_v9  ;;  %13140 = vst [vmem:[#allocation704_spill] sm:$0xff] %v10286_v12  ;;  %v10292_v11 = vld [vmem:[%s7989_s15 + $0x1748] sm:$0xff]  ;;  %v10295_v55 = vld [vmem:[%s7989_s15 + $0x1750] sm:$0xff] }
 0x1a4   : > { %13141 = vst [vmem:[#allocation705_spill] sm:$0xff] %v10289_v54  ;;  %13142 = vst [vmem:[#allocation706_spill] sm:$0xff] %v10292_v11  ;;  %v10298_v10 = vld [vmem:[%s7989_s15 + $0x1758] sm:$0xff]  ;;  %v10301_v56 = vld [vmem:[%s7989_s15 + $0x1760] sm:$0xff] }
 0x1a5   : > { %13143 = vst [vmem:[#allocation707_spill] sm:$0xff] %v10295_v55  ;;  %13144 = vst [vmem:[#allocation708_spill] sm:$0xff] %v10298_v10  ;;  %v10304_v9 = vld [vmem:[%s7989_s15 + $0x1768] sm:$0xff]  ;;  %v10307_v12 = vld [vmem:[%s7989_s15 + $0x1770] sm:$0xff] }
 0x1a6   : > { %13145 = vst [vmem:[#allocation709_spill] sm:$0xff] %v10301_v56  ;;  %13146 = vst [vmem:[#allocation710_spill] sm:$0xff] %v10304_v9  ;;  %v10310_v54 = vld [vmem:[%s7989_s15 + $0x1778] sm:$0xff]  ;;  %v10313_v11 = vld [vmem:[%s7989_s15 + $0x1780] sm:$0xff] }
 0x1a7   : > { %13147 = vst [vmem:[#allocation711_spill] sm:$0xff] %v10307_v12  ;;  %13148 = vst [vmem:[#allocation712_spill] sm:$0xff] %v10310_v54  ;;  %v10316_v55 = vld [vmem:[%s7989_s15 + $0x1788] sm:$0xff]  ;;  %v10319_v10 = vld [vmem:[%s7989_s15 + $0x1790] sm:$0xff] }
 0x1a8   : > { %13149 = vst [vmem:[#allocation713_spill] sm:$0xff] %v10313_v11  ;;  %13150 = vst [vmem:[#allocation714_spill] sm:$0xff] %v10316_v55  ;;  %v10322_v56 = vld [vmem:[%s7989_s15 + $0x1798] sm:$0xff]  ;;  %v10325_v9 = vld [vmem:[%s7989_s15 + $0x17a0] sm:$0xff] }
 0x1a9   : > { %13151 = vst [vmem:[#allocation715_spill] sm:$0xff] %v10319_v10  ;;  %13152 = vst [vmem:[#allocation716_spill] sm:$0xff] %v10322_v56  ;;  %v10328_v12 = vld [vmem:[%s7989_s15 + $0x17a8] sm:$0xff]  ;;  %v10331_v54 = vld [vmem:[%s7989_s15 + $0x17b0] sm:$0xff] }
 0x1aa   : > { %13153 = vst [vmem:[#allocation717_spill] sm:$0xff] %v10325_v9  ;;  %13154 = vst [vmem:[#allocation718_spill] sm:$0xff] %v10328_v12  ;;  %v10334_v11 = vld [vmem:[%s7989_s15 + $0x17b8] sm:$0xff]  ;;  %v10337_v55 = vld [vmem:[%s7989_s15 + $0x17c0] sm:$0xff] }
 0x1ab   : > { %13155 = vst [vmem:[#allocation719_spill] sm:$0xff] %v10331_v54  ;;  %13156 = vst [vmem:[#allocation720_spill] sm:$0xff] %v10334_v11  ;;  %v10340_v10 = vld [vmem:[%s7989_s15 + $0x17c8] sm:$0xff]  ;;  %v10343_v56 = vld [vmem:[%s7989_s15 + $0x17d0] sm:$0xff] }
 0x1ac   : > { %13157 = vst [vmem:[#allocation721_spill] sm:$0xff] %v10337_v55  ;;  %13158 = vst [vmem:[#allocation722_spill] sm:$0xff] %v10340_v10  ;;  %v10346_v9 = vld [vmem:[%s7989_s15 + $0x17d8] sm:$0xff]  ;;  %v10349_v12 = vld [vmem:[%s7989_s15 + $0x17e0] sm:$0xff] }
 0x1ad   : > { %13159 = vst [vmem:[#allocation723_spill] sm:$0xff] %v10343_v56  ;;  %13160 = vst [vmem:[#allocation724_spill] sm:$0xff] %v10346_v9  ;;  %v10352_v54 = vld [vmem:[%s7989_s15 + $0x17e8] sm:$0xff]  ;;  %v10355_v11 = vld [vmem:[%s7989_s15 + $0x17f0] sm:$0xff] }
 0x1ae   : > { %13161 = vst [vmem:[#allocation725_spill] sm:$0xff] %v10349_v12  ;;  %13162 = vst [vmem:[#allocation726_spill] sm:$0xff] %v10352_v54  ;;  %v10358_v55 = vld [vmem:[%s7989_s15 + $0x17f8] sm:$0xff]  ;;  %v10361_v10 = vld [vmem:[%s7989_s15 + $0x1800] sm:$0xff] }
 0x1af   : > { %13163 = vst [vmem:[#allocation727_spill] sm:$0xff] %v10355_v11  ;;  %13164 = vst [vmem:[#allocation728_spill] sm:$0xff] %v10358_v55  ;;  %v10364_v56 = vld [vmem:[%s7989_s15 + $0x1808] sm:$0xff]  ;;  %v10367_v9 = vld [vmem:[%s7989_s15 + $0x1810] sm:$0xff] }
 0x1b0   : > { %13165 = vst [vmem:[#allocation729_spill] sm:$0xff] %v10361_v10  ;;  %13166 = vst [vmem:[#allocation730_spill] sm:$0xff] %v10364_v56  ;;  %v10370_v12 = vld [vmem:[%s7989_s15 + $0x1818] sm:$0xff]  ;;  %v10373_v54 = vld [vmem:[%s7989_s15 + $0x1820] sm:$0xff] }
 0x1b1   : > { %13167 = vst [vmem:[#allocation731_spill] sm:$0xff] %v10367_v9  ;;  %13168 = vst [vmem:[#allocation732_spill] sm:$0xff] %v10370_v12  ;;  %v10376_v11 = vld [vmem:[%s7989_s15 + $0x1828] sm:$0xff]  ;;  %v10379_v55 = vld [vmem:[%s7989_s15 + $0x1830] sm:$0xff] }
 0x1b2   : > { %13169 = vst [vmem:[#allocation733_spill] sm:$0xff] %v10373_v54  ;;  %13170 = vst [vmem:[#allocation734_spill] sm:$0xff] %v10376_v11  ;;  %v10382_v10 = vld [vmem:[%s7989_s15 + $0x1838] sm:$0xff]  ;;  %v10385_v56 = vld [vmem:[%s7989_s15 + $0x1840] sm:$0xff] }
 0x1b3   : > { %13171 = vst [vmem:[#allocation735_spill] sm:$0xff] %v10379_v55  ;;  %13172 = vst [vmem:[#allocation736_spill] sm:$0xff] %v10382_v10  ;;  %v10388_v9 = vld [vmem:[%s7989_s15 + $0x1848] sm:$0xff]  ;;  %v10391_v12 = vld [vmem:[%s7989_s15 + $0x1850] sm:$0xff] }
 0x1b4   : > { %13173 = vst [vmem:[#allocation737_spill] sm:$0xff] %v10385_v56  ;;  %13174 = vst [vmem:[#allocation738_spill] sm:$0xff] %v10388_v9  ;;  %v10394_v54 = vld [vmem:[%s7989_s15 + $0x1858] sm:$0xff]  ;;  %v10397_v11 = vld [vmem:[%s7989_s15 + $0x1860] sm:$0xff] }
 0x1b5   : > { %13175 = vst [vmem:[#allocation739_spill] sm:$0xff] %v10391_v12  ;;  %13176 = vst [vmem:[#allocation740_spill] sm:$0xff] %v10394_v54  ;;  %v10400_v55 = vld [vmem:[%s7989_s15 + $0x1868] sm:$0xff]  ;;  %v10403_v10 = vld [vmem:[%s7989_s15 + $0x1870] sm:$0xff] }
 0x1b6   : > { %13177 = vst [vmem:[#allocation741_spill] sm:$0xff] %v10397_v11  ;;  %13178 = vst [vmem:[#allocation742_spill] sm:$0xff] %v10400_v55  ;;  %v10406_v56 = vld [vmem:[%s7989_s15 + $0x1878] sm:$0xff]  ;;  %v10409_v9 = vld [vmem:[%s7989_s15 + $0x1880] sm:$0xff] }
 0x1b7   : > { %13179 = vst [vmem:[#allocation743_spill] sm:$0xff] %v10403_v10  ;;  %13180 = vst [vmem:[#allocation744_spill] sm:$0xff] %v10406_v56  ;;  %v10412_v12 = vld [vmem:[%s7989_s15 + $0x1888] sm:$0xff]  ;;  %v10415_v54 = vld [vmem:[%s7989_s15 + $0x1890] sm:$0xff] }
 0x1b8   : > { %13181 = vst [vmem:[#allocation745_spill] sm:$0xff] %v10409_v9  ;;  %13182 = vst [vmem:[#allocation746_spill] sm:$0xff] %v10412_v12  ;;  %v10418_v11 = vld [vmem:[%s7989_s15 + $0x1898] sm:$0xff]  ;;  %v10421_v55 = vld [vmem:[%s7989_s15 + $0x18a0] sm:$0xff] }
 0x1b9   : > { %13183 = vst [vmem:[#allocation747_spill] sm:$0xff] %v10415_v54  ;;  %13184 = vst [vmem:[#allocation748_spill] sm:$0xff] %v10418_v11  ;;  %v10424_v10 = vld [vmem:[%s7989_s15 + $0x18a8] sm:$0xff]  ;;  %v10427_v56 = vld [vmem:[%s7989_s15 + $0x18b0] sm:$0xff] }
 0x1ba   : > { %13185 = vst [vmem:[#allocation749_spill] sm:$0xff] %v10421_v55  ;;  %13186 = vst [vmem:[#allocation750_spill] sm:$0xff] %v10424_v10  ;;  %v10430_v9 = vld [vmem:[%s7989_s15 + $0x18b8] sm:$0xff]  ;;  %v10433_v12 = vld [vmem:[%s7989_s15 + $0x18c0] sm:$0xff] }
 0x1bb   : > { %13187 = vst [vmem:[#allocation751_spill] sm:$0xff] %v10427_v56  ;;  %13188 = vst [vmem:[#allocation752_spill] sm:$0xff] %v10430_v9  ;;  %v10436_v54 = vld [vmem:[%s7989_s15 + $0x18c8] sm:$0xff]  ;;  %v10439_v11 = vld [vmem:[%s7989_s15 + $0x18d0] sm:$0xff] }
 0x1bc   : > { %13189 = vst [vmem:[#allocation753_spill] sm:$0xff] %v10433_v12  ;;  %13190 = vst [vmem:[#allocation754_spill] sm:$0xff] %v10436_v54  ;;  %v10442_v55 = vld [vmem:[%s7989_s15 + $0x18d8] sm:$0xff]  ;;  %v10445_v10 = vld [vmem:[%s7989_s15 + $0x18e0] sm:$0xff] }
 0x1bd   : > { %13191 = vst [vmem:[#allocation755_spill] sm:$0xff] %v10439_v11  ;;  %13192 = vst [vmem:[#allocation756_spill] sm:$0xff] %v10442_v55  ;;  %v10448_v56 = vld [vmem:[%s7989_s15 + $0x18e8] sm:$0xff]  ;;  %v10451_v9 = vld [vmem:[%s7989_s15 + $0x18f0] sm:$0xff] }
 0x1be   : > { %13193 = vst [vmem:[#allocation757_spill] sm:$0xff] %v10445_v10  ;;  %13194 = vst [vmem:[#allocation758_spill] sm:$0xff] %v10448_v56  ;;  %v10454_v12 = vld [vmem:[%s7989_s15 + $0x18f8] sm:$0xff]  ;;  %v10457_v54 = vld [vmem:[%s7989_s15 + $0x1900] sm:$0xff] }
 0x1bf   : > { %13195 = vst [vmem:[#allocation759_spill] sm:$0xff] %v10451_v9  ;;  %13196 = vst [vmem:[#allocation760_spill] sm:$0xff] %v10454_v12  ;;  %v10460_v11 = vld [vmem:[%s7989_s15 + $0x1908] sm:$0xff]  ;;  %v10463_v55 = vld [vmem:[%s7989_s15 + $0x1910] sm:$0xff] }
 0x1c0   : > { %13197 = vst [vmem:[#allocation761_spill] sm:$0xff] %v10457_v54  ;;  %13198 = vst [vmem:[#allocation762_spill] sm:$0xff] %v10460_v11  ;;  %v10466_v10 = vld [vmem:[%s7989_s15 + $0x1918] sm:$0xff]  ;;  %v10469_v56 = vld [vmem:[%s7989_s15 + $0x1920] sm:$0xff] }
 0x1c1   : > { %13199 = vst [vmem:[#allocation763_spill] sm:$0xff] %v10463_v55  ;;  %13200 = vst [vmem:[#allocation764_spill] sm:$0xff] %v10466_v10  ;;  %v10472_v9 = vld [vmem:[%s7989_s15 + $0x1928] sm:$0xff]  ;;  %v10475_v12 = vld [vmem:[%s7989_s15 + $0x1930] sm:$0xff] }
 0x1c2   : > { %13201 = vst [vmem:[#allocation765_spill] sm:$0xff] %v10469_v56  ;;  %13202 = vst [vmem:[#allocation766_spill] sm:$0xff] %v10472_v9  ;;  %v10478_v54 = vld [vmem:[%s7989_s15 + $0x1938] sm:$0xff]  ;;  %v10481_v11 = vld [vmem:[%s7989_s15 + $0x1940] sm:$0xff] }
 0x1c3   : > { %13203 = vst [vmem:[#allocation767_spill] sm:$0xff] %v10475_v12  ;;  %13204 = vst [vmem:[#allocation768_spill] sm:$0xff] %v10478_v54  ;;  %v10484_v55 = vld [vmem:[%s7989_s15 + $0x1948] sm:$0xff]  ;;  %v10487_v10 = vld [vmem:[%s7989_s15 + $0x1950] sm:$0xff] }
 0x1c4   : > { %13205 = vst [vmem:[#allocation769_spill] sm:$0xff] %v10481_v11  ;;  %13206 = vst [vmem:[#allocation770_spill] sm:$0xff] %v10484_v55  ;;  %v10490_v56 = vld [vmem:[%s7989_s15 + $0x1958] sm:$0xff]  ;;  %v10493_v9 = vld [vmem:[%s7989_s15 + $0x1960] sm:$0xff] }
 0x1c5   : > { %13207 = vst [vmem:[#allocation771_spill] sm:$0xff] %v10487_v10  ;;  %13208 = vst [vmem:[#allocation772_spill] sm:$0xff] %v10490_v56  ;;  %v10496_v12 = vld [vmem:[%s7989_s15 + $0x1968] sm:$0xff]  ;;  %v10499_v54 = vld [vmem:[%s7989_s15 + $0x1970] sm:$0xff] }
 0x1c6   : > { %13209 = vst [vmem:[#allocation773_spill] sm:$0xff] %v10493_v9  ;;  %13210 = vst [vmem:[#allocation774_spill] sm:$0xff] %v10496_v12  ;;  %v10502_v11 = vld [vmem:[%s7989_s15 + $0x1978] sm:$0xff]  ;;  %v10505_v55 = vld [vmem:[%s7989_s15 + $0x1980] sm:$0xff] }
 0x1c7   : > { %13211 = vst [vmem:[#allocation775_spill] sm:$0xff] %v10499_v54  ;;  %13212 = vst [vmem:[#allocation776_spill] sm:$0xff] %v10502_v11  ;;  %v10508_v10 = vld [vmem:[%s7989_s15 + $0x1988] sm:$0xff]  ;;  %v10511_v56 = vld [vmem:[%s7989_s15 + $0x1990] sm:$0xff] }
 0x1c8   : > { %13213 = vst [vmem:[#allocation777_spill] sm:$0xff] %v10505_v55  ;;  %13214 = vst [vmem:[#allocation778_spill] sm:$0xff] %v10508_v10  ;;  %v10514_v9 = vld [vmem:[%s7989_s15 + $0x1998] sm:$0xff]  ;;  %v10517_v12 = vld [vmem:[%s7989_s15 + $0x19a0] sm:$0xff] }
 0x1c9   : > { %13215 = vst [vmem:[#allocation779_spill] sm:$0xff] %v10511_v56  ;;  %13216 = vst [vmem:[#allocation780_spill] sm:$0xff] %v10514_v9  ;;  %v10520_v54 = vld [vmem:[%s7989_s15 + $0x19a8] sm:$0xff]  ;;  %v10523_v11 = vld [vmem:[%s7989_s15 + $0x19b0] sm:$0xff] }
 0x1ca   : > { %13217 = vst [vmem:[#allocation781_spill] sm:$0xff] %v10517_v12  ;;  %13218 = vst [vmem:[#allocation782_spill] sm:$0xff] %v10520_v54  ;;  %v10526_v55 = vld [vmem:[%s7989_s15 + $0x19b8] sm:$0xff]  ;;  %v10529_v10 = vld [vmem:[%s7989_s15 + $0x19c0] sm:$0xff] }
 0x1cb   : > { %13219 = vst [vmem:[#allocation783_spill] sm:$0xff] %v10523_v11  ;;  %13220 = vst [vmem:[#allocation784_spill] sm:$0xff] %v10526_v55  ;;  %v10532_v56 = vld [vmem:[%s7989_s15 + $0x19c8] sm:$0xff]  ;;  %v10535_v9 = vld [vmem:[%s7989_s15 + $0x19d0] sm:$0xff] }
 0x1cc   : > { %13221 = vst [vmem:[#allocation785_spill] sm:$0xff] %v10529_v10  ;;  %13222 = vst [vmem:[#allocation786_spill] sm:$0xff] %v10532_v56  ;;  %v10538_v12 = vld [vmem:[%s7989_s15 + $0x19d8] sm:$0xff]  ;;  %v10541_v54 = vld [vmem:[%s7989_s15 + $0x19e0] sm:$0xff] }
 0x1cd   : > { %13223 = vst [vmem:[#allocation787_spill] sm:$0xff] %v10535_v9  ;;  %13224 = vst [vmem:[#allocation788_spill] sm:$0xff] %v10538_v12  ;;  %v10544_v11 = vld [vmem:[%s7989_s15 + $0x19e8] sm:$0xff]  ;;  %v10547_v55 = vld [vmem:[%s7989_s15 + $0x19f0] sm:$0xff] }
 0x1ce   : > { %13225 = vst [vmem:[#allocation789_spill] sm:$0xff] %v10541_v54  ;;  %13226 = vst [vmem:[#allocation790_spill] sm:$0xff] %v10544_v11  ;;  %v10550_v10 = vld [vmem:[%s7989_s15 + $0x19f8] sm:$0xff]  ;;  %v10553_v56 = vld [vmem:[%s7989_s15 + $0x1a00] sm:$0xff] }
 0x1cf   : > { %13227 = vst [vmem:[#allocation791_spill] sm:$0xff] %v10547_v55  ;;  %13228 = vst [vmem:[#allocation792_spill] sm:$0xff] %v10550_v10  ;;  %v10556_v9 = vld [vmem:[%s7989_s15 + $0x1a08] sm:$0xff]  ;;  %v10559_v12 = vld [vmem:[%s7989_s15 + $0x1a10] sm:$0xff] }
 0x1d0   : > { %13229 = vst [vmem:[#allocation793_spill] sm:$0xff] %v10553_v56  ;;  %13230 = vst [vmem:[#allocation794_spill] sm:$0xff] %v10556_v9  ;;  %v10562_v54 = vld [vmem:[%s7989_s15 + $0x1a18] sm:$0xff]  ;;  %v10565_v11 = vld [vmem:[%s7989_s15 + $0x1a20] sm:$0xff] }
 0x1d1   : > { %13231 = vst [vmem:[#allocation795_spill] sm:$0xff] %v10559_v12  ;;  %13232 = vst [vmem:[#allocation796_spill] sm:$0xff] %v10562_v54  ;;  %v10568_v55 = vld [vmem:[%s7989_s15 + $0x1a28] sm:$0xff]  ;;  %v10571_v10 = vld [vmem:[%s7989_s15 + $0x1a30] sm:$0xff] }
 0x1d2   : > { %13233 = vst [vmem:[#allocation797_spill] sm:$0xff] %v10565_v11  ;;  %13234 = vst [vmem:[#allocation798_spill] sm:$0xff] %v10568_v55  ;;  %v10574_v56 = vld [vmem:[%s7989_s15 + $0x1a38] sm:$0xff]  ;;  %v10577_v9 = vld [vmem:[%s7989_s15 + $0x1a40] sm:$0xff] }
 0x1d3   : > { %13235 = vst [vmem:[#allocation799_spill] sm:$0xff] %v10571_v10  ;;  %13236 = vst [vmem:[#allocation800_spill] sm:$0xff] %v10574_v56  ;;  %v10580_v12 = vld [vmem:[%s7989_s15 + $0x1a48] sm:$0xff]  ;;  %v10583_v54 = vld [vmem:[%s7989_s15 + $0x1a50] sm:$0xff] }
 0x1d4   : > { %13237 = vst [vmem:[#allocation801_spill] sm:$0xff] %v10577_v9  ;;  %13238 = vst [vmem:[#allocation802_spill] sm:$0xff] %v10580_v12  ;;  %v10586_v11 = vld [vmem:[%s7989_s15 + $0x1a58] sm:$0xff]  ;;  %v10589_v55 = vld [vmem:[%s7989_s15 + $0x1a60] sm:$0xff] }
 0x1d5   : > { %13239 = vst [vmem:[#allocation803_spill] sm:$0xff] %v10583_v54  ;;  %13240 = vst [vmem:[#allocation804_spill] sm:$0xff] %v10586_v11  ;;  %v10592_v10 = vld [vmem:[%s7989_s15 + $0x1a68] sm:$0xff]  ;;  %v10595_v56 = vld [vmem:[%s7989_s15 + $0x1a70] sm:$0xff] }
 0x1d6   : > { %13241 = vst [vmem:[#allocation805_spill] sm:$0xff] %v10589_v55  ;;  %13242 = vst [vmem:[#allocation806_spill] sm:$0xff] %v10592_v10  ;;  %v10598_v9 = vld [vmem:[%s7989_s15 + $0x1a78] sm:$0xff]  ;;  %v10601_v12 = vld [vmem:[%s7989_s15 + $0x1a80] sm:$0xff] }
 0x1d7   : > { %13243 = vst [vmem:[#allocation807_spill] sm:$0xff] %v10595_v56  ;;  %13244 = vst [vmem:[#allocation808_spill] sm:$0xff] %v10598_v9  ;;  %v10604_v54 = vld [vmem:[%s7989_s15 + $0x1a88] sm:$0xff]  ;;  %v10607_v11 = vld [vmem:[%s7989_s15 + $0x1a90] sm:$0xff] }
 0x1d8   : > { %13245 = vst [vmem:[#allocation809_spill] sm:$0xff] %v10601_v12  ;;  %13246 = vst [vmem:[#allocation810_spill] sm:$0xff] %v10604_v54  ;;  %v10610_v55 = vld [vmem:[%s7989_s15 + $0x1a98] sm:$0xff]  ;;  %v10613_v10 = vld [vmem:[%s7989_s15 + $0x1aa0] sm:$0xff] }
 0x1d9   : > { %13247 = vst [vmem:[#allocation811_spill] sm:$0xff] %v10607_v11  ;;  %13248 = vst [vmem:[#allocation812_spill] sm:$0xff] %v10610_v55  ;;  %v10616_v56 = vld [vmem:[%s7989_s15 + $0x1aa8] sm:$0xff]  ;;  %v10619_v9 = vld [vmem:[%s7989_s15 + $0x1ab0] sm:$0xff] }
 0x1da   : > { %13249 = vst [vmem:[#allocation813_spill] sm:$0xff] %v10613_v10  ;;  %13250 = vst [vmem:[#allocation814_spill] sm:$0xff] %v10616_v56  ;;  %v10622_v12 = vld [vmem:[%s7989_s15 + $0x1ab8] sm:$0xff]  ;;  %v10625_v54 = vld [vmem:[%s7989_s15 + $0x1ac0] sm:$0xff] }
 0x1db   : > { %13251 = vst [vmem:[#allocation815_spill] sm:$0xff] %v10619_v9  ;;  %13252 = vst [vmem:[#allocation816_spill] sm:$0xff] %v10622_v12  ;;  %v10628_v11 = vld [vmem:[%s7989_s15 + $0x1ac8] sm:$0xff]  ;;  %v10631_v55 = vld [vmem:[%s7989_s15 + $0x1ad0] sm:$0xff] }
 0x1dc   : > { %13253 = vst [vmem:[#allocation817_spill] sm:$0xff] %v10625_v54  ;;  %13254 = vst [vmem:[#allocation818_spill] sm:$0xff] %v10628_v11  ;;  %v10634_v10 = vld [vmem:[%s7989_s15 + $0x1ad8] sm:$0xff]  ;;  %v10637_v56 = vld [vmem:[%s7989_s15 + $0x1ae0] sm:$0xff] }
 0x1dd   : > { %13255 = vst [vmem:[#allocation819_spill] sm:$0xff] %v10631_v55  ;;  %13256 = vst [vmem:[#allocation820_spill] sm:$0xff] %v10634_v10  ;;  %v10640_v9 = vld [vmem:[%s7989_s15 + $0x1ae8] sm:$0xff]  ;;  %v10643_v12 = vld [vmem:[%s7989_s15 + $0x1af0] sm:$0xff] }
 0x1de   : > { %13257 = vst [vmem:[#allocation821_spill] sm:$0xff] %v10637_v56  ;;  %13258 = vst [vmem:[#allocation822_spill] sm:$0xff] %v10640_v9  ;;  %v10646_v54 = vld [vmem:[%s7989_s15 + $0x1af8] sm:$0xff]  ;;  %v10649_v11 = vld [vmem:[%s7989_s15 + $0x1b00] sm:$0xff] }
 0x1df   : > { %13259 = vst [vmem:[#allocation823_spill] sm:$0xff] %v10643_v12  ;;  %13260 = vst [vmem:[#allocation824_spill] sm:$0xff] %v10646_v54  ;;  %v10652_v55 = vld [vmem:[%s7989_s15 + $0x1b08] sm:$0xff]  ;;  %v10655_v10 = vld [vmem:[%s7989_s15 + $0x1b10] sm:$0xff] }
 0x1e0   : > { %13261 = vst [vmem:[#allocation825_spill] sm:$0xff] %v10649_v11  ;;  %13262 = vst [vmem:[#allocation826_spill] sm:$0xff] %v10652_v55  ;;  %v10658_v56 = vld [vmem:[%s7989_s15 + $0x1b18] sm:$0xff]  ;;  %v10661_v9 = vld [vmem:[%s7989_s15 + $0x1b20] sm:$0xff] }
 0x1e1   : > { %13263 = vst [vmem:[#allocation827_spill] sm:$0xff] %v10655_v10  ;;  %13264 = vst [vmem:[#allocation828_spill] sm:$0xff] %v10658_v56  ;;  %v10664_v12 = vld [vmem:[%s7989_s15 + $0x1b28] sm:$0xff]  ;;  %v10667_v54 = vld [vmem:[%s7989_s15 + $0x1b30] sm:$0xff] }
 0x1e2   : > { %13265 = vst [vmem:[#allocation829_spill] sm:$0xff] %v10661_v9  ;;  %13266 = vst [vmem:[#allocation830_spill] sm:$0xff] %v10664_v12  ;;  %v10670_v11 = vld [vmem:[%s7989_s15 + $0x1b38] sm:$0xff]  ;;  %v10673_v55 = vld [vmem:[%s7989_s15 + $0x1b40] sm:$0xff] }
 0x1e3   : > { %13267 = vst [vmem:[#allocation831_spill] sm:$0xff] %v10667_v54  ;;  %13268 = vst [vmem:[#allocation832_spill] sm:$0xff] %v10670_v11  ;;  %v10676_v10 = vld [vmem:[%s7989_s15 + $0x1b48] sm:$0xff]  ;;  %v10679_v56 = vld [vmem:[%s7989_s15 + $0x1b50] sm:$0xff] }
 0x1e4   : > { %13269 = vst [vmem:[#allocation833_spill] sm:$0xff] %v10673_v55  ;;  %13270 = vst [vmem:[#allocation834_spill] sm:$0xff] %v10676_v10  ;;  %v10682_v9 = vld [vmem:[%s7989_s15 + $0x1b58] sm:$0xff]  ;;  %v10685_v12 = vld [vmem:[%s7989_s15 + $0x1b60] sm:$0xff] }
 0x1e5   : > { %13271 = vst [vmem:[#allocation835_spill] sm:$0xff] %v10679_v56  ;;  %13272 = vst [vmem:[#allocation836_spill] sm:$0xff] %v10682_v9  ;;  %v10688_v54 = vld [vmem:[%s7989_s15 + $0x1b68] sm:$0xff]  ;;  %v10691_v11 = vld [vmem:[%s7989_s15 + $0x1b70] sm:$0xff] }
 0x1e6   : > { %13273 = vst [vmem:[#allocation837_spill] sm:$0xff] %v10685_v12  ;;  %13274 = vst [vmem:[#allocation838_spill] sm:$0xff] %v10688_v54  ;;  %v10694_v55 = vld [vmem:[%s7989_s15 + $0x1b78] sm:$0xff]  ;;  %v10697_v10 = vld [vmem:[%s7989_s15 + $0x1b80] sm:$0xff] }
 0x1e7   : > { %13275 = vst [vmem:[#allocation839_spill] sm:$0xff] %v10691_v11  ;;  %13276 = vst [vmem:[#allocation840_spill] sm:$0xff] %v10694_v55  ;;  %v10700_v56 = vld [vmem:[%s7989_s15 + $0x1b88] sm:$0xff]  ;;  %v10703_v9 = vld [vmem:[%s7989_s15 + $0x1b90] sm:$0xff] }
 0x1e8   : > { %13277 = vst [vmem:[#allocation841_spill] sm:$0xff] %v10697_v10  ;;  %13278 = vst [vmem:[#allocation842_spill] sm:$0xff] %v10700_v56  ;;  %v10706_v12 = vld [vmem:[%s7989_s15 + $0x1b98] sm:$0xff]  ;;  %v10709_v54 = vld [vmem:[%s7989_s15 + $0x1ba0] sm:$0xff] }
 0x1e9   : > { %13279 = vst [vmem:[#allocation843_spill] sm:$0xff] %v10703_v9  ;;  %13280 = vst [vmem:[#allocation844_spill] sm:$0xff] %v10706_v12  ;;  %v10712_v11 = vld [vmem:[%s7989_s15 + $0x1ba8] sm:$0xff]  ;;  %v10715_v55 = vld [vmem:[%s7989_s15 + $0x1bb0] sm:$0xff] }
 0x1ea   : > { %13281 = vst [vmem:[#allocation845_spill] sm:$0xff] %v10709_v54  ;;  %13282 = vst [vmem:[#allocation846_spill] sm:$0xff] %v10712_v11  ;;  %v10718_v10 = vld [vmem:[%s7989_s15 + $0x1bb8] sm:$0xff]  ;;  %v10721_v56 = vld [vmem:[%s7989_s15 + $0x1bc0] sm:$0xff] }
 0x1eb   : > { %13283 = vst [vmem:[#allocation847_spill] sm:$0xff] %v10715_v55  ;;  %13284 = vst [vmem:[#allocation848_spill] sm:$0xff] %v10718_v10  ;;  %v10724_v9 = vld [vmem:[%s7989_s15 + $0x1bc8] sm:$0xff]  ;;  %v10727_v12 = vld [vmem:[%s7989_s15 + $0x1bd0] sm:$0xff] }
 0x1ec   : > { %13285 = vst [vmem:[#allocation849_spill] sm:$0xff] %v10721_v56  ;;  %13286 = vst [vmem:[#allocation850_spill] sm:$0xff] %v10724_v9  ;;  %v10730_v54 = vld [vmem:[%s7989_s15 + $0x1bd8] sm:$0xff]  ;;  %v10733_v11 = vld [vmem:[%s7989_s15 + $0x1be0] sm:$0xff] }
 0x1ed   : > { %13287 = vst [vmem:[#allocation851_spill] sm:$0xff] %v10727_v12  ;;  %13288 = vst [vmem:[#allocation852_spill] sm:$0xff] %v10730_v54  ;;  %v10736_v55 = vld [vmem:[%s7989_s15 + $0x1be8] sm:$0xff]  ;;  %v10739_v10 = vld [vmem:[%s7989_s15 + $0x1bf0] sm:$0xff] }
 0x1ee   : > { %13289 = vst [vmem:[#allocation853_spill] sm:$0xff] %v10733_v11  ;;  %13290 = vst [vmem:[#allocation854_spill] sm:$0xff] %v10736_v55  ;;  %v10742_v56 = vld [vmem:[%s7989_s15 + $0x1bf8] sm:$0xff]  ;;  %v10745_v9 = vld [vmem:[%s7989_s15 + $0x1c00] sm:$0xff] }
 0x1ef   : > { %13291 = vst [vmem:[#allocation855_spill] sm:$0xff] %v10739_v10  ;;  %13292 = vst [vmem:[#allocation856_spill] sm:$0xff] %v10742_v56  ;;  %v10748_v12 = vld [vmem:[%s7989_s15 + $0x1c08] sm:$0xff]  ;;  %v10751_v54 = vld [vmem:[%s7989_s15 + $0x1c10] sm:$0xff] }
 0x1f0   : > { %13293 = vst [vmem:[#allocation857_spill] sm:$0xff] %v10745_v9  ;;  %13294 = vst [vmem:[#allocation858_spill] sm:$0xff] %v10748_v12  ;;  %v10754_v11 = vld [vmem:[%s7989_s15 + $0x1c18] sm:$0xff]  ;;  %v10757_v55 = vld [vmem:[%s7989_s15 + $0x1c20] sm:$0xff] }
 0x1f1   : > { %13295 = vst [vmem:[#allocation859_spill] sm:$0xff] %v10751_v54  ;;  %13296 = vst [vmem:[#allocation860_spill] sm:$0xff] %v10754_v11  ;;  %v10760_v10 = vld [vmem:[%s7989_s15 + $0x1c28] sm:$0xff]  ;;  %v10763_v56 = vld [vmem:[%s7989_s15 + $0x1c30] sm:$0xff] }
 0x1f2   : > { %13297 = vst [vmem:[#allocation861_spill] sm:$0xff] %v10757_v55  ;;  %13298 = vst [vmem:[#allocation862_spill] sm:$0xff] %v10760_v10  ;;  %v10766_v9 = vld [vmem:[%s7989_s15 + $0x1c38] sm:$0xff]  ;;  %v10769_v12 = vld [vmem:[%s7989_s15 + $0x1c40] sm:$0xff] }
 0x1f3   : > { %13299 = vst [vmem:[#allocation863_spill] sm:$0xff] %v10763_v56  ;;  %13300 = vst [vmem:[#allocation864_spill] sm:$0xff] %v10766_v9  ;;  %v10772_v54 = vld [vmem:[%s7989_s15 + $0x1c48] sm:$0xff]  ;;  %v10775_v11 = vld [vmem:[%s7989_s15 + $0x1c50] sm:$0xff] }
 0x1f4   : > { %13301 = vst [vmem:[#allocation865_spill] sm:$0xff] %v10769_v12  ;;  %13302 = vst [vmem:[#allocation866_spill] sm:$0xff] %v10772_v54  ;;  %v10778_v55 = vld [vmem:[%s7989_s15 + $0x1c58] sm:$0xff]  ;;  %v10781_v10 = vld [vmem:[%s7989_s15 + $0x1c60] sm:$0xff] }
 0x1f5   : > { %13303 = vst [vmem:[#allocation867_spill] sm:$0xff] %v10775_v11  ;;  %13304 = vst [vmem:[#allocation868_spill] sm:$0xff] %v10778_v55  ;;  %v10784_v56 = vld [vmem:[%s7989_s15 + $0x1c68] sm:$0xff]  ;;  %v10787_v9 = vld [vmem:[%s7989_s15 + $0x1c70] sm:$0xff] }
 0x1f6   : > { %13305 = vst [vmem:[#allocation869_spill] sm:$0xff] %v10781_v10  ;;  %13306 = vst [vmem:[#allocation870_spill] sm:$0xff] %v10784_v56  ;;  %v10790_v12 = vld [vmem:[%s7989_s15 + $0x1c78] sm:$0xff]  ;;  %v10793_v54 = vld [vmem:[%s7989_s15 + $0x1c80] sm:$0xff] }
 0x1f7   : > { %13307 = vst [vmem:[#allocation871_spill] sm:$0xff] %v10787_v9  ;;  %13308 = vst [vmem:[#allocation872_spill] sm:$0xff] %v10790_v12  ;;  %v10796_v11 = vld [vmem:[%s7989_s15 + $0x1c88] sm:$0xff]  ;;  %v10799_v55 = vld [vmem:[%s7989_s15 + $0x1c90] sm:$0xff] }
 0x1f8   : > { %13309 = vst [vmem:[#allocation873_spill] sm:$0xff] %v10793_v54  ;;  %13310 = vst [vmem:[#allocation874_spill] sm:$0xff] %v10796_v11  ;;  %v10802_v10 = vld [vmem:[%s7989_s15 + $0x1c98] sm:$0xff]  ;;  %v10805_v56 = vld [vmem:[%s7989_s15 + $0x1ca0] sm:$0xff] }
 0x1f9   : > { %13311 = vst [vmem:[#allocation875_spill] sm:$0xff] %v10799_v55  ;;  %13312 = vst [vmem:[#allocation876_spill] sm:$0xff] %v10802_v10  ;;  %v10808_v9 = vld [vmem:[%s7989_s15 + $0x1ca8] sm:$0xff]  ;;  %v10811_v12 = vld [vmem:[%s7989_s15 + $0x1cb0] sm:$0xff] }
 0x1fa   : > { %13313 = vst [vmem:[#allocation877_spill] sm:$0xff] %v10805_v56  ;;  %13314 = vst [vmem:[#allocation878_spill] sm:$0xff] %v10808_v9  ;;  %v10814_v54 = vld [vmem:[%s7989_s15 + $0x1cb8] sm:$0xff]  ;;  %v10817_v11 = vld [vmem:[%s7989_s15 + $0x1cc0] sm:$0xff] }
 0x1fb   : > { %13315 = vst [vmem:[#allocation879_spill] sm:$0xff] %v10811_v12  ;;  %13316 = vst [vmem:[#allocation880_spill] sm:$0xff] %v10814_v54  ;;  %v10820_v55 = vld [vmem:[%s7989_s15 + $0x1cc8] sm:$0xff]  ;;  %v10823_v10 = vld [vmem:[%s7989_s15 + $0x1cd0] sm:$0xff] }
 0x1fc   : > { %13317 = vst [vmem:[#allocation881_spill] sm:$0xff] %v10817_v11  ;;  %13318 = vst [vmem:[#allocation882_spill] sm:$0xff] %v10820_v55  ;;  %v10826_v56 = vld [vmem:[%s7989_s15 + $0x1cd8] sm:$0xff]  ;;  %v10829_v9 = vld [vmem:[%s7989_s15 + $0x1ce0] sm:$0xff] }
 0x1fd   : > { %13319 = vst [vmem:[#allocation883_spill] sm:$0xff] %v10823_v10  ;;  %13320 = vst [vmem:[#allocation884_spill] sm:$0xff] %v10826_v56  ;;  %v10832_v12 = vld [vmem:[%s7989_s15 + $0x1ce8] sm:$0xff]  ;;  %v10835_v54 = vld [vmem:[%s7989_s15 + $0x1cf0] sm:$0xff] }
 0x1fe   : > { %13321 = vst [vmem:[#allocation885_spill] sm:$0xff] %v10829_v9  ;;  %13322 = vst [vmem:[#allocation886_spill] sm:$0xff] %v10832_v12  ;;  %v10838_v11 = vld [vmem:[%s7989_s15 + $0x1cf8] sm:$0xff]  ;;  %v10841_v55 = vld [vmem:[%s7989_s15 + $0x1d00] sm:$0xff] }
 0x1ff   : > { %13323 = vst [vmem:[#allocation887_spill] sm:$0xff] %v10835_v54  ;;  %13324 = vst [vmem:[#allocation888_spill] sm:$0xff] %v10838_v11  ;;  %v10844_v10 = vld [vmem:[%s7989_s15 + $0x1d08] sm:$0xff]  ;;  %v10847_v56 = vld [vmem:[%s7989_s15 + $0x1d10] sm:$0xff] }
 0x200   : > { %13325 = vst [vmem:[#allocation889_spill] sm:$0xff] %v10841_v55  ;;  %13326 = vst [vmem:[#allocation890_spill] sm:$0xff] %v10844_v10  ;;  %v10850_v9 = vld [vmem:[%s7989_s15 + $0x1d18] sm:$0xff]  ;;  %v10853_v12 = vld [vmem:[%s7989_s15 + $0x1d20] sm:$0xff] }
 0x201   : > { %13327 = vst [vmem:[#allocation891_spill] sm:$0xff] %v10847_v56  ;;  %13328 = vst [vmem:[#allocation892_spill] sm:$0xff] %v10850_v9  ;;  %v10856_v54 = vld [vmem:[%s7989_s15 + $0x1d28] sm:$0xff]  ;;  %v10859_v11 = vld [vmem:[%s7989_s15 + $0x1d30] sm:$0xff] }
 0x202   : > { %13329 = vst [vmem:[#allocation893_spill] sm:$0xff] %v10853_v12  ;;  %13330 = vst [vmem:[#allocation894_spill] sm:$0xff] %v10856_v54  ;;  %v10862_v55 = vld [vmem:[%s7989_s15 + $0x1d38] sm:$0xff]  ;;  %v10865_v10 = vld [vmem:[%s7989_s15 + $0x1d40] sm:$0xff] }
 0x203   : > { %13331 = vst [vmem:[#allocation895_spill] sm:$0xff] %v10859_v11  ;;  %13332 = vst [vmem:[#allocation896_spill] sm:$0xff] %v10862_v55  ;;  %v10868_v56 = vld [vmem:[%s7989_s15 + $0x1d48] sm:$0xff]  ;;  %v10871_v9 = vld [vmem:[%s7989_s15 + $0x1d50] sm:$0xff] }
 0x204   : > { %13333 = vst [vmem:[#allocation897_spill] sm:$0xff] %v10865_v10  ;;  %13334 = vst [vmem:[#allocation898_spill] sm:$0xff] %v10868_v56  ;;  %v10874_v12 = vld [vmem:[%s7989_s15 + $0x1d58] sm:$0xff]  ;;  %v10877_v54 = vld [vmem:[%s7989_s15 + $0x1d60] sm:$0xff] }
 0x205   : > { %13335 = vst [vmem:[#allocation899_spill] sm:$0xff] %v10871_v9  ;;  %13336 = vst [vmem:[#allocation900_spill] sm:$0xff] %v10874_v12  ;;  %v10880_v11 = vld [vmem:[%s7989_s15 + $0x1d68] sm:$0xff]  ;;  %v10883_v55 = vld [vmem:[%s7989_s15 + $0x1d70] sm:$0xff] }
 0x206   : > { %13337 = vst [vmem:[#allocation901_spill] sm:$0xff] %v10877_v54  ;;  %13338 = vst [vmem:[#allocation902_spill] sm:$0xff] %v10880_v11  ;;  %v10886_v10 = vld [vmem:[%s7989_s15 + $0x1d78] sm:$0xff]  ;;  %v10889_v56 = vld [vmem:[%s7989_s15 + $0x1d80] sm:$0xff] }
 0x207   : > { %13339 = vst [vmem:[#allocation903_spill] sm:$0xff] %v10883_v55  ;;  %13340 = vst [vmem:[#allocation904_spill] sm:$0xff] %v10886_v10  ;;  %v10892_v9 = vld [vmem:[%s7989_s15 + $0x1d88] sm:$0xff]  ;;  %v10895_v12 = vld [vmem:[%s7989_s15 + $0x1d90] sm:$0xff] }
 0x208   : > { %13341 = vst [vmem:[#allocation905_spill] sm:$0xff] %v10889_v56  ;;  %13342 = vst [vmem:[#allocation906_spill] sm:$0xff] %v10892_v9  ;;  %v10898_v54 = vld [vmem:[%s7989_s15 + $0x1d98] sm:$0xff]  ;;  %v10901_v11 = vld [vmem:[%s7989_s15 + $0x1da0] sm:$0xff] }
 0x209   : > { %13343 = vst [vmem:[#allocation907_spill] sm:$0xff] %v10895_v12  ;;  %13344 = vst [vmem:[#allocation908_spill] sm:$0xff] %v10898_v54  ;;  %v10904_v55 = vld [vmem:[%s7989_s15 + $0x1da8] sm:$0xff]  ;;  %v10907_v10 = vld [vmem:[%s7989_s15 + $0x1db0] sm:$0xff] }
 0x20a   : > { %13345 = vst [vmem:[#allocation909_spill] sm:$0xff] %v10901_v11  ;;  %13346 = vst [vmem:[#allocation910_spill] sm:$0xff] %v10904_v55  ;;  %v10910_v56 = vld [vmem:[%s7989_s15 + $0x1db8] sm:$0xff]  ;;  %v10913_v9 = vld [vmem:[%s7989_s15 + $0x1dc0] sm:$0xff] }
 0x20b   : > { %13347 = vst [vmem:[#allocation911_spill] sm:$0xff] %v10907_v10  ;;  %13348 = vst [vmem:[#allocation912_spill] sm:$0xff] %v10910_v56  ;;  %v10916_v12 = vld [vmem:[%s7989_s15 + $0x1dc8] sm:$0xff]  ;;  %v10919_v54 = vld [vmem:[%s7989_s15 + $0x1dd0] sm:$0xff] }
 0x20c   : > { %13349 = vst [vmem:[#allocation913_spill] sm:$0xff] %v10913_v9  ;;  %13350 = vst [vmem:[#allocation914_spill] sm:$0xff] %v10916_v12  ;;  %v10922_v11 = vld [vmem:[%s7989_s15 + $0x1dd8] sm:$0xff]  ;;  %v10925_v55 = vld [vmem:[%s7989_s15 + $0x1de0] sm:$0xff] }
 0x20d   : > { %13351 = vst [vmem:[#allocation915_spill] sm:$0xff] %v10919_v54  ;;  %13352 = vst [vmem:[#allocation916_spill] sm:$0xff] %v10922_v11  ;;  %v10928_v10 = vld [vmem:[%s7989_s15 + $0x1de8] sm:$0xff]  ;;  %v10931_v56 = vld [vmem:[%s7989_s15 + $0x1df0] sm:$0xff] }
 0x20e   : > { %13353 = vst [vmem:[#allocation917_spill] sm:$0xff] %v10925_v55  ;;  %13354 = vst [vmem:[#allocation918_spill] sm:$0xff] %v10928_v10  ;;  %v10934_v9 = vld [vmem:[%s7989_s15 + $0x1df8] sm:$0xff]  ;;  %v10937_v12 = vld [vmem:[%s7989_s15 + $0x1e00] sm:$0xff] }
 0x20f   : > { %13355 = vst [vmem:[#allocation919_spill] sm:$0xff] %v10931_v56  ;;  %13356 = vst [vmem:[#allocation920_spill] sm:$0xff] %v10934_v9  ;;  %v10940_v54 = vld [vmem:[%s7989_s15 + $0x1e08] sm:$0xff]  ;;  %v10943_v11 = vld [vmem:[%s7989_s15 + $0x1e10] sm:$0xff] }
 0x210   : > { %13357 = vst [vmem:[#allocation921_spill] sm:$0xff] %v10937_v12  ;;  %13358 = vst [vmem:[#allocation922_spill] sm:$0xff] %v10940_v54  ;;  %v10946_v55 = vld [vmem:[%s7989_s15 + $0x1e18] sm:$0xff]  ;;  %v10949_v10 = vld [vmem:[%s7989_s15 + $0x1e20] sm:$0xff] }
 0x211   : > { %13359 = vst [vmem:[#allocation923_spill] sm:$0xff] %v10943_v11  ;;  %13360 = vst [vmem:[#allocation924_spill] sm:$0xff] %v10946_v55  ;;  %v10952_v56 = vld [vmem:[%s7989_s15 + $0x1e28] sm:$0xff]  ;;  %v10955_v9 = vld [vmem:[%s7989_s15 + $0x1e30] sm:$0xff] }
 0x212   : > { %13361 = vst [vmem:[#allocation925_spill] sm:$0xff] %v10949_v10  ;;  %13362 = vst [vmem:[#allocation926_spill] sm:$0xff] %v10952_v56  ;;  %v10958_v12 = vld [vmem:[%s7989_s15 + $0x1e38] sm:$0xff]  ;;  %v10961_v54 = vld [vmem:[%s7989_s15 + $0x1e40] sm:$0xff] }
 0x213   : > { %13363 = vst [vmem:[#allocation927_spill] sm:$0xff] %v10955_v9  ;;  %13364 = vst [vmem:[#allocation928_spill] sm:$0xff] %v10958_v12  ;;  %v10964_v11 = vld [vmem:[%s7989_s15 + $0x1e48] sm:$0xff]  ;;  %v10967_v55 = vld [vmem:[%s7989_s15 + $0x1e50] sm:$0xff] }
 0x214   : > { %13365 = vst [vmem:[#allocation929_spill] sm:$0xff] %v10961_v54  ;;  %13366 = vst [vmem:[#allocation930_spill] sm:$0xff] %v10964_v11  ;;  %v10970_v10 = vld [vmem:[%s7989_s15 + $0x1e58] sm:$0xff]  ;;  %v10973_v56 = vld [vmem:[%s7989_s15 + $0x1e60] sm:$0xff] }
 0x215   : > { %13367 = vst [vmem:[#allocation931_spill] sm:$0xff] %v10967_v55  ;;  %13368 = vst [vmem:[#allocation932_spill] sm:$0xff] %v10970_v10  ;;  %v10976_v9 = vld [vmem:[%s7989_s15 + $0x1e68] sm:$0xff]  ;;  %v10979_v12 = vld [vmem:[%s7989_s15 + $0x1e70] sm:$0xff] }
 0x216   : > { %13369 = vst [vmem:[#allocation933_spill] sm:$0xff] %v10973_v56  ;;  %13370 = vst [vmem:[#allocation934_spill] sm:$0xff] %v10976_v9  ;;  %v10982_v54 = vld [vmem:[%s7989_s15 + $0x1e78] sm:$0xff]  ;;  %v10985_v11 = vld [vmem:[%s7989_s15 + $0x1e80] sm:$0xff] }
 0x217   : > { %13371 = vst [vmem:[#allocation935_spill] sm:$0xff] %v10979_v12  ;;  %13372 = vst [vmem:[#allocation936_spill] sm:$0xff] %v10982_v54  ;;  %v10988_v55 = vld [vmem:[%s7989_s15 + $0x1e88] sm:$0xff]  ;;  %v10991_v10 = vld [vmem:[%s7989_s15 + $0x1e90] sm:$0xff] }
 0x218   : > { %13373 = vst [vmem:[#allocation937_spill] sm:$0xff] %v10985_v11  ;;  %13374 = vst [vmem:[#allocation938_spill] sm:$0xff] %v10988_v55  ;;  %v10994_v56 = vld [vmem:[%s7989_s15 + $0x1e98] sm:$0xff]  ;;  %v10997_v9 = vld [vmem:[%s7989_s15 + $0x1ea0] sm:$0xff] }
 0x219   : > { %13375 = vst [vmem:[#allocation939_spill] sm:$0xff] %v10991_v10  ;;  %13376 = vst [vmem:[#allocation940_spill] sm:$0xff] %v10994_v56  ;;  %v11000_v12 = vld [vmem:[%s7989_s15 + $0x1ea8] sm:$0xff]  ;;  %v11003_v54 = vld [vmem:[%s7989_s15 + $0x1eb0] sm:$0xff] }
 0x21a   : > { %13377 = vst [vmem:[#allocation941_spill] sm:$0xff] %v10997_v9  ;;  %13378 = vst [vmem:[#allocation942_spill] sm:$0xff] %v11000_v12  ;;  %v11006_v11 = vld [vmem:[%s7989_s15 + $0x1eb8] sm:$0xff]  ;;  %v11009_v55 = vld [vmem:[%s7989_s15 + $0x1ec0] sm:$0xff] }
 0x21b   : > { %13379 = vst [vmem:[#allocation943_spill] sm:$0xff] %v11003_v54  ;;  %13380 = vst [vmem:[#allocation944_spill] sm:$0xff] %v11006_v11  ;;  %v11012_v10 = vld [vmem:[%s7989_s15 + $0x1ec8] sm:$0xff]  ;;  %v11015_v56 = vld [vmem:[%s7989_s15 + $0x1ed0] sm:$0xff] }
 0x21c   : > { %13381 = vst [vmem:[#allocation945_spill] sm:$0xff] %v11009_v55  ;;  %13382 = vst [vmem:[#allocation946_spill] sm:$0xff] %v11012_v10  ;;  %v11018_v9 = vld [vmem:[%s7989_s15 + $0x1ed8] sm:$0xff]  ;;  %v11021_v12 = vld [vmem:[%s7989_s15 + $0x1ee0] sm:$0xff] }
 0x21d   : > { %13383 = vst [vmem:[#allocation947_spill] sm:$0xff] %v11015_v56  ;;  %13384 = vst [vmem:[#allocation948_spill] sm:$0xff] %v11018_v9  ;;  %v11024_v54 = vld [vmem:[%s7989_s15 + $0x1ee8] sm:$0xff]  ;;  %v11027_v11 = vld [vmem:[%s7989_s15 + $0x1ef0] sm:$0xff] }
 0x21e   : > { %13385 = vst [vmem:[#allocation949_spill] sm:$0xff] %v11021_v12  ;;  %13386 = vst [vmem:[#allocation950_spill] sm:$0xff] %v11024_v54  ;;  %v11030_v55 = vld [vmem:[%s7989_s15 + $0x1ef8] sm:$0xff]  ;;  %v11033_v10 = vld [vmem:[%s7989_s15 + $0x1f00] sm:$0xff] }
 0x21f   : > { %13387 = vst [vmem:[#allocation951_spill] sm:$0xff] %v11027_v11  ;;  %13388 = vst [vmem:[#allocation952_spill] sm:$0xff] %v11030_v55  ;;  %v11036_v56 = vld [vmem:[%s7989_s15 + $0x1f08] sm:$0xff]  ;;  %v11039_v9 = vld [vmem:[%s7989_s15 + $0x1f10] sm:$0xff] }
 0x220   : > { %13389 = vst [vmem:[#allocation953_spill] sm:$0xff] %v11033_v10  ;;  %13390 = vst [vmem:[#allocation954_spill] sm:$0xff] %v11036_v56  ;;  %v11042_v12 = vld [vmem:[%s7989_s15 + $0x1f18] sm:$0xff]  ;;  %v11045_v54 = vld [vmem:[%s7989_s15 + $0x1f20] sm:$0xff] }
 0x221   : > { %13391 = vst [vmem:[#allocation955_spill] sm:$0xff] %v11039_v9  ;;  %13392 = vst [vmem:[#allocation956_spill] sm:$0xff] %v11042_v12  ;;  %v11048_v11 = vld [vmem:[%s7989_s15 + $0x1f28] sm:$0xff]  ;;  %v11051_v55 = vld [vmem:[%s7989_s15 + $0x1f30] sm:$0xff] }
 0x222   : > { %13393 = vst [vmem:[#allocation957_spill] sm:$0xff] %v11045_v54  ;;  %13394 = vst [vmem:[#allocation958_spill] sm:$0xff] %v11048_v11  ;;  %v11054_v10 = vld [vmem:[%s7989_s15 + $0x1f38] sm:$0xff]  ;;  %v11057_v56 = vld [vmem:[%s7989_s15 + $0x1f40] sm:$0xff] }
 0x223   : > { %13395 = vst [vmem:[#allocation959_spill] sm:$0xff] %v11051_v55  ;;  %13396 = vst [vmem:[#allocation960_spill] sm:$0xff] %v11054_v10  ;;  %v11060_v9 = vld [vmem:[%s7989_s15 + $0x1f48] sm:$0xff]  ;;  %v11063_v12 = vld [vmem:[%s7989_s15 + $0x1f50] sm:$0xff] }
 0x224   : > { %13397 = vst [vmem:[#allocation961_spill] sm:$0xff] %v11057_v56  ;;  %13398 = vst [vmem:[#allocation962_spill] sm:$0xff] %v11060_v9  ;;  %v11066_v54 = vld [vmem:[%s7989_s15 + $0x1f58] sm:$0xff]  ;;  %v11069_v11 = vld [vmem:[%s7989_s15 + $0x1f60] sm:$0xff] }
 0x225   : > { %13399 = vst [vmem:[#allocation963_spill] sm:$0xff] %v11063_v12  ;;  %13400 = vst [vmem:[#allocation964_spill] sm:$0xff] %v11066_v54  ;;  %v11072_v55 = vld [vmem:[%s7989_s15 + $0x1f68] sm:$0xff]  ;;  %v11075_v10 = vld [vmem:[%s7989_s15 + $0x1f70] sm:$0xff] }
 0x226   : > { %13401 = vst [vmem:[#allocation965_spill] sm:$0xff] %v11069_v11  ;;  %13402 = vst [vmem:[#allocation966_spill] sm:$0xff] %v11072_v55  ;;  %v11078_v56 = vld [vmem:[%s7989_s15 + $0x1f78] sm:$0xff]  ;;  %v11081_v9 = vld [vmem:[%s7989_s15 + $0x1f80] sm:$0xff] }
 0x227   : > { %13403 = vst [vmem:[#allocation967_spill] sm:$0xff] %v11075_v10  ;;  %13404 = vst [vmem:[#allocation968_spill] sm:$0xff] %v11078_v56  ;;  %v11084_v53 = vld [vmem:[%s7989_s15 + $0x1f88] sm:$0xff]  ;;  %v11087_v12 = vld [vmem:[%s7989_s15 + $0x1f90] sm:$0xff] }
 0x228   : > { %13405 = vst [vmem:[#allocation969_spill] sm:$0xff] %v11081_v9  ;;  %13406 = vst [vmem:[#allocation970_spill] sm:$0xff] %v11084_v53  ;;  %v11090_v54 = vld [vmem:[%s7989_s15 + $0x1f98] sm:$0xff]  ;;  %v11093_v13 = vld [vmem:[%s7989_s15 + $0x1fa0] sm:$0xff] }
 0x229   : > { %13407 = vst [vmem:[#allocation971_spill] sm:$0xff] %v11087_v12  ;;  %13408 = vst [vmem:[#allocation972_spill] sm:$0xff] %v11090_v54  ;;  %v11096_v11 = vld [vmem:[%s7989_s15 + $0x1fa8] sm:$0xff]  ;;  %v11099_v55 = vld [vmem:[%s7989_s15 + $0x1fb0] sm:$0xff] }
 0x22a   : > { %13409 = vst [vmem:[#allocation973_spill] sm:$0xff] %v11093_v13  ;;  %v11102_v52 = vld [vmem:[%s7989_s15 + $0x1fb8] sm:$0xff]  ;;  %v11105_v10 = vld [vmem:[%s7989_s15 + $0x1fc0] sm:$0xff]  ;;  %v11108_v56 = vld [vmem:[%s7989_s15 + $0x1fc8] sm:$0xff]  ;;  %1274 = sbr.rel (%p7896_p7) target bundleno = 923 (0x39b), region = 32 }
 0x22b   : > { %13410 = vst [vmem:[#allocation974_spill] sm:$0xff] %v11105_v10  ;;  %13411 = vst [vmem:[#allocation975_spill] sm:$0xff] %v11108_v56  ;;  %v11111_v14 = vld [vmem:[%s7989_s15 + $0x1fd0] sm:$0xff]  ;;  %v11114_v9 = vld [vmem:[%s7989_s15 + $0x1fd8] sm:$0xff] }
 0x22c   : > { %13412 = vst [vmem:[#allocation976_spill] sm:$0xff] %v11114_v9  ;;  %v11117_v53 = vld [vmem:[%s7989_s15 + $0x1fe0] sm:$0xff]  ;;  %v11120_v12 = vld [vmem:[%s7989_s15 + $0x1fe8] sm:$0xff]  ;;  %v11123_v54 = vld [vmem:[%s7989_s15 + $0x1ff0] sm:$0xff] }
 0x22d   : > { %13413 = vst [vmem:[#allocation977_spill] sm:$0xff] %v11117_v53  ;;  %13414 = vst [vmem:[#allocation978_spill] sm:$0xff] %v11120_v12  ;;  %v11126_v13 = vld [vmem:[%s7989_s15 + $0x1ff8] sm:$0xff] }
 0x22e   : > { %13415 = vst [vmem:[#allocation979_spill] sm:$0xff] %v11123_v54  ;;  %13416 = vst [vmem:[#allocation980_spill] sm:$0xff] %v11126_v13 }
 0x22f   : > { %v1275_v10 = vadd.f32 %v8249_v58, %v8057_v1  ;;  %v1276_v56 = vadd.f32 %v8252_v59, %v8060_v2  ;;  %v1277_v9 = vadd.f32 %v8255_v60, %v8063_v3  ;;  %v1278_v53 = vadd.f32 %v8258_v61, %v8066_v4 }
 0x230   : > { %v1279_v54 = vadd.f32 %v8261_v62, %v8069_v5  ;;  %v1280_v13 = vadd.f32 %v8264_v63, %v8072_v6  ;;  %v1281_v12 = vadd.f32 %v8267_v0, %v8075_v7  ;;  %v1282_v58 = vadd.f32 %v8270_v57, %v8078_v8 }
 0x231   : > { %v1339_v59 = vadd.f32 %v1275_v10, %v8441_v35  ;;  %v1340_v2 = vadd.f32 %v1276_v56, %v8444_v34  ;;  %v1341_v60 = vadd.f32 %v1277_v9, %v8447_v33  ;;  %v1342_v61 = vadd.f32 %v1278_v53, %v8450_v32 }
 0x232   : > { %v1343_v4 = vadd.f32 %v1279_v54, %v8453_v31  ;;  %v1344_v62 = vadd.f32 %v1280_v13, %v8456_v30  ;;  %v1345_v63 = vadd.f32 %v1281_v12, %v8459_v36  ;;  %v1346_v6 = vadd.f32 %v1282_v58, %v8462_v29 }
 0x233   : > { %v1403_v0 = vadd.f32 %v1339_v59, %v8633_v44  ;;  %v1404_v57 = vadd.f32 %v1340_v2, %v8636_v41  ;;  %v1405_v10 = vadd.f32 %v1341_v60, %v8639_v24  ;;  %v1406_v56 = vadd.f32 %v1342_v61, %v8642_v42 }
 0x234   : > { %v1407_v9 = vadd.f32 %v1343_v4, %v8645_v23  ;;  %v1408_v53 = vadd.f32 %v1344_v62, %v8648_v43  ;;  %v1409_v54 = vadd.f32 %v1345_v63, %v8651_v22  ;;  %v1410_v13 = vadd.f32 %v1346_v6, %v8654_v21 }
 0x235   : > { %v1467_v12 = vadd.f32 %v1403_v0, %v8825_v17  ;;  %v1468_v58 = vadd.f32 %v1404_v57, %v8828_v20  ;;  %v1469_v59 = vadd.f32 %v1405_v10, %v8831_v46  ;;  %v1470_v2 = vadd.f32 %v1406_v56, %v8834_v19  ;;  %v13417_v57 = vld [vmem:[#allocation350_spill] sm:$0xff]  ;;  %v13418_v0 = vld [vmem:[#allocation351_spill] sm:$0xff]  ;;  %v13419_v10 = vld [vmem:[#allocation352_spill] sm:$0xff] }
 0x236   : > { %v1471_v60 = vadd.f32 %v1407_v9, %v8837_v47  ;;  %v1472_v61 = vadd.f32 %v1408_v53, %v8840_v18  ;;  %v1473_v4 = vadd.f32 %v1409_v54, %v8843_v48  ;;  %v1474_v62 = vadd.f32 %v1410_v13, %v8846_v45  ;;  %v13420_v56 = vld [vmem:[#allocation409_spill] sm:$0xff]  ;;  %v13421_v9 = vld [vmem:[#allocation410_spill] sm:$0xff]  ;;  %v13422_v53 = vld [vmem:[#allocation411_spill] sm:$0xff] }
 0x237   : > { %v1531_v63 = vadd.f32 %v1467_v12, %v9017_v25  ;;  %v1532_v6 = vadd.f32 %v1468_v58, %v9020_v40  ;;  %v1533_v17 = vadd.f32 %v1469_v59, %v9023_v26  ;;  %v1534_v20 = vadd.f32 %v1470_v2, %v9026_v39  ;;  %v13423_v54 = vld [vmem:[#allocation412_spill] sm:$0xff]  ;;  %v13424_v13 = vld [vmem:[#allocation413_spill] sm:$0xff]  ;;  %v13425_v12 = vld [vmem:[#allocation414_spill] sm:$0xff] }
 0x238   : > { %v1535_v46 = vadd.f32 %v1471_v60, %v9029_v27  ;;  %v1536_v19 = vadd.f32 %v1472_v61, %v9032_v38  ;;  %v1537_v47 = vadd.f32 %v1473_v4, %v9035_v28  ;;  %v1538_v18 = vadd.f32 %v1474_v62, %v9038_v37  ;;  %v13426_v58 = vld [vmem:[#allocation415_spill] sm:$0xff]  ;;  %v13427_v59 = vld [vmem:[#allocation416_spill] sm:$0xff]  ;;  %v13428_v60 = vld [vmem:[#allocation473_spill] sm:$0xff] }
 0x239   : > { %v1595_v48 = vadd.f32 %v1531_v63, %v9209_v49  ;;  %v1596_v45 = vadd.f32 %v1532_v6, %v9212_v16  ;;  %v1597_v25 = vadd.f32 %v1533_v17, %v9215_v50  ;;  %v1598_v40 = vadd.f32 %v1534_v20, %v9218_v15  ;;  %v13429_v4 = vld [vmem:[#allocation474_spill] sm:$0xff]  ;;  %v13430_v63 = vld [vmem:[#allocation475_spill] sm:$0xff]  ;;  %v13431_v17 = vld [vmem:[#allocation476_spill] sm:$0xff] }
 0x23a   : > { %v1599_v26 = vadd.f32 %v1535_v46, %v9221_v51  ;;  %v1600_v39 = vadd.f32 %v1536_v19, %v13417_v57  ;;  %v1601_v27 = vadd.f32 %v1537_v47, %v13418_v0  ;;  %v1602_v38 = vadd.f32 %v1538_v18, %v13419_v10  ;;  %v13432_v46 = vld [vmem:[#allocation477_spill] sm:$0xff]  ;;  %v13433_v47 = vld [vmem:[#allocation478_spill] sm:$0xff] }
 0x23b   : > { %v1659_v28 = vadd.f32 %v1595_v48, %v13420_v56  ;;  %v1660_v37 = vadd.f32 %v1596_v45, %v13421_v9  ;;  %v1661_v49 = vadd.f32 %v1597_v25, %v13422_v53  ;;  %v1662_v16 = vadd.f32 %v1598_v40, %v13423_v54  ;;  %v13434_v48 = vld [vmem:[#allocation479_spill] sm:$0xff]  ;;  %v13435_v25 = vld [vmem:[#allocation480_spill] sm:$0xff] }
 0x23c   : > { %v1663_v50 = vadd.f32 %v1599_v26, %v13424_v13  ;;  %v1664_v15 = vadd.f32 %v1600_v39, %v13425_v12  ;;  %v1665_v51 = vadd.f32 %v1601_v27, %v13426_v58  ;;  %v1666_v2 = vadd.f32 %v1602_v38, %v13427_v59  ;;  %v13436_v26 = vld [vmem:[#allocation537_spill] sm:$0xff]  ;;  %v13437_v39 = vld [vmem:[#allocation538_spill] sm:$0xff]  ;;  %v13438_v27 = vld [vmem:[#allocation539_spill] sm:$0xff] }
 0x23d   : > { %v1723_v61 = vadd.f32 %v1659_v28, %v13428_v60  ;;  %v1724_v62 = vadd.f32 %v1660_v37, %v13429_v4  ;;  %v1725_v6 = vadd.f32 %v1661_v49, %v13430_v63  ;;  %v1726_v20 = vadd.f32 %v1662_v16, %v13431_v17  ;;  %v13439_v38 = vld [vmem:[#allocation540_spill] sm:$0xff]  ;;  %v13440_v28 = vld [vmem:[#allocation541_spill] sm:$0xff]  ;;  %v13441_v37 = vld [vmem:[#allocation542_spill] sm:$0xff] }
 0x23e   : > { %v1727_v19 = vadd.f32 %v1663_v50, %v13432_v46  ;;  %v1728_v18 = vadd.f32 %v1664_v15, %v13433_v47  ;;  %v1729_v45 = vadd.f32 %v1665_v51, %v13434_v48  ;;  %v1730_v40 = vadd.f32 %v1666_v2, %v13435_v25  ;;  %v13442_v49 = vld [vmem:[#allocation543_spill] sm:$0xff]  ;;  %v13443_v16 = vld [vmem:[#allocation544_spill] sm:$0xff]  ;;  %v13444_v50 = vld [vmem:[#allocation601_spill] sm:$0xff] }
 0x23f   : > { %v1787_v57 = vadd.f32 %v1723_v61, %v13436_v26  ;;  %v1788_v0 = vadd.f32 %v1724_v62, %v13437_v39  ;;  %v1789_v10 = vadd.f32 %v1725_v6, %v13438_v27  ;;  %v1790_v56 = vadd.f32 %v1726_v20, %v13439_v38  ;;  %v13445_v15 = vld [vmem:[#allocation602_spill] sm:$0xff]  ;;  %v13446_v51 = vld [vmem:[#allocation603_spill] sm:$0xff]  ;;  %v13447_v2 = vld [vmem:[#allocation604_spill] sm:$0xff] }
 0x240   : > { %v1791_v9 = vadd.f32 %v1727_v19, %v13440_v28  ;;  %v1792_v53 = vadd.f32 %v1728_v18, %v13441_v37  ;;  %v1793_v54 = vadd.f32 %v1729_v45, %v13442_v49  ;;  %v1794_v13 = vadd.f32 %v1730_v40, %v13443_v16  ;;  %v13448_v61 = vld [vmem:[#allocation605_spill] sm:$0xff]  ;;  %v13449_v62 = vld [vmem:[#allocation606_spill] sm:$0xff]  ;;  %v13450_v6 = vld [vmem:[#allocation607_spill] sm:$0xff] }
 0x241   : > { %v1851_v12 = vadd.f32 %v1787_v57, %v13444_v50  ;;  %v1852_v58 = vadd.f32 %v1788_v0, %v13445_v15  ;;  %v1853_v59 = vadd.f32 %v1789_v10, %v13446_v51  ;;  %v1854_v60 = vadd.f32 %v1790_v56, %v13447_v2  ;;  %v13451_v20 = vld [vmem:[#allocation608_spill] sm:$0xff]  ;;  %v13452_v19 = vld [vmem:[#allocation665_spill] sm:$0xff]  ;;  %v13453_v18 = vld [vmem:[#allocation666_spill] sm:$0xff] }
 0x242   : > { %v1855_v4 = vadd.f32 %v1791_v9, %v13448_v61  ;;  %v1856_v63 = vadd.f32 %v1792_v53, %v13449_v62  ;;  %v1857_v17 = vadd.f32 %v1793_v54, %v13450_v6  ;;  %v1858_v46 = vadd.f32 %v1794_v13, %v13451_v20  ;;  %v13454_v45 = vld [vmem:[#allocation667_spill] sm:$0xff]  ;;  %v13455_v40 = vld [vmem:[#allocation668_spill] sm:$0xff]  ;;  %v13456_v57 = vld [vmem:[#allocation669_spill] sm:$0xff] }
 0x243   : > { %v1915_v47 = vadd.f32 %v1851_v12, %v13452_v19  ;;  %v1916_v48 = vadd.f32 %v1852_v58, %v13453_v18  ;;  %v1917_v25 = vadd.f32 %v1853_v59, %v13454_v45  ;;  %v1918_v26 = vadd.f32 %v1854_v60, %v13455_v40  ;;  %v13457_v0 = vld [vmem:[#allocation670_spill] sm:$0xff]  ;;  %v13458_v10 = vld [vmem:[#allocation671_spill] sm:$0xff]  ;;  %v13459_v56 = vld [vmem:[#allocation672_spill] sm:$0xff] }
 0x244   : > { %v1919_v39 = vadd.f32 %v1855_v4, %v13456_v57  ;;  %v1920_v27 = vadd.f32 %v1856_v63, %v13457_v0  ;;  %v1921_v38 = vadd.f32 %v1857_v17, %v13458_v10  ;;  %v1922_v28 = vadd.f32 %v1858_v46, %v13459_v56  ;;  %v13460_v9 = vld [vmem:[#allocation729_spill] sm:$0xff]  ;;  %v13461_v53 = vld [vmem:[#allocation730_spill] sm:$0xff]  ;;  %v13462_v54 = vld [vmem:[#allocation731_spill] sm:$0xff] }
 0x245   : > { %v1979_v37 = vadd.f32 %v1915_v47, %v13460_v9  ;;  %v1980_v49 = vadd.f32 %v1916_v48, %v13461_v53  ;;  %v1981_v16 = vadd.f32 %v1917_v25, %v13462_v54  ;;  %v13463_v13 = vld [vmem:[#allocation732_spill] sm:$0xff]  ;;  %v13464_v12 = vld [vmem:[#allocation733_spill] sm:$0xff]  ;;  %v13465_v58 = vld [vmem:[#allocation734_spill] sm:$0xff] }
 0x246   : > { %v1982_v50 = vadd.f32 %v1918_v26, %v13463_v13  ;;  %v1983_v15 = vadd.f32 %v1919_v39, %v13464_v12  ;;  %v1984_v51 = vadd.f32 %v1920_v27, %v13465_v58  ;;  %v13466_v59 = vld [vmem:[#allocation735_spill] sm:$0xff]  ;;  %v13467_v60 = vld [vmem:[#allocation736_spill] sm:$0xff]  ;;  %v13468_v4 = vld [vmem:[#allocation793_spill] sm:$0xff] }
 0x247   : > { %v1985_v2 = vadd.f32 %v1921_v38, %v13466_v59  ;;  %v1986_v61 = vadd.f32 %v1922_v28, %v13467_v60  ;;  %v2043_v62 = vadd.f32 %v1979_v37, %v13468_v4  ;;  %v13469_v63 = vld [vmem:[#allocation794_spill] sm:$0xff]  ;;  %v13470_v17 = vld [vmem:[#allocation795_spill] sm:$0xff]  ;;  %v13471_v46 = vld [vmem:[#allocation796_spill] sm:$0xff] }
 0x248   : > { %v2044_v6 = vadd.f32 %v1980_v49, %v13469_v63  ;;  %v2045_v20 = vadd.f32 %v1981_v16, %v13470_v17  ;;  %v2046_v19 = vadd.f32 %v1982_v50, %v13471_v46  ;;  %v13472_v47 = vld [vmem:[#allocation797_spill] sm:$0xff]  ;;  %v13473_v48 = vld [vmem:[#allocation798_spill] sm:$0xff]  ;;  %v13474_v25 = vld [vmem:[#allocation799_spill] sm:$0xff] }
 0x249   : > { %v2047_v18 = vadd.f32 %v1983_v15, %v13472_v47  ;;  %v2048_v45 = vadd.f32 %v1984_v51, %v13473_v48  ;;  %v2049_v40 = vadd.f32 %v1985_v2, %v13474_v25  ;;  %v13475_v26 = vld [vmem:[#allocation800_spill] sm:$0xff]  ;;  %v13476_v39 = vld [vmem:[#allocation857_spill] sm:$0xff]  ;;  %v13477_v10 = vld [vmem:[#allocation858_spill] sm:$0xff] }
 0x24a   : > { %v2050_v57 = vadd.f32 %v1986_v61, %v13475_v26  ;;  %v2107_v0 = vadd.f32 %v2043_v62, %v13476_v39  ;;  %v2235_v27 = vld [vmem:[#allocation2 + $0xb0] sm:$0xff]  ;;  %v2108_v38 = vadd.f32 %v2044_v6, %v13477_v10  ;;  %v13478_v28 = vld [vmem:[#allocation859_spill] sm:$0xff]  ;;  %v13479_v37 = vld [vmem:[#allocation860_spill] sm:$0xff] }
 0x24b   : > { %v2236_v56 = vld [vmem:[#allocation2 + $0x1b0] sm:$0xff]  ;;  %v2109_v9 = vadd.f32 %v2045_v20, %v13478_v28  ;;  %v2110_v53 = vadd.f32 %v2046_v19, %v13479_v37  ;;  %v2237_v49 = vld [vmem:[#allocation2 + $0xd8] sm:$0xff]  ;;  %v13482_v58 = vld [vmem:[#allocation863_spill] sm:$0xff] }
 0x24c   : > { %v2238_v54 = vld [vmem:[#allocation2 + $0x18] sm:$0xff]  ;;  %v13480_v16 = vld [vmem:[#allocation861_spill] sm:$0xff]  ;;  %v2113_v51 = vadd.f32 %v2049_v40, %v13482_v58  ;;  %v13483_v59 = vld [vmem:[#allocation864_spill] sm:$0xff] }
 0x24d   : > { %v2111_v13 = vadd.f32 %v2047_v18, %v13480_v16  ;;  %v2239_v50 = vld [vmem:[#allocation2 + $0x50] sm:$0xff]  ;;  %v13481_v12 = vld [vmem:[#allocation862_spill] sm:$0xff]  ;;  %v2114_v2 = vadd.f32 %v2050_v57, %v13483_v59  ;;  %v13486_v63 = vld [vmem:[#allocation923_spill] sm:$0xff] }
 0x24e   : > { %v2112_v15 = vadd.f32 %v2048_v45, %v13481_v12  ;;  %v13484_v60 = vld [vmem:[#allocation921_spill] sm:$0xff]  ;;  %v13485_v4 = vld [vmem:[#allocation922_spill] sm:$0xff]  ;;  %v2173_v6 = vadd.f32 %v2109_v9, %v13486_v63  ;;  %v13487_v17 = vld [vmem:[#allocation924_spill] sm:$0xff] }
 0x24f   : > { %v2171_v61 = vadd.f32 %v2107_v0, %v13484_v60  ;;  %v2172_v62 = vadd.f32 %v2108_v38, %v13485_v4  ;;  %v2174_v20 = vadd.f32 %v2110_v53, %v13487_v17  ;;  %v2240_v46 = vld [vmem:[#allocation2 + $0x168] sm:$0xff]  ;;  %v2241_v19 = vld [vmem:[#allocation2 + $0x130] sm:$0xff]  ;;  %v13489_v25 = vld [vmem:[#allocation926_spill] sm:$0xff] }
 0x250   : > { %v2242_v47 = vld [vmem:[#allocation2 + $0x48] sm:$0xff]  ;;  %v13488_v48 = vld [vmem:[#allocation925_spill] sm:$0xff]  ;;  %v2176_v26 = vadd.f32 %v2112_v15, %v13489_v25  ;;  %v13490_v45 = vld [vmem:[#allocation927_spill] sm:$0xff]  ;;  %v2301_v0 = vadd.f32 %v2237_v49, %v2173_v6 }
 0x251   : > { %v2175_v18 = vadd.f32 %v2111_v13, %v13488_v48  ;;  %v2177_v39 = vadd.f32 %v2113_v51, %v13490_v45  ;;  %v13491_v40 = vld [vmem:[#allocation928_spill] sm:$0xff]  ;;  %v2299_v57 = vadd.f32 %v2235_v27, %v2171_v61  ;;  %v2300_v28 = vadd.f32 %v2236_v56, %v2172_v62  ;;  %v13492_v53 = vld [vmem:[#allocation6_spill] sm:$0xff]  ;;  %v13494_v15 = vld [vmem:[#allocation7_spill] sm:$0xff] }
 0x252   : > { %v2178_v10 = vadd.f32 %v2114_v2, %v13491_v40  ;;  %v2302_v37 = vadd.f32 %v2238_v54, %v2174_v20  ;;  %v2304_v16 = vadd.f32 %v2240_v46, %v2176_v26  ;;  %2365 = vst [vmem:[#allocation2 + $0xd8] sm:$0xff] %v2301_v0  ;;  %v13493_v13 = vld [vmem:[#allocation70_spill] sm:$0xff]  ;;  %v13495_v59 = vld [vmem:[#allocation71_spill] sm:$0xff]  ;;  %v13496_v60 = vld [vmem:[#allocation8_spill] sm:$0xff] }
 0x253   : > { %v2303_v38 = vadd.f32 %v2239_v50, %v2175_v18  ;;  %v2305_v9 = vadd.f32 %v2241_v19, %v2177_v39  ;;  %2363 = vst [vmem:[#allocation2 + $0xb0] sm:$0xff] %v2299_v57  ;;  %2364 = vst [vmem:[#allocation2 + $0x1b0] sm:$0xff] %v2300_v28  ;;  %v1283_v58 = vadd.f32 %v13493_v13, %v13492_v53  ;;  %v13497_v2 = vld [vmem:[#allocation72_spill] sm:$0xff]  ;;  %v13498_v56 = vld [vmem:[#allocation9_spill] sm:$0xff] }
 0x254   : > { %v2306_v12 = vadd.f32 %v2242_v47, %v2178_v10  ;;  %2366 = vst [vmem:[#allocation2 + $0x18] sm:$0xff] %v2302_v37  ;;  %v1284_v51 = vadd.f32 %v13495_v59, %v13494_v15  ;;  %v1285_v27 = vadd.f32 %v13497_v2, %v13496_v60  ;;  %v13499_v49 = vld [vmem:[#allocation73_spill] sm:$0xff]  ;;  %2368 = vst [vmem:[#allocation2 + $0x168] sm:$0xff] %v2304_v16  ;;  %v13500_v50 = vld [vmem:[#allocation10_spill] sm:$0xff] }
 0x255   : > { %v1286_v54 = vadd.f32 %v13499_v49, %v13498_v56  ;;  %2367 = vst [vmem:[#allocation2 + $0x50] sm:$0xff] %v2303_v38  ;;  %2369 = vst [vmem:[#allocation2 + $0x130] sm:$0xff] %v2305_v9  ;;  %v13501_v61 = vld [vmem:[#allocation74_spill] sm:$0xff]  ;;  %v13502_v62 = vld [vmem:[#allocation11_spill] sm:$0xff] }
 0x256   : > { %2370 = vst [vmem:[#allocation2 + $0x48] sm:$0xff] %v2306_v12  ;;  %v1287_v4 = vadd.f32 %v13501_v61, %v13500_v50  ;;  %v13503_v63 = vld [vmem:[#allocation75_spill] sm:$0xff]  ;;  %v13504_v17 = vld [vmem:[#allocation12_spill] sm:$0xff]  ;;  %v13506_v19 = vld [vmem:[#allocation13_spill] sm:$0xff] }
 0x257   : > { %v1288_v6 = vadd.f32 %v13503_v63, %v13502_v62  ;;  %v13505_v20 = vld [vmem:[#allocation76_spill] sm:$0xff]  ;;  %v13507_v47 = vld [vmem:[#allocation77_spill] sm:$0xff]  ;;  %v13508_v18 = vld [vmem:[#allocation126_spill] sm:$0xff] }
 0x258   : > { %v1289_v46 = vadd.f32 %v13505_v20, %v13504_v17  ;;  %v1290_v48 = vadd.f32 %v13507_v47, %v13506_v19  ;;  %v1347_v25 = vadd.f32 %v1283_v58, %v13508_v18  ;;  %v13509_v26 = vld [vmem:[#allocation127_spill] sm:$0xff]  ;;  %v13510_v39 = vld [vmem:[#allocation128_spill] sm:$0xff]  ;;  %v13511_v10 = vld [vmem:[#allocation129_spill] sm:$0xff] }
 0x259   : > { %v1348_v45 = vadd.f32 %v1284_v51, %v13509_v26  ;;  %v1349_v40 = vadd.f32 %v1285_v27, %v13510_v39  ;;  %v1350_v57 = vadd.f32 %v1286_v54, %v13511_v10  ;;  %v13512_v28 = vld [vmem:[#allocation130_spill] sm:$0xff]  ;;  %v13513_v37 = vld [vmem:[#allocation131_spill] sm:$0xff]  ;;  %v13514_v16 = vld [vmem:[#allocation132_spill] sm:$0xff] }
 0x25a   : > { %v1351_v0 = vadd.f32 %v1287_v4, %v13512_v28  ;;  %v1352_v38 = vadd.f32 %v1288_v6, %v13513_v37  ;;  %v1353_v9 = vadd.f32 %v1289_v46, %v13514_v16  ;;  %v13515_v12 = vld [vmem:[#allocation133_spill] sm:$0xff]  ;;  %v13516_v13 = vld [vmem:[#allocation182_spill] sm:$0xff]  ;;  %v13517_v59 = vld [vmem:[#allocation183_spill] sm:$0xff] }
 0x25b   : > { %v1354_v53 = vadd.f32 %v1290_v48, %v13515_v12  ;;  %v1411_v15 = vadd.f32 %v1347_v25, %v13516_v13  ;;  %v1412_v60 = vadd.f32 %v1348_v45, %v13517_v59  ;;  %v13518_v2 = vld [vmem:[#allocation184_spill] sm:$0xff]  ;;  %v13519_v56 = vld [vmem:[#allocation185_spill] sm:$0xff]  ;;  %v13520_v49 = vld [vmem:[#allocation186_spill] sm:$0xff] }
 0x25c   : > { %v1413_v58 = vadd.f32 %v1349_v40, %v13518_v2  ;;  %v1414_v51 = vadd.f32 %v1350_v57, %v13519_v56  ;;  %v1415_v27 = vadd.f32 %v1351_v0, %v13520_v49  ;;  %v13521_v50 = vld [vmem:[#allocation187_spill] sm:$0xff]  ;;  %v13522_v61 = vld [vmem:[#allocation188_spill] sm:$0xff]  ;;  %v13523_v62 = vld [vmem:[#allocation189_spill] sm:$0xff] }
 0x25d   : > { %v1416_v54 = vadd.f32 %v1352_v38, %v13521_v50  ;;  %v1417_v4 = vadd.f32 %v1353_v9, %v13522_v61  ;;  %v1418_v63 = vadd.f32 %v1354_v53, %v13523_v62  ;;  %v13524_v6 = vld [vmem:[#allocation238_spill] sm:$0xff]  ;;  %v13525_v20 = vld [vmem:[#allocation239_spill] sm:$0xff]  ;;  %v13526_v19 = vld [vmem:[#allocation240_spill] sm:$0xff] }
 0x25e   : > { %v1475_v17 = vadd.f32 %v1411_v15, %v13524_v6  ;;  %v1476_v46 = vadd.f32 %v1412_v60, %v13525_v20  ;;  %v1477_v47 = vadd.f32 %v1413_v58, %v13526_v19  ;;  %v13527_v48 = vld [vmem:[#allocation241_spill] sm:$0xff]  ;;  %v13528_v25 = vld [vmem:[#allocation242_spill] sm:$0xff]  ;;  %v13529_v45 = vld [vmem:[#allocation243_spill] sm:$0xff] }
 0x25f   : > { %v1478_v18 = vadd.f32 %v1414_v51, %v13527_v48  ;;  %v1479_v26 = vadd.f32 %v1415_v27, %v13528_v25  ;;  %v1480_v39 = vadd.f32 %v1416_v54, %v13529_v45  ;;  %v13530_v40 = vld [vmem:[#allocation244_spill] sm:$0xff]  ;;  %v13531_v57 = vld [vmem:[#allocation245_spill] sm:$0xff]  ;;  %v13532_v0 = vld [vmem:[#allocation294_spill] sm:$0xff] }
 0x260   : > { %v1481_v10 = vadd.f32 %v1417_v4, %v13530_v40  ;;  %v1482_v28 = vadd.f32 %v1418_v63, %v13531_v57  ;;  %v1539_v37 = vadd.f32 %v1475_v17, %v13532_v0  ;;  %v13533_v38 = vld [vmem:[#allocation295_spill] sm:$0xff]  ;;  %v13534_v9 = vld [vmem:[#allocation296_spill] sm:$0xff]  ;;  %v13535_v53 = vld [vmem:[#allocation297_spill] sm:$0xff] }
 0x261   : > { %v1540_v16 = vadd.f32 %v1476_v46, %v13533_v38  ;;  %v1541_v12 = vadd.f32 %v1477_v47, %v13534_v9  ;;  %v1542_v13 = vadd.f32 %v1478_v18, %v13535_v53  ;;  %v13536_v15 = vld [vmem:[#allocation298_spill] sm:$0xff]  ;;  %v13537_v60 = vld [vmem:[#allocation299_spill] sm:$0xff]  ;;  %v13538_v58 = vld [vmem:[#allocation300_spill] sm:$0xff] }
 0x262   : > { %v1543_v59 = vadd.f32 %v1479_v26, %v13536_v15  ;;  %v1544_v2 = vadd.f32 %v1480_v39, %v13537_v60  ;;  %v1545_v56 = vadd.f32 %v1481_v10, %v13538_v58  ;;  %v13539_v51 = vld [vmem:[#allocation301_spill] sm:$0xff]  ;;  %v13541_v54 = vld [vmem:[#allocation354_spill] sm:$0xff]  ;;  %v13542_v4 = vld [vmem:[#allocation355_spill] sm:$0xff] }
 0x263   : > { %v1546_v49 = vadd.f32 %v1482_v28, %v13539_v51  ;;  %v13540_v27 = vld [vmem:[#allocation353_spill] sm:$0xff]  ;;  %v1604_v61 = vadd.f32 %v1540_v16, %v13541_v54  ;;  %v1605_v62 = vadd.f32 %v1541_v12, %v13542_v4  ;;  %v13543_v63 = vld [vmem:[#allocation356_spill] sm:$0xff]  ;;  %v13545_v46 = vld [vmem:[#allocation358_spill] sm:$0xff] }
 0x264   : > { %v1603_v50 = vadd.f32 %v1539_v37, %v13540_v27  ;;  %v1606_v6 = vadd.f32 %v1542_v13, %v13543_v63  ;;  %v13544_v17 = vld [vmem:[#allocation357_spill] sm:$0xff]  ;;  %v1608_v19 = vadd.f32 %v1544_v2, %v13545_v46  ;;  %v13546_v47 = vld [vmem:[#allocation359_spill] sm:$0xff]  ;;  %v13547_v18 = vld [vmem:[#allocation360_spill] sm:$0xff] }
 0x265   : > { %v1607_v20 = vadd.f32 %v1543_v59, %v13544_v17  ;;  %v1609_v48 = vadd.f32 %v1545_v56, %v13546_v47  ;;  %v1610_v25 = vadd.f32 %v1546_v49, %v13547_v18  ;;  %v13548_v26 = vld [vmem:[#allocation417_spill] sm:$0xff]  ;;  %v13549_v39 = vld [vmem:[#allocation418_spill] sm:$0xff]  ;;  %v13550_v10 = vld [vmem:[#allocation419_spill] sm:$0xff] }
 0x266   : > { %v1667_v45 = vadd.f32 %v1603_v50, %v13548_v26  ;;  %v1668_v40 = vadd.f32 %v1604_v61, %v13549_v39  ;;  %v1669_v57 = vadd.f32 %v1605_v62, %v13550_v10  ;;  %v13551_v28 = vld [vmem:[#allocation420_spill] sm:$0xff]  ;;  %v13552_v37 = vld [vmem:[#allocation421_spill] sm:$0xff]  ;;  %v13553_v16 = vld [vmem:[#allocation422_spill] sm:$0xff] }
 0x267   : > { %v1670_v0 = vadd.f32 %v1606_v6, %v13551_v28  ;;  %v1671_v38 = vadd.f32 %v1607_v20, %v13552_v37  ;;  %v1672_v9 = vadd.f32 %v1608_v19, %v13553_v16  ;;  %v13554_v12 = vld [vmem:[#allocation423_spill] sm:$0xff]  ;;  %v13555_v13 = vld [vmem:[#allocation424_spill] sm:$0xff]  ;;  %v13556_v59 = vld [vmem:[#allocation481_spill] sm:$0xff] }
 0x268   : > { %v1673_v53 = vadd.f32 %v1609_v48, %v13554_v12  ;;  %v1674_v15 = vadd.f32 %v1610_v25, %v13555_v13  ;;  %v1731_v60 = vadd.f32 %v1667_v45, %v13556_v59  ;;  %v13557_v2 = vld [vmem:[#allocation482_spill] sm:$0xff]  ;;  %v13558_v56 = vld [vmem:[#allocation483_spill] sm:$0xff]  ;;  %v13559_v49 = vld [vmem:[#allocation484_spill] sm:$0xff] }
 0x269   : > { %v1732_v58 = vadd.f32 %v1668_v40, %v13557_v2  ;;  %v1733_v51 = vadd.f32 %v1669_v57, %v13558_v56  ;;  %v1734_v27 = vadd.f32 %v1670_v0, %v13559_v49  ;;  %v13560_v50 = vld [vmem:[#allocation485_spill] sm:$0xff]  ;;  %v13561_v61 = vld [vmem:[#allocation486_spill] sm:$0xff]  ;;  %v13562_v62 = vld [vmem:[#allocation487_spill] sm:$0xff] }
 0x26a   : > { %v1735_v54 = vadd.f32 %v1671_v38, %v13560_v50  ;;  %v1736_v4 = vadd.f32 %v1672_v9, %v13561_v61  ;;  %v1737_v63 = vadd.f32 %v1673_v53, %v13562_v62  ;;  %v13563_v6 = vld [vmem:[#allocation488_spill] sm:$0xff]  ;;  %v13564_v20 = vld [vmem:[#allocation545_spill] sm:$0xff]  ;;  %v13565_v19 = vld [vmem:[#allocation546_spill] sm:$0xff] }
 0x26b   : > { %v1738_v17 = vadd.f32 %v1674_v15, %v13563_v6  ;;  %v1795_v46 = vadd.f32 %v1731_v60, %v13564_v20  ;;  %v1796_v47 = vadd.f32 %v1732_v58, %v13565_v19  ;;  %v13566_v48 = vld [vmem:[#allocation547_spill] sm:$0xff]  ;;  %v13567_v25 = vld [vmem:[#allocation548_spill] sm:$0xff]  ;;  %v13568_v45 = vld [vmem:[#allocation549_spill] sm:$0xff] }
 0x26c   : > { %v1797_v18 = vadd.f32 %v1733_v51, %v13566_v48  ;;  %v1798_v26 = vadd.f32 %v1734_v27, %v13567_v25  ;;  %v1799_v39 = vadd.f32 %v1735_v54, %v13568_v45  ;;  %v13569_v40 = vld [vmem:[#allocation550_spill] sm:$0xff]  ;;  %v13570_v57 = vld [vmem:[#allocation551_spill] sm:$0xff]  ;;  %v13571_v0 = vld [vmem:[#allocation552_spill] sm:$0xff] }
 0x26d   : > { %v1800_v10 = vadd.f32 %v1736_v4, %v13569_v40  ;;  %v1801_v28 = vadd.f32 %v1737_v63, %v13570_v57  ;;  %v1802_v37 = vadd.f32 %v1738_v17, %v13571_v0  ;;  %v13572_v38 = vld [vmem:[#allocation609_spill] sm:$0xff]  ;;  %v13573_v9 = vld [vmem:[#allocation610_spill] sm:$0xff]  ;;  %v13574_v53 = vld [vmem:[#allocation611_spill] sm:$0xff] }
 0x26e   : > { %v1859_v16 = vadd.f32 %v1795_v46, %v13572_v38  ;;  %v1860_v12 = vadd.f32 %v1796_v47, %v13573_v9  ;;  %v1861_v13 = vadd.f32 %v1797_v18, %v13574_v53  ;;  %v13575_v15 = vld [vmem:[#allocation612_spill] sm:$0xff]  ;;  %v13576_v60 = vld [vmem:[#allocation613_spill] sm:$0xff]  ;;  %v13577_v58 = vld [vmem:[#allocation614_spill] sm:$0xff] }
 0x26f   : > { %v1862_v59 = vadd.f32 %v1798_v26, %v13575_v15  ;;  %v1863_v2 = vadd.f32 %v1799_v39, %v13576_v60  ;;  %v1864_v56 = vadd.f32 %v1800_v10, %v13577_v58  ;;  %v13578_v51 = vld [vmem:[#allocation615_spill] sm:$0xff]  ;;  %v13579_v27 = vld [vmem:[#allocation616_spill] sm:$0xff]  ;;  %v13580_v54 = vld [vmem:[#allocation673_spill] sm:$0xff] }
 0x270   : > { %v1865_v49 = vadd.f32 %v1801_v28, %v13578_v51  ;;  %v1866_v50 = vadd.f32 %v1802_v37, %v13579_v27  ;;  %v1923_v61 = vadd.f32 %v1859_v16, %v13580_v54  ;;  %v13581_v4 = vld [vmem:[#allocation674_spill] sm:$0xff]  ;;  %v13582_v63 = vld [vmem:[#allocation675_spill] sm:$0xff]  ;;  %v13583_v17 = vld [vmem:[#allocation676_spill] sm:$0xff] }
 0x271   : > { %v1924_v62 = vadd.f32 %v1860_v12, %v13581_v4  ;;  %v1925_v6 = vadd.f32 %v1861_v13, %v13582_v63  ;;  %v1926_v20 = vadd.f32 %v1862_v59, %v13583_v17  ;;  %v13584_v46 = vld [vmem:[#allocation677_spill] sm:$0xff]  ;;  %v13585_v47 = vld [vmem:[#allocation678_spill] sm:$0xff]  ;;  %v13586_v18 = vld [vmem:[#allocation679_spill] sm:$0xff] }
 0x272   : > { %v1927_v19 = vadd.f32 %v1863_v2, %v13584_v46  ;;  %v1928_v48 = vadd.f32 %v1864_v56, %v13585_v47  ;;  %v1929_v25 = vadd.f32 %v1865_v49, %v13586_v18  ;;  %v13587_v26 = vld [vmem:[#allocation680_spill] sm:$0xff]  ;;  %v13588_v39 = vld [vmem:[#allocation737_spill] sm:$0xff]  ;;  %v13589_v10 = vld [vmem:[#allocation738_spill] sm:$0xff] }
 0x273   : > { %v1930_v45 = vadd.f32 %v1866_v50, %v13587_v26  ;;  %v1987_v40 = vadd.f32 %v1923_v61, %v13588_v39  ;;  %v1988_v57 = vadd.f32 %v1924_v62, %v13589_v10  ;;  %v13590_v28 = vld [vmem:[#allocation739_spill] sm:$0xff]  ;;  %v13591_v37 = vld [vmem:[#allocation740_spill] sm:$0xff]  ;;  %v13592_v16 = vld [vmem:[#allocation741_spill] sm:$0xff] }
 0x274   : > { %v1989_v0 = vadd.f32 %v1925_v6, %v13590_v28  ;;  %v1990_v38 = vadd.f32 %v1926_v20, %v13591_v37  ;;  %v1991_v9 = vadd.f32 %v1927_v19, %v13592_v16  ;;  %v13593_v12 = vld [vmem:[#allocation742_spill] sm:$0xff]  ;;  %v13594_v13 = vld [vmem:[#allocation743_spill] sm:$0xff]  ;;  %v13595_v59 = vld [vmem:[#allocation744_spill] sm:$0xff] }
 0x275   : > { %v1992_v53 = vadd.f32 %v1928_v48, %v13593_v12  ;;  %v1993_v15 = vadd.f32 %v1929_v25, %v13594_v13  ;;  %v1994_v60 = vadd.f32 %v1930_v45, %v13595_v59  ;;  %v13596_v2 = vld [vmem:[#allocation801_spill] sm:$0xff]  ;;  %v13597_v56 = vld [vmem:[#allocation802_spill] sm:$0xff]  ;;  %v13598_v49 = vld [vmem:[#allocation803_spill] sm:$0xff] }
 0x276   : > { %v2051_v58 = vadd.f32 %v1987_v40, %v13596_v2  ;;  %v2052_v51 = vadd.f32 %v1988_v57, %v13597_v56  ;;  %v2053_v27 = vadd.f32 %v1989_v0, %v13598_v49  ;;  %v13599_v50 = vld [vmem:[#allocation804_spill] sm:$0xff]  ;;  %v13600_v61 = vld [vmem:[#allocation805_spill] sm:$0xff]  ;;  %v13601_v62 = vld [vmem:[#allocation806_spill] sm:$0xff] }
 0x277   : > { %v2054_v54 = vadd.f32 %v1990_v38, %v13599_v50  ;;  %v2055_v4 = vadd.f32 %v1991_v9, %v13600_v61  ;;  %v2056_v63 = vadd.f32 %v1992_v53, %v13601_v62  ;;  %v13602_v6 = vld [vmem:[#allocation807_spill] sm:$0xff]  ;;  %v13603_v20 = vld [vmem:[#allocation808_spill] sm:$0xff]  ;;  %v13604_v19 = vld [vmem:[#allocation865_spill] sm:$0xff] }
 0x278   : > { %v2057_v17 = vadd.f32 %v1993_v15, %v13602_v6  ;;  %v2058_v46 = vadd.f32 %v1994_v60, %v13603_v20  ;;  %v2115_v47 = vadd.f32 %v2051_v58, %v13604_v19  ;;  %v2243_v48 = vld [vmem:[#allocation2 + $0x180] sm:$0xff]  ;;  %v13605_v18 = vld [vmem:[#allocation866_spill] sm:$0xff]  ;;  %v2244_v26 = vld [vmem:[#allocation2 + $0x110] sm:$0xff] }
 0x279   : > { %v2116_v25 = vadd.f32 %v2052_v51, %v13605_v18  ;;  %v13606_v45 = vld [vmem:[#allocation867_spill] sm:$0xff]  ;;  %v13607_v40 = vld [vmem:[#allocation868_spill] sm:$0xff]  ;;  %v2245_v57 = vld [vmem:[#allocation2 + $0x118] sm:$0xff] }
 0x27a   : > { %v2117_v39 = vadd.f32 %v2053_v27, %v13606_v45  ;;  %v2118_v10 = vadd.f32 %v2054_v54, %v13607_v40  ;;  %v2246_v28 = vld [vmem:[#allocation2 + $0x98] sm:$0xff]  ;;  %v13608_v0 = vld [vmem:[#allocation869_spill] sm:$0xff]  ;;  %v2247_v38 = vld [vmem:[#allocation2 + $0x120] sm:$0xff] }
 0x27b   : > { %v2119_v37 = vadd.f32 %v2055_v4, %v13608_v0  ;;  %v13609_v16 = vld [vmem:[#allocation870_spill] sm:$0xff]  ;;  %v13610_v12 = vld [vmem:[#allocation871_spill] sm:$0xff]  ;;  %v13611_v13 = vld [vmem:[#allocation872_spill] sm:$0xff] }
 0x27c   : > { %v2120_v9 = vadd.f32 %v2056_v63, %v13609_v16  ;;  %v2121_v53 = vadd.f32 %v2057_v17, %v13610_v12  ;;  %v2122_v15 = vadd.f32 %v2058_v46, %v13611_v13  ;;  %v13612_v59 = vld [vmem:[#allocation929_spill] sm:$0xff]  ;;  %v13613_v2 = vld [vmem:[#allocation930_spill] sm:$0xff]  ;;  %v13614_v56 = vld [vmem:[#allocation931_spill] sm:$0xff] }
 0x27d   : > { %v2179_v60 = vadd.f32 %v2115_v47, %v13612_v59  ;;  %v2180_v58 = vadd.f32 %v2116_v25, %v13613_v2  ;;  %v2181_v51 = vadd.f32 %v2117_v39, %v13614_v56  ;;  %v13615_v49 = vld [vmem:[#allocation932_spill] sm:$0xff]  ;;  %v2248_v50 = vld [vmem:[#allocation2 + $0x150] sm:$0xff]  ;;  %v2250_v61 = vld [vmem:[#allocation2 + $0x60] sm:$0xff] }
 0x27e   : > { %v2182_v27 = vadd.f32 %v2118_v10, %v13615_v49  ;;  %v2249_v54 = vld [vmem:[#allocation2 + $0x108] sm:$0xff]  ;;  %v13616_v62 = vld [vmem:[#allocation933_spill] sm:$0xff]  ;;  %v13617_v6 = vld [vmem:[#allocation934_spill] sm:$0xff] }
 0x27f   : > { %v2183_v4 = vadd.f32 %v2119_v37, %v13616_v62  ;;  %v2184_v20 = vadd.f32 %v2120_v9, %v13617_v6  ;;  %v13618_v63 = vld [vmem:[#allocation935_spill] sm:$0xff]  ;;  %v13619_v17 = vld [vmem:[#allocation936_spill] sm:$0xff]  ;;  %v2307_v46 = vadd.f32 %v2243_v48, %v2179_v60  ;;  %v2308_v45 = vadd.f32 %v2244_v26, %v2180_v58  ;;  %v13620_v10 = vld [vmem:[#allocation14_spill] sm:$0xff] }
 0x280   : > { %v2185_v19 = vadd.f32 %v2121_v53, %v13618_v63  ;;  %v2186_v18 = vadd.f32 %v2122_v15, %v13619_v17  ;;  %v2309_v47 = vadd.f32 %v2245_v57, %v2181_v51  ;;  %v2310_v40 = vadd.f32 %v2246_v28, %v2182_v27  ;;  %v13621_v37 = vld [vmem:[#allocation78_spill] sm:$0xff]  ;;  %v13622_v9 = vld [vmem:[#allocation15_spill] sm:$0xff]  ;;  %v13624_v59 = vld [vmem:[#allocation16_spill] sm:$0xff] }
 0x281   : > { %v2311_v25 = vadd.f32 %v2247_v38, %v2183_v4  ;;  %v2312_v0 = vadd.f32 %v2248_v50, %v2184_v20  ;;  %2371 = vst [vmem:[#allocation2 + $0x180] sm:$0xff] %v2307_v46  ;;  %2372 = vst [vmem:[#allocation2 + $0x110] sm:$0xff] %v2308_v45  ;;  %v1291_v12 = vadd.f32 %v13621_v37, %v13620_v10  ;;  %v13623_v13 = vld [vmem:[#allocation79_spill] sm:$0xff]  ;;  %v13625_v15 = vld [vmem:[#allocation80_spill] sm:$0xff] }
 0x282   : > { %v2313_v39 = vadd.f32 %v2249_v54, %v2185_v19  ;;  %v2314_v16 = vadd.f32 %v2250_v61, %v2186_v18  ;;  %2373 = vst [vmem:[#allocation2 + $0x118] sm:$0xff] %v2309_v47  ;;  %2374 = vst [vmem:[#allocation2 + $0x98] sm:$0xff] %v2310_v40  ;;  %v1292_v53 = vadd.f32 %v13623_v13, %v13622_v9  ;;  %v13626_v26 = vld [vmem:[#allocation17_spill] sm:$0xff]  ;;  %v13628_v38 = vld [vmem:[#allocation18_spill] sm:$0xff] }
 0x283   : > { %v1293_v48 = vadd.f32 %v13625_v15, %v13624_v59  ;;  %v13627_v57 = vld [vmem:[#allocation81_spill] sm:$0xff]  ;;  %2375 = vst [vmem:[#allocation2 + $0x120] sm:$0xff] %v2311_v25  ;;  %2376 = vst [vmem:[#allocation2 + $0x150] sm:$0xff] %v2312_v0  ;;  %v13629_v60 = vld [vmem:[#allocation82_spill] sm:$0xff] }
 0x284   : > { %v1294_v28 = vadd.f32 %v13627_v57, %v13626_v26  ;;  %2377 = vst [vmem:[#allocation2 + $0x108] sm:$0xff] %v2313_v39  ;;  %2378 = vst [vmem:[#allocation2 + $0x60] sm:$0xff] %v2314_v16  ;;  %v1295_v2 = vadd.f32 %v13629_v60, %v13628_v38  ;;  %v13630_v58 = vld [vmem:[#allocation19_spill] sm:$0xff]  ;;  %v13632_v49 = vld [vmem:[#allocation20_spill] sm:$0xff] }
 0x285   : > { %v13631_v56 = vld [vmem:[#allocation83_spill] sm:$0xff]  ;;  %v13633_v27 = vld [vmem:[#allocation84_spill] sm:$0xff]  ;;  %v13634_v54 = vld [vmem:[#allocation21_spill] sm:$0xff] }
 0x286   : > { %v1296_v51 = vadd.f32 %v13631_v56, %v13630_v58  ;;  %v1297_v50 = vadd.f32 %v13633_v27, %v13632_v49  ;;  %v13635_v61 = vld [vmem:[#allocation85_spill] sm:$0xff]  ;;  %v13636_v4 = vld [vmem:[#allocation134_spill] sm:$0xff]  ;;  %v13637_v20 = vld [vmem:[#allocation135_spill] sm:$0xff] }
 0x287   : > { %v1298_v62 = vadd.f32 %v13635_v61, %v13634_v54  ;;  %v1355_v6 = vadd.f32 %v1291_v12, %v13636_v4  ;;  %v1356_v63 = vadd.f32 %v1292_v53, %v13637_v20  ;;  %v13638_v19 = vld [vmem:[#allocation136_spill] sm:$0xff]  ;;  %v13639_v18 = vld [vmem:[#allocation137_spill] sm:$0xff]  ;;  %v13640_v45 = vld [vmem:[#allocation138_spill] sm:$0xff] }
 0x288   : > { %v1357_v17 = vadd.f32 %v1293_v48, %v13638_v19  ;;  %v1358_v46 = vadd.f32 %v1294_v28, %v13639_v18  ;;  %v1359_v47 = vadd.f32 %v1295_v2, %v13640_v45  ;;  %v13641_v40 = vld [vmem:[#allocation139_spill] sm:$0xff]  ;;  %v13642_v0 = vld [vmem:[#allocation140_spill] sm:$0xff]  ;;  %v13643_v16 = vld [vmem:[#allocation141_spill] sm:$0xff] }
 0x289   : > { %v1360_v25 = vadd.f32 %v1296_v51, %v13641_v40  ;;  %v1361_v39 = vadd.f32 %v1297_v50, %v13642_v0  ;;  %v1362_v10 = vadd.f32 %v1298_v62, %v13643_v16  ;;  %v13644_v37 = vld [vmem:[#allocation190_spill] sm:$0xff]  ;;  %v13645_v13 = vld [vmem:[#allocation191_spill] sm:$0xff]  ;;  %v13646_v15 = vld [vmem:[#allocation192_spill] sm:$0xff] }
 0x28a   : > { %v1419_v9 = vadd.f32 %v1355_v6, %v13644_v37  ;;  %v1420_v59 = vadd.f32 %v1356_v63, %v13645_v13  ;;  %v1421_v12 = vadd.f32 %v1357_v17, %v13646_v15  ;;  %v13647_v26 = vld [vmem:[#allocation193_spill] sm:$0xff]  ;;  %v13648_v57 = vld [vmem:[#allocation194_spill] sm:$0xff]  ;;  %v13649_v38 = vld [vmem:[#allocation195_spill] sm:$0xff] }
 0x28b   : > { %v1422_v53 = vadd.f32 %v1358_v46, %v13647_v26  ;;  %v1423_v48 = vadd.f32 %v1359_v47, %v13648_v57  ;;  %v1424_v28 = vadd.f32 %v1360_v25, %v13649_v38  ;;  %v13650_v60 = vld [vmem:[#allocation196_spill] sm:$0xff]  ;;  %v13651_v58 = vld [vmem:[#allocation197_spill] sm:$0xff]  ;;  %v13652_v51 = vld [vmem:[#allocation246_spill] sm:$0xff] }
 0x28c   : > { %v1425_v2 = vadd.f32 %v1361_v39, %v13650_v60  ;;  %v1426_v56 = vadd.f32 %v1362_v10, %v13651_v58  ;;  %v1483_v49 = vadd.f32 %v1419_v9, %v13652_v51  ;;  %v13653_v27 = vld [vmem:[#allocation247_spill] sm:$0xff]  ;;  %v13654_v54 = vld [vmem:[#allocation248_spill] sm:$0xff]  ;;  %v13655_v62 = vld [vmem:[#allocation249_spill] sm:$0xff] }
 0x28d   : > { %v1484_v50 = vadd.f32 %v1420_v59, %v13653_v27  ;;  %v1485_v61 = vadd.f32 %v1421_v12, %v13654_v54  ;;  %v1486_v4 = vadd.f32 %v1422_v53, %v13655_v62  ;;  %v13656_v6 = vld [vmem:[#allocation250_spill] sm:$0xff]  ;;  %v13657_v63 = vld [vmem:[#allocation251_spill] sm:$0xff]  ;;  %v13658_v17 = vld [vmem:[#allocation252_spill] sm:$0xff] }
 0x28e   : > { %v1487_v20 = vadd.f32 %v1423_v48, %v13656_v6  ;;  %v1488_v19 = vadd.f32 %v1424_v28, %v13657_v63  ;;  %v1489_v18 = vadd.f32 %v1425_v2, %v13658_v17  ;;  %v13659_v46 = vld [vmem:[#allocation253_spill] sm:$0xff]  ;;  %v13660_v47 = vld [vmem:[#allocation302_spill] sm:$0xff]  ;;  %v13661_v25 = vld [vmem:[#allocation303_spill] sm:$0xff] }
 0x28f   : > { %v1490_v45 = vadd.f32 %v1426_v56, %v13659_v46  ;;  %v1547_v40 = vadd.f32 %v1483_v49, %v13660_v47  ;;  %v1548_v0 = vadd.f32 %v1484_v50, %v13661_v25  ;;  %v13662_v39 = vld [vmem:[#allocation304_spill] sm:$0xff]  ;;  %v13663_v10 = vld [vmem:[#allocation305_spill] sm:$0xff]  ;;  %v13664_v9 = vld [vmem:[#allocation306_spill] sm:$0xff] }
 0x290   : > { %v1549_v16 = vadd.f32 %v1485_v61, %v13662_v39  ;;  %v1550_v37 = vadd.f32 %v1486_v4, %v13663_v10  ;;  %v1551_v13 = vadd.f32 %v1487_v20, %v13664_v9  ;;  %v13665_v59 = vld [vmem:[#allocation307_spill] sm:$0xff]  ;;  %v13666_v12 = vld [vmem:[#allocation308_spill] sm:$0xff]  ;;  %v13667_v53 = vld [vmem:[#allocation309_spill] sm:$0xff] }
 0x291   : > { %v1552_v15 = vadd.f32 %v1488_v19, %v13665_v59  ;;  %v1553_v26 = vadd.f32 %v1489_v18, %v13666_v12  ;;  %v1554_v57 = vadd.f32 %v1490_v45, %v13667_v53  ;;  %v13668_v48 = vld [vmem:[#allocation361_spill] sm:$0xff]  ;;  %v13669_v28 = vld [vmem:[#allocation362_spill] sm:$0xff]  ;;  %v13670_v2 = vld [vmem:[#allocation363_spill] sm:$0xff] }
 0x292   : > { %v1611_v38 = vadd.f32 %v1547_v40, %v13668_v48  ;;  %v1612_v60 = vadd.f32 %v1548_v0, %v13669_v28  ;;  %v1613_v58 = vadd.f32 %v1549_v16, %v13670_v2  ;;  %v13671_v56 = vld [vmem:[#allocation364_spill] sm:$0xff]  ;;  %v13672_v49 = vld [vmem:[#allocation365_spill] sm:$0xff]  ;;  %v13673_v50 = vld [vmem:[#allocation366_spill] sm:$0xff] }
 0x293   : > { %v1614_v51 = vadd.f32 %v1550_v37, %v13671_v56  ;;  %v1615_v27 = vadd.f32 %v1551_v13, %v13672_v49  ;;  %v1616_v54 = vadd.f32 %v1552_v15, %v13673_v50  ;;  %v13674_v61 = vld [vmem:[#allocation367_spill] sm:$0xff]  ;;  %v13675_v4 = vld [vmem:[#allocation368_spill] sm:$0xff]  ;;  %v13676_v20 = vld [vmem:[#allocation425_spill] sm:$0xff] }
 0x294   : > { %v1617_v62 = vadd.f32 %v1553_v26, %v13674_v61  ;;  %v1618_v6 = vadd.f32 %v1554_v57, %v13675_v4  ;;  %v1675_v63 = vadd.f32 %v1611_v38, %v13676_v20  ;;  %v13677_v19 = vld [vmem:[#allocation426_spill] sm:$0xff]  ;;  %v13678_v18 = vld [vmem:[#allocation427_spill] sm:$0xff]  ;;  %v13679_v45 = vld [vmem:[#allocation428_spill] sm:$0xff] }
 0x295   : > { %v1676_v17 = vadd.f32 %v1612_v60, %v13677_v19  ;;  %v1677_v46 = vadd.f32 %v1613_v58, %v13678_v18  ;;  %v1678_v47 = vadd.f32 %v1614_v51, %v13679_v45  ;;  %v13680_v40 = vld [vmem:[#allocation429_spill] sm:$0xff]  ;;  %v13681_v0 = vld [vmem:[#allocation430_spill] sm:$0xff]  ;;  %v13682_v16 = vld [vmem:[#allocation431_spill] sm:$0xff] }
 0x296   : > { %v1679_v25 = vadd.f32 %v1615_v27, %v13680_v40  ;;  %v1680_v39 = vadd.f32 %v1616_v54, %v13681_v0  ;;  %v1681_v10 = vadd.f32 %v1617_v62, %v13682_v16  ;;  %v13683_v37 = vld [vmem:[#allocation432_spill] sm:$0xff]  ;;  %v13684_v13 = vld [vmem:[#allocation489_spill] sm:$0xff]  ;;  %v13685_v15 = vld [vmem:[#allocation490_spill] sm:$0xff] }
 0x297   : > { %v1682_v9 = vadd.f32 %v1618_v6, %v13683_v37  ;;  %v1739_v59 = vadd.f32 %v1675_v63, %v13684_v13  ;;  %v1740_v12 = vadd.f32 %v1676_v17, %v13685_v15  ;;  %v13686_v26 = vld [vmem:[#allocation491_spill] sm:$0xff]  ;;  %v13687_v57 = vld [vmem:[#allocation492_spill] sm:$0xff]  ;;  %v13688_v38 = vld [vmem:[#allocation493_spill] sm:$0xff] }
 0x298   : > { %v1741_v53 = vadd.f32 %v1677_v46, %v13686_v26  ;;  %v1742_v48 = vadd.f32 %v1678_v47, %v13687_v57  ;;  %v1743_v28 = vadd.f32 %v1679_v25, %v13688_v38  ;;  %v13689_v60 = vld [vmem:[#allocation494_spill] sm:$0xff]  ;;  %v13690_v58 = vld [vmem:[#allocation495_spill] sm:$0xff]  ;;  %v13691_v51 = vld [vmem:[#allocation496_spill] sm:$0xff] }
 0x299   : > { %v1744_v2 = vadd.f32 %v1680_v39, %v13689_v60  ;;  %v1745_v56 = vadd.f32 %v1681_v10, %v13690_v58  ;;  %v1746_v49 = vadd.f32 %v1682_v9, %v13691_v51  ;;  %v13692_v27 = vld [vmem:[#allocation553_spill] sm:$0xff]  ;;  %v13693_v54 = vld [vmem:[#allocation554_spill] sm:$0xff]  ;;  %v13694_v62 = vld [vmem:[#allocation555_spill] sm:$0xff] }
 0x29a   : > { %v1803_v50 = vadd.f32 %v1739_v59, %v13692_v27  ;;  %v1804_v61 = vadd.f32 %v1740_v12, %v13693_v54  ;;  %v1805_v4 = vadd.f32 %v1741_v53, %v13694_v62  ;;  %v13695_v6 = vld [vmem:[#allocation556_spill] sm:$0xff]  ;;  %v13696_v63 = vld [vmem:[#allocation557_spill] sm:$0xff]  ;;  %v13697_v17 = vld [vmem:[#allocation558_spill] sm:$0xff] }
 0x29b   : > { %v1806_v20 = vadd.f32 %v1742_v48, %v13695_v6  ;;  %v1807_v19 = vadd.f32 %v1743_v28, %v13696_v63  ;;  %v1808_v18 = vadd.f32 %v1744_v2, %v13697_v17  ;;  %v13698_v46 = vld [vmem:[#allocation559_spill] sm:$0xff]  ;;  %v13699_v47 = vld [vmem:[#allocation560_spill] sm:$0xff]  ;;  %v13700_v25 = vld [vmem:[#allocation617_spill] sm:$0xff] }
 0x29c   : > { %v1809_v45 = vadd.f32 %v1745_v56, %v13698_v46  ;;  %v1810_v40 = vadd.f32 %v1746_v49, %v13699_v47  ;;  %v1867_v0 = vadd.f32 %v1803_v50, %v13700_v25  ;;  %v13701_v39 = vld [vmem:[#allocation618_spill] sm:$0xff]  ;;  %v13702_v10 = vld [vmem:[#allocation619_spill] sm:$0xff]  ;;  %v13703_v9 = vld [vmem:[#allocation620_spill] sm:$0xff] }
 0x29d   : > { %v1868_v16 = vadd.f32 %v1804_v61, %v13701_v39  ;;  %v1869_v37 = vadd.f32 %v1805_v4, %v13702_v10  ;;  %v1870_v13 = vadd.f32 %v1806_v20, %v13703_v9  ;;  %v13704_v59 = vld [vmem:[#allocation621_spill] sm:$0xff]  ;;  %v13705_v12 = vld [vmem:[#allocation622_spill] sm:$0xff]  ;;  %v13706_v53 = vld [vmem:[#allocation623_spill] sm:$0xff] }
 0x29e   : > { %v1871_v15 = vadd.f32 %v1807_v19, %v13704_v59  ;;  %v1872_v26 = vadd.f32 %v1808_v18, %v13705_v12  ;;  %v1873_v57 = vadd.f32 %v1809_v45, %v13706_v53  ;;  %v13707_v48 = vld [vmem:[#allocation624_spill] sm:$0xff]  ;;  %v13708_v28 = vld [vmem:[#allocation681_spill] sm:$0xff]  ;;  %v13709_v2 = vld [vmem:[#allocation682_spill] sm:$0xff] }
 0x29f   : > { %v1874_v38 = vadd.f32 %v1810_v40, %v13707_v48  ;;  %v1931_v60 = vadd.f32 %v1867_v0, %v13708_v28  ;;  %v1932_v58 = vadd.f32 %v1868_v16, %v13709_v2  ;;  %v13710_v56 = vld [vmem:[#allocation683_spill] sm:$0xff]  ;;  %v13711_v49 = vld [vmem:[#allocation684_spill] sm:$0xff]  ;;  %v13712_v50 = vld [vmem:[#allocation685_spill] sm:$0xff] }
 0x2a0   : > { %v1933_v51 = vadd.f32 %v1869_v37, %v13710_v56  ;;  %v1934_v27 = vadd.f32 %v1870_v13, %v13711_v49  ;;  %v1935_v54 = vadd.f32 %v1871_v15, %v13712_v50  ;;  %v13713_v61 = vld [vmem:[#allocation686_spill] sm:$0xff]  ;;  %v13714_v4 = vld [vmem:[#allocation687_spill] sm:$0xff]  ;;  %v13715_v20 = vld [vmem:[#allocation688_spill] sm:$0xff] }
 0x2a1   : > { %v1936_v62 = vadd.f32 %v1872_v26, %v13713_v61  ;;  %v1937_v6 = vadd.f32 %v1873_v57, %v13714_v4  ;;  %v1938_v63 = vadd.f32 %v1874_v38, %v13715_v20  ;;  %v13716_v19 = vld [vmem:[#allocation745_spill] sm:$0xff]  ;;  %v13717_v18 = vld [vmem:[#allocation746_spill] sm:$0xff]  ;;  %v13718_v45 = vld [vmem:[#allocation747_spill] sm:$0xff] }
 0x2a2   : > { %v1995_v17 = vadd.f32 %v1931_v60, %v13716_v19  ;;  %v1996_v46 = vadd.f32 %v1932_v58, %v13717_v18  ;;  %v1997_v47 = vadd.f32 %v1933_v51, %v13718_v45  ;;  %v13719_v40 = vld [vmem:[#allocation748_spill] sm:$0xff]  ;;  %v13720_v0 = vld [vmem:[#allocation749_spill] sm:$0xff]  ;;  %v13721_v16 = vld [vmem:[#allocation750_spill] sm:$0xff] }
 0x2a3   : > { %v1998_v25 = vadd.f32 %v1934_v27, %v13719_v40  ;;  %v1999_v39 = vadd.f32 %v1935_v54, %v13720_v0  ;;  %v2000_v10 = vadd.f32 %v1936_v62, %v13721_v16  ;;  %v13722_v37 = vld [vmem:[#allocation751_spill] sm:$0xff]  ;;  %v13723_v13 = vld [vmem:[#allocation752_spill] sm:$0xff]  ;;  %v13724_v15 = vld [vmem:[#allocation809_spill] sm:$0xff] }
 0x2a4   : > { %v2001_v9 = vadd.f32 %v1937_v6, %v13722_v37  ;;  %v2002_v59 = vadd.f32 %v1938_v63, %v13723_v13  ;;  %v2059_v12 = vadd.f32 %v1995_v17, %v13724_v15  ;;  %v13725_v26 = vld [vmem:[#allocation810_spill] sm:$0xff]  ;;  %v13726_v57 = vld [vmem:[#allocation811_spill] sm:$0xff]  ;;  %v13727_v38 = vld [vmem:[#allocation812_spill] sm:$0xff] }
 0x2a5   : > { %v2060_v53 = vadd.f32 %v1996_v46, %v13725_v26  ;;  %v2061_v48 = vadd.f32 %v1997_v47, %v13726_v57  ;;  %v2062_v28 = vadd.f32 %v1998_v25, %v13727_v38  ;;  %v13728_v60 = vld [vmem:[#allocation813_spill] sm:$0xff]  ;;  %v13729_v58 = vld [vmem:[#allocation814_spill] sm:$0xff]  ;;  %v13730_v51 = vld [vmem:[#allocation815_spill] sm:$0xff] }
 0x2a6   : > { %v2063_v2 = vadd.f32 %v1999_v39, %v13728_v60  ;;  %v2064_v56 = vadd.f32 %v2000_v10, %v13729_v58  ;;  %v2065_v49 = vadd.f32 %v2001_v9, %v13730_v51  ;;  %v13731_v27 = vld [vmem:[#allocation816_spill] sm:$0xff]  ;;  %v13732_v54 = vld [vmem:[#allocation873_spill] sm:$0xff]  ;;  %v2251_v62 = vld [vmem:[#allocation2 + $0xe0] sm:$0xff] }
 0x2a7   : > { %v2066_v50 = vadd.f32 %v2002_v59, %v13731_v27  ;;  %v2123_v61 = vadd.f32 %v2059_v12, %v13732_v54  ;;  %v13733_v4 = vld [vmem:[#allocation874_spill] sm:$0xff]  ;;  %v2252_v20 = vld [vmem:[#allocation2 + $0x188] sm:$0xff]  ;;  %v13734_v63 = vld [vmem:[#allocation875_spill] sm:$0xff] }
 0x2a8   : > { %v2124_v6 = vadd.f32 %v2060_v53, %v13733_v4  ;;  %v2125_v19 = vadd.f32 %v2061_v48, %v13734_v63  ;;  %v13735_v17 = vld [vmem:[#allocation876_spill] sm:$0xff]  ;;  %v2253_v46 = vld [vmem:[#allocation2 + $0x138] sm:$0xff]  ;;  %v2254_v45 = vld [vmem:[#allocation2 + $0x140] sm:$0xff] }
 0x2a9   : > { %v2126_v18 = vadd.f32 %v2062_v28, %v13735_v17  ;;  %v13736_v47 = vld [vmem:[#allocation877_spill] sm:$0xff]  ;;  %v2255_v25 = vld [vmem:[#allocation2 + $0x80] sm:$0xff]  ;;  %v13737_v0 = vld [vmem:[#allocation878_spill] sm:$0xff] }
 0x2aa   : > { %v2127_v40 = vadd.f32 %v2063_v2, %v13736_v47  ;;  %v2128_v39 = vadd.f32 %v2064_v56, %v13737_v0  ;;  %v13738_v16 = vld [vmem:[#allocation879_spill] sm:$0xff]  ;;  %v13739_v37 = vld [vmem:[#allocation880_spill] sm:$0xff]  ;;  %v13740_v13 = vld [vmem:[#allocation937_spill] sm:$0xff] }
 0x2ab   : > { %v2129_v10 = vadd.f32 %v2065_v49, %v13738_v16  ;;  %v2130_v9 = vadd.f32 %v2066_v50, %v13739_v37  ;;  %v2187_v59 = vadd.f32 %v2123_v61, %v13740_v13  ;;  %v13741_v15 = vld [vmem:[#allocation938_spill] sm:$0xff]  ;;  %v13742_v26 = vld [vmem:[#allocation939_spill] sm:$0xff]  ;;  %v13743_v57 = vld [vmem:[#allocation940_spill] sm:$0xff] }
 0x2ac   : > { %v2188_v12 = vadd.f32 %v2124_v6, %v13741_v15  ;;  %v2189_v53 = vadd.f32 %v2125_v19, %v13742_v26  ;;  %v2190_v48 = vadd.f32 %v2126_v18, %v13743_v57  ;;  %v2256_v38 = vld [vmem:[#allocation2 + $0x1a8] sm:$0xff]  ;;  %v2257_v28 = vld [vmem:[#allocation2 + $0x1b8] sm:$0xff]  ;;  %v13744_v58 = vld [vmem:[#allocation941_spill] sm:$0xff] }
 0x2ad   : > { %v2258_v60 = vld [vmem:[#allocation2 + $0x28] sm:$0xff]  ;;  %v2191_v2 = vadd.f32 %v2127_v40, %v13744_v58  ;;  %v13745_v51 = vld [vmem:[#allocation942_spill] sm:$0xff]  ;;  %v13746_v56 = vld [vmem:[#allocation943_spill] sm:$0xff]  ;;  %v2315_v50 = vadd.f32 %v2251_v62, %v2187_v59 }
 0x2ae   : > { %v2192_v27 = vadd.f32 %v2128_v39, %v13745_v51  ;;  %v2193_v54 = vadd.f32 %v2129_v10, %v13746_v56  ;;  %v13747_v49 = vld [vmem:[#allocation944_spill] sm:$0xff]  ;;  %v2316_v63 = vadd.f32 %v2252_v20, %v2188_v12  ;;  %v2317_v61 = vadd.f32 %v2253_v46, %v2189_v53  ;;  %v13748_v18 = vld [vmem:[#allocation22_spill] sm:$0xff]  ;;  %v13750_v39 = vld [vmem:[#allocation23_spill] sm:$0xff] }
 0x2af   : > { %v2194_v4 = vadd.f32 %v2130_v9, %v13747_v49  ;;  %v2318_v17 = vadd.f32 %v2254_v45, %v2190_v48  ;;  %v2319_v6 = vadd.f32 %v2255_v25, %v2191_v2  ;;  %2379 = vst [vmem:[#allocation2 + $0xe0] sm:$0xff] %v2315_v50  ;;  %v13749_v40 = vld [vmem:[#allocation86_spill] sm:$0xff]  ;;  %v13751_v37 = vld [vmem:[#allocation87_spill] sm:$0xff]  ;;  %v13752_v13 = vld [vmem:[#allocation24_spill] sm:$0xff] }
 0x2b0   : > { %v2320_v47 = vadd.f32 %v2256_v38, %v2192_v27  ;;  %v2321_v19 = vadd.f32 %v2257_v28, %v2193_v54  ;;  %2380 = vst [vmem:[#allocation2 + $0x188] sm:$0xff] %v2316_v63  ;;  %2381 = vst [vmem:[#allocation2 + $0x138] sm:$0xff] %v2317_v61  ;;  %v1299_v16 = vadd.f32 %v13749_v40, %v13748_v18  ;;  %v13753_v9 = vld [vmem:[#allocation88_spill] sm:$0xff]  ;;  %v13754_v20 = vld [vmem:[#allocation25_spill] sm:$0xff] }
 0x2b1   : > { %v2322_v0 = vadd.f32 %v2258_v60, %v2194_v4  ;;  %2382 = vst [vmem:[#allocation2 + $0x140] sm:$0xff] %v2318_v17  ;;  %v1300_v10 = vadd.f32 %v13751_v37, %v13750_v39  ;;  %v1301_v62 = vadd.f32 %v13753_v9, %v13752_v13  ;;  %v13755_v46 = vld [vmem:[#allocation89_spill] sm:$0xff]  ;;  %2383 = vst [vmem:[#allocation2 + $0x80] sm:$0xff] %v2319_v6  ;;  %v13756_v25 = vld [vmem:[#allocation26_spill] sm:$0xff] }
 0x2b2   : > { %v1302_v45 = vadd.f32 %v13755_v46, %v13754_v20  ;;  %2384 = vst [vmem:[#allocation2 + $0x1a8] sm:$0xff] %v2320_v47  ;;  %2385 = vst [vmem:[#allocation2 + $0x1b8] sm:$0xff] %v2321_v19  ;;  %v13757_v59 = vld [vmem:[#allocation90_spill] sm:$0xff]  ;;  %v13758_v12 = vld [vmem:[#allocation27_spill] sm:$0xff] }
 0x2b3   : > { %2386 = vst [vmem:[#allocation2 + $0x28] sm:$0xff] %v2322_v0  ;;  %v1303_v15 = vadd.f32 %v13757_v59, %v13756_v25  ;;  %v13759_v26 = vld [vmem:[#allocation91_spill] sm:$0xff]  ;;  %v13760_v57 = vld [vmem:[#allocation28_spill] sm:$0xff]  ;;  %v13762_v28 = vld [vmem:[#allocation29_spill] sm:$0xff] }
 0x2b4   : > { %v1304_v53 = vadd.f32 %v13759_v26, %v13758_v12  ;;  %v13761_v48 = vld [vmem:[#allocation92_spill] sm:$0xff]  ;;  %v13763_v60 = vld [vmem:[#allocation93_spill] sm:$0xff]  ;;  %v13764_v2 = vld [vmem:[#allocation142_spill] sm:$0xff] }
 0x2b5   : > { %v1305_v38 = vadd.f32 %v13761_v48, %v13760_v57  ;;  %v1306_v58 = vadd.f32 %v13763_v60, %v13762_v28  ;;  %v1363_v51 = vadd.f32 %v1299_v16, %v13764_v2  ;;  %v13765_v27 = vld [vmem:[#allocation143_spill] sm:$0xff]  ;;  %v13766_v54 = vld [vmem:[#allocation144_spill] sm:$0xff]  ;;  %v13767_v4 = vld [vmem:[#allocation145_spill] sm:$0xff] }
 0x2b6   : > { %v1364_v56 = vadd.f32 %v1300_v10, %v13765_v27  ;;  %v1365_v49 = vadd.f32 %v1301_v62, %v13766_v54  ;;  %v1366_v50 = vadd.f32 %v1302_v45, %v13767_v4  ;;  %v13768_v63 = vld [vmem:[#allocation146_spill] sm:$0xff]  ;;  %v13769_v17 = vld [vmem:[#allocation147_spill] sm:$0xff]  ;;  %v13770_v47 = vld [vmem:[#allocation148_spill] sm:$0xff] }
 0x2b7   : > { %v1367_v61 = vadd.f32 %v1303_v15, %v13768_v63  ;;  %v1368_v6 = vadd.f32 %v1304_v53, %v13769_v17  ;;  %v1369_v19 = vadd.f32 %v1305_v38, %v13770_v47  ;;  %v13771_v0 = vld [vmem:[#allocation149_spill] sm:$0xff]  ;;  %v13772_v40 = vld [vmem:[#allocation198_spill] sm:$0xff]  ;;  %v13773_v37 = vld [vmem:[#allocation199_spill] sm:$0xff] }
 0x2b8   : > { %v1370_v18 = vadd.f32 %v1306_v58, %v13771_v0  ;;  %v1427_v39 = vadd.f32 %v1363_v51, %v13772_v40  ;;  %v1428_v13 = vadd.f32 %v1364_v56, %v13773_v37  ;;  %v13774_v9 = vld [vmem:[#allocation200_spill] sm:$0xff]  ;;  %v13775_v20 = vld [vmem:[#allocation201_spill] sm:$0xff]  ;;  %v13776_v46 = vld [vmem:[#allocation202_spill] sm:$0xff] }
 0x2b9   : > { %v1429_v16 = vadd.f32 %v1365_v49, %v13774_v9  ;;  %v1430_v10 = vadd.f32 %v1366_v50, %v13775_v20  ;;  %v1431_v62 = vadd.f32 %v1367_v61, %v13776_v46  ;;  %v13777_v25 = vld [vmem:[#allocation203_spill] sm:$0xff]  ;;  %v13778_v59 = vld [vmem:[#allocation204_spill] sm:$0xff]  ;;  %v13779_v12 = vld [vmem:[#allocation205_spill] sm:$0xff] }
 0x2ba   : > { %v1432_v45 = vadd.f32 %v1368_v6, %v13777_v25  ;;  %v1433_v15 = vadd.f32 %v1369_v19, %v13778_v59  ;;  %v1434_v26 = vadd.f32 %v1370_v18, %v13779_v12  ;;  %v13780_v53 = vld [vmem:[#allocation254_spill] sm:$0xff]  ;;  %v13781_v48 = vld [vmem:[#allocation255_spill] sm:$0xff]  ;;  %v13782_v28 = vld [vmem:[#allocation256_spill] sm:$0xff] }
 0x2bb   : > { %v1491_v57 = vadd.f32 %v1427_v39, %v13780_v53  ;;  %v1492_v38 = vadd.f32 %v1428_v13, %v13781_v48  ;;  %v1493_v60 = vadd.f32 %v1429_v16, %v13782_v28  ;;  %v13783_v58 = vld [vmem:[#allocation257_spill] sm:$0xff]  ;;  %v13784_v51 = vld [vmem:[#allocation258_spill] sm:$0xff]  ;;  %v13785_v56 = vld [vmem:[#allocation259_spill] sm:$0xff] }
 0x2bc   : > { %v1494_v2 = vadd.f32 %v1430_v10, %v13783_v58  ;;  %v1495_v27 = vadd.f32 %v1431_v62, %v13784_v51  ;;  %v1496_v54 = vadd.f32 %v1432_v45, %v13785_v56  ;;  %v13786_v49 = vld [vmem:[#allocation260_spill] sm:$0xff]  ;;  %v13787_v50 = vld [vmem:[#allocation261_spill] sm:$0xff]  ;;  %v13788_v61 = vld [vmem:[#allocation310_spill] sm:$0xff] }
 0x2bd   : > { %v1497_v4 = vadd.f32 %v1433_v15, %v13786_v49  ;;  %v1498_v63 = vadd.f32 %v1434_v26, %v13787_v50  ;;  %v1555_v17 = vadd.f32 %v1491_v57, %v13788_v61  ;;  %v13789_v6 = vld [vmem:[#allocation311_spill] sm:$0xff]  ;;  %v13790_v19 = vld [vmem:[#allocation312_spill] sm:$0xff]  ;;  %v13791_v18 = vld [vmem:[#allocation313_spill] sm:$0xff] }
 0x2be   : > { %v1556_v47 = vadd.f32 %v1492_v38, %v13789_v6  ;;  %v1557_v0 = vadd.f32 %v1493_v60, %v13790_v19  ;;  %v1558_v40 = vadd.f32 %v1494_v2, %v13791_v18  ;;  %v13792_v39 = vld [vmem:[#allocation314_spill] sm:$0xff]  ;;  %v13793_v13 = vld [vmem:[#allocation315_spill] sm:$0xff]  ;;  %v13794_v16 = vld [vmem:[#allocation316_spill] sm:$0xff] }
 0x2bf   : > { %v1559_v37 = vadd.f32 %v1495_v27, %v13792_v39  ;;  %v1560_v9 = vadd.f32 %v1496_v54, %v13793_v13  ;;  %v1561_v20 = vadd.f32 %v1497_v4, %v13794_v16  ;;  %v13795_v10 = vld [vmem:[#allocation317_spill] sm:$0xff]  ;;  %v13797_v45 = vld [vmem:[#allocation370_spill] sm:$0xff]  ;;  %v13798_v15 = vld [vmem:[#allocation371_spill] sm:$0xff] }
 0x2c0   : > { %v1562_v46 = vadd.f32 %v1498_v63, %v13795_v10  ;;  %v13796_v62 = vld [vmem:[#allocation369_spill] sm:$0xff]  ;;  %v1620_v59 = vadd.f32 %v1556_v47, %v13797_v45  ;;  %v1621_v12 = vadd.f32 %v1557_v0, %v13798_v15  ;;  %v13799_v26 = vld [vmem:[#allocation372_spill] sm:$0xff]  ;;  %v13801_v38 = vld [vmem:[#allocation374_spill] sm:$0xff] }
 0x2c1   : > { %v1619_v25 = vadd.f32 %v1555_v17, %v13796_v62  ;;  %v1622_v53 = vadd.f32 %v1558_v40, %v13799_v26  ;;  %v13800_v57 = vld [vmem:[#allocation373_spill] sm:$0xff]  ;;  %v1624_v28 = vadd.f32 %v1560_v9, %v13801_v38  ;;  %v13802_v60 = vld [vmem:[#allocation375_spill] sm:$0xff]  ;;  %v13803_v2 = vld [vmem:[#allocation376_spill] sm:$0xff] }
 0x2c2   : > { %v1623_v48 = vadd.f32 %v1559_v37, %v13800_v57  ;;  %v1625_v58 = vadd.f32 %v1561_v20, %v13802_v60  ;;  %v1626_v51 = vadd.f32 %v1562_v46, %v13803_v2  ;;  %v13804_v27 = vld [vmem:[#allocation433_spill] sm:$0xff]  ;;  %v13805_v54 = vld [vmem:[#allocation434_spill] sm:$0xff]  ;;  %v13806_v4 = vld [vmem:[#allocation435_spill] sm:$0xff] }
 0x2c3   : > { %v1683_v56 = vadd.f32 %v1619_v25, %v13804_v27  ;;  %v1684_v49 = vadd.f32 %v1620_v59, %v13805_v54  ;;  %v1685_v50 = vadd.f32 %v1621_v12, %v13806_v4  ;;  %v13807_v63 = vld [vmem:[#allocation436_spill] sm:$0xff]  ;;  %v13808_v17 = vld [vmem:[#allocation437_spill] sm:$0xff]  ;;  %v13809_v47 = vld [vmem:[#allocation438_spill] sm:$0xff] }
 0x2c4   : > { %v1686_v61 = vadd.f32 %v1622_v53, %v13807_v63  ;;  %v1687_v6 = vadd.f32 %v1623_v48, %v13808_v17  ;;  %v1688_v19 = vadd.f32 %v1624_v28, %v13809_v47  ;;  %v13810_v0 = vld [vmem:[#allocation439_spill] sm:$0xff]  ;;  %v13811_v40 = vld [vmem:[#allocation440_spill] sm:$0xff]  ;;  %v13812_v37 = vld [vmem:[#allocation497_spill] sm:$0xff] }
 0x2c5   : > { %v1689_v18 = vadd.f32 %v1625_v58, %v13810_v0  ;;  %v1690_v39 = vadd.f32 %v1626_v51, %v13811_v40  ;;  %v1747_v13 = vadd.f32 %v1683_v56, %v13812_v37  ;;  %v13813_v9 = vld [vmem:[#allocation498_spill] sm:$0xff]  ;;  %v13814_v20 = vld [vmem:[#allocation499_spill] sm:$0xff]  ;;  %v13815_v46 = vld [vmem:[#allocation500_spill] sm:$0xff] }
 0x2c6   : > { %v1748_v16 = vadd.f32 %v1684_v49, %v13813_v9  ;;  %v1749_v10 = vadd.f32 %v1685_v50, %v13814_v20  ;;  %v1750_v62 = vadd.f32 %v1686_v61, %v13815_v46  ;;  %v13816_v25 = vld [vmem:[#allocation501_spill] sm:$0xff]  ;;  %v13817_v59 = vld [vmem:[#allocation502_spill] sm:$0xff]  ;;  %v13818_v12 = vld [vmem:[#allocation503_spill] sm:$0xff] }
 0x2c7   : > { %v1751_v45 = vadd.f32 %v1687_v6, %v13816_v25  ;;  %v1752_v15 = vadd.f32 %v1688_v19, %v13817_v59  ;;  %v1753_v26 = vadd.f32 %v1689_v18, %v13818_v12  ;;  %v13819_v53 = vld [vmem:[#allocation504_spill] sm:$0xff]  ;;  %v13820_v48 = vld [vmem:[#allocation561_spill] sm:$0xff]  ;;  %v13821_v28 = vld [vmem:[#allocation562_spill] sm:$0xff] }
 0x2c8   : > { %v1754_v57 = vadd.f32 %v1690_v39, %v13819_v53  ;;  %v1811_v38 = vadd.f32 %v1747_v13, %v13820_v48  ;;  %v1812_v60 = vadd.f32 %v1748_v16, %v13821_v28  ;;  %v13822_v58 = vld [vmem:[#allocation563_spill] sm:$0xff]  ;;  %v13823_v51 = vld [vmem:[#allocation564_spill] sm:$0xff]  ;;  %v13824_v56 = vld [vmem:[#allocation565_spill] sm:$0xff] }
 0x2c9   : > { %v1813_v2 = vadd.f32 %v1749_v10, %v13822_v58  ;;  %v1814_v27 = vadd.f32 %v1750_v62, %v13823_v51  ;;  %v1815_v54 = vadd.f32 %v1751_v45, %v13824_v56  ;;  %v13825_v49 = vld [vmem:[#allocation566_spill] sm:$0xff]  ;;  %v13826_v50 = vld [vmem:[#allocation567_spill] sm:$0xff]  ;;  %v13827_v61 = vld [vmem:[#allocation568_spill] sm:$0xff] }
 0x2ca   : > { %v1816_v4 = vadd.f32 %v1752_v15, %v13825_v49  ;;  %v1817_v63 = vadd.f32 %v1753_v26, %v13826_v50  ;;  %v1818_v17 = vadd.f32 %v1754_v57, %v13827_v61  ;;  %v13828_v6 = vld [vmem:[#allocation625_spill] sm:$0xff]  ;;  %v13829_v19 = vld [vmem:[#allocation626_spill] sm:$0xff]  ;;  %v13830_v18 = vld [vmem:[#allocation627_spill] sm:$0xff] }
 0x2cb   : > { %v1875_v47 = vadd.f32 %v1811_v38, %v13828_v6  ;;  %v1876_v0 = vadd.f32 %v1812_v60, %v13829_v19  ;;  %v1877_v40 = vadd.f32 %v1813_v2, %v13830_v18  ;;  %v13831_v39 = vld [vmem:[#allocation628_spill] sm:$0xff]  ;;  %v13832_v13 = vld [vmem:[#allocation629_spill] sm:$0xff]  ;;  %v13833_v16 = vld [vmem:[#allocation630_spill] sm:$0xff] }
 0x2cc   : > { %v1878_v37 = vadd.f32 %v1814_v27, %v13831_v39  ;;  %v1879_v9 = vadd.f32 %v1815_v54, %v13832_v13  ;;  %v1880_v20 = vadd.f32 %v1816_v4, %v13833_v16  ;;  %v13834_v10 = vld [vmem:[#allocation631_spill] sm:$0xff]  ;;  %v13835_v62 = vld [vmem:[#allocation632_spill] sm:$0xff]  ;;  %v13836_v45 = vld [vmem:[#allocation689_spill] sm:$0xff] }
 0x2cd   : > { %v1881_v46 = vadd.f32 %v1817_v63, %v13834_v10  ;;  %v1882_v25 = vadd.f32 %v1818_v17, %v13835_v62  ;;  %v1939_v59 = vadd.f32 %v1875_v47, %v13836_v45  ;;  %v13837_v15 = vld [vmem:[#allocation690_spill] sm:$0xff]  ;;  %v13838_v26 = vld [vmem:[#allocation691_spill] sm:$0xff]  ;;  %v13839_v57 = vld [vmem:[#allocation692_spill] sm:$0xff] }
 0x2ce   : > { %v1940_v12 = vadd.f32 %v1876_v0, %v13837_v15  ;;  %v1941_v53 = vadd.f32 %v1877_v40, %v13838_v26  ;;  %v1942_v48 = vadd.f32 %v1878_v37, %v13839_v57  ;;  %v13840_v38 = vld [vmem:[#allocation693_spill] sm:$0xff]  ;;  %v13841_v60 = vld [vmem:[#allocation694_spill] sm:$0xff]  ;;  %v13842_v2 = vld [vmem:[#allocation695_spill] sm:$0xff] }
 0x2cf   : > { %v1943_v28 = vadd.f32 %v1879_v9, %v13840_v38  ;;  %v1944_v58 = vadd.f32 %v1880_v20, %v13841_v60  ;;  %v1945_v51 = vadd.f32 %v1881_v46, %v13842_v2  ;;  %v13843_v27 = vld [vmem:[#allocation696_spill] sm:$0xff]  ;;  %v13844_v54 = vld [vmem:[#allocation753_spill] sm:$0xff]  ;;  %v13845_v4 = vld [vmem:[#allocation754_spill] sm:$0xff] }
 0x2d0   : > { %v1946_v56 = vadd.f32 %v1882_v25, %v13843_v27  ;;  %v2003_v49 = vadd.f32 %v1939_v59, %v13844_v54  ;;  %v2004_v50 = vadd.f32 %v1940_v12, %v13845_v4  ;;  %v13846_v63 = vld [vmem:[#allocation755_spill] sm:$0xff]  ;;  %v13847_v17 = vld [vmem:[#allocation756_spill] sm:$0xff]  ;;  %v13848_v47 = vld [vmem:[#allocation757_spill] sm:$0xff] }
 0x2d1   : > { %v2005_v61 = vadd.f32 %v1941_v53, %v13846_v63  ;;  %v2006_v6 = vadd.f32 %v1942_v48, %v13847_v17  ;;  %v2007_v19 = vadd.f32 %v1943_v28, %v13848_v47  ;;  %v13849_v0 = vld [vmem:[#allocation758_spill] sm:$0xff]  ;;  %v13850_v40 = vld [vmem:[#allocation759_spill] sm:$0xff]  ;;  %v13851_v37 = vld [vmem:[#allocation760_spill] sm:$0xff] }
 0x2d2   : > { %v2008_v18 = vadd.f32 %v1944_v58, %v13849_v0  ;;  %v2009_v39 = vadd.f32 %v1945_v51, %v13850_v40  ;;  %v2010_v13 = vadd.f32 %v1946_v56, %v13851_v37  ;;  %v13852_v9 = vld [vmem:[#allocation817_spill] sm:$0xff]  ;;  %v13853_v20 = vld [vmem:[#allocation818_spill] sm:$0xff]  ;;  %v13854_v46 = vld [vmem:[#allocation819_spill] sm:$0xff] }
 0x2d3   : > { %v2067_v16 = vadd.f32 %v2003_v49, %v13852_v9  ;;  %v2068_v10 = vadd.f32 %v2004_v50, %v13853_v20  ;;  %v2069_v62 = vadd.f32 %v2005_v61, %v13854_v46  ;;  %v13855_v25 = vld [vmem:[#allocation820_spill] sm:$0xff]  ;;  %v13856_v59 = vld [vmem:[#allocation821_spill] sm:$0xff]  ;;  %v13857_v12 = vld [vmem:[#allocation822_spill] sm:$0xff] }
 0x2d4   : > { %v2070_v45 = vadd.f32 %v2006_v6, %v13855_v25  ;;  %v2071_v15 = vadd.f32 %v2007_v19, %v13856_v59  ;;  %v2072_v26 = vadd.f32 %v2008_v18, %v13857_v12  ;;  %v13858_v53 = vld [vmem:[#allocation823_spill] sm:$0xff]  ;;  %v13859_v48 = vld [vmem:[#allocation824_spill] sm:$0xff]  ;;  %v13860_v28 = vld [vmem:[#allocation881_spill] sm:$0xff] }
 0x2d5   : > { %v2073_v57 = vadd.f32 %v2009_v39, %v13858_v53  ;;  %v2074_v38 = vadd.f32 %v2010_v13, %v13859_v48  ;;  %v2131_v60 = vadd.f32 %v2067_v16, %v13860_v28  ;;  %v2259_v58 = vld [vmem:[#allocation2 + $0x1e8] sm:$0xff]  ;;  %v13861_v2 = vld [vmem:[#allocation882_spill] sm:$0xff]  ;;  %v13862_v56 = vld [vmem:[#allocation883_spill] sm:$0xff] }
 0x2d6   : > { %v2132_v51 = vadd.f32 %v2068_v10, %v13861_v2  ;;  %v2260_v27 = vld [vmem:[#allocation2 + $0xf8] sm:$0xff]  ;;  %v2133_v54 = vadd.f32 %v2069_v62, %v13862_v56  ;;  %v13863_v49 = vld [vmem:[#allocation884_spill] sm:$0xff]  ;;  %v2261_v50 = vld [vmem:[#allocation2 + $0x160] sm:$0xff] }
 0x2d7   : > { %v2134_v4 = vadd.f32 %v2070_v45, %v13863_v49  ;;  %v2262_v63 = vld [vmem:[#allocation2 + $0x30] sm:$0xff]  ;;  %v2263_v6 = vld [vmem:[#allocation2 + $0x1e0] sm:$0xff]  ;;  %v13865_v47 = vld [vmem:[#allocation886_spill] sm:$0xff] }
 0x2d8   : > { %v13864_v61 = vld [vmem:[#allocation885_spill] sm:$0xff]  ;;  %v2136_v19 = vadd.f32 %v2072_v26, %v13865_v47  ;;  %v13866_v0 = vld [vmem:[#allocation887_spill] sm:$0xff]  ;;  %v13867_v40 = vld [vmem:[#allocation888_spill] sm:$0xff] }
 0x2d9   : > { %v2135_v17 = vadd.f32 %v2071_v15, %v13864_v61  ;;  %v2137_v18 = vadd.f32 %v2073_v57, %v13866_v0  ;;  %v2138_v39 = vadd.f32 %v2074_v38, %v13867_v40  ;;  %v13868_v37 = vld [vmem:[#allocation945_spill] sm:$0xff]  ;;  %v13869_v9 = vld [vmem:[#allocation946_spill] sm:$0xff]  ;;  %v13870_v20 = vld [vmem:[#allocation947_spill] sm:$0xff] }
 0x2da   : > { %v2195_v13 = vadd.f32 %v2131_v60, %v13868_v37  ;;  %v2196_v16 = vadd.f32 %v2132_v51, %v13869_v9  ;;  %v2197_v10 = vadd.f32 %v2133_v54, %v13870_v20  ;;  %v13871_v46 = vld [vmem:[#allocation948_spill] sm:$0xff]  ;;  %v2264_v25 = vld [vmem:[#allocation2] sm:$0xff]  ;;  %v2265_v45 = vld [vmem:[#allocation2 + $0xf0] sm:$0xff] }
 0x2db   : > { %v2198_v62 = vadd.f32 %v2134_v4, %v13871_v46  ;;  %v2266_v59 = vld [vmem:[#allocation2 + $0x8] sm:$0xff]  ;;  %v13872_v12 = vld [vmem:[#allocation949_spill] sm:$0xff]  ;;  %v13873_v53 = vld [vmem:[#allocation950_spill] sm:$0xff] }
 0x2dc   : > { %v2199_v15 = vadd.f32 %v2135_v17, %v13872_v12  ;;  %v2200_v48 = vadd.f32 %v2136_v19, %v13873_v53  ;;  %v13874_v26 = vld [vmem:[#allocation951_spill] sm:$0xff]  ;;  %v13875_v57 = vld [vmem:[#allocation952_spill] sm:$0xff]  ;;  %v2323_v38 = vadd.f32 %v2259_v58, %v2195_v13  ;;  %v2324_v56 = vadd.f32 %v2260_v27, %v2196_v16  ;;  %v13876_v4 = vld [vmem:[#allocation30_spill] sm:$0xff] }
 0x2dd   : > { %v2201_v28 = vadd.f32 %v2137_v18, %v13874_v26  ;;  %v2202_v2 = vadd.f32 %v2138_v39, %v13875_v57  ;;  %v2325_v60 = vadd.f32 %v2261_v50, %v2197_v10  ;;  %v2326_v49 = vadd.f32 %v2262_v63, %v2198_v62  ;;  %v13877_v17 = vld [vmem:[#allocation94_spill] sm:$0xff]  ;;  %v13878_v19 = vld [vmem:[#allocation31_spill] sm:$0xff]  ;;  %v13880_v37 = vld [vmem:[#allocation32_spill] sm:$0xff] }
 0x2de   : > { %v2327_v51 = vadd.f32 %v2263_v6, %v2199_v15  ;;  %v2328_v61 = vadd.f32 %v2264_v25, %v2200_v48  ;;  %2387 = vst [vmem:[#allocation2 + $0x1e8] sm:$0xff] %v2323_v38  ;;  %2388 = vst [vmem:[#allocation2 + $0xf8] sm:$0xff] %v2324_v56  ;;  %v1307_v0 = vadd.f32 %v13877_v17, %v13876_v4  ;;  %v13879_v40 = vld [vmem:[#allocation95_spill] sm:$0xff]  ;;  %v13881_v39 = vld [vmem:[#allocation96_spill] sm:$0xff] }
 0x2df   : > { %v2329_v54 = vadd.f32 %v2265_v45, %v2201_v28  ;;  %v2330_v47 = vadd.f32 %v2266_v59, %v2202_v2  ;;  %2389 = vst [vmem:[#allocation2 + $0x160] sm:$0xff] %v2325_v60  ;;  %2390 = vst [vmem:[#allocation2 + $0x30] sm:$0xff] %v2326_v49  ;;  %v1308_v18 = vadd.f32 %v13879_v40, %v13878_v19  ;;  %v13882_v27 = vld [vmem:[#allocation33_spill] sm:$0xff]  ;;  %v13884_v6 = vld [vmem:[#allocation34_spill] sm:$0xff] }
 0x2e0   : > { %v1309_v58 = vadd.f32 %v13881_v39, %v13880_v37  ;;  %v13883_v50 = vld [vmem:[#allocation97_spill] sm:$0xff]  ;;  %2391 = vst [vmem:[#allocation2 + $0x1e0] sm:$0xff] %v2327_v51  ;;  %2392 = vst [vmem:[#allocation2] sm:$0xff] %v2328_v61  ;;  %v13885_v13 = vld [vmem:[#allocation98_spill] sm:$0xff] }
 0x2e1   : > { %v1310_v63 = vadd.f32 %v13883_v50, %v13882_v27  ;;  %2393 = vst [vmem:[#allocation2 + $0xf0] sm:$0xff] %v2329_v54  ;;  %2394 = vst [vmem:[#allocation2 + $0x8] sm:$0xff] %v2330_v47  ;;  %v1311_v9 = vadd.f32 %v13885_v13, %v13884_v6  ;;  %v13886_v16 = vld [vmem:[#allocation35_spill] sm:$0xff]  ;;  %v13888_v46 = vld [vmem:[#allocation36_spill] sm:$0xff] }
 0x2e2   : > { %v13887_v20 = vld [vmem:[#allocation99_spill] sm:$0xff]  ;;  %v13889_v62 = vld [vmem:[#allocation100_spill] sm:$0xff]  ;;  %v13890_v45 = vld [vmem:[#allocation37_spill] sm:$0xff] }
 0x2e3   : > { %v1312_v10 = vadd.f32 %v13887_v20, %v13886_v16  ;;  %v1313_v25 = vadd.f32 %v13889_v62, %v13888_v46  ;;  %v13891_v59 = vld [vmem:[#allocation101_spill] sm:$0xff]  ;;  %v13892_v15 = vld [vmem:[#allocation150_spill] sm:$0xff]  ;;  %v13893_v48 = vld [vmem:[#allocation151_spill] sm:$0xff] }
 0x2e4   : > { %v1314_v12 = vadd.f32 %v13891_v59, %v13890_v45  ;;  %v1371_v53 = vadd.f32 %v1307_v0, %v13892_v15  ;;  %v1372_v26 = vadd.f32 %v1308_v18, %v13893_v48  ;;  %v13894_v28 = vld [vmem:[#allocation152_spill] sm:$0xff]  ;;  %v13895_v2 = vld [vmem:[#allocation153_spill] sm:$0xff]  ;;  %v13896_v56 = vld [vmem:[#allocation154_spill] sm:$0xff] }
 0x2e5   : > { %v1373_v57 = vadd.f32 %v1309_v58, %v13894_v28  ;;  %v1374_v38 = vadd.f32 %v1310_v63, %v13895_v2  ;;  %v1375_v60 = vadd.f32 %v1311_v9, %v13896_v56  ;;  %v13897_v49 = vld [vmem:[#allocation155_spill] sm:$0xff]  ;;  %v13898_v61 = vld [vmem:[#allocation156_spill] sm:$0xff]  ;;  %v13899_v47 = vld [vmem:[#allocation157_spill] sm:$0xff] }
 0x2e6   : > { %v1376_v51 = vadd.f32 %v1312_v10, %v13897_v49  ;;  %v1377_v54 = vadd.f32 %v1313_v25, %v13898_v61  ;;  %v1378_v4 = vadd.f32 %v1314_v12, %v13899_v47  ;;  %v13900_v17 = vld [vmem:[#allocation206_spill] sm:$0xff]  ;;  %v13901_v40 = vld [vmem:[#allocation207_spill] sm:$0xff]  ;;  %v13902_v39 = vld [vmem:[#allocation208_spill] sm:$0xff] }
 0x2e7   : > { %v1435_v19 = vadd.f32 %v1371_v53, %v13900_v17  ;;  %v1436_v37 = vadd.f32 %v1372_v26, %v13901_v40  ;;  %v1437_v0 = vadd.f32 %v1373_v57, %v13902_v39  ;;  %v13903_v27 = vld [vmem:[#allocation209_spill] sm:$0xff]  ;;  %v13904_v50 = vld [vmem:[#allocation210_spill] sm:$0xff]  ;;  %v13905_v6 = vld [vmem:[#allocation211_spill] sm:$0xff] }
 0x2e8   : > { %v1438_v18 = vadd.f32 %v1374_v38, %v13903_v27  ;;  %v1439_v58 = vadd.f32 %v1375_v60, %v13904_v50  ;;  %v1440_v63 = vadd.f32 %v1376_v51, %v13905_v6  ;;  %v13906_v13 = vld [vmem:[#allocation212_spill] sm:$0xff]  ;;  %v13907_v16 = vld [vmem:[#allocation213_spill] sm:$0xff]  ;;  %v13908_v10 = vld [vmem:[#allocation262_spill] sm:$0xff] }
 0x2e9   : > { %v1441_v9 = vadd.f32 %v1377_v54, %v13906_v13  ;;  %v1442_v20 = vadd.f32 %v1378_v4, %v13907_v16  ;;  %v1499_v46 = vadd.f32 %v1435_v19, %v13908_v10  ;;  %v13909_v62 = vld [vmem:[#allocation263_spill] sm:$0xff]  ;;  %v13910_v45 = vld [vmem:[#allocation264_spill] sm:$0xff]  ;;  %v13911_v12 = vld [vmem:[#allocation265_spill] sm:$0xff] }
 0x2ea   : > { %v1500_v25 = vadd.f32 %v1436_v37, %v13909_v62  ;;  %v1501_v59 = vadd.f32 %v1437_v0, %v13910_v45  ;;  %v1502_v15 = vadd.f32 %v1438_v18, %v13911_v12  ;;  %v13912_v53 = vld [vmem:[#allocation266_spill] sm:$0xff]  ;;  %v13913_v26 = vld [vmem:[#allocation267_spill] sm:$0xff]  ;;  %v13914_v57 = vld [vmem:[#allocation268_spill] sm:$0xff] }
 0x2eb   : > { %v1503_v48 = vadd.f32 %v1439_v58, %v13912_v53  ;;  %v1504_v28 = vadd.f32 %v1440_v63, %v13913_v26  ;;  %v1505_v2 = vadd.f32 %v1441_v9, %v13914_v57  ;;  %v13915_v38 = vld [vmem:[#allocation269_spill] sm:$0xff]  ;;  %v13916_v60 = vld [vmem:[#allocation318_spill] sm:$0xff]  ;;  %v13917_v51 = vld [vmem:[#allocation319_spill] sm:$0xff] }
 0x2ec   : > { %v1506_v56 = vadd.f32 %v1442_v20, %v13915_v38  ;;  %v1563_v49 = vadd.f32 %v1499_v46, %v13916_v60  ;;  %v1564_v61 = vadd.f32 %v1500_v25, %v13917_v51  ;;  %v13918_v54 = vld [vmem:[#allocation320_spill] sm:$0xff]  ;;  %v13919_v4 = vld [vmem:[#allocation321_spill] sm:$0xff]  ;;  %v13920_v19 = vld [vmem:[#allocation322_spill] sm:$0xff] }
 0x2ed   : > { %v1565_v47 = vadd.f32 %v1501_v59, %v13918_v54  ;;  %v1566_v17 = vadd.f32 %v1502_v15, %v13919_v4  ;;  %v1567_v40 = vadd.f32 %v1503_v48, %v13920_v19  ;;  %v13921_v37 = vld [vmem:[#allocation323_spill] sm:$0xff]  ;;  %v13922_v0 = vld [vmem:[#allocation324_spill] sm:$0xff]  ;;  %v13923_v18 = vld [vmem:[#allocation325_spill] sm:$0xff] }
 0x2ee   : > { %v1568_v39 = vadd.f32 %v1504_v28, %v13921_v37  ;;  %v1569_v27 = vadd.f32 %v1505_v2, %v13922_v0  ;;  %v1570_v50 = vadd.f32 %v1506_v56, %v13923_v18  ;;  %v13924_v58 = vld [vmem:[#allocation377_spill] sm:$0xff]  ;;  %v13925_v63 = vld [vmem:[#allocation378_spill] sm:$0xff]  ;;  %v13926_v9 = vld [vmem:[#allocation379_spill] sm:$0xff] }
 0x2ef   : > { %v1627_v6 = vadd.f32 %v1563_v49, %v13924_v58  ;;  %v1628_v13 = vadd.f32 %v1564_v61, %v13925_v63  ;;  %v1629_v16 = vadd.f32 %v1565_v47, %v13926_v9  ;;  %v13927_v20 = vld [vmem:[#allocation380_spill] sm:$0xff]  ;;  %v13928_v46 = vld [vmem:[#allocation381_spill] sm:$0xff]  ;;  %v13929_v25 = vld [vmem:[#allocation382_spill] sm:$0xff] }
 0x2f0   : > { %v1630_v10 = vadd.f32 %v1566_v17, %v13927_v20  ;;  %v1631_v62 = vadd.f32 %v1567_v40, %v13928_v46  ;;  %v1632_v45 = vadd.f32 %v1568_v39, %v13929_v25  ;;  %v13930_v59 = vld [vmem:[#allocation383_spill] sm:$0xff]  ;;  %v13931_v15 = vld [vmem:[#allocation384_spill] sm:$0xff]  ;;  %v13932_v48 = vld [vmem:[#allocation441_spill] sm:$0xff] }
 0x2f1   : > { %v1633_v12 = vadd.f32 %v1569_v27, %v13930_v59  ;;  %v1634_v53 = vadd.f32 %v1570_v50, %v13931_v15  ;;  %v1691_v26 = vadd.f32 %v1627_v6, %v13932_v48  ;;  %v13933_v28 = vld [vmem:[#allocation442_spill] sm:$0xff]  ;;  %v13934_v2 = vld [vmem:[#allocation443_spill] sm:$0xff]  ;;  %v13935_v56 = vld [vmem:[#allocation444_spill] sm:$0xff] }
 0x2f2   : > { %v1692_v57 = vadd.f32 %v1628_v13, %v13933_v28  ;;  %v1693_v38 = vadd.f32 %v1629_v16, %v13934_v2  ;;  %v1694_v60 = vadd.f32 %v1630_v10, %v13935_v56  ;;  %v13936_v49 = vld [vmem:[#allocation445_spill] sm:$0xff]  ;;  %v13937_v61 = vld [vmem:[#allocation446_spill] sm:$0xff]  ;;  %v13938_v47 = vld [vmem:[#allocation447_spill] sm:$0xff] }
 0x2f3   : > { %v1695_v51 = vadd.f32 %v1631_v62, %v13936_v49  ;;  %v1696_v54 = vadd.f32 %v1632_v45, %v13937_v61  ;;  %v1697_v4 = vadd.f32 %v1633_v12, %v13938_v47  ;;  %v13939_v17 = vld [vmem:[#allocation448_spill] sm:$0xff]  ;;  %v13940_v40 = vld [vmem:[#allocation505_spill] sm:$0xff]  ;;  %v13941_v39 = vld [vmem:[#allocation506_spill] sm:$0xff] }
 0x2f4   : > { %v1698_v19 = vadd.f32 %v1634_v53, %v13939_v17  ;;  %v1755_v37 = vadd.f32 %v1691_v26, %v13940_v40  ;;  %v1756_v0 = vadd.f32 %v1692_v57, %v13941_v39  ;;  %v13942_v27 = vld [vmem:[#allocation507_spill] sm:$0xff]  ;;  %v13943_v50 = vld [vmem:[#allocation508_spill] sm:$0xff]  ;;  %v13944_v6 = vld [vmem:[#allocation509_spill] sm:$0xff] }
 0x2f5   : > { %v1757_v18 = vadd.f32 %v1693_v38, %v13942_v27  ;;  %v1758_v58 = vadd.f32 %v1694_v60, %v13943_v50  ;;  %v1759_v63 = vadd.f32 %v1695_v51, %v13944_v6  ;;  %v13945_v13 = vld [vmem:[#allocation510_spill] sm:$0xff]  ;;  %v13946_v16 = vld [vmem:[#allocation511_spill] sm:$0xff]  ;;  %v13947_v10 = vld [vmem:[#allocation512_spill] sm:$0xff] }
 0x2f6   : > { %v1760_v9 = vadd.f32 %v1696_v54, %v13945_v13  ;;  %v1761_v20 = vadd.f32 %v1697_v4, %v13946_v16  ;;  %v1762_v46 = vadd.f32 %v1698_v19, %v13947_v10  ;;  %v13948_v62 = vld [vmem:[#allocation569_spill] sm:$0xff]  ;;  %v13949_v45 = vld [vmem:[#allocation570_spill] sm:$0xff]  ;;  %v13950_v12 = vld [vmem:[#allocation571_spill] sm:$0xff] }
 0x2f7   : > { %v1819_v25 = vadd.f32 %v1755_v37, %v13948_v62  ;;  %v1820_v59 = vadd.f32 %v1756_v0, %v13949_v45  ;;  %v1821_v15 = vadd.f32 %v1757_v18, %v13950_v12  ;;  %v13951_v53 = vld [vmem:[#allocation572_spill] sm:$0xff]  ;;  %v13952_v26 = vld [vmem:[#allocation573_spill] sm:$0xff]  ;;  %v13953_v57 = vld [vmem:[#allocation574_spill] sm:$0xff] }
 0x2f8   : > { %v1822_v48 = vadd.f32 %v1758_v58, %v13951_v53  ;;  %v1823_v28 = vadd.f32 %v1759_v63, %v13952_v26  ;;  %v1824_v2 = vadd.f32 %v1760_v9, %v13953_v57  ;;  %v13954_v38 = vld [vmem:[#allocation575_spill] sm:$0xff]  ;;  %v13955_v60 = vld [vmem:[#allocation576_spill] sm:$0xff]  ;;  %v13956_v51 = vld [vmem:[#allocation633_spill] sm:$0xff] }
 0x2f9   : > { %v1825_v56 = vadd.f32 %v1761_v20, %v13954_v38  ;;  %v1826_v49 = vadd.f32 %v1762_v46, %v13955_v60  ;;  %v1883_v61 = vadd.f32 %v1819_v25, %v13956_v51  ;;  %v13957_v54 = vld [vmem:[#allocation634_spill] sm:$0xff]  ;;  %v13958_v4 = vld [vmem:[#allocation635_spill] sm:$0xff]  ;;  %v13959_v19 = vld [vmem:[#allocation636_spill] sm:$0xff] }
 0x2fa   : > { %v1884_v47 = vadd.f32 %v1820_v59, %v13957_v54  ;;  %v1885_v17 = vadd.f32 %v1821_v15, %v13958_v4  ;;  %v1886_v40 = vadd.f32 %v1822_v48, %v13959_v19  ;;  %v13960_v37 = vld [vmem:[#allocation637_spill] sm:$0xff]  ;;  %v13961_v0 = vld [vmem:[#allocation638_spill] sm:$0xff]  ;;  %v13962_v18 = vld [vmem:[#allocation639_spill] sm:$0xff] }
 0x2fb   : > { %v1887_v39 = vadd.f32 %v1823_v28, %v13960_v37  ;;  %v1888_v27 = vadd.f32 %v1824_v2, %v13961_v0  ;;  %v1889_v50 = vadd.f32 %v1825_v56, %v13962_v18  ;;  %v13963_v58 = vld [vmem:[#allocation640_spill] sm:$0xff]  ;;  %v13964_v63 = vld [vmem:[#allocation697_spill] sm:$0xff]  ;;  %v13965_v9 = vld [vmem:[#allocation698_spill] sm:$0xff] }
 0x2fc   : > { %v1890_v6 = vadd.f32 %v1826_v49, %v13963_v58  ;;  %v1947_v13 = vadd.f32 %v1883_v61, %v13964_v63  ;;  %v1948_v16 = vadd.f32 %v1884_v47, %v13965_v9  ;;  %v13966_v20 = vld [vmem:[#allocation699_spill] sm:$0xff]  ;;  %v13967_v46 = vld [vmem:[#allocation700_spill] sm:$0xff]  ;;  %v13968_v25 = vld [vmem:[#allocation701_spill] sm:$0xff] }
 0x2fd   : > { %v1949_v10 = vadd.f32 %v1885_v17, %v13966_v20  ;;  %v1950_v62 = vadd.f32 %v1886_v40, %v13967_v46  ;;  %v1951_v45 = vadd.f32 %v1887_v39, %v13968_v25  ;;  %v13969_v59 = vld [vmem:[#allocation702_spill] sm:$0xff]  ;;  %v13970_v15 = vld [vmem:[#allocation703_spill] sm:$0xff]  ;;  %v13971_v48 = vld [vmem:[#allocation704_spill] sm:$0xff] }
 0x2fe   : > { %v1952_v12 = vadd.f32 %v1888_v27, %v13969_v59  ;;  %v1953_v53 = vadd.f32 %v1889_v50, %v13970_v15  ;;  %v1954_v26 = vadd.f32 %v1890_v6, %v13971_v48  ;;  %v13972_v28 = vld [vmem:[#allocation761_spill] sm:$0xff]  ;;  %v13973_v2 = vld [vmem:[#allocation762_spill] sm:$0xff]  ;;  %v13974_v56 = vld [vmem:[#allocation763_spill] sm:$0xff] }
 0x2ff   : > { %v2011_v57 = vadd.f32 %v1947_v13, %v13972_v28  ;;  %v2012_v38 = vadd.f32 %v1948_v16, %v13973_v2  ;;  %v2013_v60 = vadd.f32 %v1949_v10, %v13974_v56  ;;  %v13975_v49 = vld [vmem:[#allocation764_spill] sm:$0xff]  ;;  %v13976_v61 = vld [vmem:[#allocation765_spill] sm:$0xff]  ;;  %v13977_v47 = vld [vmem:[#allocation766_spill] sm:$0xff] }
 0x300   : > { %v2014_v51 = vadd.f32 %v1950_v62, %v13975_v49  ;;  %v2015_v54 = vadd.f32 %v1951_v45, %v13976_v61  ;;  %v2016_v4 = vadd.f32 %v1952_v12, %v13977_v47  ;;  %v13978_v17 = vld [vmem:[#allocation767_spill] sm:$0xff]  ;;  %v13979_v40 = vld [vmem:[#allocation768_spill] sm:$0xff]  ;;  %v13980_v39 = vld [vmem:[#allocation825_spill] sm:$0xff] }
 0x301   : > { %v2017_v19 = vadd.f32 %v1953_v53, %v13978_v17  ;;  %v2018_v37 = vadd.f32 %v1954_v26, %v13979_v40  ;;  %v2075_v0 = vadd.f32 %v2011_v57, %v13980_v39  ;;  %v13981_v27 = vld [vmem:[#allocation826_spill] sm:$0xff]  ;;  %v13982_v50 = vld [vmem:[#allocation827_spill] sm:$0xff]  ;;  %v13983_v6 = vld [vmem:[#allocation828_spill] sm:$0xff] }
 0x302   : > { %v2076_v18 = vadd.f32 %v2012_v38, %v13981_v27  ;;  %v2077_v58 = vadd.f32 %v2013_v60, %v13982_v50  ;;  %v2078_v63 = vadd.f32 %v2014_v51, %v13983_v6  ;;  %v13984_v13 = vld [vmem:[#allocation829_spill] sm:$0xff]  ;;  %v13985_v16 = vld [vmem:[#allocation830_spill] sm:$0xff]  ;;  %v13986_v10 = vld [vmem:[#allocation831_spill] sm:$0xff] }
 0x303   : > { %v2079_v9 = vadd.f32 %v2015_v54, %v13984_v13  ;;  %v2080_v20 = vadd.f32 %v2016_v4, %v13985_v16  ;;  %v2081_v46 = vadd.f32 %v2017_v19, %v13986_v10  ;;  %v13987_v62 = vld [vmem:[#allocation832_spill] sm:$0xff]  ;;  %v13988_v45 = vld [vmem:[#allocation889_spill] sm:$0xff]  ;;  %v13989_v15 = vld [vmem:[#allocation890_spill] sm:$0xff] }
 0x304   : > { %v2082_v25 = vadd.f32 %v2018_v37, %v13987_v62  ;;  %v2139_v59 = vadd.f32 %v2075_v0, %v13988_v45  ;;  %v2267_v12 = vld [vmem:[#allocation2 + $0x148] sm:$0xff]  ;;  %v2140_v53 = vadd.f32 %v2076_v18, %v13989_v15  ;;  %v2268_v48 = vld [vmem:[#allocation2 + $0x1d0] sm:$0xff]  ;;  %v13990_v26 = vld [vmem:[#allocation891_spill] sm:$0xff] }
 0x305   : > { %v2141_v28 = vadd.f32 %v2077_v58, %v13990_v26  ;;  %v13991_v57 = vld [vmem:[#allocation892_spill] sm:$0xff]  ;;  %v2269_v38 = vld [vmem:[#allocation2 + $0x100] sm:$0xff]  ;;  %v13992_v60 = vld [vmem:[#allocation893_spill] sm:$0xff] }
 0x306   : > { %v2142_v2 = vadd.f32 %v2078_v63, %v13991_v57  ;;  %v2270_v56 = vld [vmem:[#allocation2 + $0xc8] sm:$0xff]  ;;  %v2143_v49 = vadd.f32 %v2079_v9, %v13992_v60  ;;  %v2271_v51 = vld [vmem:[#allocation2 + $0x40] sm:$0xff]  ;;  %v13993_v61 = vld [vmem:[#allocation894_spill] sm:$0xff] }
 0x307   : > { %v2144_v54 = vadd.f32 %v2080_v20, %v13993_v61  ;;  %v13994_v47 = vld [vmem:[#allocation895_spill] sm:$0xff]  ;;  %v13995_v17 = vld [vmem:[#allocation896_spill] sm:$0xff]  ;;  %v13996_v40 = vld [vmem:[#allocation953_spill] sm:$0xff] }
 0x308   : > { %v2145_v4 = vadd.f32 %v2081_v46, %v13994_v47  ;;  %v2146_v19 = vadd.f32 %v2082_v25, %v13995_v17  ;;  %v2203_v37 = vadd.f32 %v2139_v59, %v13996_v40  ;;  %v13997_v39 = vld [vmem:[#allocation954_spill] sm:$0xff]  ;;  %v13998_v27 = vld [vmem:[#allocation955_spill] sm:$0xff]  ;;  %v13999_v50 = vld [vmem:[#allocation956_spill] sm:$0xff] }
 0x309   : > { %v2204_v0 = vadd.f32 %v2140_v53, %v13997_v39  ;;  %v2205_v18 = vadd.f32 %v2141_v28, %v13998_v27  ;;  %v2206_v58 = vadd.f32 %v2142_v2, %v13999_v50  ;;  %v2272_v6 = vld [vmem:[#allocation2 + $0x1f8] sm:$0xff]  ;;  %v2273_v63 = vld [vmem:[#allocation2 + $0x20] sm:$0xff]  ;;  %v2274_v13 = vld [vmem:[#allocation2 + $0x128] sm:$0xff] }
 0x30a   : > { %v14000_v16 = vld [vmem:[#allocation957_spill] sm:$0xff]  ;;  %v14001_v10 = vld [vmem:[#allocation958_spill] sm:$0xff]  ;;  %v14002_v20 = vld [vmem:[#allocation959_spill] sm:$0xff]  ;;  %v2331_v25 = vadd.f32 %v2267_v12, %v2203_v37 }
 0x30b   : > { %v2207_v9 = vadd.f32 %v2143_v49, %v14000_v16  ;;  %v2208_v62 = vadd.f32 %v2144_v54, %v14001_v10  ;;  %v2209_v45 = vadd.f32 %v2145_v4, %v14002_v20  ;;  %v14003_v46 = vld [vmem:[#allocation960_spill] sm:$0xff]  ;;  %v2332_v26 = vadd.f32 %v2268_v48, %v2204_v0  ;;  %v14004_v2 = vld [vmem:[#allocation38_spill] sm:$0xff]  ;;  %v14006_v54 = vld [vmem:[#allocation39_spill] sm:$0xff] }
 0x30c   : > { %v2210_v15 = vadd.f32 %v2146_v19, %v14003_v46  ;;  %v2333_v59 = vadd.f32 %v2269_v38, %v2205_v18  ;;  %v2334_v57 = vadd.f32 %v2270_v56, %v2206_v58  ;;  %2395 = vst [vmem:[#allocation2 + $0x148] sm:$0xff] %v2331_v25  ;;  %v14005_v49 = vld [vmem:[#allocation102_spill] sm:$0xff]  ;;  %v14007_v17 = vld [vmem:[#allocation103_spill] sm:$0xff]  ;;  %v14008_v40 = vld [vmem:[#allocation40_spill] sm:$0xff] }
 0x30d   : > { %v2335_v53 = vadd.f32 %v2271_v51, %v2207_v9  ;;  %v2336_v60 = vadd.f32 %v2272_v6, %v2208_v62  ;;  %v2337_v28 = vadd.f32 %v2273_v63, %v2209_v45  ;;  %2396 = vst [vmem:[#allocation2 + $0x1d0] sm:$0xff] %v2332_v26  ;;  %v1315_v47 = vadd.f32 %v14005_v49, %v14004_v2  ;;  %v14009_v19 = vld [vmem:[#allocation104_spill] sm:$0xff]  ;;  %v14010_v48 = vld [vmem:[#allocation41_spill] sm:$0xff]  ;;  %v14012_v51 = vld [vmem:[#allocation42_spill] sm:$0xff] }
 0x30e   : > { %v2338_v61 = vadd.f32 %v2274_v13, %v2210_v15  ;;  %2397 = vst [vmem:[#allocation2 + $0x100] sm:$0xff] %v2333_v59  ;;  %2398 = vst [vmem:[#allocation2 + $0xc8] sm:$0xff] %v2334_v57  ;;  %v1316_v4 = vadd.f32 %v14007_v17, %v14006_v54  ;;  %v1317_v12 = vadd.f32 %v14009_v19, %v14008_v40  ;;  %v14011_v38 = vld [vmem:[#allocation105_spill] sm:$0xff]  ;;  %v14013_v37 = vld [vmem:[#allocation106_spill] sm:$0xff] }
 0x30f   : > { %v1318_v56 = vadd.f32 %v14011_v38, %v14010_v48  ;;  %2399 = vst [vmem:[#allocation2 + $0x40] sm:$0xff] %v2335_v53  ;;  %2400 = vst [vmem:[#allocation2 + $0x1f8] sm:$0xff] %v2336_v60  ;;  %v1319_v39 = vadd.f32 %v14013_v37, %v14012_v51  ;;  %v14014_v0 = vld [vmem:[#allocation43_spill] sm:$0xff]  ;;  %v14016_v50 = vld [vmem:[#allocation44_spill] sm:$0xff] }
 0x310   : > { %2401 = vst [vmem:[#allocation2 + $0x20] sm:$0xff] %v2337_v28  ;;  %2402 = vst [vmem:[#allocation2 + $0x128] sm:$0xff] %v2338_v61  ;;  %v14015_v27 = vld [vmem:[#allocation107_spill] sm:$0xff]  ;;  %v14017_v58 = vld [vmem:[#allocation108_spill] sm:$0xff] }
 0x311   : > { %v1320_v18 = vadd.f32 %v14015_v27, %v14014_v0  ;;  %v1321_v6 = vadd.f32 %v14017_v58, %v14016_v50  ;;  %v14018_v63 = vld [vmem:[#allocation45_spill] sm:$0xff]  ;;  %v14020_v9 = vld [vmem:[#allocation158_spill] sm:$0xff]  ;;  %v14021_v62 = vld [vmem:[#allocation159_spill] sm:$0xff] }
 0x312   : > { %v14019_v13 = vld [vmem:[#allocation109_spill] sm:$0xff]  ;;  %v1379_v10 = vadd.f32 %v1315_v47, %v14020_v9  ;;  %v1380_v20 = vadd.f32 %v1316_v4, %v14021_v62  ;;  %v14022_v45 = vld [vmem:[#allocation160_spill] sm:$0xff]  ;;  %v14024_v26 = vld [vmem:[#allocation162_spill] sm:$0xff] }
 0x313   : > { %v1322_v16 = vadd.f32 %v14019_v13, %v14018_v63  ;;  %v1381_v46 = vadd.f32 %v1317_v12, %v14022_v45  ;;  %v14023_v15 = vld [vmem:[#allocation161_spill] sm:$0xff]  ;;  %v1383_v59 = vadd.f32 %v1319_v39, %v14024_v26  ;;  %v14025_v57 = vld [vmem:[#allocation163_spill] sm:$0xff]  ;;  %v14026_v60 = vld [vmem:[#allocation164_spill] sm:$0xff] }
 0x314   : > { %v1382_v25 = vadd.f32 %v1318_v56, %v14023_v15  ;;  %v1384_v53 = vadd.f32 %v1320_v18, %v14025_v57  ;;  %v1385_v28 = vadd.f32 %v1321_v6, %v14026_v60  ;;  %v14027_v61 = vld [vmem:[#allocation165_spill] sm:$0xff]  ;;  %v14028_v49 = vld [vmem:[#allocation214_spill] sm:$0xff]  ;;  %v14029_v17 = vld [vmem:[#allocation215_spill] sm:$0xff] }
 0x315   : > { %v1386_v2 = vadd.f32 %v1322_v16, %v14027_v61  ;;  %v1443_v54 = vadd.f32 %v1379_v10, %v14028_v49  ;;  %v1444_v40 = vadd.f32 %v1380_v20, %v14029_v17  ;;  %v14030_v19 = vld [vmem:[#allocation216_spill] sm:$0xff]  ;;  %v14031_v48 = vld [vmem:[#allocation217_spill] sm:$0xff]  ;;  %v14032_v38 = vld [vmem:[#allocation218_spill] sm:$0xff] }
 0x316   : > { %v1445_v47 = vadd.f32 %v1381_v46, %v14030_v19  ;;  %v1446_v4 = vadd.f32 %v1382_v25, %v14031_v48  ;;  %v1447_v12 = vadd.f32 %v1383_v59, %v14032_v38  ;;  %v14033_v51 = vld [vmem:[#allocation219_spill] sm:$0xff]  ;;  %v14034_v37 = vld [vmem:[#allocation220_spill] sm:$0xff]  ;;  %v14035_v0 = vld [vmem:[#allocation221_spill] sm:$0xff] }
 0x317   : > { %v1448_v56 = vadd.f32 %v1384_v53, %v14033_v51  ;;  %v1449_v39 = vadd.f32 %v1385_v28, %v14034_v37  ;;  %v1450_v27 = vadd.f32 %v1386_v2, %v14035_v0  ;;  %v14036_v18 = vld [vmem:[#allocation270_spill] sm:$0xff]  ;;  %v14037_v58 = vld [vmem:[#allocation271_spill] sm:$0xff]  ;;  %v14038_v63 = vld [vmem:[#allocation272_spill] sm:$0xff] }
 0x318   : > { %v1507_v50 = vadd.f32 %v1443_v54, %v14036_v18  ;;  %v1508_v6 = vadd.f32 %v1444_v40, %v14037_v58  ;;  %v1509_v13 = vadd.f32 %v1445_v47, %v14038_v63  ;;  %v14039_v16 = vld [vmem:[#allocation273_spill] sm:$0xff]  ;;  %v14040_v10 = vld [vmem:[#allocation274_spill] sm:$0xff]  ;;  %v14041_v20 = vld [vmem:[#allocation275_spill] sm:$0xff] }
 0x319   : > { %v1510_v9 = vadd.f32 %v1446_v4, %v14039_v16  ;;  %v1511_v62 = vadd.f32 %v1447_v12, %v14040_v10  ;;  %v1512_v45 = vadd.f32 %v1448_v56, %v14041_v20  ;;  %v14042_v46 = vld [vmem:[#allocation276_spill] sm:$0xff]  ;;  %v14043_v25 = vld [vmem:[#allocation277_spill] sm:$0xff]  ;;  %v14044_v59 = vld [vmem:[#allocation326_spill] sm:$0xff] }
 0x31a   : > { %v1513_v15 = vadd.f32 %v1449_v39, %v14042_v46  ;;  %v1514_v26 = vadd.f32 %v1450_v27, %v14043_v25  ;;  %v1571_v57 = vadd.f32 %v1507_v50, %v14044_v59  ;;  %v14045_v53 = vld [vmem:[#allocation327_spill] sm:$0xff]  ;;  %v14046_v28 = vld [vmem:[#allocation328_spill] sm:$0xff]  ;;  %v14047_v2 = vld [vmem:[#allocation329_spill] sm:$0xff] }
 0x31b   : > { %v1572_v60 = vadd.f32 %v1508_v6, %v14045_v53  ;;  %v1573_v61 = vadd.f32 %v1509_v13, %v14046_v28  ;;  %v1574_v49 = vadd.f32 %v1510_v9, %v14047_v2  ;;  %v14048_v54 = vld [vmem:[#allocation330_spill] sm:$0xff]  ;;  %v14049_v40 = vld [vmem:[#allocation331_spill] sm:$0xff]  ;;  %v14050_v47 = vld [vmem:[#allocation332_spill] sm:$0xff] }
 0x31c   : > { %v1575_v17 = vadd.f32 %v1511_v62, %v14048_v54  ;;  %v1576_v19 = vadd.f32 %v1512_v45, %v14049_v40  ;;  %v1577_v48 = vadd.f32 %v1513_v15, %v14050_v47  ;;  %v14051_v4 = vld [vmem:[#allocation333_spill] sm:$0xff]  ;;  %v14053_v56 = vld [vmem:[#allocation386_spill] sm:$0xff]  ;;  %v14054_v39 = vld [vmem:[#allocation387_spill] sm:$0xff] }
 0x31d   : > { %v1578_v38 = vadd.f32 %v1514_v26, %v14051_v4  ;;  %v14052_v12 = vld [vmem:[#allocation385_spill] sm:$0xff]  ;;  %v1636_v37 = vadd.f32 %v1572_v60, %v14053_v56  ;;  %v1637_v0 = vadd.f32 %v1573_v61, %v14054_v39  ;;  %v14055_v27 = vld [vmem:[#allocation388_spill] sm:$0xff]  ;;  %v14057_v6 = vld [vmem:[#allocation390_spill] sm:$0xff] }
 0x31e   : > { %v1635_v51 = vadd.f32 %v1571_v57, %v14052_v12  ;;  %v1638_v18 = vadd.f32 %v1574_v49, %v14055_v27  ;;  %v14056_v50 = vld [vmem:[#allocation389_spill] sm:$0xff]  ;;  %v1640_v63 = vadd.f32 %v1576_v19, %v14057_v6  ;;  %v14058_v13 = vld [vmem:[#allocation391_spill] sm:$0xff]  ;;  %v14059_v9 = vld [vmem:[#allocation392_spill] sm:$0xff] }
 0x31f   : > { %v1639_v58 = vadd.f32 %v1575_v17, %v14056_v50  ;;  %v1641_v16 = vadd.f32 %v1577_v48, %v14058_v13  ;;  %v1642_v10 = vadd.f32 %v1578_v38, %v14059_v9  ;;  %v14060_v62 = vld [vmem:[#allocation449_spill] sm:$0xff]  ;;  %v14061_v45 = vld [vmem:[#allocation450_spill] sm:$0xff]  ;;  %v14062_v15 = vld [vmem:[#allocation451_spill] sm:$0xff] }
 0x320   : > { %v1699_v20 = vadd.f32 %v1635_v51, %v14060_v62  ;;  %v1700_v46 = vadd.f32 %v1636_v37, %v14061_v45  ;;  %v1701_v25 = vadd.f32 %v1637_v0, %v14062_v15  ;;  %v14063_v26 = vld [vmem:[#allocation452_spill] sm:$0xff]  ;;  %v14064_v57 = vld [vmem:[#allocation453_spill] sm:$0xff]  ;;  %v14065_v60 = vld [vmem:[#allocation454_spill] sm:$0xff] }
 0x321   : > { %v1702_v59 = vadd.f32 %v1638_v18, %v14063_v26  ;;  %v1703_v53 = vadd.f32 %v1639_v58, %v14064_v57  ;;  %v1704_v28 = vadd.f32 %v1640_v63, %v14065_v60  ;;  %v14066_v61 = vld [vmem:[#allocation455_spill] sm:$0xff]  ;;  %v14067_v49 = vld [vmem:[#allocation456_spill] sm:$0xff]  ;;  %v14068_v17 = vld [vmem:[#allocation513_spill] sm:$0xff] }
 0x322   : > { %v1705_v2 = vadd.f32 %v1641_v16, %v14066_v61  ;;  %v1706_v54 = vadd.f32 %v1642_v10, %v14067_v49  ;;  %v1763_v40 = vadd.f32 %v1699_v20, %v14068_v17  ;;  %v14069_v19 = vld [vmem:[#allocation514_spill] sm:$0xff]  ;;  %v14070_v48 = vld [vmem:[#allocation515_spill] sm:$0xff]  ;;  %v14071_v38 = vld [vmem:[#allocation516_spill] sm:$0xff] }
 0x323   : > { %v1764_v47 = vadd.f32 %v1700_v46, %v14069_v19  ;;  %v1765_v4 = vadd.f32 %v1701_v25, %v14070_v48  ;;  %v1766_v12 = vadd.f32 %v1702_v59, %v14071_v38  ;;  %v14072_v51 = vld [vmem:[#allocation517_spill] sm:$0xff]  ;;  %v14073_v37 = vld [vmem:[#allocation518_spill] sm:$0xff]  ;;  %v14074_v0 = vld [vmem:[#allocation519_spill] sm:$0xff] }
 0x324   : > { %v1767_v56 = vadd.f32 %v1703_v53, %v14072_v51  ;;  %v1768_v39 = vadd.f32 %v1704_v28, %v14073_v37  ;;  %v1769_v27 = vadd.f32 %v1705_v2, %v14074_v0  ;;  %v14075_v18 = vld [vmem:[#allocation520_spill] sm:$0xff]  ;;  %v14076_v58 = vld [vmem:[#allocation577_spill] sm:$0xff]  ;;  %v14077_v63 = vld [vmem:[#allocation578_spill] sm:$0xff] }
 0x325   : > { %v1770_v50 = vadd.f32 %v1706_v54, %v14075_v18  ;;  %v1827_v6 = vadd.f32 %v1763_v40, %v14076_v58  ;;  %v1828_v13 = vadd.f32 %v1764_v47, %v14077_v63  ;;  %v14078_v16 = vld [vmem:[#allocation579_spill] sm:$0xff]  ;;  %v14079_v10 = vld [vmem:[#allocation580_spill] sm:$0xff]  ;;  %v14080_v20 = vld [vmem:[#allocation581_spill] sm:$0xff] }
 0x326   : > { %v1829_v9 = vadd.f32 %v1765_v4, %v14078_v16  ;;  %v1830_v62 = vadd.f32 %v1766_v12, %v14079_v10  ;;  %v1831_v45 = vadd.f32 %v1767_v56, %v14080_v20  ;;  %v14081_v46 = vld [vmem:[#allocation582_spill] sm:$0xff]  ;;  %v14082_v25 = vld [vmem:[#allocation583_spill] sm:$0xff]  ;;  %v14083_v59 = vld [vmem:[#allocation584_spill] sm:$0xff] }
 0x327   : > { %v1832_v15 = vadd.f32 %v1768_v39, %v14081_v46  ;;  %v1833_v26 = vadd.f32 %v1769_v27, %v14082_v25  ;;  %v1834_v57 = vadd.f32 %v1770_v50, %v14083_v59  ;;  %v14084_v53 = vld [vmem:[#allocation641_spill] sm:$0xff]  ;;  %v14085_v28 = vld [vmem:[#allocation642_spill] sm:$0xff]  ;;  %v14086_v2 = vld [vmem:[#allocation643_spill] sm:$0xff] }
 0x328   : > { %v1891_v60 = vadd.f32 %v1827_v6, %v14084_v53  ;;  %v1892_v61 = vadd.f32 %v1828_v13, %v14085_v28  ;;  %v1893_v49 = vadd.f32 %v1829_v9, %v14086_v2  ;;  %v14087_v54 = vld [vmem:[#allocation644_spill] sm:$0xff]  ;;  %v14088_v40 = vld [vmem:[#allocation645_spill] sm:$0xff]  ;;  %v14089_v47 = vld [vmem:[#allocation646_spill] sm:$0xff] }
 0x329   : > { %v1894_v17 = vadd.f32 %v1830_v62, %v14087_v54  ;;  %v1895_v19 = vadd.f32 %v1831_v45, %v14088_v40  ;;  %v1896_v48 = vadd.f32 %v1832_v15, %v14089_v47  ;;  %v14090_v4 = vld [vmem:[#allocation647_spill] sm:$0xff]  ;;  %v14091_v12 = vld [vmem:[#allocation648_spill] sm:$0xff]  ;;  %v14092_v56 = vld [vmem:[#allocation705_spill] sm:$0xff] }
 0x32a   : > { %v1897_v38 = vadd.f32 %v1833_v26, %v14090_v4  ;;  %v1898_v51 = vadd.f32 %v1834_v57, %v14091_v12  ;;  %v1955_v37 = vadd.f32 %v1891_v60, %v14092_v56  ;;  %v14093_v39 = vld [vmem:[#allocation706_spill] sm:$0xff]  ;;  %v14094_v27 = vld [vmem:[#allocation707_spill] sm:$0xff]  ;;  %v14095_v50 = vld [vmem:[#allocation708_spill] sm:$0xff] }
 0x32b   : > { %v1956_v0 = vadd.f32 %v1892_v61, %v14093_v39  ;;  %v1957_v18 = vadd.f32 %v1893_v49, %v14094_v27  ;;  %v1958_v58 = vadd.f32 %v1894_v17, %v14095_v50  ;;  %v14096_v6 = vld [vmem:[#allocation709_spill] sm:$0xff]  ;;  %v14097_v13 = vld [vmem:[#allocation710_spill] sm:$0xff]  ;;  %v14098_v9 = vld [vmem:[#allocation711_spill] sm:$0xff] }
 0x32c   : > { %v1959_v63 = vadd.f32 %v1895_v19, %v14096_v6  ;;  %v1960_v16 = vadd.f32 %v1896_v48, %v14097_v13  ;;  %v1961_v10 = vadd.f32 %v1897_v38, %v14098_v9  ;;  %v14099_v62 = vld [vmem:[#allocation712_spill] sm:$0xff]  ;;  %v14100_v45 = vld [vmem:[#allocation769_spill] sm:$0xff]  ;;  %v14101_v15 = vld [vmem:[#allocation770_spill] sm:$0xff] }
 0x32d   : > { %v1962_v20 = vadd.f32 %v1898_v51, %v14099_v62  ;;  %v2019_v46 = vadd.f32 %v1955_v37, %v14100_v45  ;;  %v2020_v25 = vadd.f32 %v1956_v0, %v14101_v15  ;;  %v14102_v26 = vld [vmem:[#allocation771_spill] sm:$0xff]  ;;  %v14103_v57 = vld [vmem:[#allocation772_spill] sm:$0xff]  ;;  %v14104_v60 = vld [vmem:[#allocation773_spill] sm:$0xff] }
 0x32e   : > { %v2021_v59 = vadd.f32 %v1957_v18, %v14102_v26  ;;  %v2022_v53 = vadd.f32 %v1958_v58, %v14103_v57  ;;  %v2023_v28 = vadd.f32 %v1959_v63, %v14104_v60  ;;  %v14105_v61 = vld [vmem:[#allocation774_spill] sm:$0xff]  ;;  %v14106_v49 = vld [vmem:[#allocation775_spill] sm:$0xff]  ;;  %v14107_v17 = vld [vmem:[#allocation776_spill] sm:$0xff] }
 0x32f   : > { %v2024_v2 = vadd.f32 %v1960_v16, %v14105_v61  ;;  %v2025_v54 = vadd.f32 %v1961_v10, %v14106_v49  ;;  %v2026_v40 = vadd.f32 %v1962_v20, %v14107_v17  ;;  %v14108_v19 = vld [vmem:[#allocation833_spill] sm:$0xff]  ;;  %v14109_v48 = vld [vmem:[#allocation834_spill] sm:$0xff]  ;;  %v14110_v38 = vld [vmem:[#allocation835_spill] sm:$0xff] }
 0x330   : > { %v2083_v47 = vadd.f32 %v2019_v46, %v14108_v19  ;;  %v2084_v4 = vadd.f32 %v2020_v25, %v14109_v48  ;;  %v2085_v12 = vadd.f32 %v2021_v59, %v14110_v38  ;;  %v14111_v51 = vld [vmem:[#allocation836_spill] sm:$0xff]  ;;  %v14112_v37 = vld [vmem:[#allocation837_spill] sm:$0xff]  ;;  %v14113_v0 = vld [vmem:[#allocation838_spill] sm:$0xff] }
 0x331   : > { %v2086_v56 = vadd.f32 %v2022_v53, %v14111_v51  ;;  %v2087_v39 = vadd.f32 %v2023_v28, %v14112_v37  ;;  %v2088_v27 = vadd.f32 %v2024_v2, %v14113_v0  ;;  %v14114_v18 = vld [vmem:[#allocation839_spill] sm:$0xff]  ;;  %v14115_v58 = vld [vmem:[#allocation840_spill] sm:$0xff]  ;;  %v14116_v63 = vld [vmem:[#allocation897_spill] sm:$0xff] }
 0x332   : > { %v2089_v50 = vadd.f32 %v2025_v54, %v14114_v18  ;;  %v2090_v6 = vadd.f32 %v2026_v40, %v14115_v58  ;;  %v2147_v13 = vadd.f32 %v2083_v47, %v14116_v63  ;;  %v2275_v16 = vld [vmem:[#allocation2 + $0x1a0] sm:$0xff]  ;;  %v14117_v9 = vld [vmem:[#allocation898_spill] sm:$0xff]  ;;  %v2276_v62 = vld [vmem:[#allocation2 + $0x1f0] sm:$0xff] }
 0x333   : > { %v2148_v10 = vadd.f32 %v2084_v4, %v14117_v9  ;;  %v14118_v20 = vld [vmem:[#allocation899_spill] sm:$0xff]  ;;  %v14119_v46 = vld [vmem:[#allocation900_spill] sm:$0xff]  ;;  %v2278_v26 = vld [vmem:[#allocation2 + $0x78] sm:$0xff] }
 0x334   : > { %v2149_v45 = vadd.f32 %v2085_v12, %v14118_v20  ;;  %v2150_v15 = vadd.f32 %v2086_v56, %v14119_v46  ;;  %v2277_v25 = vld [vmem:[#allocation2 + $0xe8] sm:$0xff]  ;;  %v14120_v59 = vld [vmem:[#allocation901_spill] sm:$0xff]  ;;  %v14121_v60 = vld [vmem:[#allocation902_spill] sm:$0xff] }
 0x335   : > { %v2151_v57 = vadd.f32 %v2087_v39, %v14120_v59  ;;  %v2279_v53 = vld [vmem:[#allocation2 + $0x70] sm:$0xff]  ;;  %v2152_v28 = vadd.f32 %v2088_v27, %v14121_v60  ;;  %v14122_v61 = vld [vmem:[#allocation903_spill] sm:$0xff]  ;;  %v14123_v49 = vld [vmem:[#allocation904_spill] sm:$0xff] }
 0x336   : > { %v2153_v2 = vadd.f32 %v2089_v50, %v14122_v61  ;;  %v2154_v54 = vadd.f32 %v2090_v6, %v14123_v49  ;;  %v14124_v17 = vld [vmem:[#allocation961_spill] sm:$0xff]  ;;  %v14125_v19 = vld [vmem:[#allocation962_spill] sm:$0xff]  ;;  %v14126_v48 = vld [vmem:[#allocation963_spill] sm:$0xff] }
 0x337   : > { %v2211_v40 = vadd.f32 %v2147_v13, %v14124_v17  ;;  %v2212_v47 = vadd.f32 %v2148_v10, %v14125_v19  ;;  %v2213_v4 = vadd.f32 %v2149_v45, %v14126_v48  ;;  %v14127_v38 = vld [vmem:[#allocation964_spill] sm:$0xff]  ;;  %v2280_v51 = vld [vmem:[#allocation2 + $0x90] sm:$0xff]  ;;  %v2281_v56 = vld [vmem:[#allocation2 + $0x1d8] sm:$0xff] }
 0x338   : > { %v2214_v12 = vadd.f32 %v2150_v15, %v14127_v38  ;;  %v2282_v37 = vld [vmem:[#allocation2 + $0xd0] sm:$0xff]  ;;  %v14129_v18 = vld [vmem:[#allocation966_spill] sm:$0xff]  ;;  %v14130_v27 = vld [vmem:[#allocation967_spill] sm:$0xff] }
 0x339   : > { %v14128_v0 = vld [vmem:[#allocation965_spill] sm:$0xff]  ;;  %v2216_v58 = vadd.f32 %v2152_v28, %v14129_v18  ;;  %v2217_v63 = vadd.f32 %v2153_v2, %v14130_v27  ;;  %v14131_v50 = vld [vmem:[#allocation968_spill] sm:$0xff]  ;;  %v2339_v6 = vadd.f32 %v2275_v16, %v2211_v40  ;;  %v2340_v20 = vadd.f32 %v2276_v62, %v2212_v47  ;;  %v14132_v15 = vld [vmem:[#allocation46_spill] sm:$0xff] }
 0x33a   : > { %v2215_v39 = vadd.f32 %v2151_v57, %v14128_v0  ;;  %v2218_v9 = vadd.f32 %v2154_v54, %v14131_v50  ;;  %v2341_v13 = vadd.f32 %v2277_v25, %v2213_v4  ;;  %v2342_v46 = vadd.f32 %v2278_v26, %v2214_v12  ;;  %v14133_v57 = vld [vmem:[#allocation110_spill] sm:$0xff]  ;;  %v14134_v28 = vld [vmem:[#allocation47_spill] sm:$0xff]  ;;  %v14136_v17 = vld [vmem:[#allocation48_spill] sm:$0xff] }
 0x33b   : > { %v2344_v59 = vadd.f32 %v2280_v51, %v2216_v58  ;;  %v2345_v45 = vadd.f32 %v2281_v56, %v2217_v63  ;;  %2403 = vst [vmem:[#allocation2 + $0x1a0] sm:$0xff] %v2339_v6  ;;  %2404 = vst [vmem:[#allocation2 + $0x1f0] sm:$0xff] %v2340_v20  ;;  %v1323_v61 = vadd.f32 %v14133_v57, %v14132_v15  ;;  %v14135_v49 = vld [vmem:[#allocation111_spill] sm:$0xff]  ;;  %v14137_v54 = vld [vmem:[#allocation112_spill] sm:$0xff] }
 0x33c   : > { %v2343_v10 = vadd.f32 %v2279_v53, %v2215_v39  ;;  %v2346_v60 = vadd.f32 %v2282_v37, %v2218_v9  ;;  %2405 = vst [vmem:[#allocation2 + $0xe8] sm:$0xff] %v2341_v13  ;;  %2406 = vst [vmem:[#allocation2 + $0x78] sm:$0xff] %v2342_v46  ;;  %v1324_v2 = vadd.f32 %v14135_v49, %v14134_v28  ;;  %v14138_v62 = vld [vmem:[#allocation49_spill] sm:$0xff]  ;;  %v14140_v53 = vld [vmem:[#allocation50_spill] sm:$0xff] }
 0x33d   : > { %v1325_v16 = vadd.f32 %v14137_v54, %v14136_v17  ;;  %v14139_v25 = vld [vmem:[#allocation113_spill] sm:$0xff]  ;;  %2408 = vst [vmem:[#allocation2 + $0x90] sm:$0xff] %v2344_v59  ;;  %2409 = vst [vmem:[#allocation2 + $0x1d8] sm:$0xff] %v2345_v45  ;;  %v14141_v40 = vld [vmem:[#allocation114_spill] sm:$0xff] }
 0x33e   : > { %v1326_v26 = vadd.f32 %v14139_v25, %v14138_v62  ;;  %2407 = vst [vmem:[#allocation2 + $0x70] sm:$0xff] %v2343_v10  ;;  %2410 = vst [vmem:[#allocation2 + $0xd0] sm:$0xff] %v2346_v60  ;;  %v1327_v19 = vadd.f32 %v14141_v40, %v14140_v53  ;;  %v14142_v47 = vld [vmem:[#allocation51_spill] sm:$0xff]  ;;  %v14144_v38 = vld [vmem:[#allocation52_spill] sm:$0xff] }
 0x33f   : > { %v14143_v48 = vld [vmem:[#allocation115_spill] sm:$0xff]  ;;  %v14145_v12 = vld [vmem:[#allocation116_spill] sm:$0xff]  ;;  %v14146_v56 = vld [vmem:[#allocation53_spill] sm:$0xff] }
 0x340   : > { %v1328_v4 = vadd.f32 %v14143_v48, %v14142_v47  ;;  %v1329_v51 = vadd.f32 %v14145_v12, %v14144_v38  ;;  %v14147_v37 = vld [vmem:[#allocation117_spill] sm:$0xff]  ;;  %v14148_v39 = vld [vmem:[#allocation166_spill] sm:$0xff]  ;;  %v14149_v58 = vld [vmem:[#allocation167_spill] sm:$0xff] }
 0x341   : > { %v1330_v0 = vadd.f32 %v14147_v37, %v14146_v56  ;;  %v1387_v18 = vadd.f32 %v1323_v61, %v14148_v39  ;;  %v1388_v27 = vadd.f32 %v1324_v2, %v14149_v58  ;;  %v14150_v63 = vld [vmem:[#allocation168_spill] sm:$0xff]  ;;  %v14151_v9 = vld [vmem:[#allocation169_spill] sm:$0xff]  ;;  %v14152_v20 = vld [vmem:[#allocation170_spill] sm:$0xff] }
 0x342   : > { %v1389_v50 = vadd.f32 %v1325_v16, %v14150_v63  ;;  %v1390_v6 = vadd.f32 %v1326_v26, %v14151_v9  ;;  %v1391_v13 = vadd.f32 %v1327_v19, %v14152_v20  ;;  %v14153_v46 = vld [vmem:[#allocation171_spill] sm:$0xff]  ;;  %v14154_v59 = vld [vmem:[#allocation172_spill] sm:$0xff]  ;;  %v14155_v60 = vld [vmem:[#allocation173_spill] sm:$0xff] }
 0x343   : > { %v1392_v10 = vadd.f32 %v1328_v4, %v14153_v46  ;;  %v1393_v45 = vadd.f32 %v1329_v51, %v14154_v59  ;;  %v1394_v15 = vadd.f32 %v1330_v0, %v14155_v60  ;;  %v14156_v57 = vld [vmem:[#allocation222_spill] sm:$0xff]  ;;  %v14157_v49 = vld [vmem:[#allocation223_spill] sm:$0xff]  ;;  %v14158_v54 = vld [vmem:[#allocation224_spill] sm:$0xff] }
 0x344   : > { %v1451_v28 = vadd.f32 %v1387_v18, %v14156_v57  ;;  %v1452_v17 = vadd.f32 %v1388_v27, %v14157_v49  ;;  %v1453_v61 = vadd.f32 %v1389_v50, %v14158_v54  ;;  %v14159_v62 = vld [vmem:[#allocation225_spill] sm:$0xff]  ;;  %v14160_v25 = vld [vmem:[#allocation226_spill] sm:$0xff]  ;;  %v14161_v53 = vld [vmem:[#allocation227_spill] sm:$0xff] }
 0x345   : > { %v1454_v2 = vadd.f32 %v1390_v6, %v14159_v62  ;;  %v1455_v16 = vadd.f32 %v1391_v13, %v14160_v25  ;;  %v1456_v26 = vadd.f32 %v1392_v10, %v14161_v53  ;;  %v14162_v40 = vld [vmem:[#allocation228_spill] sm:$0xff]  ;;  %v14163_v47 = vld [vmem:[#allocation229_spill] sm:$0xff]  ;;  %v14164_v4 = vld [vmem:[#allocation278_spill] sm:$0xff] }
 0x346   : > { %v1457_v19 = vadd.f32 %v1393_v45, %v14162_v40  ;;  %v1458_v48 = vadd.f32 %v1394_v15, %v14163_v47  ;;  %v1515_v38 = vadd.f32 %v1451_v28, %v14164_v4  ;;  %v14165_v12 = vld [vmem:[#allocation279_spill] sm:$0xff]  ;;  %v14166_v56 = vld [vmem:[#allocation280_spill] sm:$0xff]  ;;  %v14167_v0 = vld [vmem:[#allocation281_spill] sm:$0xff] }
 0x347   : > { %v1516_v51 = vadd.f32 %v1452_v17, %v14165_v12  ;;  %v1517_v37 = vadd.f32 %v1453_v61, %v14166_v56  ;;  %v1518_v39 = vadd.f32 %v1454_v2, %v14167_v0  ;;  %v14168_v18 = vld [vmem:[#allocation282_spill] sm:$0xff]  ;;  %v14169_v27 = vld [vmem:[#allocation283_spill] sm:$0xff]  ;;  %v14170_v50 = vld [vmem:[#allocation284_spill] sm:$0xff] }
 0x348   : > { %v1519_v58 = vadd.f32 %v1455_v16, %v14168_v18  ;;  %v1520_v63 = vadd.f32 %v1456_v26, %v14169_v27  ;;  %v1521_v9 = vadd.f32 %v1457_v19, %v14170_v50  ;;  %v14171_v6 = vld [vmem:[#allocation285_spill] sm:$0xff]  ;;  %v14172_v13 = vld [vmem:[#allocation334_spill] sm:$0xff]  ;;  %v14173_v10 = vld [vmem:[#allocation335_spill] sm:$0xff] }
 0x349   : > { %v1522_v20 = vadd.f32 %v1458_v48, %v14171_v6  ;;  %v1579_v46 = vadd.f32 %v1515_v38, %v14172_v13  ;;  %v1580_v59 = vadd.f32 %v1516_v51, %v14173_v10  ;;  %v14174_v45 = vld [vmem:[#allocation336_spill] sm:$0xff]  ;;  %v14175_v15 = vld [vmem:[#allocation337_spill] sm:$0xff]  ;;  %v14176_v28 = vld [vmem:[#allocation338_spill] sm:$0xff] }
 0x34a   : > { %v1581_v60 = vadd.f32 %v1517_v37, %v14174_v45  ;;  %v1582_v57 = vadd.f32 %v1518_v39, %v14175_v15  ;;  %v1583_v49 = vadd.f32 %v1519_v58, %v14176_v28  ;;  %v14177_v17 = vld [vmem:[#allocation339_spill] sm:$0xff]  ;;  %v14178_v61 = vld [vmem:[#allocation340_spill] sm:$0xff]  ;;  %v14179_v2 = vld [vmem:[#allocation341_spill] sm:$0xff] }
 0x34b   : > { %v1584_v54 = vadd.f32 %v1520_v63, %v14177_v17  ;;  %v1585_v62 = vadd.f32 %v1521_v9, %v14178_v61  ;;  %v1586_v25 = vadd.f32 %v1522_v20, %v14179_v2  ;;  %v14180_v16 = vld [vmem:[#allocation393_spill] sm:$0xff]  ;;  %v14181_v26 = vld [vmem:[#allocation394_spill] sm:$0xff]  ;;  %v14182_v19 = vld [vmem:[#allocation395_spill] sm:$0xff] }
 0x34c   : > { %v1643_v53 = vadd.f32 %v1579_v46, %v14180_v16  ;;  %v1644_v40 = vadd.f32 %v1580_v59, %v14181_v26  ;;  %v1645_v47 = vadd.f32 %v1581_v60, %v14182_v19  ;;  %v14183_v48 = vld [vmem:[#allocation396_spill] sm:$0xff]  ;;  %v14184_v38 = vld [vmem:[#allocation397_spill] sm:$0xff]  ;;  %v14185_v51 = vld [vmem:[#allocation398_spill] sm:$0xff] }
 0x34d   : > { %v1646_v4 = vadd.f32 %v1582_v57, %v14183_v48  ;;  %v1647_v12 = vadd.f32 %v1583_v49, %v14184_v38  ;;  %v1648_v56 = vadd.f32 %v1584_v54, %v14185_v51  ;;  %v14186_v37 = vld [vmem:[#allocation399_spill] sm:$0xff]  ;;  %v14187_v39 = vld [vmem:[#allocation400_spill] sm:$0xff]  ;;  %v14188_v58 = vld [vmem:[#allocation457_spill] sm:$0xff] }
 0x34e   : > { %v1649_v0 = vadd.f32 %v1585_v62, %v14186_v37  ;;  %v1650_v18 = vadd.f32 %v1586_v25, %v14187_v39  ;;  %v1707_v27 = vadd.f32 %v1643_v53, %v14188_v58  ;;  %v14189_v63 = vld [vmem:[#allocation458_spill] sm:$0xff]  ;;  %v14190_v9 = vld [vmem:[#allocation459_spill] sm:$0xff]  ;;  %v14191_v20 = vld [vmem:[#allocation460_spill] sm:$0xff] }
 0x34f   : > { %v1708_v50 = vadd.f32 %v1644_v40, %v14189_v63  ;;  %v1709_v6 = vadd.f32 %v1645_v47, %v14190_v9  ;;  %v1710_v13 = vadd.f32 %v1646_v4, %v14191_v20  ;;  %v14192_v46 = vld [vmem:[#allocation461_spill] sm:$0xff]  ;;  %v14193_v59 = vld [vmem:[#allocation462_spill] sm:$0xff]  ;;  %v14194_v60 = vld [vmem:[#allocation463_spill] sm:$0xff] }
 0x350   : > { %v1711_v10 = vadd.f32 %v1647_v12, %v14192_v46  ;;  %v1712_v45 = vadd.f32 %v1648_v56, %v14193_v59  ;;  %v1713_v15 = vadd.f32 %v1649_v0, %v14194_v60  ;;  %v14195_v57 = vld [vmem:[#allocation464_spill] sm:$0xff]  ;;  %v14196_v49 = vld [vmem:[#allocation521_spill] sm:$0xff]  ;;  %v14197_v54 = vld [vmem:[#allocation522_spill] sm:$0xff] }
 0x351   : > { %v1714_v28 = vadd.f32 %v1650_v18, %v14195_v57  ;;  %v1771_v17 = vadd.f32 %v1707_v27, %v14196_v49  ;;  %v1772_v61 = vadd.f32 %v1708_v50, %v14197_v54  ;;  %v14198_v62 = vld [vmem:[#allocation523_spill] sm:$0xff]  ;;  %v14199_v25 = vld [vmem:[#allocation524_spill] sm:$0xff]  ;;  %v14200_v53 = vld [vmem:[#allocation525_spill] sm:$0xff] }
 0x352   : > { %v1773_v2 = vadd.f32 %v1709_v6, %v14198_v62  ;;  %v1774_v16 = vadd.f32 %v1710_v13, %v14199_v25  ;;  %v1775_v26 = vadd.f32 %v1711_v10, %v14200_v53  ;;  %v14201_v40 = vld [vmem:[#allocation526_spill] sm:$0xff]  ;;  %v14202_v47 = vld [vmem:[#allocation527_spill] sm:$0xff]  ;;  %v14203_v4 = vld [vmem:[#allocation528_spill] sm:$0xff] }
 0x353   : > { %v1776_v19 = vadd.f32 %v1712_v45, %v14201_v40  ;;  %v1777_v48 = vadd.f32 %v1713_v15, %v14202_v47  ;;  %v1778_v38 = vadd.f32 %v1714_v28, %v14203_v4  ;;  %v14204_v12 = vld [vmem:[#allocation585_spill] sm:$0xff]  ;;  %v14205_v56 = vld [vmem:[#allocation586_spill] sm:$0xff]  ;;  %v14206_v0 = vld [vmem:[#allocation587_spill] sm:$0xff] }
 0x354   : > { %v1835_v51 = vadd.f32 %v1771_v17, %v14204_v12  ;;  %v1836_v37 = vadd.f32 %v1772_v61, %v14205_v56  ;;  %v1837_v39 = vadd.f32 %v1773_v2, %v14206_v0  ;;  %v14207_v18 = vld [vmem:[#allocation588_spill] sm:$0xff]  ;;  %v14208_v27 = vld [vmem:[#allocation589_spill] sm:$0xff]  ;;  %v14209_v50 = vld [vmem:[#allocation590_spill] sm:$0xff] }
 0x355   : > { %v1838_v58 = vadd.f32 %v1774_v16, %v14207_v18  ;;  %v1839_v63 = vadd.f32 %v1775_v26, %v14208_v27  ;;  %v1840_v9 = vadd.f32 %v1776_v19, %v14209_v50  ;;  %v14210_v6 = vld [vmem:[#allocation591_spill] sm:$0xff]  ;;  %v14211_v13 = vld [vmem:[#allocation592_spill] sm:$0xff]  ;;  %v14212_v10 = vld [vmem:[#allocation649_spill] sm:$0xff] }
 0x356   : > { %v1841_v20 = vadd.f32 %v1777_v48, %v14210_v6  ;;  %v1842_v46 = vadd.f32 %v1778_v38, %v14211_v13  ;;  %v1899_v59 = vadd.f32 %v1835_v51, %v14212_v10  ;;  %v14213_v45 = vld [vmem:[#allocation650_spill] sm:$0xff]  ;;  %v14214_v15 = vld [vmem:[#allocation651_spill] sm:$0xff]  ;;  %v14215_v28 = vld [vmem:[#allocation652_spill] sm:$0xff] }
 0x357   : > { %v1900_v60 = vadd.f32 %v1836_v37, %v14213_v45  ;;  %v1901_v57 = vadd.f32 %v1837_v39, %v14214_v15  ;;  %v1902_v49 = vadd.f32 %v1838_v58, %v14215_v28  ;;  %v14216_v17 = vld [vmem:[#allocation653_spill] sm:$0xff]  ;;  %v14217_v61 = vld [vmem:[#allocation654_spill] sm:$0xff]  ;;  %v14218_v2 = vld [vmem:[#allocation655_spill] sm:$0xff] }
 0x358   : > { %v1903_v54 = vadd.f32 %v1839_v63, %v14216_v17  ;;  %v1904_v62 = vadd.f32 %v1840_v9, %v14217_v61  ;;  %v1905_v25 = vadd.f32 %v1841_v20, %v14218_v2  ;;  %v14219_v16 = vld [vmem:[#allocation656_spill] sm:$0xff]  ;;  %v14220_v26 = vld [vmem:[#allocation713_spill] sm:$0xff]  ;;  %v14221_v19 = vld [vmem:[#allocation714_spill] sm:$0xff] }
 0x359   : > { %v1906_v53 = vadd.f32 %v1842_v46, %v14219_v16  ;;  %v1963_v40 = vadd.f32 %v1899_v59, %v14220_v26  ;;  %v1964_v47 = vadd.f32 %v1900_v60, %v14221_v19  ;;  %v14222_v48 = vld [vmem:[#allocation715_spill] sm:$0xff]  ;;  %v14223_v38 = vld [vmem:[#allocation716_spill] sm:$0xff]  ;;  %v14224_v51 = vld [vmem:[#allocation717_spill] sm:$0xff] }
 0x35a   : > { %v1965_v4 = vadd.f32 %v1901_v57, %v14222_v48  ;;  %v1966_v12 = vadd.f32 %v1902_v49, %v14223_v38  ;;  %v1967_v56 = vadd.f32 %v1903_v54, %v14224_v51  ;;  %v14225_v37 = vld [vmem:[#allocation718_spill] sm:$0xff]  ;;  %v14226_v39 = vld [vmem:[#allocation719_spill] sm:$0xff]  ;;  %v14227_v58 = vld [vmem:[#allocation720_spill] sm:$0xff] }
 0x35b   : > { %v1968_v0 = vadd.f32 %v1904_v62, %v14225_v37  ;;  %v1969_v18 = vadd.f32 %v1905_v25, %v14226_v39  ;;  %v1970_v27 = vadd.f32 %v1906_v53, %v14227_v58  ;;  %v14228_v63 = vld [vmem:[#allocation777_spill] sm:$0xff]  ;;  %v14229_v9 = vld [vmem:[#allocation778_spill] sm:$0xff]  ;;  %v14230_v20 = vld [vmem:[#allocation779_spill] sm:$0xff] }
 0x35c   : > { %v2027_v50 = vadd.f32 %v1963_v40, %v14228_v63  ;;  %v2028_v6 = vadd.f32 %v1964_v47, %v14229_v9  ;;  %v2029_v13 = vadd.f32 %v1965_v4, %v14230_v20  ;;  %v14231_v46 = vld [vmem:[#allocation780_spill] sm:$0xff]  ;;  %v14232_v59 = vld [vmem:[#allocation781_spill] sm:$0xff]  ;;  %v14233_v60 = vld [vmem:[#allocation782_spill] sm:$0xff] }
 0x35d   : > { %v2030_v10 = vadd.f32 %v1966_v12, %v14231_v46  ;;  %v2031_v45 = vadd.f32 %v1967_v56, %v14232_v59  ;;  %v2032_v15 = vadd.f32 %v1968_v0, %v14233_v60  ;;  %v14234_v57 = vld [vmem:[#allocation783_spill] sm:$0xff]  ;;  %v14235_v49 = vld [vmem:[#allocation784_spill] sm:$0xff]  ;;  %v14236_v54 = vld [vmem:[#allocation841_spill] sm:$0xff] }
 0x35e   : > { %v2033_v28 = vadd.f32 %v1969_v18, %v14234_v57  ;;  %v2034_v17 = vadd.f32 %v1970_v27, %v14235_v49  ;;  %v2091_v61 = vadd.f32 %v2027_v50, %v14236_v54  ;;  %v14237_v62 = vld [vmem:[#allocation842_spill] sm:$0xff]  ;;  %v14238_v25 = vld [vmem:[#allocation843_spill] sm:$0xff]  ;;  %v14239_v53 = vld [vmem:[#allocation844_spill] sm:$0xff] }
 0x35f   : > { %v2092_v2 = vadd.f32 %v2028_v6, %v14237_v62  ;;  %v2093_v16 = vadd.f32 %v2029_v13, %v14238_v25  ;;  %v2094_v26 = vadd.f32 %v2030_v10, %v14239_v53  ;;  %v14240_v40 = vld [vmem:[#allocation845_spill] sm:$0xff]  ;;  %v14241_v47 = vld [vmem:[#allocation846_spill] sm:$0xff]  ;;  %v14242_v4 = vld [vmem:[#allocation847_spill] sm:$0xff] }
 0x360   : > { %v2095_v19 = vadd.f32 %v2031_v45, %v14240_v40  ;;  %v2096_v48 = vadd.f32 %v2032_v15, %v14241_v47  ;;  %v2097_v38 = vadd.f32 %v2033_v28, %v14242_v4  ;;  %v14243_v12 = vld [vmem:[#allocation848_spill] sm:$0xff]  ;;  %v14244_v56 = vld [vmem:[#allocation905_spill] sm:$0xff]  ;;  %v2283_v0 = vld [vmem:[#allocation2 + $0xb8] sm:$0xff] }
 0x361   : > { %v2098_v51 = vadd.f32 %v2034_v17, %v14243_v12  ;;  %v2155_v37 = vadd.f32 %v2091_v61, %v14244_v56  ;;  %v14245_v39 = vld [vmem:[#allocation906_spill] sm:$0xff]  ;;  %v2284_v58 = vld [vmem:[#allocation2 + $0x88] sm:$0xff]  ;;  %v14246_v27 = vld [vmem:[#allocation907_spill] sm:$0xff] }
 0x362   : > { %v2156_v18 = vadd.f32 %v2092_v2, %v14245_v39  ;;  %v2157_v63 = vadd.f32 %v2093_v16, %v14246_v27  ;;  %v14247_v50 = vld [vmem:[#allocation908_spill] sm:$0xff]  ;;  %v14248_v13 = vld [vmem:[#allocation909_spill] sm:$0xff]  ;;  %v14249_v59 = vld [vmem:[#allocation910_spill] sm:$0xff] }
 0x363   : > { %v2158_v9 = vadd.f32 %v2094_v26, %v14247_v50  ;;  %v2285_v6 = vld [vmem:[#allocation2 + $0xa8] sm:$0xff]  ;;  %v2159_v46 = vadd.f32 %v2095_v19, %v14248_v13  ;;  %v2287_v10 = vld [vmem:[#allocation2 + $0x170] sm:$0xff]  ;;  %v2160_v45 = vadd.f32 %v2096_v48, %v14249_v59  ;;  %v14250_v60 = vld [vmem:[#allocation911_spill] sm:$0xff] }
 0x364   : > { %v2286_v20 = vld [vmem:[#allocation2 + $0x1c8] sm:$0xff]  ;;  %v2161_v15 = vadd.f32 %v2097_v38, %v14250_v60  ;;  %v14252_v49 = vld [vmem:[#allocation969_spill] sm:$0xff]  ;;  %v14253_v54 = vld [vmem:[#allocation970_spill] sm:$0xff] }
 0x365   : > { %v14251_v57 = vld [vmem:[#allocation912_spill] sm:$0xff]  ;;  %v2219_v17 = vadd.f32 %v2155_v37, %v14252_v49  ;;  %v2220_v61 = vadd.f32 %v2156_v18, %v14253_v54  ;;  %v14254_v62 = vld [vmem:[#allocation971_spill] sm:$0xff]  ;;  %v2288_v53 = vld [vmem:[#allocation2 + $0x178] sm:$0xff]  ;;  %v2224_v4 = vadd.f32 %v2160_v45, %v11096_v11 }
 0x366   : > { %v2162_v28 = vadd.f32 %v2098_v51, %v14251_v57  ;;  %v2221_v2 = vadd.f32 %v2157_v63, %v14254_v62  ;;  %v14255_v25 = vld [vmem:[#allocation972_spill] sm:$0xff]  ;;  %v2290_v40 = vld [vmem:[#allocation2 + $0x190] sm:$0xff]  ;;  %v2225_v48 = vadd.f32 %v2161_v15, %v11099_v55  ;;  %v14257_v50 = vld [vmem:[#allocation54_spill] sm:$0xff] }
 0x367   : > { %v2222_v16 = vadd.f32 %v2158_v9, %v14255_v25  ;;  %v2289_v26 = vld [vmem:[#allocation2 + $0x68] sm:$0xff]  ;;  %v14256_v47 = vld [vmem:[#allocation973_spill] sm:$0xff]  ;;  %v2347_v12 = vadd.f32 %v2283_v0, %v2219_v17  ;;  %v2348_v51 = vadd.f32 %v2284_v58, %v2220_v61  ;;  %v2352_v18 = vadd.f32 %v2288_v53, %v2224_v4  ;;  %v14258_v9 = vld [vmem:[#allocation118_spill] sm:$0xff] }
 0x368   : > { %v2223_v19 = vadd.f32 %v2159_v46, %v14256_v47  ;;  %v2226_v38 = vadd.f32 %v2162_v28, %v11102_v52  ;;  %v2349_v56 = vadd.f32 %v2285_v6, %v2221_v2  ;;  %v2353_v27 = vadd.f32 %v2289_v26, %v2225_v48  ;;  %v14259_v11 = vld [vmem:[#allocation55_spill] sm:$0xff]  ;;  %v14261_v59 = vld [vmem:[#allocation56_spill] sm:$0xff]  ;;  %v14263_v58 = vld [vmem:[#allocation57_spill] sm:$0xff] }
 0x369   : > { %v2350_v37 = vadd.f32 %v2286_v20, %v2222_v16  ;;  %2411 = vst [vmem:[#allocation2 + $0xb8] sm:$0xff] %v2347_v12  ;;  %2412 = vst [vmem:[#allocation2 + $0x88] sm:$0xff] %v2348_v51  ;;  %v1331_v13 = vadd.f32 %v14258_v9, %v14257_v50  ;;  %v14260_v46 = vld [vmem:[#allocation119_spill] sm:$0xff]  ;;  %v14262_v52 = vld [vmem:[#allocation120_spill] sm:$0xff] }
 0x36a   : > { %v2351_v39 = vadd.f32 %v2287_v10, %v2223_v19  ;;  %v2354_v63 = vadd.f32 %v2290_v40, %v2226_v38  ;;  %2413 = vst [vmem:[#allocation2 + $0xa8] sm:$0xff] %v2349_v56  ;;  %v1332_v55 = vadd.f32 %v14260_v46, %v14259_v11  ;;  %v1333_v0 = vadd.f32 %v14262_v52, %v14261_v59  ;;  %v14264_v6 = vld [vmem:[#allocation121_spill] sm:$0xff]  ;;  %v14265_v10 = vld [vmem:[#allocation58_spill] sm:$0xff]  ;;  %v14267_v15 = vld [vmem:[#allocation59_spill] sm:$0xff] }
 0x36b   : > { %2414 = vst [vmem:[#allocation2 + $0x1c8] sm:$0xff] %v2350_v37  ;;  %v1334_v20 = vadd.f32 %v14264_v6, %v14263_v58  ;;  %2416 = vst [vmem:[#allocation2 + $0x178] sm:$0xff] %v2352_v18  ;;  %v14266_v45 = vld [vmem:[#allocation122_spill] sm:$0xff]  ;;  %v14268_v57 = vld [vmem:[#allocation123_spill] sm:$0xff] }
 0x36c   : > { %2415 = vst [vmem:[#allocation2 + $0x170] sm:$0xff] %v2351_v39  ;;  %2417 = vst [vmem:[#allocation2 + $0x68] sm:$0xff] %v2353_v27  ;;  %v1335_v60 = vadd.f32 %v14266_v45, %v14265_v10  ;;  %v1336_v28 = vadd.f32 %v14268_v57, %v14267_v15  ;;  %v14269_v49 = vld [vmem:[#allocation60_spill] sm:$0xff]  ;;  %v14271_v61 = vld [vmem:[#allocation61_spill] sm:$0xff] }
 0x36d   : > { %2418 = vst [vmem:[#allocation2 + $0x190] sm:$0xff] %v2354_v63  ;;  %v14270_v17 = vld [vmem:[#allocation124_spill] sm:$0xff]  ;;  %v14272_v62 = vld [vmem:[#allocation125_spill] sm:$0xff]  ;;  %v14273_v25 = vld [vmem:[#allocation174_spill] sm:$0xff] }
 0x36e   : > { %v1337_v54 = vadd.f32 %v14270_v17, %v14269_v49  ;;  %v1338_v2 = vadd.f32 %v14272_v62, %v14271_v61  ;;  %v1395_v16 = vadd.f32 %v1331_v13, %v14273_v25  ;;  %v14274_v53 = vld [vmem:[#allocation175_spill] sm:$0xff]  ;;  %v14275_v40 = vld [vmem:[#allocation176_spill] sm:$0xff]  ;;  %v14276_v19 = vld [vmem:[#allocation177_spill] sm:$0xff] }
 0x36f   : > { %v1396_v26 = vadd.f32 %v1332_v55, %v14274_v53  ;;  %v1397_v47 = vadd.f32 %v1333_v0, %v14275_v40  ;;  %v1398_v4 = vadd.f32 %v1334_v20, %v14276_v19  ;;  %v14277_v48 = vld [vmem:[#allocation178_spill] sm:$0xff]  ;;  %v14278_v12 = vld [vmem:[#allocation179_spill] sm:$0xff]  ;;  %v14279_v56 = vld [vmem:[#allocation180_spill] sm:$0xff] }
 0x370   : > { %v1399_v38 = vadd.f32 %v1335_v60, %v14277_v48  ;;  %v1400_v51 = vadd.f32 %v1336_v28, %v14278_v12  ;;  %v1401_v37 = vadd.f32 %v1337_v54, %v14279_v56  ;;  %v14280_v39 = vld [vmem:[#allocation181_spill] sm:$0xff]  ;;  %v14281_v27 = vld [vmem:[#allocation230_spill] sm:$0xff]  ;;  %v14282_v50 = vld [vmem:[#allocation231_spill] sm:$0xff] }
 0x371   : > { %v1402_v18 = vadd.f32 %v1338_v2, %v14280_v39  ;;  %v1459_v63 = vadd.f32 %v1395_v16, %v14281_v27  ;;  %v1460_v9 = vadd.f32 %v1396_v26, %v14282_v50  ;;  %v14283_v11 = vld [vmem:[#allocation232_spill] sm:$0xff]  ;;  %v14284_v46 = vld [vmem:[#allocation233_spill] sm:$0xff]  ;;  %v14285_v59 = vld [vmem:[#allocation234_spill] sm:$0xff] }
 0x372   : > { %v1461_v13 = vadd.f32 %v1397_v47, %v14283_v11  ;;  %v1462_v55 = vadd.f32 %v1398_v4, %v14284_v46  ;;  %v1463_v52 = vadd.f32 %v1399_v38, %v14285_v59  ;;  %v14286_v0 = vld [vmem:[#allocation235_spill] sm:$0xff]  ;;  %v14287_v6 = vld [vmem:[#allocation236_spill] sm:$0xff]  ;;  %v14288_v10 = vld [vmem:[#allocation237_spill] sm:$0xff] }
 0x373   : > { %v1464_v58 = vadd.f32 %v1400_v51, %v14286_v0  ;;  %v1465_v20 = vadd.f32 %v1401_v37, %v14287_v6  ;;  %v1466_v45 = vadd.f32 %v1402_v18, %v14288_v10  ;;  %v14289_v60 = vld [vmem:[#allocation286_spill] sm:$0xff]  ;;  %v14290_v57 = vld [vmem:[#allocation287_spill] sm:$0xff]  ;;  %v14291_v49 = vld [vmem:[#allocation288_spill] sm:$0xff] }
 0x374   : > { %v1523_v15 = vadd.f32 %v1459_v63, %v14289_v60  ;;  %v1524_v28 = vadd.f32 %v1460_v9, %v14290_v57  ;;  %v1525_v17 = vadd.f32 %v1461_v13, %v14291_v49  ;;  %v14292_v54 = vld [vmem:[#allocation289_spill] sm:$0xff]  ;;  %v14293_v62 = vld [vmem:[#allocation290_spill] sm:$0xff]  ;;  %v14294_v25 = vld [vmem:[#allocation291_spill] sm:$0xff] }
 0x375   : > { %v1526_v61 = vadd.f32 %v1462_v55, %v14292_v54  ;;  %v1527_v2 = vadd.f32 %v1463_v52, %v14293_v62  ;;  %v1528_v16 = vadd.f32 %v1464_v58, %v14294_v25  ;;  %v14295_v53 = vld [vmem:[#allocation292_spill] sm:$0xff]  ;;  %v14296_v40 = vld [vmem:[#allocation293_spill] sm:$0xff]  ;;  %v14297_v19 = vld [vmem:[#allocation342_spill] sm:$0xff] }
 0x376   : > { %v1529_v26 = vadd.f32 %v1465_v20, %v14295_v53  ;;  %v1530_v47 = vadd.f32 %v1466_v45, %v14296_v40  ;;  %v1587_v4 = vadd.f32 %v1523_v15, %v14297_v19  ;;  %v14298_v48 = vld [vmem:[#allocation343_spill] sm:$0xff]  ;;  %v14299_v12 = vld [vmem:[#allocation344_spill] sm:$0xff]  ;;  %v14300_v56 = vld [vmem:[#allocation345_spill] sm:$0xff] }
 0x377   : > { %v1588_v38 = vadd.f32 %v1524_v28, %v14298_v48  ;;  %v1589_v51 = vadd.f32 %v1525_v17, %v14299_v12  ;;  %v1590_v37 = vadd.f32 %v1526_v61, %v14300_v56  ;;  %v14301_v39 = vld [vmem:[#allocation346_spill] sm:$0xff]  ;;  %v14302_v27 = vld [vmem:[#allocation347_spill] sm:$0xff]  ;;  %v14303_v50 = vld [vmem:[#allocation348_spill] sm:$0xff] }
 0x378   : > { %v1591_v18 = vadd.f32 %v1527_v2, %v14301_v39  ;;  %v1592_v63 = vadd.f32 %v1528_v16, %v14302_v27  ;;  %v1593_v9 = vadd.f32 %v1529_v26, %v14303_v50  ;;  %v14304_v11 = vld [vmem:[#allocation349_spill] sm:$0xff]  ;;  %v14306_v59 = vld [vmem:[#allocation402_spill] sm:$0xff]  ;;  %v14307_v0 = vld [vmem:[#allocation403_spill] sm:$0xff] }
 0x379   : > { %v1594_v13 = vadd.f32 %v1530_v47, %v14304_v11  ;;  %v14305_v46 = vld [vmem:[#allocation401_spill] sm:$0xff]  ;;  %v1652_v52 = vadd.f32 %v1588_v38, %v14306_v59  ;;  %v1653_v58 = vadd.f32 %v1589_v51, %v14307_v0  ;;  %v14308_v6 = vld [vmem:[#allocation404_spill] sm:$0xff]  ;;  %v14310_v60 = vld [vmem:[#allocation406_spill] sm:$0xff] }
 0x37a   : > { %v1651_v55 = vadd.f32 %v1587_v4, %v14305_v46  ;;  %v1654_v20 = vadd.f32 %v1590_v37, %v14308_v6  ;;  %v14309_v10 = vld [vmem:[#allocation405_spill] sm:$0xff]  ;;  %v1656_v15 = vadd.f32 %v1592_v63, %v14310_v60  ;;  %v14311_v57 = vld [vmem:[#allocation407_spill] sm:$0xff]  ;;  %v14312_v49 = vld [vmem:[#allocation408_spill] sm:$0xff] }
 0x37b   : > { %v1655_v45 = vadd.f32 %v1591_v18, %v14309_v10  ;;  %v1657_v28 = vadd.f32 %v1593_v9, %v14311_v57  ;;  %v1658_v17 = vadd.f32 %v1594_v13, %v14312_v49  ;;  %v14313_v54 = vld [vmem:[#allocation465_spill] sm:$0xff]  ;;  %v14314_v62 = vld [vmem:[#allocation466_spill] sm:$0xff]  ;;  %v14315_v25 = vld [vmem:[#allocation467_spill] sm:$0xff] }
 0x37c   : > { %v1715_v61 = vadd.f32 %v1651_v55, %v14313_v54  ;;  %v1716_v2 = vadd.f32 %v1652_v52, %v14314_v62  ;;  %v1717_v16 = vadd.f32 %v1653_v58, %v14315_v25  ;;  %v14316_v53 = vld [vmem:[#allocation468_spill] sm:$0xff]  ;;  %v14317_v40 = vld [vmem:[#allocation469_spill] sm:$0xff]  ;;  %v14318_v19 = vld [vmem:[#allocation470_spill] sm:$0xff] }
 0x37d   : > { %v1718_v26 = vadd.f32 %v1654_v20, %v14316_v53  ;;  %v1719_v47 = vadd.f32 %v1655_v45, %v14317_v40  ;;  %v1720_v4 = vadd.f32 %v1656_v15, %v14318_v19  ;;  %v14319_v48 = vld [vmem:[#allocation471_spill] sm:$0xff]  ;;  %v14320_v12 = vld [vmem:[#allocation472_spill] sm:$0xff]  ;;  %v14321_v56 = vld [vmem:[#allocation529_spill] sm:$0xff] }
 0x37e   : > { %v1721_v38 = vadd.f32 %v1657_v28, %v14319_v48  ;;  %v1722_v51 = vadd.f32 %v1658_v17, %v14320_v12  ;;  %v1779_v37 = vadd.f32 %v1715_v61, %v14321_v56  ;;  %v14322_v39 = vld [vmem:[#allocation530_spill] sm:$0xff]  ;;  %v14323_v27 = vld [vmem:[#allocation531_spill] sm:$0xff]  ;;  %v14324_v50 = vld [vmem:[#allocation532_spill] sm:$0xff] }
 0x37f   : > { %v1780_v18 = vadd.f32 %v1716_v2, %v14322_v39  ;;  %v1781_v63 = vadd.f32 %v1717_v16, %v14323_v27  ;;  %v1782_v9 = vadd.f32 %v1718_v26, %v14324_v50  ;;  %v14325_v11 = vld [vmem:[#allocation533_spill] sm:$0xff]  ;;  %v14326_v46 = vld [vmem:[#allocation534_spill] sm:$0xff]  ;;  %v14327_v59 = vld [vmem:[#allocation535_spill] sm:$0xff] }
 0x380   : > { %v1783_v13 = vadd.f32 %v1719_v47, %v14325_v11  ;;  %v1784_v55 = vadd.f32 %v1720_v4, %v14326_v46  ;;  %v1785_v52 = vadd.f32 %v1721_v38, %v14327_v59  ;;  %v14328_v0 = vld [vmem:[#allocation536_spill] sm:$0xff]  ;;  %v14329_v6 = vld [vmem:[#allocation593_spill] sm:$0xff]  ;;  %v14330_v10 = vld [vmem:[#allocation594_spill] sm:$0xff] }
 0x381   : > { %v1786_v58 = vadd.f32 %v1722_v51, %v14328_v0  ;;  %v1843_v20 = vadd.f32 %v1779_v37, %v14329_v6  ;;  %v1844_v45 = vadd.f32 %v1780_v18, %v14330_v10  ;;  %v14331_v60 = vld [vmem:[#allocation595_spill] sm:$0xff]  ;;  %v14332_v57 = vld [vmem:[#allocation596_spill] sm:$0xff]  ;;  %v14333_v49 = vld [vmem:[#allocation597_spill] sm:$0xff] }
 0x382   : > { %v1845_v15 = vadd.f32 %v1781_v63, %v14331_v60  ;;  %v1846_v28 = vadd.f32 %v1782_v9, %v14332_v57  ;;  %v1847_v17 = vadd.f32 %v1783_v13, %v14333_v49  ;;  %v14334_v54 = vld [vmem:[#allocation598_spill] sm:$0xff]  ;;  %v14335_v62 = vld [vmem:[#allocation599_spill] sm:$0xff]  ;;  %v14336_v25 = vld [vmem:[#allocation600_spill] sm:$0xff] }
 0x383   : > { %v1848_v61 = vadd.f32 %v1784_v55, %v14334_v54  ;;  %v1849_v2 = vadd.f32 %v1785_v52, %v14335_v62  ;;  %v1850_v16 = vadd.f32 %v1786_v58, %v14336_v25  ;;  %v14337_v53 = vld [vmem:[#allocation657_spill] sm:$0xff]  ;;  %v14338_v40 = vld [vmem:[#allocation658_spill] sm:$0xff]  ;;  %v14339_v19 = vld [vmem:[#allocation659_spill] sm:$0xff] }
 0x384   : > { %v1907_v26 = vadd.f32 %v1843_v20, %v14337_v53  ;;  %v1908_v47 = vadd.f32 %v1844_v45, %v14338_v40  ;;  %v1909_v4 = vadd.f32 %v1845_v15, %v14339_v19  ;;  %v14340_v48 = vld [vmem:[#allocation660_spill] sm:$0xff]  ;;  %v14341_v12 = vld [vmem:[#allocation661_spill] sm:$0xff]  ;;  %v14342_v56 = vld [vmem:[#allocation662_spill] sm:$0xff] }
 0x385   : > { %v1910_v38 = vadd.f32 %v1846_v28, %v14340_v48  ;;  %v1911_v51 = vadd.f32 %v1847_v17, %v14341_v12  ;;  %v1912_v37 = vadd.f32 %v1848_v61, %v14342_v56  ;;  %v14343_v39 = vld [vmem:[#allocation663_spill] sm:$0xff]  ;;  %v14344_v27 = vld [vmem:[#allocation664_spill] sm:$0xff]  ;;  %v14345_v50 = vld [vmem:[#allocation721_spill] sm:$0xff] }
 0x386   : > { %v1913_v18 = vadd.f32 %v1849_v2, %v14343_v39  ;;  %v1914_v63 = vadd.f32 %v1850_v16, %v14344_v27  ;;  %v1971_v9 = vadd.f32 %v1907_v26, %v14345_v50  ;;  %v14346_v11 = vld [vmem:[#allocation722_spill] sm:$0xff]  ;;  %v14347_v46 = vld [vmem:[#allocation723_spill] sm:$0xff]  ;;  %v14348_v59 = vld [vmem:[#allocation724_spill] sm:$0xff] }
 0x387   : > { %v1972_v13 = vadd.f32 %v1908_v47, %v14346_v11  ;;  %v1973_v55 = vadd.f32 %v1909_v4, %v14347_v46  ;;  %v1974_v52 = vadd.f32 %v1910_v38, %v14348_v59  ;;  %v14349_v0 = vld [vmem:[#allocation725_spill] sm:$0xff]  ;;  %v14350_v6 = vld [vmem:[#allocation726_spill] sm:$0xff]  ;;  %v14351_v10 = vld [vmem:[#allocation727_spill] sm:$0xff] }
 0x388   : > { %v1975_v58 = vadd.f32 %v1911_v51, %v14349_v0  ;;  %v1976_v20 = vadd.f32 %v1912_v37, %v14350_v6  ;;  %v1977_v45 = vadd.f32 %v1913_v18, %v14351_v10  ;;  %v14352_v60 = vld [vmem:[#allocation728_spill] sm:$0xff]  ;;  %v14353_v57 = vld [vmem:[#allocation785_spill] sm:$0xff]  ;;  %v14354_v49 = vld [vmem:[#allocation786_spill] sm:$0xff] }
 0x389   : > { %v1978_v15 = vadd.f32 %v1914_v63, %v14352_v60  ;;  %v2035_v28 = vadd.f32 %v1971_v9, %v14353_v57  ;;  %v2036_v17 = vadd.f32 %v1972_v13, %v14354_v49  ;;  %v14355_v54 = vld [vmem:[#allocation787_spill] sm:$0xff]  ;;  %v14356_v62 = vld [vmem:[#allocation788_spill] sm:$0xff]  ;;  %v14357_v25 = vld [vmem:[#allocation789_spill] sm:$0xff] }
 0x38a   : > { %v2037_v61 = vadd.f32 %v1973_v55, %v14355_v54  ;;  %v2038_v2 = vadd.f32 %v1974_v52, %v14356_v62  ;;  %v2039_v16 = vadd.f32 %v1975_v58, %v14357_v25  ;;  %v14358_v53 = vld [vmem:[#allocation790_spill] sm:$0xff]  ;;  %v14359_v40 = vld [vmem:[#allocation791_spill] sm:$0xff]  ;;  %v14360_v19 = vld [vmem:[#allocation792_spill] sm:$0xff] }
 0x38b   : > { %v2040_v26 = vadd.f32 %v1976_v20, %v14358_v53  ;;  %v2041_v47 = vadd.f32 %v1977_v45, %v14359_v40  ;;  %v2042_v4 = vadd.f32 %v1978_v15, %v14360_v19  ;;  %v14361_v48 = vld [vmem:[#allocation849_spill] sm:$0xff]  ;;  %v14362_v12 = vld [vmem:[#allocation850_spill] sm:$0xff]  ;;  %v14363_v56 = vld [vmem:[#allocation851_spill] sm:$0xff] }
 0x38c   : > { %v2099_v38 = vadd.f32 %v2035_v28, %v14361_v48  ;;  %v2100_v51 = vadd.f32 %v2036_v17, %v14362_v12  ;;  %v2101_v37 = vadd.f32 %v2037_v61, %v14363_v56  ;;  %v14364_v39 = vld [vmem:[#allocation852_spill] sm:$0xff]  ;;  %v14365_v27 = vld [vmem:[#allocation853_spill] sm:$0xff]  ;;  %v14366_v50 = vld [vmem:[#allocation854_spill] sm:$0xff] }
 0x38d   : > { %v2102_v18 = vadd.f32 %v2038_v2, %v14364_v39  ;;  %v2103_v63 = vadd.f32 %v2039_v16, %v14365_v27  ;;  %v2104_v9 = vadd.f32 %v2040_v26, %v14366_v50  ;;  %v14367_v11 = vld [vmem:[#allocation855_spill] sm:$0xff]  ;;  %v14368_v46 = vld [vmem:[#allocation856_spill] sm:$0xff]  ;;  %v14369_v59 = vld [vmem:[#allocation913_spill] sm:$0xff] }
 0x38e   : > { %v2105_v13 = vadd.f32 %v2041_v47, %v14367_v11  ;;  %v2106_v55 = vadd.f32 %v2042_v4, %v14368_v46  ;;  %v2163_v52 = vadd.f32 %v2099_v38, %v14369_v59  ;;  %v2291_v0 = vld [vmem:[#allocation2 + $0x198] sm:$0xff]  ;;  %v14371_v10 = vld [vmem:[#allocation915_spill] sm:$0xff]  ;;  %v14372_v60 = vld [vmem:[#allocation916_spill] sm:$0xff] }
 0x38f   : > { %v14370_v58 = vld [vmem:[#allocation914_spill] sm:$0xff]  ;;  %v2165_v45 = vadd.f32 %v2101_v37, %v14371_v10  ;;  %v2166_v15 = vadd.f32 %v2102_v18, %v14372_v60  ;;  %v2293_v57 = vld [vmem:[#allocation2 + $0xc0] sm:$0xff]  ;;  %v14373_v49 = vld [vmem:[#allocation917_spill] sm:$0xff] }
 0x390   : > { %v2164_v6 = vadd.f32 %v2100_v51, %v14370_v58  ;;  %v2292_v20 = vld [vmem:[#allocation2 + $0x38] sm:$0xff]  ;;  %v2294_v28 = vld [vmem:[#allocation2 + $0x1c0] sm:$0xff]  ;;  %v2167_v17 = vadd.f32 %v2103_v63, %v14373_v49  ;;  %v14376_v16 = vld [vmem:[#allocation920_spill] sm:$0xff] }
 0x391   : > { %v2295_v54 = vld [vmem:[#allocation2 + $0x158] sm:$0xff]  ;;  %v14375_v2 = vld [vmem:[#allocation919_spill] sm:$0xff]  ;;  %v2170_v53 = vadd.f32 %v2106_v55, %v14376_v16  ;;  %v2229_v4 = vadd.f32 %v2165_v45, %v11111_v14  ;;  %v14379_v48 = vld [vmem:[#allocation976_spill] sm:$0xff] }
 0x392   : > { %v14374_v61 = vld [vmem:[#allocation918_spill] sm:$0xff]  ;;  %v2169_v25 = vadd.f32 %v2105_v13, %v14375_v2  ;;  %v14378_v47 = vld [vmem:[#allocation975_spill] sm:$0xff]  ;;  %v2230_v38 = vadd.f32 %v2166_v15, %v14379_v48  ;;  %v2296_v12 = vld [vmem:[#allocation2 + $0x10] sm:$0xff] }
 0x393   : > { %v2168_v62 = vadd.f32 %v2104_v9, %v14374_v61  ;;  %v14377_v26 = vld [vmem:[#allocation974_spill] sm:$0xff]  ;;  %v2228_v19 = vadd.f32 %v2164_v6, %v14378_v47  ;;  %v2298_v56 = vld [vmem:[#allocation2 + $0xa0] sm:$0xff]  ;;  %v14380_v37 = vld [vmem:[#allocation977_spill] sm:$0xff]  ;;  %v2357_v55 = vadd.f32 %v2293_v57, %v2229_v4 }
 0x394   : > { %v2227_v40 = vadd.f32 %v2163_v52, %v14377_v26  ;;  %v2297_v51 = vld [vmem:[#allocation2 + $0x58] sm:$0xff]  ;;  %v2231_v39 = vadd.f32 %v2167_v17, %v14380_v37  ;;  %v14382_v63 = vld [vmem:[#allocation979_spill] sm:$0xff]  ;;  %v14383_v9 = vld [vmem:[#allocation980_spill] sm:$0xff]  ;;  %v2358_v59 = vadd.f32 %v2294_v28, %v2230_v38 }
 0x395   : > { %v14381_v18 = vld [vmem:[#allocation978_spill] sm:$0xff]  ;;  %v2233_v50 = vadd.f32 %v2169_v25, %v14382_v63  ;;  %v2234_v11 = vadd.f32 %v2170_v53, %v14383_v9  ;;  %v2356_v46 = vadd.f32 %v2292_v20, %v2228_v19  ;;  %2421 = vst [vmem:[#allocation2 + $0xc0] sm:$0xff] %v2357_v55 }
 0x396   : > { %v2232_v27 = vadd.f32 %v2168_v62, %v14381_v18  ;;  %v2355_v13 = vadd.f32 %v2291_v0, %v2227_v40  ;;  %v2359_v52 = vadd.f32 %v2295_v54, %v2231_v39  ;;  %2422 = vst [vmem:[#allocation2 + $0x1c0] sm:$0xff] %v2358_v59 }
 0x397   : > { %v2361_v14 = vadd.f32 %v2297_v51, %v2233_v50  ;;  %v2362_v6 = vadd.f32 %v2298_v56, %v2234_v11  ;;  %2420 = vst [vmem:[#allocation2 + $0x38] sm:$0xff] %v2356_v46 }
 0x398   : > { %v2360_v58 = vadd.f32 %v2296_v12, %v2232_v27  ;;  %2419 = vst [vmem:[#allocation2 + $0x198] sm:$0xff] %v2355_v13  ;;  %2423 = vst [vmem:[#allocation2 + $0x158] sm:$0xff] %v2359_v52 }
 0x399   : > { %2425 = vst [vmem:[#allocation2 + $0x58] sm:$0xff] %v2361_v14  ;;  %2426 = vst [vmem:[#allocation2 + $0xa0] sm:$0xff] %v2362_v6 }
 0x39a   : > { %2424 = vst [vmem:[#allocation2 + $0x10] sm:$0xff] %v2360_v58 }
 0x39b PF: > { %p7897_p8 = scmp.ne.s32.totalorder %s7943_s6, 1 }
 0x39d   : > { %2430 = sbr.rel (%p7897_p8) target bundleno = 1043 (0x413), region = 36 }
 0x3a2   : > { %v14384_v0 = vld [vmem:[#allocation62_spill] sm:$0xff]  ;;  %v14385_v10 = vld [vmem:[#allocation3_spill] sm:$0xff]  ;;  %v14387_v15 = vld [vmem:[#allocation64_spill] sm:$0xff] }
 0x3a3   : > { %v6528_v20 = vadd.f32 %v14384_v0, %v8057_v1  ;;  %v14386_v45 = vld [vmem:[#allocation63_spill] sm:$0xff]  ;;  %v6530_v57 = vadd.f32 %v14387_v15, %v8063_v3  ;;  %v14388_v28 = vld [vmem:[#allocation4_spill] sm:$0xff]  ;;  %v14389_v49 = vld [vmem:[#allocation65_spill] sm:$0xff] }
 0x3a4   : > { %v6529_v60 = vadd.f32 %v14386_v45, %v14385_v10  ;;  %v6531_v17 = vadd.f32 %v14389_v49, %v14388_v28  ;;  %v14390_v54 = vld [vmem:[#allocation66_spill] sm:$0xff]  ;;  %v14391_v62 = vld [vmem:[#allocation5_spill] sm:$0xff]  ;;  %v14392_v2 = vld [vmem:[#allocation67_spill] sm:$0xff] }
 0x3a5   : > { %v6532_v61 = vadd.f32 %v14390_v54, %v8069_v5  ;;  %v6533_v25 = vadd.f32 %v14392_v2, %v14391_v62  ;;  %v14393_v16 = vld [vmem:[#allocation68_spill] sm:$0xff]  ;;  %v14394_v1 = vld [vmem:[#allocation69_spill] sm:$0xff]  ;;  %v6592_v40 = vadd.f32 %v6528_v20, %v8441_v35  ;;  %v6594_v4 = vadd.f32 %v6530_v57, %v8447_v33  ;;  %v7490_v5 = vld [vmem:[#allocation2 + $0xd8] sm:$0xff] }
 0x3a6   : > { %v6534_v53 = vadd.f32 %v14393_v16, %v8075_v7  ;;  %v6535_v26 = vadd.f32 %v14394_v1, %v8078_v8  ;;  %v7488_v47 = vld [vmem:[#allocation2 + $0xb0] sm:$0xff]  ;;  %v6593_v3 = vadd.f32 %v6529_v60, %v8444_v34  ;;  %v6595_v48 = vadd.f32 %v6531_v17, %v8450_v32  ;;  %v7491_v38 = vld [vmem:[#allocation2 + $0x18] sm:$0xff]  ;;  %v7493_v32 = vld [vmem:[#allocation2 + $0x168] sm:$0xff] }
 0x3a7   : > { %v7489_v19 = vld [vmem:[#allocation2 + $0x1b0] sm:$0xff]  ;;  %v6596_v12 = vadd.f32 %v6532_v61, %v8453_v31  ;;  %v6597_v7 = vadd.f32 %v6533_v25, %v8456_v30  ;;  %v6656_v35 = vadd.f32 %v6592_v40, %v8633_v44  ;;  %v6658_v37 = vadd.f32 %v6594_v4, %v8639_v24  ;;  %v7495_v18 = vld [vmem:[#allocation2 + $0x48] sm:$0xff]  ;;  %v14398_v46 = vld [vmem:[#allocation71_spill] sm:$0xff] }
 0x3a8   : > { %v7492_v51 = vld [vmem:[#allocation2 + $0x50] sm:$0xff]  ;;  %v6598_v56 = vadd.f32 %v6534_v53, %v8459_v36  ;;  %v6599_v8 = vadd.f32 %v6535_v26, %v8462_v29  ;;  %v6657_v34 = vadd.f32 %v6593_v3, %v8636_v41  ;;  %v6659_v33 = vadd.f32 %v6595_v48, %v8642_v42  ;;  %v14395_v42 = vld [vmem:[#allocation6_spill] sm:$0xff]  ;;  %v14399_v55 = vld [vmem:[#allocation8_spill] sm:$0xff] }
 0x3a9   : > { %v7494_v39 = vld [vmem:[#allocation2 + $0x130] sm:$0xff]  ;;  %v6660_v31 = vadd.f32 %v6596_v12, %v8645_v23  ;;  %v6661_v27 = vadd.f32 %v6597_v7, %v8648_v43  ;;  %v7552_v29 = vadd.f32 %v7488_v47, %v6656_v35  ;;  %v7554_v44 = vadd.f32 %v7490_v5, %v6658_v37  ;;  %v14396_v23 = vld [vmem:[#allocation70_spill] sm:$0xff]  ;;  %v14397_v43 = vld [vmem:[#allocation7_spill] sm:$0xff] }
 0x3aa   : > { %v6662_v30 = vadd.f32 %v6598_v56, %v8651_v22  ;;  %v6663_v36 = vadd.f32 %v6599_v8, %v8654_v21  ;;  %v7553_v63 = vadd.f32 %v7489_v19, %v6657_v34  ;;  %v7555_v50 = vadd.f32 %v7491_v38, %v6659_v33  ;;  %v14400_v21 = vld [vmem:[#allocation72_spill] sm:$0xff]  ;;  %v14401_v52 = vld [vmem:[#allocation9_spill] sm:$0xff]  ;;  %v14403_v6 = vld [vmem:[#allocation10_spill] sm:$0xff] }
 0x3ab   : > { %v7556_v41 = vadd.f32 %v7492_v51, %v6660_v31  ;;  %v7557_v9 = vadd.f32 %v7493_v32, %v6661_v27  ;;  %7616 = vst [vmem:[#allocation2 + $0xb0] sm:$0xff] %v7552_v29  ;;  %7618 = vst [vmem:[#allocation2 + $0xd8] sm:$0xff] %v7554_v44  ;;  %v6536_v13 = vadd.f32 %v14396_v23, %v14395_v42  ;;  %v14402_v58 = vld [vmem:[#allocation73_spill] sm:$0xff]  ;;  %v14404_v0 = vld [vmem:[#allocation74_spill] sm:$0xff] }
 0x3ac   : > { %v7558_v24 = vadd.f32 %v7494_v39, %v6662_v30  ;;  %v7559_v11 = vadd.f32 %v7495_v18, %v6663_v36  ;;  %7617 = vst [vmem:[#allocation2 + $0x1b0] sm:$0xff] %v7553_v63  ;;  %7619 = vst [vmem:[#allocation2 + $0x18] sm:$0xff] %v7555_v50  ;;  %v6537_v22 = vadd.f32 %v14398_v46, %v14397_v43  ;;  %v14405_v10 = vld [vmem:[#allocation11_spill] sm:$0xff]  ;;  %v14407_v15 = vld [vmem:[#allocation12_spill] sm:$0xff] }
 0x3ad   : > { %v6538_v59 = vadd.f32 %v14400_v21, %v14399_v55  ;;  %v6539_v14 = vadd.f32 %v14402_v58, %v14401_v52  ;;  %7620 = vst [vmem:[#allocation2 + $0x50] sm:$0xff] %v7556_v41  ;;  %7621 = vst [vmem:[#allocation2 + $0x168] sm:$0xff] %v7557_v9  ;;  %v6540_v20 = vadd.f32 %v14404_v0, %v14403_v6  ;;  %v14406_v45 = vld [vmem:[#allocation75_spill] sm:$0xff]  ;;  %v14408_v57 = vld [vmem:[#allocation76_spill] sm:$0xff] }
 0x3ae   : > { %7622 = vst [vmem:[#allocation2 + $0x130] sm:$0xff] %v7558_v24  ;;  %7623 = vst [vmem:[#allocation2 + $0x48] sm:$0xff] %v7559_v11  ;;  %v6541_v60 = vadd.f32 %v14406_v45, %v14405_v10  ;;  %v6542_v28 = vadd.f32 %v14408_v57, %v14407_v15  ;;  %v14409_v49 = vld [vmem:[#allocation13_spill] sm:$0xff]  ;;  %v14411_v61 = vld [vmem:[#allocation126_spill] sm:$0xff] }
 0x3af   : > { %v14410_v17 = vld [vmem:[#allocation77_spill] sm:$0xff]  ;;  %v6600_v62 = vadd.f32 %v6536_v13, %v14411_v61  ;;  %v7496_v2 = vld [vmem:[#allocation2 + $0x180] sm:$0xff]  ;;  %v14413_v1 = vld [vmem:[#allocation128_spill] sm:$0xff] }
 0x3b0   : > { %v6543_v54 = vadd.f32 %v14410_v17, %v14409_v49  ;;  %v14412_v25 = vld [vmem:[#allocation127_spill] sm:$0xff]  ;;  %v7497_v53 = vld [vmem:[#allocation2 + $0x110] sm:$0xff]  ;;  %v6602_v26 = vadd.f32 %v6538_v59, %v14413_v1  ;;  %v7498_v3 = vld [vmem:[#allocation2 + $0x118] sm:$0xff] }
 0x3b1   : > { %v6601_v16 = vadd.f32 %v6537_v22, %v14412_v25  ;;  %v14414_v40 = vld [vmem:[#allocation129_spill] sm:$0xff]  ;;  %v7499_v19 = vld [vmem:[#allocation2 + $0x98] sm:$0xff]  ;;  %v7500_v5 = vld [vmem:[#allocation2 + $0x120] sm:$0xff] }
 0x3b2   : > { %v6603_v47 = vadd.f32 %v6539_v14, %v14414_v40  ;;  %v14415_v4 = vld [vmem:[#allocation130_spill] sm:$0xff]  ;;  %v14416_v38 = vld [vmem:[#allocation131_spill] sm:$0xff]  ;;  %v14417_v51 = vld [vmem:[#allocation132_spill] sm:$0xff] }
 0x3b3   : > { %v6604_v48 = vadd.f32 %v6540_v20, %v14415_v4  ;;  %v6605_v12 = vadd.f32 %v6541_v60, %v14416_v38  ;;  %v6606_v7 = vadd.f32 %v6542_v28, %v14417_v51  ;;  %v14418_v56 = vld [vmem:[#allocation133_spill] sm:$0xff]  ;;  %v14419_v35 = vld [vmem:[#allocation182_spill] sm:$0xff]  ;;  %v14420_v37 = vld [vmem:[#allocation183_spill] sm:$0xff] }
 0x3b4   : > { %v6607_v8 = vadd.f32 %v6543_v54, %v14418_v56  ;;  %v6664_v34 = vadd.f32 %v6600_v62, %v14419_v35  ;;  %v6665_v33 = vadd.f32 %v6601_v16, %v14420_v37  ;;  %v14421_v32 = vld [vmem:[#allocation184_spill] sm:$0xff]  ;;  %v14422_v18 = vld [vmem:[#allocation185_spill] sm:$0xff]  ;;  %v7503_v36 = vld [vmem:[#allocation2 + $0x60] sm:$0xff] }
 0x3b5   : > { %v6666_v39 = vadd.f32 %v6602_v26, %v14421_v32  ;;  %v6667_v31 = vadd.f32 %v6603_v47, %v14422_v18  ;;  %v7501_v27 = vld [vmem:[#allocation2 + $0x150] sm:$0xff]  ;;  %v7502_v30 = vld [vmem:[#allocation2 + $0x108] sm:$0xff]  ;;  %v14423_v29 = vld [vmem:[#allocation186_spill] sm:$0xff] }
 0x3b6   : > { %v6668_v63 = vadd.f32 %v6604_v48, %v14423_v29  ;;  %v14424_v44 = vld [vmem:[#allocation187_spill] sm:$0xff]  ;;  %v14425_v41 = vld [vmem:[#allocation188_spill] sm:$0xff]  ;;  %v14426_v24 = vld [vmem:[#allocation189_spill] sm:$0xff]  ;;  %v7560_v42 = vadd.f32 %v7496_v2, %v6664_v34  ;;  %v7561_v23 = vadd.f32 %v7497_v53, %v6665_v33 }
 0x3b7   : > { %v6669_v50 = vadd.f32 %v6605_v12, %v14424_v44  ;;  %v6670_v9 = vadd.f32 %v6606_v7, %v14425_v41  ;;  %v6671_v11 = vadd.f32 %v6607_v8, %v14426_v24  ;;  %v7562_v13 = vadd.f32 %v7498_v3, %v6666_v39  ;;  %v14427_v59 = vld [vmem:[#allocation14_spill] sm:$0xff]  ;;  %v14429_v14 = vld [vmem:[#allocation15_spill] sm:$0xff]  ;;  %v14431_v20 = vld [vmem:[#allocation16_spill] sm:$0xff] }
 0x3b8   : > { %v7563_v43 = vadd.f32 %v7499_v19, %v6667_v31  ;;  %v7564_v46 = vadd.f32 %v7500_v5, %v6668_v63  ;;  %7624 = vst [vmem:[#allocation2 + $0x180] sm:$0xff] %v7560_v42  ;;  %7625 = vst [vmem:[#allocation2 + $0x110] sm:$0xff] %v7561_v23  ;;  %v14428_v52 = vld [vmem:[#allocation78_spill] sm:$0xff]  ;;  %v14430_v6 = vld [vmem:[#allocation79_spill] sm:$0xff] }
 0x3b9   : > { %v7565_v22 = vadd.f32 %v7501_v27, %v6669_v50  ;;  %v7566_v55 = vadd.f32 %v7502_v30, %v6670_v9  ;;  %v7567_v21 = vadd.f32 %v7503_v36, %v6671_v11  ;;  %7626 = vst [vmem:[#allocation2 + $0x118] sm:$0xff] %v7562_v13  ;;  %v6544_v58 = vadd.f32 %v14428_v52, %v14427_v59  ;;  %v14432_v10 = vld [vmem:[#allocation80_spill] sm:$0xff]  ;;  %v14433_v60 = vld [vmem:[#allocation17_spill] sm:$0xff]  ;;  %v14435_v28 = vld [vmem:[#allocation18_spill] sm:$0xff] }
 0x3ba   : > { %7627 = vst [vmem:[#allocation2 + $0x98] sm:$0xff] %v7563_v43  ;;  %v6545_v0 = vadd.f32 %v14430_v6, %v14429_v14  ;;  %v6546_v45 = vadd.f32 %v14432_v10, %v14431_v20  ;;  %v14434_v15 = vld [vmem:[#allocation81_spill] sm:$0xff]  ;;  %7628 = vst [vmem:[#allocation2 + $0x120] sm:$0xff] %v7564_v46  ;;  %v14436_v49 = vld [vmem:[#allocation82_spill] sm:$0xff] }
 0x3bb   : > { %v6547_v57 = vadd.f32 %v14434_v15, %v14433_v60  ;;  %7629 = vst [vmem:[#allocation2 + $0x150] sm:$0xff] %v7565_v22  ;;  %7630 = vst [vmem:[#allocation2 + $0x108] sm:$0xff] %v7566_v55  ;;  %v6548_v17 = vadd.f32 %v14436_v49, %v14435_v28  ;;  %v14437_v54 = vld [vmem:[#allocation19_spill] sm:$0xff]  ;;  %v14439_v2 = vld [vmem:[#allocation20_spill] sm:$0xff] }
 0x3bc   : > { %7631 = vst [vmem:[#allocation2 + $0x60] sm:$0xff] %v7567_v21  ;;  %v14438_v61 = vld [vmem:[#allocation83_spill] sm:$0xff]  ;;  %v14440_v25 = vld [vmem:[#allocation84_spill] sm:$0xff]  ;;  %v14441_v53 = vld [vmem:[#allocation21_spill] sm:$0xff] }
 0x3bd   : > { %v6549_v62 = vadd.f32 %v14438_v61, %v14437_v54  ;;  %v6550_v16 = vadd.f32 %v14440_v25, %v14439_v2  ;;  %v14442_v1 = vld [vmem:[#allocation85_spill] sm:$0xff]  ;;  %v14443_v40 = vld [vmem:[#allocation134_spill] sm:$0xff]  ;;  %v7504_v3 = vld [vmem:[#allocation2 + $0xe0] sm:$0xff] }
 0x3be   : > { %v6551_v26 = vadd.f32 %v14442_v1, %v14441_v53  ;;  %v6608_v47 = vadd.f32 %v6544_v58, %v14443_v40  ;;  %v14444_v19 = vld [vmem:[#allocation135_spill] sm:$0xff]  ;;  %v7505_v48 = vld [vmem:[#allocation2 + $0x188] sm:$0xff]  ;;  %v14446_v12 = vld [vmem:[#allocation137_spill] sm:$0xff] }
 0x3bf   : > { %v6609_v4 = vadd.f32 %v6545_v0, %v14444_v19  ;;  %v14445_v5 = vld [vmem:[#allocation136_spill] sm:$0xff]  ;;  %v6611_v51 = vadd.f32 %v6547_v57, %v14446_v12  ;;  %v7506_v7 = vld [vmem:[#allocation2 + $0x138] sm:$0xff]  ;;  %v7507_v56 = vld [vmem:[#allocation2 + $0x140] sm:$0xff] }
 0x3c0   : > { %v6610_v38 = vadd.f32 %v6546_v45, %v14445_v5  ;;  %v14447_v8 = vld [vmem:[#allocation138_spill] sm:$0xff]  ;;  %v7508_v34 = vld [vmem:[#allocation2 + $0x80] sm:$0xff]  ;;  %v14449_v32 = vld [vmem:[#allocation140_spill] sm:$0xff] }
 0x3c1   : > { %v6612_v35 = vadd.f32 %v6548_v17, %v14447_v8  ;;  %v14448_v37 = vld [vmem:[#allocation139_spill] sm:$0xff]  ;;  %v6614_v39 = vadd.f32 %v6550_v16, %v14449_v32  ;;  %v14450_v18 = vld [vmem:[#allocation141_spill] sm:$0xff]  ;;  %v14451_v27 = vld [vmem:[#allocation190_spill] sm:$0xff] }
 0x3c2   : > { %v6613_v33 = vadd.f32 %v6549_v62, %v14448_v37  ;;  %v6615_v31 = vadd.f32 %v6551_v26, %v14450_v18  ;;  %v6672_v30 = vadd.f32 %v6608_v47, %v14451_v27  ;;  %v14452_v36 = vld [vmem:[#allocation191_spill] sm:$0xff]  ;;  %v14453_v63 = vld [vmem:[#allocation192_spill] sm:$0xff]  ;;  %v14454_v50 = vld [vmem:[#allocation193_spill] sm:$0xff] }
 0x3c3   : > { %v6673_v29 = vadd.f32 %v6609_v4, %v14452_v36  ;;  %v6674_v44 = vadd.f32 %v6610_v38, %v14453_v63  ;;  %v6675_v41 = vadd.f32 %v6611_v51, %v14454_v50  ;;  %v7509_v9 = vld [vmem:[#allocation2 + $0x1a8] sm:$0xff]  ;;  %v7510_v24 = vld [vmem:[#allocation2 + $0x1b8] sm:$0xff]  ;;  %v14456_v13 = vld [vmem:[#allocation195_spill] sm:$0xff] }
 0x3c4   : > { %v7511_v11 = vld [vmem:[#allocation2 + $0x28] sm:$0xff]  ;;  %v14455_v42 = vld [vmem:[#allocation194_spill] sm:$0xff]  ;;  %v6677_v43 = vadd.f32 %v6613_v33, %v14456_v13  ;;  %v14458_v55 = vld [vmem:[#allocation197_spill] sm:$0xff]  ;;  %v7568_v59 = vadd.f32 %v7504_v3, %v6672_v30 }
 0x3c5   : > { %v6676_v23 = vadd.f32 %v6612_v35, %v14455_v42  ;;  %v14457_v46 = vld [vmem:[#allocation196_spill] sm:$0xff]  ;;  %v6679_v21 = vadd.f32 %v6615_v31, %v14458_v55  ;;  %v7569_v52 = vadd.f32 %v7505_v48, %v6673_v29  ;;  %v7570_v58 = vadd.f32 %v7506_v7, %v6674_v44  ;;  %v14459_v45 = vld [vmem:[#allocation22_spill] sm:$0xff]  ;;  %v14461_v57 = vld [vmem:[#allocation23_spill] sm:$0xff] }
 0x3c6   : > { %v6678_v22 = vadd.f32 %v6614_v39, %v14457_v46  ;;  %v7571_v14 = vadd.f32 %v7507_v56, %v6675_v41  ;;  %v7573_v0 = vadd.f32 %v7509_v9, %v6677_v43  ;;  %7632 = vst [vmem:[#allocation2 + $0xe0] sm:$0xff] %v7568_v59  ;;  %v14460_v60 = vld [vmem:[#allocation86_spill] sm:$0xff]  ;;  %v14462_v28 = vld [vmem:[#allocation87_spill] sm:$0xff]  ;;  %v14463_v17 = vld [vmem:[#allocation24_spill] sm:$0xff] }
 0x3c7   : > { %v7572_v6 = vadd.f32 %v7508_v34, %v6676_v23  ;;  %v7575_v10 = vadd.f32 %v7511_v11, %v6679_v21  ;;  %7633 = vst [vmem:[#allocation2 + $0x188] sm:$0xff] %v7569_v52  ;;  %7634 = vst [vmem:[#allocation2 + $0x138] sm:$0xff] %v7570_v58  ;;  %v6552_v15 = vadd.f32 %v14460_v60, %v14459_v45  ;;  %v14464_v54 = vld [vmem:[#allocation88_spill] sm:$0xff]  ;;  %v14465_v62 = vld [vmem:[#allocation25_spill] sm:$0xff] }
 0x3c8   : > { %v7574_v20 = vadd.f32 %v7510_v24, %v6678_v22  ;;  %7635 = vst [vmem:[#allocation2 + $0x140] sm:$0xff] %v7571_v14  ;;  %v6553_v49 = vadd.f32 %v14462_v28, %v14461_v57  ;;  %v6554_v61 = vadd.f32 %v14464_v54, %v14463_v17  ;;  %v14466_v2 = vld [vmem:[#allocation89_spill] sm:$0xff]  ;;  %7637 = vst [vmem:[#allocation2 + $0x1a8] sm:$0xff] %v7573_v0  ;;  %v14467_v16 = vld [vmem:[#allocation26_spill] sm:$0xff] }
 0x3c9   : > { %v6555_v25 = vadd.f32 %v14466_v2, %v14465_v62  ;;  %7636 = vst [vmem:[#allocation2 + $0x80] sm:$0xff] %v7572_v6  ;;  %7639 = vst [vmem:[#allocation2 + $0x28] sm:$0xff] %v7575_v10  ;;  %v14468_v53 = vld [vmem:[#allocation90_spill] sm:$0xff]  ;;  %v14469_v26 = vld [vmem:[#allocation27_spill] sm:$0xff] }
 0x3ca   : > { %7638 = vst [vmem:[#allocation2 + $0x1b8] sm:$0xff] %v7574_v20  ;;  %v6556_v1 = vadd.f32 %v14468_v53, %v14467_v16  ;;  %v14470_v40 = vld [vmem:[#allocation91_spill] sm:$0xff]  ;;  %v14471_v3 = vld [vmem:[#allocation28_spill] sm:$0xff]  ;;  %v14473_v48 = vld [vmem:[#allocation29_spill] sm:$0xff] }
 0x3cb   : > { %v6557_v47 = vadd.f32 %v14470_v40, %v14469_v26  ;;  %v14472_v19 = vld [vmem:[#allocation92_spill] sm:$0xff]  ;;  %v14474_v5 = vld [vmem:[#allocation93_spill] sm:$0xff]  ;;  %v14475_v12 = vld [vmem:[#allocation142_spill] sm:$0xff] }
 0x3cc   : > { %v6558_v4 = vadd.f32 %v14472_v19, %v14471_v3  ;;  %v6559_v38 = vadd.f32 %v14474_v5, %v14473_v48  ;;  %v6616_v51 = vadd.f32 %v6552_v15, %v14475_v12  ;;  %v7512_v7 = vld [vmem:[#allocation2 + $0x1e8] sm:$0xff]  ;;  %v14476_v56 = vld [vmem:[#allocation143_spill] sm:$0xff]  ;;  %v7513_v35 = vld [vmem:[#allocation2 + $0xf8] sm:$0xff] }
 0x3cd   : > { %v6617_v8 = vadd.f32 %v6553_v49, %v14476_v56  ;;  %v14477_v34 = vld [vmem:[#allocation144_spill] sm:$0xff]  ;;  %v14478_v33 = vld [vmem:[#allocation145_spill] sm:$0xff]  ;;  %v7514_v39 = vld [vmem:[#allocation2 + $0x160] sm:$0xff] }
 0x3ce   : > { %v6618_v37 = vadd.f32 %v6554_v61, %v14477_v34  ;;  %v6619_v32 = vadd.f32 %v6555_v25, %v14478_v33  ;;  %v7515_v18 = vld [vmem:[#allocation2 + $0x30] sm:$0xff]  ;;  %v14479_v31 = vld [vmem:[#allocation146_spill] sm:$0xff]  ;;  %v7516_v30 = vld [vmem:[#allocation2 + $0x1e0] sm:$0xff] }
 0x3cf   : > { %v6620_v27 = vadd.f32 %v6556_v1, %v14479_v31  ;;  %v14480_v36 = vld [vmem:[#allocation147_spill] sm:$0xff]  ;;  %v14481_v63 = vld [vmem:[#allocation148_spill] sm:$0xff]  ;;  %v14482_v50 = vld [vmem:[#allocation149_spill] sm:$0xff] }
 0x3d0   : > { %v6621_v29 = vadd.f32 %v6557_v47, %v14480_v36  ;;  %v6622_v44 = vadd.f32 %v6558_v4, %v14481_v63  ;;  %v6623_v41 = vadd.f32 %v6559_v38, %v14482_v50  ;;  %v14483_v9 = vld [vmem:[#allocation198_spill] sm:$0xff]  ;;  %v14484_v11 = vld [vmem:[#allocation199_spill] sm:$0xff]  ;;  %v14485_v23 = vld [vmem:[#allocation200_spill] sm:$0xff] }
 0x3d1   : > { %v6680_v24 = vadd.f32 %v6616_v51, %v14483_v9  ;;  %v6681_v42 = vadd.f32 %v6617_v8, %v14484_v11  ;;  %v6682_v13 = vadd.f32 %v6618_v37, %v14485_v23  ;;  %v14486_v43 = vld [vmem:[#allocation201_spill] sm:$0xff]  ;;  %v7517_v22 = vld [vmem:[#allocation2] sm:$0xff]  ;;  %v7519_v21 = vld [vmem:[#allocation2 + $0x8] sm:$0xff] }
 0x3d2   : > { %v6683_v46 = vadd.f32 %v6619_v32, %v14486_v43  ;;  %v7518_v55 = vld [vmem:[#allocation2 + $0xf0] sm:$0xff]  ;;  %v14487_v59 = vld [vmem:[#allocation202_spill] sm:$0xff]  ;;  %v14488_v58 = vld [vmem:[#allocation203_spill] sm:$0xff] }
 0x3d3   : > { %v6684_v52 = vadd.f32 %v6620_v27, %v14487_v59  ;;  %v6685_v14 = vadd.f32 %v6621_v29, %v14488_v58  ;;  %v14489_v6 = vld [vmem:[#allocation204_spill] sm:$0xff]  ;;  %v14490_v20 = vld [vmem:[#allocation205_spill] sm:$0xff]  ;;  %v7576_v45 = vadd.f32 %v7512_v7, %v6680_v24  ;;  %v7577_v60 = vadd.f32 %v7513_v35, %v6681_v42  ;;  %v14491_v61 = vld [vmem:[#allocation30_spill] sm:$0xff] }
 0x3d4   : > { %v6686_v0 = vadd.f32 %v6622_v44, %v14489_v6  ;;  %v6687_v10 = vadd.f32 %v6623_v41, %v14490_v20  ;;  %v7578_v15 = vadd.f32 %v7514_v39, %v6682_v13  ;;  %v7579_v57 = vadd.f32 %v7515_v18, %v6683_v46  ;;  %v14492_v62 = vld [vmem:[#allocation94_spill] sm:$0xff]  ;;  %v14493_v25 = vld [vmem:[#allocation31_spill] sm:$0xff]  ;;  %v14495_v1 = vld [vmem:[#allocation32_spill] sm:$0xff] }
 0x3d5   : > { %v7580_v28 = vadd.f32 %v7516_v30, %v6684_v52  ;;  %v7581_v49 = vadd.f32 %v7517_v22, %v6685_v14  ;;  %7640 = vst [vmem:[#allocation2 + $0x1e8] sm:$0xff] %v7576_v45  ;;  %7641 = vst [vmem:[#allocation2 + $0xf8] sm:$0xff] %v7577_v60  ;;  %v6560_v2 = vadd.f32 %v14492_v62, %v14491_v61  ;;  %v14494_v16 = vld [vmem:[#allocation95_spill] sm:$0xff]  ;;  %v14496_v26 = vld [vmem:[#allocation96_spill] sm:$0xff] }
 0x3d6   : > { %v7582_v17 = vadd.f32 %v7518_v55, %v6686_v0  ;;  %v7583_v54 = vadd.f32 %v7519_v21, %v6687_v10  ;;  %7642 = vst [vmem:[#allocation2 + $0x160] sm:$0xff] %v7578_v15  ;;  %7643 = vst [vmem:[#allocation2 + $0x30] sm:$0xff] %v7579_v57  ;;  %v6561_v53 = vadd.f32 %v14494_v16, %v14493_v25  ;;  %v14497_v47 = vld [vmem:[#allocation33_spill] sm:$0xff]  ;;  %v14499_v4 = vld [vmem:[#allocation34_spill] sm:$0xff] }
 0x3d7   : > { %v6562_v40 = vadd.f32 %v14496_v26, %v14495_v1  ;;  %v14498_v3 = vld [vmem:[#allocation97_spill] sm:$0xff]  ;;  %7644 = vst [vmem:[#allocation2 + $0x1e0] sm:$0xff] %v7580_v28  ;;  %7645 = vst [vmem:[#allocation2] sm:$0xff] %v7581_v49  ;;  %v14500_v48 = vld [vmem:[#allocation98_spill] sm:$0xff] }
 0x3d8   : > { %v6563_v19 = vadd.f32 %v14498_v3, %v14497_v47  ;;  %7646 = vst [vmem:[#allocation2 + $0xf0] sm:$0xff] %v7582_v17  ;;  %7647 = vst [vmem:[#allocation2 + $0x8] sm:$0xff] %v7583_v54  ;;  %v6564_v5 = vadd.f32 %v14500_v48, %v14499_v4  ;;  %v14501_v38 = vld [vmem:[#allocation35_spill] sm:$0xff]  ;;  %v14503_v7 = vld [vmem:[#allocation36_spill] sm:$0xff] }
 0x3d9   : > { %v14502_v12 = vld [vmem:[#allocation99_spill] sm:$0xff]  ;;  %v14504_v56 = vld [vmem:[#allocation100_spill] sm:$0xff]  ;;  %v14505_v35 = vld [vmem:[#allocation37_spill] sm:$0xff] }
 0x3da   : > { %v6565_v51 = vadd.f32 %v14502_v12, %v14501_v38  ;;  %v6566_v8 = vadd.f32 %v14504_v56, %v14503_v7  ;;  %v14506_v34 = vld [vmem:[#allocation101_spill] sm:$0xff]  ;;  %v14507_v33 = vld [vmem:[#allocation150_spill] sm:$0xff]  ;;  %v7520_v39 = vld [vmem:[#allocation2 + $0x148] sm:$0xff] }
 0x3db   : > { %v6567_v37 = vadd.f32 %v14506_v34, %v14505_v35  ;;  %v6624_v32 = vadd.f32 %v6560_v2, %v14507_v33  ;;  %v14508_v18 = vld [vmem:[#allocation151_spill] sm:$0xff]  ;;  %v7521_v27 = vld [vmem:[#allocation2 + $0x1d0] sm:$0xff]  ;;  %v14509_v30 = vld [vmem:[#allocation152_spill] sm:$0xff] }
 0x3dc   : > { %v6625_v31 = vadd.f32 %v6561_v53, %v14508_v18  ;;  %v6626_v36 = vadd.f32 %v6562_v40, %v14509_v30  ;;  %v14510_v29 = vld [vmem:[#allocation153_spill] sm:$0xff]  ;;  %v7522_v44 = vld [vmem:[#allocation2 + $0x100] sm:$0xff]  ;;  %v7523_v50 = vld [vmem:[#allocation2 + $0xc8] sm:$0xff] }
 0x3dd   : > { %v6627_v63 = vadd.f32 %v6563_v19, %v14510_v29  ;;  %v14511_v41 = vld [vmem:[#allocation154_spill] sm:$0xff]  ;;  %v7524_v24 = vld [vmem:[#allocation2 + $0x40] sm:$0xff]  ;;  %v14513_v23 = vld [vmem:[#allocation156_spill] sm:$0xff] }
 0x3de   : > { %v6628_v9 = vadd.f32 %v6564_v5, %v14511_v41  ;;  %v14512_v11 = vld [vmem:[#allocation155_spill] sm:$0xff]  ;;  %v6630_v13 = vadd.f32 %v6566_v8, %v14513_v23  ;;  %v14514_v43 = vld [vmem:[#allocation157_spill] sm:$0xff]  ;;  %v14515_v22 = vld [vmem:[#allocation206_spill] sm:$0xff] }
 0x3df   : > { %v6629_v42 = vadd.f32 %v6565_v51, %v14512_v11  ;;  %v6631_v46 = vadd.f32 %v6567_v37, %v14514_v43  ;;  %v6688_v55 = vadd.f32 %v6624_v32, %v14515_v22  ;;  %v14516_v21 = vld [vmem:[#allocation207_spill] sm:$0xff]  ;;  %v14517_v52 = vld [vmem:[#allocation208_spill] sm:$0xff]  ;;  %v14518_v14 = vld [vmem:[#allocation209_spill] sm:$0xff] }
 0x3e0   : > { %v6689_v59 = vadd.f32 %v6625_v31, %v14516_v21  ;;  %v6690_v58 = vadd.f32 %v6626_v36, %v14517_v52  ;;  %v6691_v6 = vadd.f32 %v6627_v63, %v14518_v14  ;;  %v7525_v0 = vld [vmem:[#allocation2 + $0x1f8] sm:$0xff]  ;;  %v7526_v20 = vld [vmem:[#allocation2 + $0x20] sm:$0xff]  ;;  %v7527_v10 = vld [vmem:[#allocation2 + $0x128] sm:$0xff] }
 0x3e1   : > { %v14519_v45 = vld [vmem:[#allocation210_spill] sm:$0xff]  ;;  %v14520_v15 = vld [vmem:[#allocation211_spill] sm:$0xff]  ;;  %v14521_v28 = vld [vmem:[#allocation212_spill] sm:$0xff]  ;;  %v7584_v61 = vadd.f32 %v7520_v39, %v6688_v55 }
 0x3e2   : > { %v6692_v60 = vadd.f32 %v6628_v9, %v14519_v45  ;;  %v6693_v57 = vadd.f32 %v6629_v42, %v14520_v15  ;;  %v6694_v49 = vadd.f32 %v6630_v13, %v14521_v28  ;;  %v14522_v17 = vld [vmem:[#allocation213_spill] sm:$0xff]  ;;  %v7585_v62 = vadd.f32 %v7521_v27, %v6689_v59  ;;  %v14523_v40 = vld [vmem:[#allocation38_spill] sm:$0xff]  ;;  %v14525_v19 = vld [vmem:[#allocation39_spill] sm:$0xff] }
 0x3e3   : > { %v6695_v54 = vadd.f32 %v6631_v46, %v14522_v17  ;;  %v7586_v2 = vadd.f32 %v7522_v44, %v6690_v58  ;;  %v7587_v25 = vadd.f32 %v7523_v50, %v6691_v6  ;;  %7648 = vst [vmem:[#allocation2 + $0x148] sm:$0xff] %v7584_v61  ;;  %v14524_v47 = vld [vmem:[#allocation102_spill] sm:$0xff]  ;;  %v14526_v4 = vld [vmem:[#allocation103_spill] sm:$0xff]  ;;  %v14527_v5 = vld [vmem:[#allocation40_spill] sm:$0xff] }
 0x3e4   : > { %v7588_v16 = vadd.f32 %v7524_v24, %v6692_v60  ;;  %v7589_v53 = vadd.f32 %v7525_v0, %v6693_v57  ;;  %v7590_v1 = vadd.f32 %v7526_v20, %v6694_v49  ;;  %7649 = vst [vmem:[#allocation2 + $0x1d0] sm:$0xff] %v7585_v62  ;;  %v6568_v3 = vadd.f32 %v14524_v47, %v14523_v40  ;;  %v14528_v38 = vld [vmem:[#allocation104_spill] sm:$0xff]  ;;  %v14529_v51 = vld [vmem:[#allocation41_spill] sm:$0xff]  ;;  %v14531_v8 = vld [vmem:[#allocation42_spill] sm:$0xff] }
 0x3e5   : > { %v7591_v26 = vadd.f32 %v7527_v10, %v6695_v54  ;;  %7650 = vst [vmem:[#allocation2 + $0x100] sm:$0xff] %v7586_v2  ;;  %7651 = vst [vmem:[#allocation2 + $0xc8] sm:$0xff] %v7587_v25  ;;  %v6569_v48 = vadd.f32 %v14526_v4, %v14525_v19  ;;  %v6570_v12 = vadd.f32 %v14528_v38, %v14527_v5  ;;  %v14530_v7 = vld [vmem:[#allocation105_spill] sm:$0xff]  ;;  %v14532_v35 = vld [vmem:[#allocation106_spill] sm:$0xff] }
 0x3e6   : > { %v6571_v56 = vadd.f32 %v14530_v7, %v14529_v51  ;;  %7652 = vst [vmem:[#allocation2 + $0x40] sm:$0xff] %v7588_v16  ;;  %7653 = vst [vmem:[#allocation2 + $0x1f8] sm:$0xff] %v7589_v53  ;;  %v6572_v34 = vadd.f32 %v14532_v35, %v14531_v8  ;;  %v14533_v37 = vld [vmem:[#allocation43_spill] sm:$0xff]  ;;  %v14535_v39 = vld [vmem:[#allocation44_spill] sm:$0xff] }
 0x3e7   : > { %7654 = vst [vmem:[#allocation2 + $0x20] sm:$0xff] %v7590_v1  ;;  %7655 = vst [vmem:[#allocation2 + $0x128] sm:$0xff] %v7591_v26  ;;  %v14534_v33 = vld [vmem:[#allocation107_spill] sm:$0xff]  ;;  %v14536_v18 = vld [vmem:[#allocation108_spill] sm:$0xff] }
 0x3e8   : > { %v6573_v32 = vadd.f32 %v14534_v33, %v14533_v37  ;;  %v6574_v31 = vadd.f32 %v14536_v18, %v14535_v39  ;;  %v14537_v27 = vld [vmem:[#allocation45_spill] sm:$0xff]  ;;  %v14539_v29 = vld [vmem:[#allocation158_spill] sm:$0xff]  ;;  %v7528_v44 = vld [vmem:[#allocation2 + $0x1a0] sm:$0xff] }
 0x3e9   : > { %v14538_v30 = vld [vmem:[#allocation109_spill] sm:$0xff]  ;;  %v6632_v63 = vadd.f32 %v6568_v3, %v14539_v29  ;;  %v14540_v50 = vld [vmem:[#allocation159_spill] sm:$0xff]  ;;  %v14541_v24 = vld [vmem:[#allocation160_spill] sm:$0xff] }
 0x3ea   : > { %v6575_v36 = vadd.f32 %v14538_v30, %v14537_v27  ;;  %v6633_v41 = vadd.f32 %v6569_v48, %v14540_v50  ;;  %v7529_v9 = vld [vmem:[#allocation2 + $0x1f0] sm:$0xff]  ;;  %v6634_v11 = vadd.f32 %v6570_v12, %v14541_v24  ;;  %v7530_v13 = vld [vmem:[#allocation2 + $0xe8] sm:$0xff]  ;;  %v7531_v43 = vld [vmem:[#allocation2 + $0x78] sm:$0xff] }
 0x3eb   : > { %v14542_v42 = vld [vmem:[#allocation161_spill] sm:$0xff]  ;;  %v14543_v46 = vld [vmem:[#allocation162_spill] sm:$0xff]  ;;  %v14544_v21 = vld [vmem:[#allocation163_spill] sm:$0xff] }
 0x3ec   : > { %v6635_v23 = vadd.f32 %v6571_v56, %v14542_v42  ;;  %v6636_v22 = vadd.f32 %v6572_v34, %v14543_v46  ;;  %v7532_v55 = vld [vmem:[#allocation2 + $0x70] sm:$0xff]  ;;  %v6637_v59 = vadd.f32 %v6573_v32, %v14544_v21  ;;  %v14545_v52 = vld [vmem:[#allocation164_spill] sm:$0xff]  ;;  %v14547_v0 = vld [vmem:[#allocation214_spill] sm:$0xff] }
 0x3ed   : > { %v6638_v58 = vadd.f32 %v6574_v31, %v14545_v52  ;;  %v14546_v14 = vld [vmem:[#allocation165_spill] sm:$0xff]  ;;  %v6696_v20 = vadd.f32 %v6632_v63, %v14547_v0  ;;  %v14548_v10 = vld [vmem:[#allocation215_spill] sm:$0xff]  ;;  %v14549_v60 = vld [vmem:[#allocation216_spill] sm:$0xff] }
 0x3ee   : > { %v6639_v6 = vadd.f32 %v6575_v36, %v14546_v14  ;;  %v6697_v45 = vadd.f32 %v6633_v41, %v14548_v10  ;;  %v6698_v15 = vadd.f32 %v6634_v11, %v14549_v60  ;;  %v14550_v57 = vld [vmem:[#allocation217_spill] sm:$0xff]  ;;  %v7534_v17 = vld [vmem:[#allocation2 + $0x1d8] sm:$0xff]  ;;  %v14552_v2 = vld [vmem:[#allocation219_spill] sm:$0xff] }
 0x3ef   : > { %v6699_v28 = vadd.f32 %v6635_v23, %v14550_v57  ;;  %v7533_v49 = vld [vmem:[#allocation2 + $0x90] sm:$0xff]  ;;  %v14551_v61 = vld [vmem:[#allocation218_spill] sm:$0xff]  ;;  %v6701_v25 = vadd.f32 %v6637_v59, %v14552_v2  ;;  %v14553_v16 = vld [vmem:[#allocation220_spill] sm:$0xff]  ;;  %v7592_v40 = vadd.f32 %v7528_v44, %v6696_v20 }
 0x3f0   : > { %v7535_v54 = vld [vmem:[#allocation2 + $0xd0] sm:$0xff]  ;;  %v6700_v62 = vadd.f32 %v6636_v22, %v14551_v61  ;;  %v6702_v53 = vadd.f32 %v6638_v58, %v14553_v16  ;;  %v7593_v47 = vadd.f32 %v7529_v9, %v6697_v45  ;;  %v7594_v3 = vadd.f32 %v7530_v13, %v6698_v15  ;;  %v14555_v12 = vld [vmem:[#allocation46_spill] sm:$0xff]  ;;  %v14557_v56 = vld [vmem:[#allocation47_spill] sm:$0xff] }
 0x3f1   : > { %v14554_v1 = vld [vmem:[#allocation221_spill] sm:$0xff]  ;;  %v7595_v19 = vadd.f32 %v7531_v43, %v6699_v28  ;;  %v7597_v48 = vadd.f32 %v7533_v49, %v6701_v25  ;;  %7656 = vst [vmem:[#allocation2 + $0x1a0] sm:$0xff] %v7592_v40  ;;  %v14556_v51 = vld [vmem:[#allocation110_spill] sm:$0xff]  ;;  %v14558_v8 = vld [vmem:[#allocation111_spill] sm:$0xff] }
 0x3f2   : > { %v6703_v26 = vadd.f32 %v6639_v6, %v14554_v1  ;;  %v7596_v4 = vadd.f32 %v7532_v55, %v6700_v62  ;;  %v7598_v5 = vadd.f32 %v7534_v17, %v6702_v53  ;;  %7657 = vst [vmem:[#allocation2 + $0x1f0] sm:$0xff] %v7593_v47  ;;  %7658 = vst [vmem:[#allocation2 + $0xe8] sm:$0xff] %v7594_v3  ;;  %v14559_v34 = vld [vmem:[#allocation48_spill] sm:$0xff]  ;;  %v14561_v32 = vld [vmem:[#allocation49_spill] sm:$0xff] }
 0x3f3   : > { %7659 = vst [vmem:[#allocation2 + $0x78] sm:$0xff] %v7595_v19  ;;  %v6576_v7 = vadd.f32 %v14556_v51, %v14555_v12  ;;  %v6577_v35 = vadd.f32 %v14558_v8, %v14557_v56  ;;  %v14560_v37 = vld [vmem:[#allocation112_spill] sm:$0xff]  ;;  %v14562_v39 = vld [vmem:[#allocation113_spill] sm:$0xff]  ;;  %7661 = vst [vmem:[#allocation2 + $0x90] sm:$0xff] %v7597_v48 }
 0x3f4   : > { %v7599_v38 = vadd.f32 %v7535_v54, %v6703_v26  ;;  %v6578_v33 = vadd.f32 %v14560_v37, %v14559_v34  ;;  %v6579_v18 = vadd.f32 %v14562_v39, %v14561_v32  ;;  %7660 = vst [vmem:[#allocation2 + $0x70] sm:$0xff] %v7596_v4  ;;  %7662 = vst [vmem:[#allocation2 + $0x1d8] sm:$0xff] %v7598_v5  ;;  %v14563_v31 = vld [vmem:[#allocation50_spill] sm:$0xff]  ;;  %v14565_v36 = vld [vmem:[#allocation51_spill] sm:$0xff] }
 0x3f5   : > { %v14564_v27 = vld [vmem:[#allocation114_spill] sm:$0xff]  ;;  %v14566_v29 = vld [vmem:[#allocation115_spill] sm:$0xff]  ;;  %v14567_v44 = vld [vmem:[#allocation52_spill] sm:$0xff] }
 0x3f6   : > { %7663 = vst [vmem:[#allocation2 + $0xd0] sm:$0xff] %v7599_v38  ;;  %v6580_v30 = vadd.f32 %v14564_v27, %v14563_v31  ;;  %v6581_v63 = vadd.f32 %v14566_v29, %v14565_v36  ;;  %v14568_v50 = vld [vmem:[#allocation116_spill] sm:$0xff]  ;;  %v14569_v9 = vld [vmem:[#allocation53_spill] sm:$0xff]  ;;  %v14571_v42 = vld [vmem:[#allocation166_spill] sm:$0xff] }
 0x3f7   : > { %v6582_v41 = vadd.f32 %v14568_v50, %v14567_v44  ;;  %v14570_v24 = vld [vmem:[#allocation117_spill] sm:$0xff]  ;;  %v6640_v23 = vadd.f32 %v6576_v7, %v14571_v42  ;;  %v7536_v13 = vld [vmem:[#allocation2 + $0xb8] sm:$0xff]  ;;  %v14572_v43 = vld [vmem:[#allocation167_spill] sm:$0xff] }
 0x3f8   : > { %v6583_v11 = vadd.f32 %v14570_v24, %v14569_v9  ;;  %v6641_v46 = vadd.f32 %v6577_v35, %v14572_v43  ;;  %v7537_v22 = vld [vmem:[#allocation2 + $0x88] sm:$0xff]  ;;  %v14574_v59 = vld [vmem:[#allocation169_spill] sm:$0xff]  ;;  %v14575_v6 = vld [vmem:[#allocation170_spill] sm:$0xff] }
 0x3f9   : > { %v14573_v55 = vld [vmem:[#allocation168_spill] sm:$0xff]  ;;  %v6643_v52 = vadd.f32 %v6579_v18, %v14574_v59  ;;  %v6644_v0 = vadd.f32 %v6580_v30, %v14575_v6  ;;  %v7540_v20 = vld [vmem:[#allocation2 + $0x170] sm:$0xff]  ;;  %v14576_v10 = vld [vmem:[#allocation171_spill] sm:$0xff] }
 0x3fa   : > { %v6642_v21 = vadd.f32 %v6578_v33, %v14573_v55  ;;  %v7538_v58 = vld [vmem:[#allocation2 + $0xa8] sm:$0xff]  ;;  %v6645_v45 = vadd.f32 %v6581_v63, %v14576_v10  ;;  %v14578_v57 = vld [vmem:[#allocation173_spill] sm:$0xff]  ;;  %v14579_v49 = vld [vmem:[#allocation222_spill] sm:$0xff] }
 0x3fb   : > { %v7539_v14 = vld [vmem:[#allocation2 + $0x1c8] sm:$0xff]  ;;  %v6647_v28 = vadd.f32 %v6583_v11, %v14578_v57  ;;  %v6704_v17 = vadd.f32 %v6640_v23, %v14579_v49  ;;  %v14580_v54 = vld [vmem:[#allocation223_spill] sm:$0xff]  ;;  %v14582_v25 = vld [vmem:[#allocation225_spill] sm:$0xff] }
 0x3fc   : > { %v14577_v60 = vld [vmem:[#allocation172_spill] sm:$0xff]  ;;  %v6705_v61 = vadd.f32 %v6641_v46, %v14580_v54  ;;  %v6707_v16 = vadd.f32 %v6643_v52, %v14582_v25  ;;  %v7541_v53 = vld [vmem:[#allocation2 + $0x178] sm:$0xff]  ;;  %v7543_v26 = vld [vmem:[#allocation2 + $0x190] sm:$0xff] }
 0x3fd   : > { %v6646_v15 = vadd.f32 %v6582_v41, %v14577_v60  ;;  %v14581_v62 = vld [vmem:[#allocation224_spill] sm:$0xff]  ;;  %v14583_v40 = vld [vmem:[#allocation226_spill] sm:$0xff]  ;;  %v14584_v3 = vld [vmem:[#allocation227_spill] sm:$0xff]  ;;  %v7600_v12 = vadd.f32 %v7536_v13, %v6704_v17 }
 0x3fe   : > { %v6706_v2 = vadd.f32 %v6642_v21, %v14581_v62  ;;  %v7542_v1 = vld [vmem:[#allocation2 + $0x68] sm:$0xff]  ;;  %v6708_v47 = vadd.f32 %v6644_v0, %v14583_v40  ;;  %v6709_v19 = vadd.f32 %v6645_v45, %v14584_v3  ;;  %v14586_v5 = vld [vmem:[#allocation229_spill] sm:$0xff]  ;;  %v7601_v51 = vadd.f32 %v7537_v22, %v6705_v61  ;;  %v14587_v33 = vld [vmem:[#allocation54_spill] sm:$0xff] }
 0x3ff   : > { %v14585_v4 = vld [vmem:[#allocation228_spill] sm:$0xff]  ;;  %v6711_v38 = vadd.f32 %v6647_v28, %v14586_v5  ;;  %v7603_v56 = vadd.f32 %v7539_v14, %v6707_v16  ;;  %7664 = vst [vmem:[#allocation2 + $0xb8] sm:$0xff] %v7600_v12  ;;  %v14588_v32 = vld [vmem:[#allocation118_spill] sm:$0xff]  ;;  %v14589_v18 = vld [vmem:[#allocation55_spill] sm:$0xff] }
 0x400   : > { %v6710_v48 = vadd.f32 %v6646_v15, %v14585_v4  ;;  %v7602_v7 = vadd.f32 %v7538_v58, %v6706_v2  ;;  %v7604_v8 = vadd.f32 %v7540_v20, %v6708_v47  ;;  %v7605_v35 = vadd.f32 %v7541_v53, %v6709_v19  ;;  %7665 = vst [vmem:[#allocation2 + $0x88] sm:$0xff] %v7601_v51  ;;  %v14590_v31 = vld [vmem:[#allocation119_spill] sm:$0xff]  ;;  %v14591_v30 = vld [vmem:[#allocation56_spill] sm:$0xff]  ;;  %v14593_v63 = vld [vmem:[#allocation57_spill] sm:$0xff] }
 0x401   : > { %v7607_v37 = vadd.f32 %v7543_v26, %v6711_v38  ;;  %7667 = vst [vmem:[#allocation2 + $0x1c8] sm:$0xff] %v7603_v56  ;;  %v6584_v39 = vadd.f32 %v14588_v32, %v14587_v33  ;;  %v6585_v27 = vadd.f32 %v14590_v31, %v14589_v18  ;;  %v14592_v36 = vld [vmem:[#allocation120_spill] sm:$0xff]  ;;  %v14594_v44 = vld [vmem:[#allocation121_spill] sm:$0xff]  ;;  %v14595_v41 = vld [vmem:[#allocation58_spill] sm:$0xff] }
 0x402   : > { %v7606_v34 = vadd.f32 %v7542_v1, %v6710_v48  ;;  %7666 = vst [vmem:[#allocation2 + $0xa8] sm:$0xff] %v7602_v7  ;;  %v6586_v29 = vadd.f32 %v14592_v36, %v14591_v30  ;;  %v6587_v50 = vadd.f32 %v14594_v44, %v14593_v63  ;;  %7668 = vst [vmem:[#allocation2 + $0x170] sm:$0xff] %v7604_v8  ;;  %v14596_v9 = vld [vmem:[#allocation122_spill] sm:$0xff]  ;;  %v14597_v11 = vld [vmem:[#allocation59_spill] sm:$0xff] }
 0x403   : > { %7669 = vst [vmem:[#allocation2 + $0x178] sm:$0xff] %v7605_v35  ;;  %7671 = vst [vmem:[#allocation2 + $0x190] sm:$0xff] %v7607_v37  ;;  %v6588_v24 = vadd.f32 %v14596_v9, %v14595_v41  ;;  %v14598_v42 = vld [vmem:[#allocation123_spill] sm:$0xff]  ;;  %v14599_v13 = vld [vmem:[#allocation60_spill] sm:$0xff] }
 0x404   : > { %7670 = vst [vmem:[#allocation2 + $0x68] sm:$0xff] %v7606_v34  ;;  %v6589_v23 = vadd.f32 %v14598_v42, %v14597_v11  ;;  %v14600_v43 = vld [vmem:[#allocation124_spill] sm:$0xff]  ;;  %v14601_v22 = vld [vmem:[#allocation61_spill] sm:$0xff]  ;;  %v14603_v59 = vld [vmem:[#allocation174_spill] sm:$0xff] }
 0x405   : > { %v6590_v46 = vadd.f32 %v14600_v43, %v14599_v13  ;;  %v14602_v55 = vld [vmem:[#allocation125_spill] sm:$0xff]  ;;  %v6648_v52 = vadd.f32 %v6584_v39, %v14603_v59  ;;  %v7544_v58 = vld [vmem:[#allocation2 + $0x198] sm:$0xff]  ;;  %v14604_v14 = vld [vmem:[#allocation175_spill] sm:$0xff] }
 0x406   : > { %v6591_v21 = vadd.f32 %v14602_v55, %v14601_v22  ;;  %v6649_v6 = vadd.f32 %v6585_v27, %v14604_v14  ;;  %v7545_v0 = vld [vmem:[#allocation2 + $0x38] sm:$0xff]  ;;  %v14605_v20 = vld [vmem:[#allocation176_spill] sm:$0xff]  ;;  %v14606_v45 = vld [vmem:[#allocation177_spill] sm:$0xff] }
 0x407   : > { %v6650_v10 = vadd.f32 %v6586_v29, %v14605_v20  ;;  %v6651_v60 = vadd.f32 %v6587_v50, %v14606_v45  ;;  %v7546_v15 = vld [vmem:[#allocation2 + $0xc0] sm:$0xff]  ;;  %v14607_v28 = vld [vmem:[#allocation178_spill] sm:$0xff]  ;;  %v14609_v62 = vld [vmem:[#allocation180_spill] sm:$0xff] }
 0x408   : > { %v7547_v57 = vld [vmem:[#allocation2 + $0x1c0] sm:$0xff]  ;;  %v6652_v49 = vadd.f32 %v6588_v24, %v14607_v28  ;;  %v7548_v17 = vld [vmem:[#allocation2 + $0x158] sm:$0xff]  ;;  %v6654_v2 = vadd.f32 %v6590_v46, %v14609_v62  ;;  %v14610_v25 = vld [vmem:[#allocation181_spill] sm:$0xff] }
 0x409   : > { %v14608_v54 = vld [vmem:[#allocation179_spill] sm:$0xff]  ;;  %v6655_v16 = vadd.f32 %v6591_v21, %v14610_v25  ;;  %v14611_v53 = vld [vmem:[#allocation230_spill] sm:$0xff]  ;;  %v14613_v47 = vld [vmem:[#allocation232_spill] sm:$0xff] }
 0x40a   : > { %v6653_v61 = vadd.f32 %v6589_v23, %v14608_v54  ;;  %v6712_v1 = vadd.f32 %v6648_v52, %v14611_v53  ;;  %v14612_v26 = vld [vmem:[#allocation231_spill] sm:$0xff]  ;;  %v6714_v3 = vadd.f32 %v6650_v10, %v14613_v47  ;;  %v14614_v19 = vld [vmem:[#allocation233_spill] sm:$0xff]  ;;  %v7550_v5 = vld [vmem:[#allocation2 + $0x58] sm:$0xff] }
 0x40b   : > { %v6713_v40 = vadd.f32 %v6649_v6, %v14612_v26  ;;  %v6715_v4 = vadd.f32 %v6651_v60, %v14614_v19  ;;  %v7549_v48 = vld [vmem:[#allocation2 + $0x10] sm:$0xff]  ;;  %v7551_v38 = vld [vmem:[#allocation2 + $0xa0] sm:$0xff]  ;;  %v14615_v12 = vld [vmem:[#allocation234_spill] sm:$0xff] }
 0x40c   : > { %v6716_v51 = vadd.f32 %v6652_v49, %v14615_v12  ;;  %v14616_v7 = vld [vmem:[#allocation235_spill] sm:$0xff]  ;;  %v14617_v8 = vld [vmem:[#allocation236_spill] sm:$0xff]  ;;  %v14618_v34 = vld [vmem:[#allocation237_spill] sm:$0xff]  ;;  %v7608_v33 = vadd.f32 %v7544_v58, %v6712_v1  ;;  %v7610_v39 = vadd.f32 %v7546_v15, %v6714_v3 }
 0x40d   : > { %v6717_v56 = vadd.f32 %v6653_v61, %v14616_v7  ;;  %v6718_v35 = vadd.f32 %v6654_v2, %v14617_v8  ;;  %v6719_v37 = vadd.f32 %v6655_v16, %v14618_v34  ;;  %v7609_v32 = vadd.f32 %v7545_v0, %v6713_v40 }
 0x40e   : > { %v7611_v18 = vadd.f32 %v7547_v57, %v6715_v4  ;;  %v7612_v31 = vadd.f32 %v7548_v17, %v6716_v51  ;;  %7672 = vst [vmem:[#allocation2 + $0x198] sm:$0xff] %v7608_v33  ;;  %7674 = vst [vmem:[#allocation2 + $0xc0] sm:$0xff] %v7610_v39 }
 0x40f   : > { %v7613_v27 = vadd.f32 %v7549_v48, %v6717_v56  ;;  %v7614_v30 = vadd.f32 %v7550_v5, %v6718_v35  ;;  %v7615_v36 = vadd.f32 %v7551_v38, %v6719_v37  ;;  %7673 = vst [vmem:[#allocation2 + $0x38] sm:$0xff] %v7609_v32 }
 0x410   : > { %7675 = vst [vmem:[#allocation2 + $0x1c0] sm:$0xff] %v7611_v18  ;;  %7676 = vst [vmem:[#allocation2 + $0x158] sm:$0xff] %v7612_v31 }
 0x411   : > { %7677 = vst [vmem:[#allocation2 + $0x10] sm:$0xff] %v7613_v27  ;;  %7678 = vst [vmem:[#allocation2 + $0x58] sm:$0xff] %v7614_v30 }
 0x412   : > { %7679 = vst [vmem:[#allocation2 + $0xa0] sm:$0xff] %v7615_v36 }
 0x413 PF: > { %7683 = sbr.rel (%p7897_p8) target bundleno = 1379 (0x563), region = 40 }
 0x418   : > { %v7691_v29 = vld [vmem:[#allocation2 + $0xb0] sm:$0xff]  ;;  %v7693_v44 = vld [vmem:[#allocation2 + $0xd8] sm:$0xff]  ;;  %v7696_v42 = vld [vmem:[#allocation2 + $0x168] sm:$0xff] }
 0x419   : > { %v7692_v63 = vld [vmem:[#allocation2 + $0x1b0] sm:$0xff]  ;;  %v7694_v41 = vld [vmem:[#allocation2 + $0x18] sm:$0xff]  ;;  %v7698_v46 = vld [vmem:[#allocation2 + $0x48] sm:$0xff] }
 0x41a   : > { %v7755_v50 = vadd.f32 %v7692_v63, %v7691_v29  ;;  %v7695_v24 = vld [vmem:[#allocation2 + $0x50] sm:$0xff]  ;;  %v7699_v55 = vld [vmem:[#allocation2 + $0x180] sm:$0xff]  ;;  %v7701_v58 = vld [vmem:[#allocation2 + $0x118] sm:$0xff] }
 0x41b   : > { %v7697_v13 = vld [vmem:[#allocation2 + $0x130] sm:$0xff]  ;;  %v7702_v6 = vld [vmem:[#allocation2 + $0x98] sm:$0xff]  ;;  %v7703_v20 = vld [vmem:[#allocation2 + $0x120] sm:$0xff] }
 0x41c   : > { %v7756_v9 = vadd.f32 %v7755_v50, %v7693_v44  ;;  %v7700_v59 = vld [vmem:[#allocation2 + $0x110] sm:$0xff]  ;;  %v7705_v15 = vld [vmem:[#allocation2 + $0x108] sm:$0xff]  ;;  %v7706_v28 = vld [vmem:[#allocation2 + $0x60] sm:$0xff] }
 0x41d   : > { %v7704_v45 = vld [vmem:[#allocation2 + $0x150] sm:$0xff]  ;;  %v7707_v17 = vld [vmem:[#allocation2 + $0xe0] sm:$0xff]  ;;  %v7708_v61 = vld [vmem:[#allocation2 + $0x188] sm:$0xff] }
 0x41e   : > { %v7757_v11 = vadd.f32 %v7756_v9, %v7694_v41  ;;  %v7709_v2 = vld [vmem:[#allocation2 + $0x138] sm:$0xff]  ;;  %v7710_v16 = vld [vmem:[#allocation2 + $0x140] sm:$0xff]  ;;  %v7712_v40 = vld [vmem:[#allocation2 + $0x1a8] sm:$0xff] }
 0x41f   : > { %v7711_v1 = vld [vmem:[#allocation2 + $0x80] sm:$0xff]  ;;  %v7713_v3 = vld [vmem:[#allocation2 + $0x1b8] sm:$0xff]  ;;  %v7714_v4 = vld [vmem:[#allocation2 + $0x28] sm:$0xff] }
 0x420   : > { %v7758_v23 = vadd.f32 %v7757_v11, %v7695_v24  ;;  %v7715_v5 = vld [vmem:[#allocation2 + $0x1e8] sm:$0xff]  ;;  %v7716_v12 = vld [vmem:[#allocation2 + $0xf8] sm:$0xff]  ;;  %v7717_v7 = vld [vmem:[#allocation2 + $0x160] sm:$0xff] }
 0x421   : > { %v7718_v8 = vld [vmem:[#allocation2 + $0x30] sm:$0xff]  ;;  %v7719_v34 = vld [vmem:[#allocation2 + $0x1e0] sm:$0xff]  ;;  %v7722_v31 = vld [vmem:[#allocation2 + $0x8] sm:$0xff] }
 0x422   : > { %v7759_v43 = vadd.f32 %v7758_v23, %v7696_v42  ;;  %v7720_v33 = vld [vmem:[#allocation2] sm:$0xff]  ;;  %v7721_v39 = vld [vmem:[#allocation2 + $0xf0] sm:$0xff]  ;;  %v7723_v30 = vld [vmem:[#allocation2 + $0x148] sm:$0xff] }
 0x423   : > { %v7724_v29 = vld [vmem:[#allocation2 + $0x1d0] sm:$0xff]  ;;  %v7725_v44 = vld [vmem:[#allocation2 + $0x100] sm:$0xff]  ;;  %v7726_v41 = vld [vmem:[#allocation2 + $0xc8] sm:$0xff] }
 0x424   : > { %v7760_v22 = vadd.f32 %v7759_v43, %v7697_v13  ;;  %v7727_v24 = vld [vmem:[#allocation2 + $0x40] sm:$0xff]  ;;  %v7728_v42 = vld [vmem:[#allocation2 + $0x1f8] sm:$0xff] }
 0x425   : > { %v7729_v13 = vld [vmem:[#allocation2 + $0x20] sm:$0xff] }
 0x426   : > { %v7761_v21 = vadd.f32 %v7760_v22, %v7698_v46  ;;  %v7730_v46 = vld [vmem:[#allocation2 + $0x128] sm:$0xff] }
 0x428   : > { %v7762_v52 = vadd.f32 %v7761_v21, %v7699_v55  ;;  %v7731_v55 = vld [vmem:[#allocation2 + $0x1a0] sm:$0xff] }
 0x42a   : > { %v7763_v14 = vadd.f32 %v7762_v52, %v7700_v59  ;;  %v7732_v59 = vld [vmem:[#allocation2 + $0x1f0] sm:$0xff] }
 0x42c   : > { %v7764_v0 = vadd.f32 %v7763_v14, %v7701_v58  ;;  %v7733_v58 = vld [vmem:[#allocation2 + $0xe8] sm:$0xff] }
 0x42e   : > { %v7765_v10 = vadd.f32 %v7764_v0, %v7702_v6  ;;  %v7734_v6 = vld [vmem:[#allocation2 + $0x78] sm:$0xff] }
 0x430   : > { %v7766_v60 = vadd.f32 %v7765_v10, %v7703_v20  ;;  %v7735_v20 = vld [vmem:[#allocation2 + $0x70] sm:$0xff] }
 0x432   : > { %v7767_v57 = vadd.f32 %v7766_v60, %v7704_v45  ;;  %v7736_v45 = vld [vmem:[#allocation2 + $0x90] sm:$0xff] }
 0x434   : > { %v7768_v49 = vadd.f32 %v7767_v57, %v7705_v15  ;;  %v7737_v15 = vld [vmem:[#allocation2 + $0x1d8] sm:$0xff] }
 0x436   : > { %v7769_v54 = vadd.f32 %v7768_v49, %v7706_v28  ;;  %v7738_v28 = vld [vmem:[#allocation2 + $0xd0] sm:$0xff] }
 0x438   : > { %v7770_v62 = vadd.f32 %v7769_v54, %v7707_v17  ;;  %v7739_v17 = vld [vmem:[#allocation2 + $0xb8] sm:$0xff] }
 0x43a   : > { %v7771_v25 = vadd.f32 %v7770_v62, %v7708_v61  ;;  %v7740_v61 = vld [vmem:[#allocation2 + $0x88] sm:$0xff] }
 0x43c   : > { %v7772_v53 = vadd.f32 %v7771_v25, %v7709_v2  ;;  %v7741_v2 = vld [vmem:[#allocation2 + $0xa8] sm:$0xff] }
 0x43e   : > { %v7773_v26 = vadd.f32 %v7772_v53, %v7710_v16  ;;  %v7742_v16 = vld [vmem:[#allocation2 + $0x1c8] sm:$0xff] }
 0x440   : > { %v7774_v47 = vadd.f32 %v7773_v26, %v7711_v1  ;;  %v7743_v1 = vld [vmem:[#allocation2 + $0x170] sm:$0xff] }
 0x442   : > { %v7775_v19 = vadd.f32 %v7774_v47, %v7712_v40  ;;  %v7744_v40 = vld [vmem:[#allocation2 + $0x178] sm:$0xff] }
 0x444   : > { %v7776_v48 = vadd.f32 %v7775_v19, %v7713_v3  ;;  %v7745_v3 = vld [vmem:[#allocation2 + $0x68] sm:$0xff] }
 0x446   : > { %v7777_v38 = vadd.f32 %v7776_v48, %v7714_v4  ;;  %v7746_v4 = vld [vmem:[#allocation2 + $0x190] sm:$0xff] }
 0x448   : > { %v7778_v51 = vadd.f32 %v7777_v38, %v7715_v5  ;;  %v7747_v5 = vld [vmem:[#allocation2 + $0x198] sm:$0xff] }
 0x44a   : > { %v7779_v56 = vadd.f32 %v7778_v51, %v7716_v12  ;;  %v7748_v12 = vld [vmem:[#allocation2 + $0x38] sm:$0xff] }
 0x44c   : > { %v7780_v35 = vadd.f32 %v7779_v56, %v7717_v7  ;;  %v7749_v7 = vld [vmem:[#allocation2 + $0xc0] sm:$0xff] }
 0x44e   : > { %v7781_v37 = vadd.f32 %v7780_v35, %v7718_v8  ;;  %v7750_v8 = vld [vmem:[#allocation2 + $0x1c0] sm:$0xff] }
 0x450   : > { %v7782_v32 = vadd.f32 %v7781_v37, %v7719_v34  ;;  %v7751_v34 = vld [vmem:[#allocation2 + $0x158] sm:$0xff] }
 0x452   : > { %v7783_v18 = vadd.f32 %v7782_v32, %v7720_v33  ;;  %v7752_v33 = vld [vmem:[#allocation2 + $0x10] sm:$0xff] }
 0x454   : > { %v7784_v27 = vadd.f32 %v7783_v18, %v7721_v39  ;;  %v7753_v39 = vld [vmem:[#allocation2 + $0x58] sm:$0xff] }
 0x456   : > { %v7785_v36 = vadd.f32 %v7784_v27, %v7722_v31  ;;  %v7754_v31 = vld [vmem:[#allocation2 + $0xa0] sm:$0xff] }
 0x458   : > { %v7786_v63 = vadd.f32 %v7785_v36, %v7723_v30 }
 0x45a   : > { %v7787_v50 = vadd.f32 %v7786_v63, %v7724_v29 }
 0x45c   : > { %v7788_v9 = vadd.f32 %v7787_v50, %v7725_v44 }
 0x45e   : > { %v7789_v11 = vadd.f32 %v7788_v9, %v7726_v41 }
 0x460   : > { %v7790_v23 = vadd.f32 %v7789_v11, %v7727_v24  ;;  %v7684_v24 = vlaneseq }
 0x462   : > { %v7791_v43 = vadd.f32 %v7790_v23, %v7728_v42  ;;  %v7685_v11 = vshrl.u32 %v7684_v24, 7  ;;  %v7687_v42 = vand.u32 127, %v7684_v24 }
 0x464   : > { %v7792_v22 = vadd.f32 %v7791_v43, %v7729_v13  ;;  %vm7688_vm0 = vcmp.eq.s32.totalorder %v7685_v11, 0  ;;  %vm7689_vm1 = vcmp.eq.s32.totalorder %v7687_v42, 0 }
 0x465   : > { %vm7690_vm2 = vmand %vm7688_vm0, %vm7689_vm1 }
 0x466   : > { %v7793_v21 = vadd.f32 %v7792_v22, %v7730_v46 }
 0x468   : > { %v7794_v52 = vadd.f32 %v7793_v21, %v7731_v55 }
 0x46a   : > { %v7795_v14 = vadd.f32 %v7794_v52, %v7732_v59 }
 0x46c   : > { %v7796_v0 = vadd.f32 %v7795_v14, %v7733_v58 }
 0x46e   : > { %v7797_v10 = vadd.f32 %v7796_v0, %v7734_v6 }
 0x470   : > { %v7798_v60 = vadd.f32 %v7797_v10, %v7735_v20 }
 0x472   : > { %v7799_v57 = vadd.f32 %v7798_v60, %v7736_v45 }
 0x474   : > { %v7800_v49 = vadd.f32 %v7799_v57, %v7737_v15 }
 0x476   : > { %v7801_v54 = vadd.f32 %v7800_v49, %v7738_v28 }
 0x478   : > { %v7802_v62 = vadd.f32 %v7801_v54, %v7739_v17 }
 0x47a   : > { %v7803_v25 = vadd.f32 %v7802_v62, %v7740_v61 }
 0x47c   : > { %v7804_v53 = vadd.f32 %v7803_v25, %v7741_v2 }
 0x47e   : > { %v7805_v26 = vadd.f32 %v7804_v53, %v7742_v16 }
 0x480   : > { %v7806_v47 = vadd.f32 %v7805_v26, %v7743_v1 }
 0x482   : > { %v7807_v19 = vadd.f32 %v7806_v47, %v7744_v40 }
 0x484   : > { %v7808_v48 = vadd.f32 %v7807_v19, %v7745_v3 }
 0x486   : > { %v7809_v38 = vadd.f32 %v7808_v48, %v7746_v4 }
 0x488   : > { %v7810_v51 = vadd.f32 %v7809_v38, %v7747_v5 }
 0x48a   : > { %v7811_v56 = vadd.f32 %v7810_v51, %v7748_v12 }
 0x48c   : > { %v7812_v35 = vadd.f32 %v7811_v56, %v7749_v7 }
 0x48e   : > { %v7813_v37 = vadd.f32 %v7812_v35, %v7750_v8 }
 0x490   : > { %v7814_v32 = vadd.f32 %v7813_v37, %v7751_v34 }
 0x492   : > { %v7815_v18 = vadd.f32 %v7814_v32, %v7752_v33 }
 0x494   : > { %v7816_v27 = vadd.f32 %v7815_v18, %v7753_v39 }
 0x496   : > { %v7817_v30 = vadd.f32 %v7816_v27, %v7754_v31 }
 0x498   : > { %7818 = vadd.xlane.f32.xlu0 %v7817_v30 }
 0x521   : > { %v7819_v36 = vpop.xlane.xlu0 %7818 }
 0x522   : > { %v7820_v29 = vrot.slane %v7819_v36, 4 }
 0x524   : > { %v7821_v63 = vadd.f32 %v7820_v29, %v7819_v36 }
 0x526   : > { %v7822_v44 = vrot.slane %v7821_v63, 2 }
 0x528   : > { %v7823_v50 = vadd.f32 %v7822_v44, %v7821_v63 }
 0x52a   : > { %v7824_v41 = vrot.slane %v7823_v50, 1 }
 0x52c   : > { %v7825_v9 = vadd.f32 %v7824_v41, %v7823_v50 }
 0x52e   : > { %7902 = vpush %v7825_v9 }
 0x55f   : > { %s7903_s16 = spop %7902 }
 0x560   : > { %v7827_v23 = vstv %s7903_s16 }
 0x561   : > { %v7828_v13 = vsel %vm7690_vm2, %v7827_v23, 0.0 }
 0x562   : > { %7829 = vst [vmem:[%s12427_s1] sm:$0xff] %v7828_v13 }
 0x563 PF: > { %s11_s8 = sadd.s32 1, %s7951_s8   ;;  %s14619_s6 = smov %s7947_s7 }
 0x564   : > { %p8_p9 = scmp.ge.s32.totalorder %s11_s8, 4   ;;  %s14620_s7 = smov %s14622_s9 }
 0x566   :  { %10 = sbr.rel (!%p8_p9) target bundleno = 2 (0x2), region = 70 }

</bundles_post_ra>
